<compile_context>
chip_gen: v6e
topology: v6e:2x2x1
jax: 0.10.0
libtpu: 0.0.40
codegen_flags: <defaults>
</compile_context>

<pallas_src>
import functools
import numpy as np
import jax
import jax.numpy as jnp
from jax import lax
from jax.experimental import pallas as pl
from jax.experimental.pallas import tpu as pltpu

N_BINS = 361            # f0 quantization bins
NB = 384                # lane-padded bins (361 -> 3*128)
KS = 10                 # conv kernel size (all three convs)
C1, C2, C3 = 16, 64, 256
C_OUT = 513
RADIUS = 4              # gaussian kernel radius for sigma=1, truncate=4
DEFAULT_TILE_T = 512    # output frames per grid step


def _gaussian_kernel1d(sigma=1.0, truncate=4.0):
    radius = int(truncate * sigma + 0.5)
    x = np.arange(-radius, radius + 1)
    phi = np.exp(-0.5 / (sigma * sigma) * x ** 2)
    return (phi / phi.sum()).astype(np.float32)


GAUSS = _gaussian_kernel1d(1.0)          # length 9 — reference path only


def _round_up(x, m):
    return ((x + m - 1) // m) * m


# ----------------------------------------------------------------------------
# Fused kernel.  Time-major layout for the conv stack (rows=time, lanes=chan),
# channel-major for the final heads (rows=out-chan, lanes=time).
# Receptive field per output tile [t0, t0+TT):
#   conv3 needs conv2 frames [t0-4,  t0+TT+4]   (R2  = TT + 9 rows)
#   conv2 needs conv1 frames [t0-8,  t0+TT+9]   (R1  = TT + 18 rows)
#   conv1 needs one-hot rows [t0-12, t0+TT+14]  (TW0 = TT + 32 rows, padded)
# Out-of-range frames are masked to zero after each layer, reproducing torch's
# zero padding (F.pad + conv padding=4) exactly.
# ----------------------------------------------------------------------------
def _make_kernel(T, TT, TW0, R1, R2):
    def kernel(k_ref, w1_ref, b1_ref, w2_ref, b2_ref, w3_ref, b3_ref,
               wb_ref, bb_ref, wg_ref, bg_ref, ob_ref, og_ref,
               e_scr, a2_scr, a3_scr):
        t0 = pl.program_id(1) * TT
        start = pl.multiple_of(t0, 8)                 # padded row of frame t0-12

        # ---- hard one-hot over (blur-folded) bins; invalid frames -> zero ----
        kwin = k_ref[0, pl.ds(start, TW0), :]                      # (TW0, 1) i32
        frame0 = lax.broadcasted_iota(jnp.int32, (TW0, 1), 0) + (t0 - 12)
        valid0 = (frame0 >= 0) & (frame0 < T)
        bins = lax.broadcasted_iota(jnp.int32, (TW0, NB), 1)
        e_scr[...] = jnp.where((bins == kwin) & valid0,
                               1.0, 0.0).astype(jnp.bfloat16)

        # ---- conv1: ONE tap-concatenated bf16 matmul + 10 shifted slice-adds ----
        ytap = jnp.dot(e_scr[...], w1_ref[...],
                       preferred_element_type=jnp.float32)         # (TW0, 160)
        acc1 = ytap[0:R1, 0:C1]
        for k in range(1, KS):
            acc1 = acc1 + ytap[k:k + R1, k * C1:(k + 1) * C1]
        frame1 = lax.broadcasted_iota(jnp.int32, (R1, 1), 0) + (t0 - 8)
        y1 = jnp.where((frame1 >= 0) & (frame1 < T), acc1 + b1_ref[...], 0.0)

        # ---- conv2: im2col -> one (R2, 160) @ (160, 64) bf16 matmul ----
        for k in range(KS):
            a2_scr[:, k * C1:(k + 1) * C1] = y1[k:k + R2, :].astype(jnp.bfloat16)
        y2 = jnp.dot(a2_scr[...], w2_ref[...],
                     preferred_element_type=jnp.float32) + b2_ref[...]
        frame2 = lax.broadcasted_iota(jnp.int32, (R2, 1), 0) + (t0 - 4)
        y2 = jnp.where((frame2 >= 0) & (frame2 < T), y2, 0.0)

        # ---- conv3: im2col -> one (TT, 640) @ (640, 256) bf16 matmul ----
        for k in range(KS):
            a3_scr[:, k * C2:(k + 1) * C2] = y2[k:k + TT, :].astype(jnp.bfloat16)
        y3 = jnp.dot(a3_scr[...], w3_ref[...],
                     preferred_element_type=jnp.float32) + b3_ref[...]   # (TT, 256)

        # ---- channel-major heads: W^T @ y3^T -> (513, TT), lane-dense stores ----
        y3t = jnp.transpose(y3).astype(jnp.bfloat16)                # (256, TT)
        ob_ref[0] = (jnp.dot(wb_ref[...], y3t, preferred_element_type=jnp.float32)
                     + bb_ref[...]).astype(ob_ref.dtype)
        og_ref[0] = (jnp.dot(wg_ref[...], y3t, preferred_element_type=jnp.float32)
                     + bg_ref[...]).astype(og_ref.dtype)

    return kernel


# ----------------------------------------------------------------------------
# Wrapper
# ----------------------------------------------------------------------------
def condition_generator_forward(f0_hz, p, tile_t=None, out_dtype=jnp.float32):
    """f0_hz: (B, n_frames, 1) f32 -> (beta, gamma), each (B, 513, n_frames).

    out_dtype=jnp.bfloat16 halves output writeback (useful on v5e)."""
    B, T, _ = f0_hz.shape
    T8 = _round_up(T, 8)

    # Tile size: multi-tile output blocks put time on lanes -> need multiple of
    # 128; a single tile (== full padded extent) may be any multiple of 8.
    tt_req = max(8, DEFAULT_TILE_T if tile_t is None else int(tile_t))
    if tt_req >= T8:
        TT = T8
    else:
        TT = _round_up(tt_req, 128)
        if TT >= T8:
            TT = T8
    # v7x megacore: guarantee >= 2 parallel grid steps when B == 1.
    if B == 1 and TT == T8 and T8 >= 256:
        TT = _round_up((T8 + 1) // 2, 128)
        if TT >= T8:
            TT = T8

    ntiles = -(-T8 // TT)
    Tpad = ntiles * TT
    Tfull = Tpad + 32                         # 12-frame front halo + 20-frame back halo
    TW0, R1, R2 = TT + 32, TT + 18, TT + 9

    hp = lax.Precision.HIGHEST
    f32, bf16 = jnp.float32, jnp.bfloat16

    # Fold the Gaussian blur + row-max normalisation into the conv1 weights:
    # the normalised blurred one-hot for bin k is exp(-0.5*(b-k)^2) on |b-k|<=4
    # (edge-clipped), so conv1(blurred_onehot) == onehot @ (M @ W1).
    idx = np.arange(N_BINS)
    dmat = idx[None, :] - idx[:, None]
    Mblur = np.where(np.abs(dmat) <= RADIUS,
                     np.exp(-0.5 * dmat.astype(np.float64) ** 2), 0.0).astype(np.float32)
    w1b = jnp.einsum('kb,tbc->tkc', jnp.asarray(Mblur), p['w1'].astype(f32),
                     precision=hp)                                  # (10, 361, 16)
    w1b = jnp.pad(w1b, ((0, 0), (0, NB - N_BINS), (0, 0)))          # (10, 384, 16)
    w1cat = jnp.transpose(w1b, (1, 0, 2)).reshape(NB, KS * C1).astype(bf16)  # (384,160)

    w2c = p['w2'].reshape(KS * C1, C2).astype(bf16)                 # (160, 64)
    w3c = p['w3'].reshape(KS * C2, C3).astype(bf16)                 # (640, 256)
    wbT = p['w_beta'].T.astype(bf16)                                # (513, 256)
    wgT = p['w_gamma'].T.astype(bf16)                               # (513, 256)
    b1 = p['b1'][None, :].astype(f32)
    b2 = p['b2'][None, :].astype(f32)
    b3 = p['b3'][None, :].astype(f32)
    bbT = p['b_beta'][:, None].astype(f32)                          # (513, 1)
    bgT = p['b_gamma'][:, None].astype(f32)

    # f0 -> quantized bin index in the wrapper (torch clamps below at 0; we also
    # clamp above at 360 where torch's scatter_ would raise).
    kq = jnp.round(jnp.log2(f0_hz.astype(f32) / 32.7 + 1e-8) * 60.0) + 1.0
    k_idx = jnp.clip(kq, 0.0, float(N_BINS - 1)).astype(jnp.int32)  # (B, T, 1)
    k_pad = jnp.pad(k_idx, ((0, 0), (12, Tfull - 12 - T), (0, 0)))  # (B, Tfull, 1)

    kernel = _make_kernel(T, TT, TW0, R1, R2)

    out_b, out_g = pl.pallas_call(
        kernel,
        out_shape=(jax.ShapeDtypeStruct((B, C_OUT, Tpad), out_dtype),
                   jax.ShapeDtypeStruct((B, C_OUT, Tpad), out_dtype)),
        grid=(B, ntiles),
        in_specs=[
            # whole padded bin-index row per batch element (tiny); re-DMA'd only
            # when b changes.
            pl.BlockSpec((1, Tfull, 1), lambda b, t: (b, 0, 0)),
            # weights / biases: constant index_map -> DMA'd once, stay resident.
            # NOTE(perf): could be single-buffered (pipeline_mode=pl.Buffered(1));
            # left at the default for lowering compatibility (~1 MB VMEM only).
            pl.BlockSpec((NB, KS * C1), lambda b, t: (0, 0)),
            pl.BlockSpec((1, C1), lambda b, t: (0, 0)),
            pl.BlockSpec((KS * C1, C2), lambda b, t: (0, 0)),
            pl.BlockSpec((1, C2), lambda b, t: (0, 0)),
            pl.BlockSpec((KS * C2, C3), lambda b, t: (0, 0)),
            pl.BlockSpec((1, C3), lambda b, t: (0, 0)),
            pl.BlockSpec((C_OUT, C3), lambda b, t: (0, 0)),
            pl.BlockSpec((C_OUT, 1), lambda b, t: (0, 0)),
            pl.BlockSpec((C_OUT, C3), lambda b, t: (0, 0)),
            pl.BlockSpec((C_OUT, 1), lambda b, t: (0, 0)),
        ],
        out_specs=(pl.BlockSpec((1, C_OUT, TT), lambda b, t: (b, 0, t)),
                   pl.BlockSpec((1, C_OUT, TT), lambda b, t: (b, 0, t))),
        scratch_shapes=[
            pltpu.VMEM((TW0, NB), jnp.bfloat16),        # one-hot embedding window
            pltpu.VMEM((R2, KS * C1), jnp.bfloat16),    # conv2 im2col
            pltpu.VMEM((TT, KS * C2), jnp.bfloat16),    # conv3 im2col
        ],
        compiler_params=pltpu.CompilerParams(
            dimension_semantics=("parallel", "parallel"),
            vmem_limit_bytes=48 * 1024 * 1024),
    )(k_pad, w1cat, b1, w2c, b2, w3c, b3, wbT, bbT, wgT, bgT)

    # Already channel-major (B, 513, Tpad); just drop the tile padding in time.
    return out_b[:, :, :T], out_g[:, :, :T]


# ----------------------------------------------------------------------------
# Deterministic synthetic parameters (shapes from the torch __init__)
#   conv weights stored as (K, Cin, Cout)  == torch.weight.permute(2, 1, 0)
#   linear weights stored as (in, out)     == torch.weight.T
# ----------------------------------------------------------------------------
def init_params(key):
    ks = jax.random.split(key, 10)
    s = 0.05
    return dict(
        w1=jax.random.normal(ks[0], (KS, N_BINS, C1), jnp.float32) * s,
        b1=jax.random.normal(ks[1], (C1,), jnp.float32) * s,
        w2=jax.random.normal(ks[2], (KS, C1, C2), jnp.float32) * s,
        b2=jax.random.normal(ks[3], (C2,), jnp.float32) * s,
        w3=jax.random.normal(ks[4], (KS, C2, C3), jnp.float32) * s,
        b3=jax.random.normal(ks[5], (C3,), jnp.float32) * s,
        w_gamma=jax.random.normal(ks[6], (C3, C_OUT), jnp.float32) * s,
        b_gamma=jax.random.normal(ks[7], (C_OUT,), jnp.float32) * s,
        w_beta=jax.random.normal(ks[8], (C3, C_OUT), jnp.float32) * s,
        b_beta=jax.random.normal(ks[9], (C_OUT,), jnp.float32) * s,
    )


# ----------------------------------------------------------------------------
# Pure-JAX reference (mirrors the torch forward) for correctness checking
# ----------------------------------------------------------------------------
def reference_forward(f0_hz, p):
    hp = lax.Precision.HIGHEST
    k = jnp.round(jnp.log2(f0_hz / 32.7 + 1e-8) * 60.0) + 1.0
    k = jnp.where(k < 0.0, 0.0, k)
    k = jnp.clip(k, 0.0, N_BINS - 1).astype(jnp.int32)[..., 0]   # torch would raise for k > 360
    onehot = jax.nn.one_hot(k, N_BINS, dtype=jnp.float32)        # (B, T, 361)
    idx = np.arange(N_BINS)
    diff = idx[None, :] - idx[:, None]
    g = np.asarray(GAUSS, np.float32)
    M = np.where(np.abs(diff) <= RADIUS,
                 g[np.clip(diff + RADIUS, 0, 2 * RADIUS)], 0.0).astype(np.float32)
    blurred = jnp.dot(onehot, jnp.asarray(M), precision=hp)
    blurred = blurred / blurred.max(axis=2, keepdims=True)
    x = blurred.transpose(0, 2, 1)                               # (B, 361, T)
    x = jnp.pad(x, ((0, 0), (0, 0), (0, 1)))

    def conv(x, w_kio, bias):
        w_oik = jnp.transpose(w_kio, (2, 1, 0))                  # (Cout, Cin, K)
        y = lax.conv_general_dilated(x, w_oik, (1,), [(4, 4)],
                                     dimension_numbers=('NCH', 'OIH', 'NCH'),
                                     precision=hp)
        return y + bias[None, :, None]

    x = conv(x, p['w1'], p['b1'])
    x = jnp.pad(x, ((0, 0), (0, 0), (0, 1)))
    x = conv(x, p['w2'], p['b2'])
    x = jnp.pad(x, ((0, 0), (0, 0), (0, 1)))
    x = conv(x, p['w3'], p['b3'])
    xt = x.transpose(0, 2, 1)                                    # (B, T, 256)
    beta = jnp.dot(xt, p['w_beta'], precision=hp) + p['b_beta']
    gamma = jnp.dot(xt, p['w_gamma'], precision=hp) + p['b_gamma']
    return beta.transpose(0, 2, 1), gamma.transpose(0, 2, 1)


if __name__ == "__main__":
    key = jax.random.PRNGKey(0)
    kp, kd = jax.random.split(key)
    params = init_params(kp)

    # Small demo: T=300 with tile_t=128 -> 3 time tiles (lane-aligned channel-major
    # output blocks), a partially valid last tile (halo masking + time slicing),
    # and B=2 so the parallel grid has plenty of steps.
    B, T = 2, 300
    f0_hz = jax.random.uniform(kd, (B, T, 1), jnp.float32, minval=60.0, maxval=800.0)

    fwd = jax.jit(functools.partial(condition_generator_forward, tile_t=128))
    beta, gamma = fwd(f0_hz, params)
    jax.block_until_ready((beta, gamma))

    assert beta.shape == (B, C_OUT, T) and gamma.shape == (B, C_OUT, T)

    beta_ref, gamma_ref = reference_forward(f0_hz, params)
    err_b = float(np.max(np.abs(np.asarray(beta) - np.asarray(beta_ref))))
    err_g = float(np.max(np.abs(np.asarray(gamma) - np.asarray(gamma_ref))))
    # bf16 MXU operands (f32 accumulation) bound per-element error to a few 1e-3
    # at these magnitudes; genuine halo/masking/index bugs show up as O(0.1).
    tol = 2.5e-2
    if err_b < tol and err_g < tol:
        print("KERNEL_OK")
    else:
        print("max |beta - ref| =", err_b, " max |gamma - ref| =", err_g)
</pallas_src>

<mosaic_0001>
module attributes {stable_mosaic.version = 11 : i64} {
  func.func @kernel(%arg0: i32, %arg1: i32, %arg2: memref<1x416x1xi32, #tpu.memory_space<vmem>>, %arg3: memref<384x160xbf16, #tpu.memory_space<vmem>>, %arg4: memref<1x16xf32, #tpu.memory_space<vmem>>, %arg5: memref<160x64xbf16, #tpu.memory_space<vmem>>, %arg6: memref<1x64xf32, #tpu.memory_space<vmem>>, %arg7: memref<640x256xbf16, #tpu.memory_space<vmem>>, %arg8: memref<1x256xf32, #tpu.memory_space<vmem>>, %arg9: memref<513x256xbf16, #tpu.memory_space<vmem>>, %arg10: memref<513x1xf32, #tpu.memory_space<vmem>>, %arg11: memref<513x256xbf16, #tpu.memory_space<vmem>>, %arg12: memref<513x1xf32, #tpu.memory_space<vmem>>, %arg13: memref<1x513x128xf32, #tpu.memory_space<vmem>>, %arg14: memref<1x513x128xf32, #tpu.memory_space<vmem>>, %arg15: memref<160x384xbf16, #tpu.memory_space<vmem>>, %arg16: memref<137x160xbf16, #tpu.memory_space<vmem>>, %arg17: memref<128x640xbf16, #tpu.memory_space<vmem>>) attributes {dimension_semantics = [#tpu.dimension_semantics<parallel>, #tpu.dimension_semantics<parallel>], iteration_bounds = array<i64: 2, 3>, scalar_prefetch = 0 : i64, scratch_operands = 3 : i64, tpu.core_type = #tpu.core_type<tc>, window_params = [{transform_indices = @transform_0, window_bounds = array<i64: 1, 416, 1>}, {pipeline_mode = #tpu.pipeline_mode<synchronous>, transform_indices = @transform_1, window_bounds = array<i64: 384, 160>}, {pipeline_mode = #tpu.pipeline_mode<synchronous>, transform_indices = @transform_2, window_bounds = array<i64: 1, 16>}, {pipeline_mode = #tpu.pipeline_mode<synchronous>, transform_indices = @transform_3, window_bounds = array<i64: 160, 64>}, {pipeline_mode = #tpu.pipeline_mode<synchronous>, transform_indices = @transform_4, window_bounds = array<i64: 1, 64>}, {pipeline_mode = #tpu.pipeline_mode<synchronous>, transform_indices = @transform_5, window_bounds = array<i64: 640, 256>}, {pipeline_mode = #tpu.pipeline_mode<synchronous>, transform_indices = @transform_6, window_bounds = array<i64: 1, 256>}, {pipeline_mode = #tpu.pipeline_mode<synchronous>, transform_indices = @transform_7, window_bounds = array<i64: 513, 256>}, {pipeline_mode = #tpu.pipeline_mode<synchronous>, transform_indices = @transform_8, window_bounds = array<i64: 513, 1>}, {pipeline_mode = #tpu.pipeline_mode<synchronous>, transform_indices = @transform_9, window_bounds = array<i64: 513, 256>}, {pipeline_mode = #tpu.pipeline_mode<synchronous>, transform_indices = @transform_10, window_bounds = array<i64: 513, 1>}, {transform_indices = @transform_11, window_bounds = array<i64: 1, 513, 128>}, {transform_indices = @transform_12, window_bounds = array<i64: 1, 513, 128>}]} {
    %c128_i32 = arith.constant 128 : i32
    %0 = arith.muli %arg1, %c128_i32 : i32
    %1 = tpu.assume_multiple %0, 8 : i32
    %c0 = arith.constant 0 : index
    %2 = arith.index_cast %1 : i32 to index
    %c0_0 = arith.constant 0 : index
    %3 = vector.load %arg2[%c0, %2, %c0_0] : memref<1x416x1xi32, #tpu.memory_space<vmem>>, vector<1x160x1xi32>
    %4 = vector.shape_cast %3 : vector<1x160x1xi32> to vector<160x1xi32>
    %5 = tpu.iota {dimensions = array<i32: 0>} : vector<160x1xi32>
    %c12_i32 = arith.constant 12 : i32
    %6 = arith.subi %0, %c12_i32 : i32
    %7 = vector.broadcast %6 : i32 to vector<160x1xi32>
    %8 = arith.addi %5, %7 : vector<160x1xi32>
    %c0_i32 = arith.constant 0 : i32
    %9 = vector.broadcast %c0_i32 : i32 to vector<160x1xi32>
    %10 = arith.cmpi sge, %8, %9 : vector<160x1xi32>
    %c300_i32 = arith.constant 300 : i32
    %11 = vector.broadcast %c300_i32 : i32 to vector<160x1xi32>
    %12 = arith.cmpi slt, %8, %11 : vector<160x1xi32>
    %13 = arith.andi %10, %12 : vector<160x1xi1>
    %14 = tpu.iota {dimensions = array<i32: 1>} : vector<160x384xi32>
    %15 = vector.broadcast %4 : vector<160x1xi32> to vector<160x384xi32>
    %16 = arith.cmpi eq, %14, %15 : vector<160x384xi32>
    %17 = vector.broadcast %13 : vector<160x1xi1> to vector<160x384xi1>
    %18 = arith.andi %16, %17 : vector<160x384xi1>
    %cst = arith.constant 1.000000e+00 : f32
    %cst_1 = arith.constant 0.000000e+00 : f32
    %19 = vector.broadcast %cst : f32 to vector<160x384xf32>
    %20 = vector.broadcast %cst_1 : f32 to vector<160x384xf32>
    %21 = arith.select %18, %19, %20 : vector<160x384xi1>, vector<160x384xf32>
    %22 = arith.truncf %21 : vector<160x384xf32> to vector<160x384xbf16>
    %c0_2 = arith.constant 0 : index
    %c0_3 = arith.constant 0 : index
    %23 = vector.load %arg15[%c0_2, %c0_3] : memref<160x384xbf16, #tpu.memory_space<vmem>>, vector<160x384xbf16>
    tpu.vector_store %arg15[%c0_2, %c0_3], %22 {strides = array<i32>} : memref<160x384xbf16, #tpu.memory_space<vmem>>, vector<160x384xbf16>,
    %c0_4 = arith.constant 0 : index
    %c0_5 = arith.constant 0 : index
    %24 = vector.load %arg15[%c0_4, %c0_5] : memref<160x384xbf16, #tpu.memory_space<vmem>>, vector<160x384xbf16>
    %c0_6 = arith.constant 0 : index
    %c0_7 = arith.constant 0 : index
    %25 = vector.load %arg3[%c0_6, %c0_7] : memref<384x160xbf16, #tpu.memory_space<vmem>>, vector<384x160xbf16>
    %cst_8 = arith.constant dense<0.000000e+00> : vector<160x160xf32>
    %26 = tpu.matmul %24, %25, %cst_8 {dimension_numbers = #tpu.dot_dimension_numbers<[1], [0], [0], [1], [0, 0, 1, 1], [], []>} : vector<160x384xbf16>, vector<384x160xbf16>, vector<160x160xf32> -> vector<160x160xf32>
    %27 = vector.extract_strided_slice %26 {offsets = [0, 0], sizes = [146, 16], strides = [1, 1]} : vector<160x160xf32> to vector<146x16xf32>
    %28 = vector.extract_strided_slice %26 {offsets = [1, 16], sizes = [146, 16], strides = [1, 1]} : vector<160x160xf32> to vector<146x16xf32>
    %29 = arith.addf %27, %28 : vector<146x16xf32>
    %30 = vector.extract_strided_slice %26 {offsets = [2, 32], sizes = [146, 16], strides = [1, 1]} : vector<160x160xf32> to vector<146x16xf32>
    %31 = arith.addf %29, %30 : vector<146x16xf32>
    %32 = vector.extract_strided_slice %26 {offsets = [3, 48], sizes = [146, 16], strides = [1, 1]} : vector<160x160xf32> to vector<146x16xf32>
    %33 = arith.addf %31, %32 : vector<146x16xf32>
    %34 = vector.extract_strided_slice %26 {offsets = [4, 64], sizes = [146, 16], strides = [1, 1]} : vector<160x160xf32> to vector<146x16xf32>
    %35 = arith.addf %33, %34 : vector<146x16xf32>
    %36 = vector.extract_strided_slice %26 {offsets = [5, 80], sizes = [146, 16], strides = [1, 1]} : vector<160x160xf32> to vector<146x16xf32>
    %37 = arith.addf %35, %36 : vector<146x16xf32>
    %38 = vector.extract_strided_slice %26 {offsets = [6, 96], sizes = [146, 16], strides = [1, 1]} : vector<160x160xf32> to vector<146x16xf32>
    %39 = arith.addf %37, %38 : vector<146x16xf32>
    %40 = vector.extract_strided_slice %26 {offsets = [7, 112], sizes = [146, 16], strides = [1, 1]} : vector<160x160xf32> to vector<146x16xf32>
    %41 = arith.addf %39, %40 : vector<146x16xf32>
    %42 = vector.extract_strided_slice %26 {offsets = [8, 128], sizes = [146, 16], strides = [1, 1]} : vector<160x160xf32> to vector<146x16xf32>
    %43 = arith.addf %41, %42 : vector<146x16xf32>
    %44 = vector.extract_strided_slice %26 {offsets = [9, 144], sizes = [146, 16], strides = [1, 1]} : vector<160x160xf32> to vector<146x16xf32>
    %45 = arith.addf %43, %44 : vector<146x16xf32>
    %46 = tpu.iota {dimensions = array<i32: 0>} : vector<146x1xi32>
    %c8_i32 = arith.constant 8 : i32
    %47 = arith.subi %0, %c8_i32 : i32
    %48 = vector.broadcast %47 : i32 to vector<146x1xi32>
    %49 = arith.addi %46, %48 : vector<146x1xi32>
    %c0_i32_9 = arith.constant 0 : i32
    %50 = vector.broadcast %c0_i32_9 : i32 to vector<146x1xi32>
    %51 = arith.cmpi sge, %49, %50 : vector<146x1xi32>
    %c300_i32_10 = arith.constant 300 : i32
    %52 = vector.broadcast %c300_i32_10 : i32 to vector<146x1xi32>
    %53 = arith.cmpi slt, %49, %52 : vector<146x1xi32>
    %54 = arith.andi %51, %53 : vector<146x1xi1>
    %c0_11 = arith.constant 0 : index
    %c0_12 = arith.constant 0 : index
    %55 = vector.load %arg4[%c0_11, %c0_12] : memref<1x16xf32, #tpu.memory_space<vmem>>, vector<1x16xf32>
    %56 = vector.broadcast %55 : vector<1x16xf32> to vector<146x16xf32>
    %57 = arith.addf %45, %56 : vector<146x16xf32>
    %cst_13 = arith.constant 0.000000e+00 : f32
    %58 = vector.shape_cast %54 : vector<146x1xi1> to vector<146x1xi1>
    %59 = vector.broadcast %58 : vector<146x1xi1> to vector<146x16xi1>
    %60 = vector.broadcast %cst_13 : f32 to vector<146x16xf32>
    %61 = arith.select %59, %57, %60 : vector<146x16xi1>, vector<146x16xf32>
    %62 = vector.extract_strided_slice %61 {offsets = [0, 0], sizes = [137, 16], strides = [1, 1]} : vector<146x16xf32> to vector<137x16xf32>
    %63 = arith.truncf %62 : vector<137x16xf32> to vector<137x16xbf16>
    %c0_14 = arith.constant 0 : index
    %c0_15 = arith.constant 0 : index
    %64 = vector.load %arg16[%c0_14, %c0_15] : memref<137x160xbf16, #tpu.memory_space<vmem>>, vector<137x16xbf16>
    tpu.vector_store %arg16[%c0_14, %c0_15], %63 {strides = array<i32>} : memref<137x160xbf16, #tpu.memory_space<vmem>>, vector<137x16xbf16>,
    %65 = vector.extract_strided_slice %61 {offsets = [1, 0], sizes = [137, 16], strides = [1, 1]} : vector<146x16xf32> to vector<137x16xf32>
    %66 = arith.truncf %65 : vector<137x16xf32> to vector<137x16xbf16>
    %c0_16 = arith.constant 0 : index
    %c16 = arith.constant 16 : index
    %67 = vector.load %arg16[%c0_16, %c16] : memref<137x160xbf16, #tpu.memory_space<vmem>>, vector<137x16xbf16>
    tpu.vector_store %arg16[%c0_16, %c16], %66 {strides = array<i32>} : memref<137x160xbf16, #tpu.memory_space<vmem>>, vector<137x16xbf16>,
    %68 = vector.extract_strided_slice %61 {offsets = [2, 0], sizes = [137, 16], strides = [1, 1]} : vector<146x16xf32> to vector<137x16xf32>
    %69 = arith.truncf %68 : vector<137x16xf32> to vector<137x16xbf16>
    %c0_17 = arith.constant 0 : index
    %c32 = arith.constant 32 : index
    %70 = vector.load %arg16[%c0_17, %c32] : memref<137x160xbf16, #tpu.memory_space<vmem>>, vector<137x16xbf16>
    tpu.vector_store %arg16[%c0_17, %c32], %69 {strides = array<i32>} : memref<137x160xbf16, #tpu.memory_space<vmem>>, vector<137x16xbf16>,
    %71 = vector.extract_strided_slice %61 {offsets = [3, 0], sizes = [137, 16], strides = [1, 1]} : vector<146x16xf32> to vector<137x16xf32>
    %72 = arith.truncf %71 : vector<137x16xf32> to vector<137x16xbf16>
    %c0_18 = arith.constant 0 : index
    %c48 = arith.constant 48 : index
    %73 = vector.load %arg16[%c0_18, %c48] : memref<137x160xbf16, #tpu.memory_space<vmem>>, vector<137x16xbf16>
    tpu.vector_store %arg16[%c0_18, %c48], %72 {strides = array<i32>} : memref<137x160xbf16, #tpu.memory_space<vmem>>, vector<137x16xbf16>,
    %74 = vector.extract_strided_slice %61 {offsets = [4, 0], sizes = [137, 16], strides = [1, 1]} : vector<146x16xf32> to vector<137x16xf32>
    %75 = arith.truncf %74 : vector<137x16xf32> to vector<137x16xbf16>
    %c0_19 = arith.constant 0 : index
    %c64 = arith.constant 64 : index
    %76 = vector.load %arg16[%c0_19, %c64] : memref<137x160xbf16, #tpu.memory_space<vmem>>, vector<137x16xbf16>
    tpu.vector_store %arg16[%c0_19, %c64], %75 {strides = array<i32>} : memref<137x160xbf16, #tpu.memory_space<vmem>>, vector<137x16xbf16>,
    %77 = vector.extract_strided_slice %61 {offsets = [5, 0], sizes = [137, 16], strides = [1, 1]} : vector<146x16xf32> to vector<137x16xf32>
    %78 = arith.truncf %77 : vector<137x16xf32> to vector<137x16xbf16>
    %c0_20 = arith.constant 0 : index
    %c80 = arith.constant 80 : index
    %79 = vector.load %arg16[%c0_20, %c80] : memref<137x160xbf16, #tpu.memory_space<vmem>>, vector<137x16xbf16>
    tpu.vector_store %arg16[%c0_20, %c80], %78 {strides = array<i32>} : memref<137x160xbf16, #tpu.memory_space<vmem>>, vector<137x16xbf16>,
    %80 = vector.extract_strided_slice %61 {offsets = [6, 0], sizes = [137, 16], strides = [1, 1]} : vector<146x16xf32> to vector<137x16xf32>
    %81 = arith.truncf %80 : vector<137x16xf32> to vector<137x16xbf16>
    %c0_21 = arith.constant 0 : index
    %c96 = arith.constant 96 : index
    %82 = vector.load %arg16[%c0_21, %c96] : memref<137x160xbf16, #tpu.memory_space<vmem>>, vector<137x16xbf16>
    tpu.vector_store %arg16[%c0_21, %c96], %81 {strides = array<i32>} : memref<137x160xbf16, #tpu.memory_space<vmem>>, vector<137x16xbf16>,
    %83 = vector.extract_strided_slice %61 {offsets = [7, 0], sizes = [137, 16], strides = [1, 1]} : vector<146x16xf32> to vector<137x16xf32>
    %84 = arith.truncf %83 : vector<137x16xf32> to vector<137x16xbf16>
    %c0_22 = arith.constant 0 : index
    %c112 = arith.constant 112 : index
    %85 = vector.load %arg16[%c0_22, %c112] : memref<137x160xbf16, #tpu.memory_space<vmem>>, vector<137x16xbf16>
    tpu.vector_store %arg16[%c0_22, %c112], %84 {strides = array<i32>} : memref<137x160xbf16, #tpu.memory_space<vmem>>, vector<137x16xbf16>,
    %86 = vector.extract_strided_slice %61 {offsets = [8, 0], sizes = [137, 16], strides = [1, 1]} : vector<146x16xf32> to vector<137x16xf32>
    %87 = arith.truncf %86 : vector<137x16xf32> to vector<137x16xbf16>
    %c0_23 = arith.constant 0 : index
    %c128 = arith.constant 128 : index
    %88 = vector.load %arg16[%c0_23, %c128] : memref<137x160xbf16, #tpu.memory_space<vmem>>, vector<137x16xbf16>
    tpu.vector_store %arg16[%c0_23, %c128], %87 {strides = array<i32>} : memref<137x160xbf16, #tpu.memory_space<vmem>>, vector<137x16xbf16>,
    %89 = vector.extract_strided_slice %61 {offsets = [9, 0], sizes = [137, 16], strides = [1, 1]} : vector<146x16xf32> to vector<137x16xf32>
    %90 = arith.truncf %89 : vector<137x16xf32> to vector<137x16xbf16>
    %c0_24 = arith.constant 0 : index
    %c144 = arith.constant 144 : index
    %91 = vector.load %arg16[%c0_24, %c144] : memref<137x160xbf16, #tpu.memory_space<vmem>>, vector<137x16xbf16>
    tpu.vector_store %arg16[%c0_24, %c144], %90 {strides = array<i32>} : memref<137x160xbf16, #tpu.memory_space<vmem>>, vector<137x16xbf16>,
    %c0_25 = arith.constant 0 : index
    %c0_26 = arith.constant 0 : index
    %92 = vector.load %arg16[%c0_25, %c0_26] : memref<137x160xbf16, #tpu.memory_space<vmem>>, vector<137x160xbf16>
    %c0_27 = arith.constant 0 : index
    %c0_28 = arith.constant 0 : index
    %93 = vector.load %arg5[%c0_27, %c0_28] : memref<160x64xbf16, #tpu.memory_space<vmem>>, vector<160x64xbf16>
    %cst_29 = arith.constant dense<0.000000e+00> : vector<137x64xf32>
    %94 = tpu.matmul %92, %93, %cst_29 {dimension_numbers = #tpu.dot_dimension_numbers<[1], [0], [0], [1], [0, 0, 1, 1], [], []>} : vector<137x160xbf16>, vector<160x64xbf16>, vector<137x64xf32> -> vector<137x64xf32>
    %c0_30 = arith.constant 0 : index
    %c0_31 = arith.constant 0 : index
    %95 = vector.load %arg6[%c0_30, %c0_31] : memref<1x64xf32, #tpu.memory_space<vmem>>, vector<1x64xf32>
    %96 = vector.broadcast %95 : vector<1x64xf32> to vector<137x64xf32>
    %97 = arith.addf %94, %96 : vector<137x64xf32>
    %98 = tpu.iota {dimensions = array<i32: 0>} : vector<137x1xi32>
    %c4_i32 = arith.constant 4 : i32
    %99 = arith.subi %0, %c4_i32 : i32
    %100 = vector.broadcast %99 : i32 to vector<137x1xi32>
    %101 = arith.addi %98, %100 : vector<137x1xi32>
    %c0_i32_32 = arith.constant 0 : i32
    %102 = vector.broadcast %c0_i32_32 : i32 to vector<137x1xi32>
    %103 = arith.cmpi sge, %101, %102 : vector<137x1xi32>
    %c300_i32_33 = arith.constant 300 : i32
    %104 = vector.broadcast %c300_i32_33 : i32 to vector<137x1xi32>
    %105 = arith.cmpi slt, %101, %104 : vector<137x1xi32>
    %106 = arith.andi %103, %105 : vector<137x1xi1>
    %cst_34 = arith.constant 0.000000e+00 : f32
    %107 = vector.shape_cast %106 : vector<137x1xi1> to vector<137x1xi1>
    %108 = vector.broadcast %107 : vector<137x1xi1> to vector<137x64xi1>
    %109 = vector.broadcast %cst_34 : f32 to vector<137x64xf32>
    %110 = arith.select %108, %97, %109 : vector<137x64xi1>, vector<137x64xf32>
    %111 = vector.extract_strided_slice %110 {offsets = [0, 0], sizes = [128, 64], strides = [1, 1]} : vector<137x64xf32> to vector<128x64xf32>
    %112 = arith.truncf %111 : vector<128x64xf32> to vector<128x64xbf16>
    %c0_35 = arith.constant 0 : index
    %c0_36 = arith.constant 0 : index
    %113 = vector.load %arg17[%c0_35, %c0_36] : memref<128x640xbf16, #tpu.memory_space<vmem>>, vector<128x64xbf16>
    tpu.vector_store %arg17[%c0_35, %c0_36], %112 {strides = array<i32>} : memref<128x640xbf16, #tpu.memory_space<vmem>>, vector<128x64xbf16>,
    %114 = vector.extract_strided_slice %110 {offsets = [1, 0], sizes = [128, 64], strides = [1, 1]} : vector<137x64xf32> to vector<128x64xf32>
    %115 = arith.truncf %114 : vector<128x64xf32> to vector<128x64xbf16>
    %c0_37 = arith.constant 0 : index
    %c64_38 = arith.constant 64 : index
    %116 = vector.load %arg17[%c0_37, %c64_38] : memref<128x640xbf16, #tpu.memory_space<vmem>>, vector<128x64xbf16>
    tpu.vector_store %arg17[%c0_37, %c64_38], %115 {strides = array<i32>} : memref<128x640xbf16, #tpu.memory_space<vmem>>, vector<128x64xbf16>,
    %117 = vector.extract_strided_slice %110 {offsets = [2, 0], sizes = [128, 64], strides = [1, 1]} : vector<137x64xf32> to vector<128x64xf32>
    %118 = arith.truncf %117 : vector<128x64xf32> to vector<128x64xbf16>
    %c0_39 = arith.constant 0 : index
    %c128_40 = arith.constant 128 : index
    %119 = vector.load %arg17[%c0_39, %c128_40] : memref<128x640xbf16, #tpu.memory_space<vmem>>, vector<128x64xbf16>
    tpu.vector_store %arg17[%c0_39, %c128_40], %118 {strides = array<i32>} : memref<128x640xbf16, #tpu.memory_space<vmem>>, vector<128x64xbf16>,
    %120 = vector.extract_strided_slice %110 {offsets = [3, 0], sizes = [128, 64], strides = [1, 1]} : vector<137x64xf32> to vector<128x64xf32>
    %121 = arith.truncf %120 : vector<128x64xf32> to vector<128x64xbf16>
    %c0_41 = arith.constant 0 : index
    %c192 = arith.constant 192 : index
    %122 = vector.load %arg17[%c0_41, %c192] : memref<128x640xbf16, #tpu.memory_space<vmem>>, vector<128x64xbf16>
    tpu.vector_store %arg17[%c0_41, %c192], %121 {strides = array<i32>} : memref<128x640xbf16, #tpu.memory_space<vmem>>, vector<128x64xbf16>,
    %123 = vector.extract_strided_slice %110 {offsets = [4, 0], sizes = [128, 64], strides = [1, 1]} : vector<137x64xf32> to vector<128x64xf32>
    %124 = arith.truncf %123 : vector<128x64xf32> to vector<128x64xbf16>
    %c0_42 = arith.constant 0 : index
    %c256 = arith.constant 256 : index
    %125 = vector.load %arg17[%c0_42, %c256] : memref<128x640xbf16, #tpu.memory_space<vmem>>, vector<128x64xbf16>
    tpu.vector_store %arg17[%c0_42, %c256], %124 {strides = array<i32>} : memref<128x640xbf16, #tpu.memory_space<vmem>>, vector<128x64xbf16>,
    %126 = vector.extract_strided_slice %110 {offsets = [5, 0], sizes = [128, 64], strides = [1, 1]} : vector<137x64xf32> to vector<128x64xf32>
    %127 = arith.truncf %126 : vector<128x64xf32> to vector<128x64xbf16>
    %c0_43 = arith.constant 0 : index
    %c320 = arith.constant 320 : index
    %128 = vector.load %arg17[%c0_43, %c320] : memref<128x640xbf16, #tpu.memory_space<vmem>>, vector<128x64xbf16>
    tpu.vector_store %arg17[%c0_43, %c320], %127 {strides = array<i32>} : memref<128x640xbf16, #tpu.memory_space<vmem>>, vector<128x64xbf16>,
    %129 = vector.extract_strided_slice %110 {offsets = [6, 0], sizes = [128, 64], strides = [1, 1]} : vector<137x64xf32> to vector<128x64xf32>
    %130 = arith.truncf %129 : vector<128x64xf32> to vector<128x64xbf16>
    %c0_44 = arith.constant 0 : index
    %c384 = arith.constant 384 : index
    %131 = vector.load %arg17[%c0_44, %c384] : memref<128x640xbf16, #tpu.memory_space<vmem>>, vector<128x64xbf16>
    tpu.vector_store %arg17[%c0_44, %c384], %130 {strides = array<i32>} : memref<128x640xbf16, #tpu.memory_space<vmem>>, vector<128x64xbf16>,
    %132 = vector.extract_strided_slice %110 {offsets = [7, 0], sizes = [128, 64], strides = [1, 1]} : vector<137x64xf32> to vector<128x64xf32>
    %133 = arith.truncf %132 : vector<128x64xf32> to vector<128x64xbf16>
    %c0_45 = arith.constant 0 : index
    %c448 = arith.constant 448 : index
    %134 = vector.load %arg17[%c0_45, %c448] : memref<128x640xbf16, #tpu.memory_space<vmem>>, vector<128x64xbf16>
    tpu.vector_store %arg17[%c0_45, %c448], %133 {strides = array<i32>} : memref<128x640xbf16, #tpu.memory_space<vmem>>, vector<128x64xbf16>,
    %135 = vector.extract_strided_slice %110 {offsets = [8, 0], sizes = [128, 64], strides = [1, 1]} : vector<137x64xf32> to vector<128x64xf32>
    %136 = arith.truncf %135 : vector<128x64xf32> to vector<128x64xbf16>
    %c0_46 = arith.constant 0 : index
    %c512 = arith.constant 512 : index
    %137 = vector.load %arg17[%c0_46, %c512] : memref<128x640xbf16, #tpu.memory_space<vmem>>, vector<128x64xbf16>
    tpu.vector_store %arg17[%c0_46, %c512], %136 {strides = array<i32>} : memref<128x640xbf16, #tpu.memory_space<vmem>>, vector<128x64xbf16>,
    %138 = vector.extract_strided_slice %110 {offsets = [9, 0], sizes = [128, 64], strides = [1, 1]} : vector<137x64xf32> to vector<128x64xf32>
    %139 = arith.truncf %138 : vector<128x64xf32> to vector<128x64xbf16>
    %c0_47 = arith.constant 0 : index
    %c576 = arith.constant 576 : index
    %140 = vector.load %arg17[%c0_47, %c576] : memref<128x640xbf16, #tpu.memory_space<vmem>>, vector<128x64xbf16>
    tpu.vector_store %arg17[%c0_47, %c576], %139 {strides = array<i32>} : memref<128x640xbf16, #tpu.memory_space<vmem>>, vector<128x64xbf16>,
    %c0_48 = arith.constant 0 : index
    %c0_49 = arith.constant 0 : index
    %141 = vector.load %arg17[%c0_48, %c0_49] : memref<128x640xbf16, #tpu.memory_space<vmem>>, vector<128x640xbf16>
    %c0_50 = arith.constant 0 : index
    %c0_51 = arith.constant 0 : index
    %142 = vector.load %arg7[%c0_50, %c0_51] : memref<640x256xbf16, #tpu.memory_space<vmem>>, vector<640x256xbf16>
    %cst_52 = arith.constant dense<0.000000e+00> : vector<128x256xf32>
    %143 = tpu.matmul %141, %142, %cst_52 {dimension_numbers = #tpu.dot_dimension_numbers<[1], [0], [0], [1], [0, 0, 1, 1], [], []>} : vector<128x640xbf16>, vector<640x256xbf16>, vector<128x256xf32> -> vector<128x256xf32>
    %c0_53 = arith.constant 0 : index
    %c0_54 = arith.constant 0 : index
    %144 = vector.load %arg8[%c0_53, %c0_54] : memref<1x256xf32, #tpu.memory_space<vmem>>, vector<1x256xf32>
    %145 = vector.broadcast %144 : vector<1x256xf32> to vector<128x256xf32>
    %146 = arith.addf %143, %145 : vector<128x256xf32>
    %147 = tpu.transpose %146, [1, 0] : vector<128x256xf32> -> vector<256x128xf32>
    %148 = arith.truncf %147 : vector<256x128xf32> to vector<256x128xbf16>
    %c0_55 = arith.constant 0 : index
    %c0_56 = arith.constant 0 : index
    %149 = vector.load %arg9[%c0_55, %c0_56] : memref<513x256xbf16, #tpu.memory_space<vmem>>, vector<513x256xbf16>
    %cst_57 = arith.constant dense<0.000000e+00> : vector<513x128xf32>
    %150 = tpu.matmul %149, %148, %cst_57 {dimension_numbers = #tpu.dot_dimension_numbers<[1], [0], [0], [1], [0, 0, 1, 1], [], []>} : vector<513x256xbf16>, vector<256x128xbf16>, vector<513x128xf32> -> vector<513x128xf32>
    %c0_58 = arith.constant 0 : index
    %c0_59 = arith.constant 0 : index
    %151 = vector.load %arg10[%c0_58, %c0_59] : memref<513x1xf32, #tpu.memory_space<vmem>>, vector<513x1xf32>
    %152 = vector.broadcast %151 : vector<513x1xf32> to vector<513x128xf32>
    %153 = arith.addf %150, %152 : vector<513x128xf32>
    %c0_60 = arith.constant 0 : index
    %c0_61 = arith.constant 0 : index
    %c0_62 = arith.constant 0 : index
    %154 = vector.load %arg13[%c0_60, %c0_61, %c0_62] : memref<1x513x128xf32, #tpu.memory_space<vmem>>, vector<1x513x128xf32>
    %155 = vector.shape_cast %154 : vector<1x513x128xf32> to vector<513x128xf32>
    %156 = vector.shape_cast %153 : vector<513x128xf32> to vector<1x513x128xf32>
    tpu.vector_store %arg13[%c0_60, %c0_61, %c0_62], %156 {strides = array<i32>} : memref<1x513x128xf32, #tpu.memory_space<vmem>>, vector<1x513x128xf32>,
    %c0_63 = arith.constant 0 : index
    %c0_64 = arith.constant 0 : index
    %157 = vector.load %arg11[%c0_63, %c0_64] : memref<513x256xbf16, #tpu.memory_space<vmem>>, vector<513x256xbf16>
    %cst_65 = arith.constant dense<0.000000e+00> : vector<513x128xf32>
    %158 = tpu.matmul %157, %148, %cst_65 {dimension_numbers = #tpu.dot_dimension_numbers<[1], [0], [0], [1], [0, 0, 1, 1], [], []>} : vector<513x256xbf16>, vector<256x128xbf16>, vector<513x128xf32> -> vector<513x128xf32>
    %c0_66 = arith.constant 0 : index
    %c0_67 = arith.constant 0 : index
    %159 = vector.load %arg12[%c0_66, %c0_67] : memref<513x1xf32, #tpu.memory_space<vmem>>, vector<513x1xf32>
    %160 = vector.broadcast %159 : vector<513x1xf32> to vector<513x128xf32>
    %161 = arith.addf %158, %160 : vector<513x128xf32>
    %c0_68 = arith.constant 0 : index
    %c0_69 = arith.constant 0 : index
    %c0_70 = arith.constant 0 : index
    %162 = vector.load %arg14[%c0_68, %c0_69, %c0_70] : memref<1x513x128xf32, #tpu.memory_space<vmem>>, vector<1x513x128xf32>
    %163 = vector.shape_cast %162 : vector<1x513x128xf32> to vector<513x128xf32>
    %164 = vector.shape_cast %161 : vector<513x128xf32> to vector<1x513x128xf32>
    tpu.vector_store %arg14[%c0_68, %c0_69, %c0_70], %164 {strides = array<i32>} : memref<1x513x128xf32, #tpu.memory_space<vmem>>, vector<1x513x128xf32>,
    return
  }
  func.func @transform_0(%arg0: i32, %arg1: i32) -> (i32, i32, i32) {
    %c0_i32 = arith.constant 0 : i32
    %c0_i32_0 = arith.constant 0 : i32
    %c0_i32_1 = arith.constant 0 : i32
    return %arg0, %c0_i32, %c0_i32_0 : i32, i32, i32
  }
  func.func @transform_1(%arg0: i32, %arg1: i32) -> (i32, i32) {
    %c0_i32 = arith.constant 0 : i32
    %c0_i32_0 = arith.constant 0 : i32
    %c0_i32_1 = arith.constant 0 : i32
    return %c0_i32, %c0_i32_0 : i32, i32
  }
  func.func @transform_2(%arg0: i32, %arg1: i32) -> (i32, i32) {
    %c0_i32 = arith.constant 0 : i32
    %c0_i32_0 = arith.constant 0 : i32
    %c0_i32_1 = arith.constant 0 : i32
    return %c0_i32, %c0_i32_0 : i32, i32
  }
  func.func @transform_3(%arg0: i32, %arg1: i32) -> (i32, i32) {
    %c0_i32 = arith.constant 0 : i32
    %c0_i32_0 = arith.constant 0 : i32
    %c0_i32_1 = arith.constant 0 : i32
    return %c0_i32, %c0_i32_0 : i32, i32
  }
  func.func @transform_4(%arg0: i32, %arg1: i32) -> (i32, i32) {
    %c0_i32 = arith.constant 0 : i32
    %c0_i32_0 = arith.constant 0 : i32
    %c0_i32_1 = arith.constant 0 : i32
    return %c0_i32, %c0_i32_0 : i32, i32
  }
  func.func @transform_5(%arg0: i32, %arg1: i32) -> (i32, i32) {
    %c0_i32 = arith.constant 0 : i32
    %c0_i32_0 = arith.constant 0 : i32
    %c0_i32_1 = arith.constant 0 : i32
    return %c0_i32, %c0_i32_0 : i32, i32
  }
  func.func @transform_6(%arg0: i32, %arg1: i32) -> (i32, i32) {
    %c0_i32 = arith.constant 0 : i32
    %c0_i32_0 = arith.constant 0 : i32
    %c0_i32_1 = arith.constant 0 : i32
    return %c0_i32, %c0_i32_0 : i32, i32
  }
  func.func @transform_7(%arg0: i32, %arg1: i32) -> (i32, i32) {
    %c0_i32 = arith.constant 0 : i32
    %c0_i32_0 = arith.constant 0 : i32
    %c0_i32_1 = arith.constant 0 : i32
    return %c0_i32, %c0_i32_0 : i32, i32
  }
  func.func @transform_8(%arg0: i32, %arg1: i32) -> (i32, i32) {
    %c0_i32 = arith.constant 0 : i32
    %c0_i32_0 = arith.constant 0 : i32
    %c0_i32_1 = arith.constant 0 : i32
    return %c0_i32, %c0_i32_0 : i32, i32
  }
  func.func @transform_9(%arg0: i32, %arg1: i32) -> (i32, i32) {
    %c0_i32 = arith.constant 0 : i32
    %c0_i32_0 = arith.constant 0 : i32
    %c0_i32_1 = arith.constant 0 : i32
    return %c0_i32, %c0_i32_0 : i32, i32
  }
  func.func @transform_10(%arg0: i32, %arg1: i32) -> (i32, i32) {
    %c0_i32 = arith.constant 0 : i32
    %c0_i32_0 = arith.constant 0 : i32
    %c0_i32_1 = arith.constant 0 : i32
    return %c0_i32, %c0_i32_0 : i32, i32
  }
  func.func @transform_11(%arg0: i32, %arg1: i32) -> (i32, i32, i32) {
    %c0_i32 = arith.constant 0 : i32
    %c0_i32_0 = arith.constant 0 : i32
    return %arg0, %c0_i32, %arg1 : i32, i32, i32
  }
  func.func @transform_12(%arg0: i32, %arg1: i32) -> (i32, i32, i32) {
    %c0_i32 = arith.constant 0 : i32
    %c0_i32_0 = arith.constant 0 : i32
    return %arg0, %c0_i32, %arg1 : i32, i32, i32
  }
}

</mosaic_0001>

<bundles_post_ra>
// kernel: condition_generator_forward.1
= control target key start
LH: loop header
LB: loop body
LE: loop exit
PB: predicated region body
PF: predicated region fallthrough
CT: control target
= control target key end

     0   :  { %s19124_s0 = inlined_call_operand.vmem [shape: s32[2,416,1], index: 0, kind: input, shape index: {}]   ;;  %s19125_s1 = inlined_call_operand.vmem [shape: bf16[384,160], index: 1, kind: input, shape index: {}]   ;;  %s19126_s2 = inlined_call_operand.vmem [shape: f32[1,16], index: 2, kind: input, shape index: {}]   ;;  %s19127_s3 = inlined_call_operand.vmem [shape: bf16[160,64], index: 3, kind: input, shape index: {}]   ;;  %s19128_s4 = inlined_call_operand.vmem [shape: f32[1,64], index: 4, kind: input, shape index: {}]   ;;  %s19129_s5 = inlined_call_operand.vmem [shape: bf16[640,256], index: 5, kind: input, shape index: {}]   ;;  %s19130_s6 = inlined_call_operand.vmem [shape: f32[1,256], index: 6, kind: input, shape index: {}]   ;;  %s19131_s7 = inlined_call_operand.vmem [shape: bf16[513,256], index: 7, kind: input, shape index: {}]   ;;  %s19132_s8 = inlined_call_operand.vmem [shape: f32[513,1], index: 8, kind: input, shape index: {}]   ;;  %s19133_s9 = inlined_call_operand.vmem [shape: bf16[513,256], index: 9, kind: input, shape index: {}]   ;;  %s19134_s10 = inlined_call_operand.vmem [shape: f32[513,1], index: 10, kind: input, shape index: {}]   ;;  %s19135_s11 = inlined_call_operand.vmem [shape: f32[2,513,384], index: 11, kind: output, shape index: {0}]   ;;  %s19136_s12 = inlined_call_operand.vmem [shape: f32[2,513,384], index: 12, kind: output, shape index: {1}]  }
   0x1   :  { %19315 = sst [smem:[#allocation91_spill]] %s19124_s0 }
   0x2   :  { %s11829_s21 = smov 0   ;;  %s11831_s22 = smov 0  }
   0x3   :  { %s11833_s23 = smov 0   ;;  %s11835_s24 = smov 0  }
   0x4   :  { %s11837_s25 = smov 0   ;;  %s11839_s26 = smov 0  }
   0x5   :  { %s11841_s27 = smov 0  }
   0x6 LB: > { %19316 = sst [smem:[#allocation7_spill]] %s11744_s25  ;;  %s32_s28 = sadd.s32 1, %s11744_s25  ;;  %s11752_s27 = sphi %s11841_s27, %s23_s27   ;;  %s11748_s26 = sphi %s11839_s26, %s20167_s26   ;;  %s11744_s25 = sphi %s11837_s25, %s20166_s25   ;;  %s11740_s24 = sphi %s11835_s24, %s20165_s24   ;;  %s11736_s23 = sphi %s11833_s23, %s20164_s23   ;;  %s11732_s22 = sphi %s11831_s22, %s20169_s22   ;;  %s11728_s21 = sphi %s11829_s21, %s20168_s21  }
   0x7   : > { %19317 = sst [smem:[#allocation8_spill]] %s11748_s26  ;;  %p33_p0 = scmp.ge.s32.totalorder %s32_s28, 3 }
   0x8   : > { %s35_s29 = sadd.s32 1, %s11748_s26  ;;  %s10439_s30 = sadd.s32 4294967295, %s11752_s27  }
   0x9   : > { %p290_p1 = scmp.ne.s32.totalorder %s11732_s22, %s11728_s21  ;;  %s20171_s28 = smov (%p33_p0, %s32_s28), 0 }
   0xa   : > { %19318 = sst [smem:[#allocation9_spill]] %s20171_s28  ;;  %s20173_s29 = smov (!%p33_p0, %s35_s29), %s11748_s26 }
   0xb   : > { %s276_s13 = ssub.s32 %s11744_s25, %s20171_s28  ;;  %p291_p2 = scmp.eq.s32.totalorder %s10439_s30, 5 }
   0xc   : > { %p37_p3 = scmp.ge.s32.totalorder %s20173_s29, 2  ;;  %p10443_p4 = scmp.ge.s32.totalorder %s11752_s27, 1 }
   0xd   : > { %p11875_p5 = por %p291_p2, %p290_p1  ;;  %p381_p6 = scmp.lt.s32.totalorder %s11752_s27, 7 }
   0xe   : > { %s20175_s29 = smov (%p37_p3, %s20173_s29), 0  ;;  %s280_s17 = sadd.s32 1, %s11732_s22 }
   0xf   : > { %19320 = sst [smem:[#allocation10_spill]] %s20175_s29  ;;  %p382_p7 = pnand %p10443_p4, %p381_p6 }
  0x10   : > { %s275_s15 = ssub.s32 %s11748_s26, %s20175_s29 }
  0x11   : > { %s277_s16 = sor.u32 %s276_s13, %s275_s15  ;;  %385 = sbr.rel (%p382_p7) target bundleno = 2416 (0x970), region = 64 }
  0x12   : > { %p278_p8 = scmp.eq.s32.totalorder %s277_s16, 0 }
  0x14   : > { %s11886_s18 = scalar_select %p278_p8, %s11732_s22, %s280_s17  }
  0x16   : > { %p426_p9 = scmp.lt.s32.totalorder %s11740_s24, 1  ;;  %v19143_v0 = vmov 0   ;;  %v11155_v1 = vld [vmem:[%s19125_s1 + $0x74] ss:$8 sps:$4 sm:$0xff]   ;;  %v11157_v2 = vld [vmem:[%s19125_s1 + $0x70] ss:$8 sps:$4 sm:$0xff]  }
  0x17   : > { %11154 = vset.pattern.permute.xlu1 %v19143_v0  ;;  %11153 = vset.pattern.permute.xlu0 %v19143_v0  ;;  %v11158_v3 = vld [vmem:[%s19125_s1 + $0x64] ss:$8 sps:$4 sm:$0xff]   ;;  %s11903_s28 = sshll.u32 %s11736_s23, 7  ;;  %v11160_v4 = vld [vmem:[%s19125_s1 + $0x60] ss:$8 sps:$4 sm:$0xff]   ;;  %s19321_s0 = sld [smem:[#allocation91_spill]] }
  0x18   : > { %s427_s15 = scalar_select %p426_p9, %s11740_s24, 1  ;;  %1733 = vmatprep.mubr.bf16.mxu1 %v19143_v0  ;;  %1569 = vmatprep.subr.bf16.mxu0 %v11155_v1  ;;  %v11161_v5 = vld [vmem:[%s19125_s1 + $0x54] ss:$8 sps:$4 sm:$0xff]   ;;  %v11163_v8 = vld [vmem:[%s19125_s1 + $0x50] ss:$8 sps:$4 sm:$0xff]  }
  0x19   : > { %1570 = vmatpush1.bf16.msra.mxu0 %v11157_v2  ;;  %v11164_v11 = vld [vmem:[%s19125_s1 + $0x44] ss:$8 sps:$4 sm:$0xff]   ;;  %v11166_v12 = vld [vmem:[%s19125_s1 + $0x40] ss:$8 sps:$4 sm:$0xff]   ;;  %v11167_v15 = vld [vmem:[%s19125_s1 + $0x34] ss:$8 sps:$4 sm:$0xff]  }
  0x1a   : > { %s11085_s29 = smul.u32 416, %s427_s15  ;;  %1571 = vmatprep.subr.bf16.mxu0 %v11158_v3  ;;  %v11169_v16 = vld [vmem:[%s19125_s1 + $0x30] ss:$8 sps:$4 sm:$0xff]   ;;  %v11170_v17 = vld [vmem:[%s19125_s1 + $0x24] ss:$8 sps:$4 sm:$0xff]   ;;  %s11757_s19 = smov 64  }
  0x1b   : > { %v11179_v20 = vld [vmem:[%s19125_s1 + $0x174] ss:$8 sps:$4 sm:$0xff]   ;;  %v11183_v21 = vld [vmem:[%s19125_s1 + $0x170] ss:$8 sps:$4 sm:$0xff]   ;;  %v11172_v23 = vld [vmem:[%s19125_s1 + $0x20] ss:$8 sps:$4 sm:$0xff]  }
  0x1c   : > { %1701 = vmatprep.subr.bf16.mxu1 %v11179_v20  ;;  %v11185_v24 = vld [vmem:[%s19125_s1 + $0x164] ss:$8 sps:$4 sm:$0xff]   ;;  %v11173_v26 = vld [vmem:[%s19125_s1 + $0x14] ss:$8 sps:$4 sm:$0xff]   ;;  %v11189_v27 = vld [vmem:[%s19125_s1 + $0x160] ss:$8 sps:$4 sm:$0xff]  }
  0x1d   : > { %s430_s13 = scalar_lea.vmem %s19321_s0, %s11085_s29  ;;  %1572 = vmatpush1.bf16.msra.mxu0 %v11160_v4  ;;  %1702 = vmatpush1.bf16.msra.mxu1 %v11183_v21  ;;  %v11191_v28 = vld [vmem:[%s19125_s1 + $0x154] ss:$8 sps:$4 sm:$0xff]   ;;  %v11175_v29 = vld [vmem:[%s19125_s1 + $0x10] ss:$8 sps:$4 sm:$0xff]   ;;  %v11176_v32 = vld [vmem:[%s19125_s1 + $0x4] ss:$8 sps:$4 sm:$0xff]  }
  0x1e   : > { %s11915_s17 = scalar_lea.vmem %s430_s13, %s11903_s28  ;;  %1573 = vmatprep.subr.bf16.mxu0 %v11161_v5  ;;  %1703 = vmatprep.subr.bf16.mxu1 %v11185_v24  ;;  %v11195_v33 = vld [vmem:[%s19125_s1 + $0x150] ss:$8 sps:$4 sm:$0xff]   ;;  %v11197_v34 = vld [vmem:[%s19125_s1 + $0x144] ss:$8 sps:$4 sm:$0xff]   ;;  %v11178_v37 = vld [vmem:[%s19125_s1] ss:$8 sps:$4 sm:$0xff]  }
  0x1f   : > { %v436_v6 = vld [vmem:[%s11915_s17 + $0x10] sm:$0xff]  ;;  %v434_v7 = vld [vmem:[%s11915_s17] sm:$0xff]  ;;  %v437_v9 = vld [vmem:[%s11915_s17 + $0x18] sm:$0xff]  ;;  %s10446_s29 = sadd.s32 4294967284, %s11903_s28  ;;  %s11759_s20 = smov 96  }
  0x20   : > { %568 = vperm.xlu1 %11154, %v436_v6   ;;  %562 = vperm.xlu0 %11153, %v434_v7   ;;  %v435_v10 = vld [vmem:[%s11915_s17 + $0x8] sm:$0xff]  ;;  %v438_v14 = vld [vmem:[%s11915_s17 + $0x20] sm:$0xff]  ;;  %v441_v18 = vld [vmem:[%s11915_s17 + $0x38] sm:$0xff]  ;;  %v454_v6 = vlaneseq  ;;  %s11760_s30 = smov 80   ;;  %s11761_s13 = smov 48  }
  0x21   : > { %1574 = vmatpush1.bf16.msra.mxu0 %v11163_v8  ;;  %v439_v13 = vld [vmem:[%s11915_s17 + $0x28] sm:$0xff]  ;;  %v440_v19 = vld [vmem:[%s11915_s17 + $0x30] sm:$0xff]  ;;  %v442_v25 = vld [vmem:[%s11915_s17 + $0x40] sm:$0xff]  ;;  %1704 = vmatpush1.bf16.msra.mxu1 %v11189_v27  ;;  %s11762_s16 = smov 32   ;;  %s11763_s26 = smov 16  }
  0x22   : > { %1575 = vmatprep.subr.bf16.mxu0 %v11164_v11  ;;  %v443_v22 = vld [vmem:[%s11915_s17 + $0x48] sm:$0xff]  ;;  %v445_v30 = vld [vmem:[%s11915_s17 + $0x58] sm:$0xff]  ;;  %v444_v31 = vld [vmem:[%s11915_s17 + $0x50] sm:$0xff]  ;;  %1705 = vmatprep.subr.bf16.mxu1 %v11191_v28  ;;  %v12067_v7 = vshrl.u32 %v454_v6, 7  ;;  %v19443_v28 = vmov 0  ;;  %s10565_s15 = sadd.s32 4294967288, %s11903_s28 }
  0x23   : > { %v447_v35 = vld [vmem:[%s11915_s17 + $0x68] sm:$0xff]  ;;  %v446_v36 = vld [vmem:[%s11915_s17 + $0x60] sm:$0xff]  ;;  %v11181_v38 = vld [vmem:[%s19125_s1 + $0xf4] ss:$8 sps:$4 sm:$0xff]   ;;  %s417_s0 = sand.u32 1, %s11728_s21  }
  0x24   : > { %571 = vperm.xlu1 %11154, %v437_v9   ;;  %565 = vperm.xlu0 %11153, %v435_v10   ;;  %v11201_v39 = vld [vmem:[%s19125_s1 + $0x140] ss:$8 sps:$4 sm:$0xff]   ;;  %v11203_v40 = vld [vmem:[%s19125_s1 + $0x134] ss:$8 sps:$4 sm:$0xff]   ;;  %v11184_v41 = vld [vmem:[%s19125_s1 + $0xf0] ss:$8 sps:$4 sm:$0xff]   ;;  %v12073_v9 = vstv %s10446_s29 }
  0x25   : > { %1576 = vmatpush1.bf16.msra.mxu0 %v11166_v12  ;;  %1706 = vmatpush1.bf16.msra.mxu1 %v11195_v33  ;;  %v449_v42 = vld [vmem:[%s11915_s17 + $0x78] sm:$0xff]  ;;  %v448_v43 = vld [vmem:[%s11915_s17 + $0x70] sm:$0xff]  ;;  %v11187_v44 = vld [vmem:[%s19125_s1 + $0xe4] ss:$8 sps:$4 sm:$0xff]   ;;  %19322 = vst [vmem:[#allocation11_spill] sm:$0xff] %v12067_v7  ;;  %v12071_v8 = vadd.s32 16, %v12067_v7 }
  0x26   : > { %1577 = vmatprep.subr.bf16.mxu0 %v11167_v15  ;;  %1707 = vmatprep.subr.bf16.mxu1 %v11197_v34  ;;  %v11207_v45 = vld [vmem:[%s19125_s1 + $0x130] ss:$8 sps:$4 sm:$0xff]   ;;  %v11209_v46 = vld [vmem:[%s19125_s1 + $0x124] ss:$8 sps:$4 sm:$0xff]   ;;  %v11190_v47 = vld [vmem:[%s19125_s1 + $0xe0] ss:$8 sps:$4 sm:$0xff]  }
  0x27   : > { %v451_v48 = vld [vmem:[%s11915_s17 + $0x88] sm:$0xff]  ;;  %v450_v49 = vld [vmem:[%s11915_s17 + $0x80] sm:$0xff]  ;;  %v11193_v50 = vld [vmem:[%s19125_s1 + $0xd4] ss:$8 sps:$4 sm:$0xff]   ;;  %19323 = vst [vmem:[#allocation12_spill] sm:$0xff] %v12071_v8  ;;  %v12076_v10 = vadd.s32 24, %v12067_v7  ;;  %v479_v12 = vadd.s32 %v12073_v9, %v12071_v8 }
  0x28   : > { %577 = vperm.xlu1 %11154, %v439_v13   ;;  %574 = vperm.xlu0 %11153, %v438_v14   ;;  %v11213_v51 = vld [vmem:[%s19125_s1 + $0x120] ss:$8 sps:$4 sm:$0xff]   ;;  %v11215_v52 = vld [vmem:[%s19125_s1 + $0x114] ss:$8 sps:$4 sm:$0xff]   ;;  %v11196_v53 = vld [vmem:[%s19125_s1 + $0xd0] ss:$8 sps:$4 sm:$0xff]   ;;  %v477_v13 = vadd.s32 %v12073_v9, %v12067_v7 }
  0x29   : > { %1578 = vmatpush1.bf16.msra.mxu0 %v11169_v16  ;;  %1708 = vmatpush1.bf16.msra.mxu1 %v11201_v39  ;;  %v453_v54 = vld [vmem:[%s11915_s17 + $0x98] sm:$0xff]  ;;  %v452_v55 = vld [vmem:[%s11915_s17 + $0x90] sm:$0xff]  ;;  %v11199_v56 = vld [vmem:[%s19125_s1 + $0xc4] ss:$8 sps:$4 sm:$0xff]   ;;  %19324 = vst [vmem:[#allocation13_spill] sm:$0xff] %v12076_v10  ;;  %v12079_v11 = vadd.s32 8, %v12067_v7  ;;  %v480_v16 = vadd.s32 %v12073_v9, %v12076_v10 }
  0x2a   : > { %1579 = vmatprep.subr.bf16.mxu0 %v11170_v17  ;;  %1709 = vmatprep.subr.bf16.mxu1 %v11203_v40  ;;  %v11219_v57 = vld [vmem:[%s19125_s1 + $0x110] ss:$8 sps:$4 sm:$0xff]   ;;  %v11202_v58 = vld [vmem:[%s19125_s1 + $0xc0] ss:$8 sps:$4 sm:$0xff]   ;;  %v11221_v59 = vld [vmem:[%s19125_s1 + $0x104] ss:$8 sps:$4 sm:$0xff]  }
  0x2b   : > { %v11205_v60 = vld [vmem:[%s19125_s1 + $0xb4] ss:$8 sps:$4 sm:$0xff]   ;;  %v11225_v61 = vld [vmem:[%s19125_s1 + $0x100] ss:$8 sps:$4 sm:$0xff]   ;;  %v11208_v62 = vld [vmem:[%s19125_s1 + $0xb0] ss:$8 sps:$4 sm:$0xff]   ;;  %v478_v17 = vadd.s32 %v12073_v9, %v12079_v11 }
  0x2c   : > { %583 = vperm.xlu1 %11154, %v441_v18   ;;  %580 = vperm.xlu0 %11153, %v440_v19   ;;  %v11211_v63 = vld [vmem:[%s19125_s1 + $0xa4] ss:$8 sps:$4 sm:$0xff]   ;;  %v11214_v1 = vld [vmem:[%s19125_s1 + $0xa0] ss:$8 sps:$4 sm:$0xff]   ;;  %v11217_v2 = vld [vmem:[%s19125_s1 + $0x94] ss:$8 sps:$4 sm:$0xff]  }
  0x2d   : > { %1580 = vmatpush1.bf16.msra.mxu0 %v11172_v23  ;;  %1710 = vmatpush1.bf16.msra.mxu1 %v11207_v45  ;;  %v11220_v3 = vld [vmem:[%s19125_s1 + $0x90] ss:$8 sps:$4 sm:$0xff]   ;;  %v11223_v4 = vld [vmem:[%s19125_s1 + $0x84] ss:$8 sps:$4 sm:$0xff]   ;;  %v11226_v5 = vld [vmem:[%s19125_s1 + $0x80] ss:$8 sps:$4 sm:$0xff]  }
  0x2e   : > { %1581 = vmatprep.subr.bf16.mxu0 %v11173_v26  ;;  %1711 = vmatprep.subr.bf16.mxu1 %v11209_v46  ;;  %19325 = vst [vmem:[#allocation14_spill] sm:$0xff] %v12079_v11  ;;  %v12086_v14 = vadd.s32 40, %v12067_v7  ;;  %v12089_v15 = vadd.s32 32, %v12067_v7  ;;  %v12096_v18 = vadd.s32 56, %v12067_v7  ;;  %vm499_vm0 = vcmp.ge.s32.totalorder %v479_v12, 0  ;;  %s11758_s17 = smov 112  }
  0x2f   : > { %vm519_vm1 = vcmp.lt.s32.totalorder %v479_v12, 300  ;;  %v12098_v19 = vand.u32 127, %v454_v6  ;;  %v12101_v20 = vadd.s32 48, %v12067_v7  ;;  %vm497_vm2 = vcmp.ge.s32.totalorder %v477_v13, 0 }
  0x30   : > { %589 = vperm.xlu1 %11154, %v443_v22   ;;  %586 = vperm.xlu0 %11153, %v442_v25   ;;  %19326 = vst [vmem:[#allocation15_spill] sm:$0xff] %v12086_v14  ;;  %19327 = vst [vmem:[#allocation16_spill] sm:$0xff] %v12089_v15  ;;  %vm517_vm3 = vcmp.lt.s32.totalorder %v477_v13, 300  ;;  %v482_v21 = vadd.s32 %v12073_v9, %v12086_v14  ;;  %v481_v22 = vadd.s32 %v12073_v9, %v12089_v15  ;;  %v19396_v34 = vmov 0 }
  0x31   : > { %1582 = vmatpush1.bf16.msra.mxu0 %v11175_v29  ;;  %1712 = vmatpush1.bf16.msra.mxu1 %v11213_v51  ;;  %19328 = vst [vmem:[#allocation17_spill] sm:$0xff] %v12096_v18  ;;  %19329 = vst [vmem:[#allocation18_spill] sm:$0xff] %v12101_v20  ;;  %vm500_vm4 = vcmp.ge.s32.totalorder %v480_v16, 0  ;;  %vm520_vm5 = vcmp.lt.s32.totalorder %v480_v16, 300  ;;  %vm498_vm7 = vcmp.ge.s32.totalorder %v478_v17, 0  ;;  %vm518_vm8 = vcmp.lt.s32.totalorder %v478_v17, 300 }
  0x32   : > { %1583 = vmatprep.subr.bf16.mxu0 %v11176_v32  ;;  %1713 = vmatprep.subr.bf16.mxu1 %v11215_v52  ;;  %vm12107_vm6 = vmand %vm499_vm0, %vm519_vm1  ;;  %v484_v24 = vadd.s32 %v12073_v9, %v12096_v18  ;;  %v12114_v25 = vadd.s32 72, %v12067_v7  ;;  %v12117_v26 = vadd.s32 128, %v12098_v19  ;;  %v12120_v27 = vadd.s32 256, %v12098_v19 }
  0x33   : > { %vm12122_vm9 = vmand %vm497_vm2, %vm517_vm3  ;;  %v12128_v29 = vadd.s32 %v12073_v9, %v12101_v20  ;;  %vm502_vm11 = vcmp.ge.s32.totalorder %v482_v21, 0  ;;  %vm522_vm12 = vcmp.lt.s32.totalorder %v482_v21, 300  ;;  %v12135_v33 = vadd.s32 64, %v12067_v7 }
  0x34   : > { %595 = vperm.xlu1 %11154, %v445_v30   ;;  %592 = vperm.xlu0 %11153, %v444_v31   ;;  %19332 = vst [vmem:[#allocation19_spill] sm:$0xff] %v12114_v25  ;;  %vm12130_vm10 = vmand %vm500_vm4, %vm520_vm5  ;;  %v12172_v39 = vadd.s32 88, %v12067_v7  ;;  %v12193_v46 = vadd.s32 80, %v12067_v7  ;;  %v19356_v52 = vmov 0  ;;  %vm19360_vm2 = vcmp.lt.s32.totalorder %v484_v24, 300 }
  0x35   : > { %1584 = vmatpush1.bf16.msra.mxu0 %v11178_v37  ;;  %1714 = vmatpush1.bf16.msra.mxu1 %v11219_v57  ;;  %19337 = vst [vmem:[#allocation20_spill] sm:$0xff] %v12135_v33  ;;  %vm12142_vm1 = vmand %vm498_vm7, %vm518_vm8  ;;  %v19342_v37 = vmov 0  ;;  %v19441_v16 = vmov 0 }
  0x36   : > { %1585 = vmatprep.subr.bf16.mxu0 %v11181_v38  ;;  %1715 = vmatprep.subr.bf16.mxu1 %v11221_v59  ;;  %19346 = vst [vmem:[#allocation21_spill] sm:$0xff] %v12172_v39  ;;  %19349 = vst [vmem:[#allocation22_spill] sm:$0xff] %v12193_v46  ;;  %v12245_v57 = vadd.s32 %v12073_v9, %v12193_v46  ;;  %v12386_v38 = vadd.s32 112, %v12067_v7 }
  0x38   : > { %601 = vperm.xlu1 %11154, %v447_v35   ;;  %598 = vperm.xlu0 %11153, %v446_v36   ;;  %v19340_v35 = vmov 0  ;;  %v12155_v36 = vadd.s32 %v12073_v9, %v12114_v25  ;;  %19400 = vst [vmem:[#allocation26_spill] sm:$0xff] %v12386_v38 }
  0x39   : > { %1586 = vmatpush2.bf16.msra.mxu0 %v11184_v41  ;;  %1716 = vmatpush1.bf16.msra.mxu1 %v11225_v61  ;;  %v12180_v41 = vadd.s32 %v12073_v9, %v12135_v33 }
  0x3a   : > { %1587 = vmatprep.subr.bf16.mxu0 %v11187_v44  ;;  %4763 = vmatprep.subr.bf16.mxu1 %v19143_v0 }
  0x3c   : > { %607 = vperm.xlu1 %11154, %v449_v42   ;;  %604 = vperm.xlu0 %11153, %v448_v43   ;;  %v11755_v42 = vmov 0.0  }
  0x3d   : > { %1588 = vmatpush2.bf16.msra.mxu0 %v11190_v47 }
  0x3e   : > { %1589 = vmatprep.subr.bf16.mxu0 %v11193_v50  ;;  %v12219_v50 = vadd.s32 %v12073_v9, %v12172_v39 }
  0x40   : > { %613 = vperm.xlu1 %11154, %v451_v48   ;;  %610 = vperm.xlu0 %11153, %v450_v49   ;;  %v12425_v48 = vadd.s32 136, %v12067_v7 }
  0x41   : > { %1590 = vmatpush2.bf16.msra.mxu0 %v11196_v53 }
  0x42   : > { %1591 = vmatprep.subr.bf16.mxu0 %v11199_v56  ;;  %v19362_v56 = vmov 0  ;;  %19412 = vst [vmem:[#allocation27_spill] sm:$0xff] %v12425_v48 }
  0x44   : > { %619 = vperm.xlu1 %11154, %v453_v54   ;;  %616 = vperm.xlu0 %11153, %v452_v55   ;;  %v19358_v55 = vmov 0 }
  0x45   : > { %1592 = vmatpush2.bf16.msra.mxu0 %v11202_v58  ;;  %v12252_v58 = vadd.s32 104, %v12067_v7 }
  0x46   : > { %1593 = vmatprep.subr.bf16.mxu0 %v11205_v60  ;;  %v19365_v60 = vmov 0 }
  0x47   : > { %19364 = vst [vmem:[#allocation23_spill] sm:$0xff] %v12252_v58  ;;  %v12299_v6 = vadd.s32 %v12073_v9, %v12252_v58 }
  0x49   : > { %1594 = vmatpush2.bf16.msra.mxu0 %v11208_v62 }
  0x4a   : > { %1595 = vmatprep.subr.bf16.mxu0 %v11211_v63  ;;  %v12485_v63 = vadd.s32 %v12073_v9, %v12425_v48 }
  0x4d   : > { %1596 = vmatpush2.bf16.msra.mxu0 %v11214_v1 }
  0x4e   : > { %1597 = vmatprep.subr.bf16.mxu0 %v11217_v2  ;;  %v12285_v2 = vadd.s32 96, %v12067_v7 }
  0x50   : > { %19373 = vst [vmem:[#allocation24_spill] sm:$0xff] %v12285_v2  ;;  %v12333_v23 = vadd.s32 %v12073_v9, %v12285_v2 }
  0x51   : > { %1598 = vmatpush2.bf16.msra.mxu0 %v11220_v3 }
  0x52   : > { %1599 = vmatprep.subr.bf16.mxu0 %v11223_v4  ;;  %v19375_v4 = vmov 0 }
  0x55   : > { %1600 = vmatpush2.bf16.msra.mxu0 %v11226_v5 }
  0x9b   : > { %v569_v30 = vpop.permute.xlu1 %568  ;;  %v563_v31 = vpop.permute.xlu0 %562 }
  0x9c   : > { %vm627_vm14 = vcmp.eq.s32.totalorder %v12098_v19, %v569_v30  ;;  %vm628_vm15 = vcmp.eq.s32.totalorder %v12117_v26, %v569_v30  ;;  %vm629_vm0 = vcmp.eq.s32.totalorder %v12120_v27, %v569_v30  ;;  %vm621_vm4 = vcmp.eq.s32.totalorder %v12098_v19, %v563_v31 }
  0x9d   : > { %vm12148_vm3 = vmand %vm627_vm14, %vm12107_vm6  ;;  %vm622_vm8 = vcmp.eq.s32.totalorder %v12117_v26, %v563_v31  ;;  %v11756_v30 = vmov 1.0|1.0  }
  0x9e   : > { %v19341_v35 = vsel %vm12148_vm3, 4294967295, %v19340_v35  ;;  %vm12159_vm7 = vmand %vm628_vm15, %vm12107_vm6  ;;  %vm623_vm15 = vcmp.eq.s32.totalorder %v12120_v27, %v563_v31  ;;  %v12356_v31 = vadd.s32 120, %v12067_v7 }
  0x9f   : > { %v19343_v37 = vsel %vm12159_vm7, 4294967295, %v19342_v37  ;;  %vm12166_vm14 = vmand %vm502_vm11, %vm522_vm12  ;;  %v572_v40 = vpop.permute.xlu1 %571  ;;  %v566_v45 = vpop.permute.xlu0 %565  ;;  %vm19361_vm7 = vcmp.ge.s32.totalorder %v484_v24, 0 }
  0xa0   : > { %vm729_vm13 = vmand %vm629_vm0, %vm12107_vm6  ;;  %vm630_vm6 = vcmp.eq.s32.totalorder %v12098_v19, %v572_v40  ;;  %vm19352_vm0 = vcmp.lt.s32.totalorder %v481_v22, 300  ;;  %19391 = vst [vmem:[#allocation25_spill] sm:$0xff] %v12356_v31 }
  0xa1   : > { %v789_v43 = vsel %vm729_vm13, 1.0, %v11755_v42  ;;  %vm12187_vm11 = vmand %vm621_vm4, %vm12122_vm9  ;;  %vm631_vm13 = vcmp.eq.s32.totalorder %v12117_v26, %v572_v40  ;;  %vm19353_vm4 = vcmp.ge.s32.totalorder %v481_v22, 0 }
  0xa2   : > { %v10947_v47 = vpack.c.bf16 %v789_v43, %v789_v43  ;;  %vm12199_vm12 = vmand %vm622_vm8, %vm12122_vm9  ;;  %vm632_vm8 = vcmp.eq.s32.totalorder %v12120_v27, %v572_v40  ;;  %v492_v43 = vadd.s32 %v12073_v9, %v12356_v31 }
  0xa3   : > { %vm12206_vm5 = vmand %vm19353_vm4, %vm19352_vm0  ;;  %vm624_vm4 = vcmp.eq.s32.totalorder %v12098_v19, %v566_v45  ;;  %v578_v53 = vpop.permute.xlu1 %577  ;;  %v575_v61 = vpop.permute.xlu0 %574 }
  0xa4   : > { %vm723_vm3 = vmand %vm623_vm15, %vm12122_vm9  ;;  %1046 = vst [vmem:[#allocation2 + $0x20] sm:$0xf] %v10947_v47 }
  0xa5   : > { %v783_v51 = vsel %vm723_vm3, 1.0, %v11755_v42  ;;  %vm12224_vm0 = vmand %vm630_vm6, %vm12130_vm10  ;;  %vm625_vm3 = vcmp.eq.s32.totalorder %v12117_v26, %v566_v45 }
  0xa6   : > { %v19357_v52 = vsel %vm12224_vm0, 4294967295, %v19356_v52  ;;  %v10943_v54 = vpack.c.bf16 %v783_v51, %v783_v51  ;;  %vm12232_vm15 = vmand %vm631_vm13, %vm12130_vm10  ;;  %vm626_vm13 = vcmp.eq.s32.totalorder %v12120_v27, %v566_v45  ;;  %vm19369_vm0 = vcmp.lt.s32.totalorder %v12128_v29, 300 }
  0xa7   : > { %v19359_v55 = vsel %vm12232_vm15, 4294967295, %v19358_v55  ;;  %vm12239_vm6 = vmand %vm19361_vm7, %vm19360_vm2  ;;  %v584_v5 = vpop.permute.xlu1 %583  ;;  %v581_v22 = vpop.permute.xlu0 %580  ;;  %v19410_v45 = vmov 0 }
  0xa8   : > { %v19363_v56 = vsel %vm12239_vm6, 4294967295, %v19362_v56  ;;  %vm732_vm9 = vmand %vm632_vm8, %vm12130_vm10  ;;  %1042 = vst [vmem:[#allocation2 + $0x8] sm:$0xf] %v10943_v54  ;;  %vm19379_vm6 = vcmp.lt.s32.totalorder %v12155_v36, 300  ;;  %v12444_v54 = vadd.s32 %v12073_v9, %v12386_v38 }
  0xa9   : > { %v792_v59 = vsel %vm732_vm9, 1.0, %v11755_v42  ;;  %vm12257_vm2 = vmand %vm624_vm4, %vm12142_vm1  ;;  %vm637_vm9 = vcmp.eq.s32.totalorder %v12117_v26, %v578_v53  ;;  %vm19370_vm4 = vcmp.ge.s32.totalorder %v12128_v29, 0 }
  0xaa   : > { %v19366_v60 = vsel %vm12257_vm2, 4294967295, %v19365_v60  ;;  %v10949_v62 = vpack.c.bf16 %v792_v59, %v792_v59  ;;  %vm12265_vm8 = vmand %vm625_vm3, %vm12142_vm1  ;;  %vm638_vm3 = vcmp.eq.s32.totalorder %v12120_v27, %v578_v53  ;;  %vm19380_vm2 = vcmp.ge.s32.totalorder %v12155_v36, 0 }
  0xab   : > { %vm12274_vm15 = vmand %vm19370_vm4, %vm19369_vm0  ;;  %vm19374_vm0 = vcmp.eq.s32.totalorder %v12098_v19, %v578_v53  ;;  %v590_v36 = vpop.permute.xlu1 %589  ;;  %v587_v47 = vpop.permute.xlu0 %586 }
  0xac   : > { %vm726_vm10 = vmand %vm626_vm13, %vm12142_vm1  ;;  %1048 = vst [vmem:[#allocation2 + $0x2c] sm:$0xf] %v10949_v62  ;;  %vm633_vm1 = vcmp.eq.s32.totalorder %v12098_v19, %v575_v61  ;;  %v19426_v62 = vmov 0 }
  0xad   : > { %v786_v3 = vsel %vm726_vm10, 1.0, %v11755_v42  ;;  %vm12292_vm4 = vmand %vm19374_vm0, %vm12166_vm14  ;;  %vm634_vm10 = vcmp.eq.s32.totalorder %v12117_v26, %v575_v61 }
  0xae   : > { %v19376_v4 = vsel %vm12292_vm4, 4294967295, %v19375_v4  ;;  %v10945_v12 = vpack.c.bf16 %v786_v3, %v786_v3  ;;  %vm12305_vm13 = vmand %vm637_vm9, %vm12166_vm14 }
  0xaf   : > { %vm12315_vm7 = vmand %vm19380_vm2, %vm19379_vm6  ;;  %vm19387_vm2 = vcmp.lt.s32.totalorder %v12180_v41, 300  ;;  %v596_v59 = vpop.permute.xlu1 %595  ;;  %v593_v1 = vpop.permute.xlu0 %592 }
  0xb0   : > { %vm738_vm9 = vmand %vm638_vm3, %vm12166_vm14  ;;  %1044 = vst [vmem:[#allocation2 + $0x14] sm:$0xf] %v10945_v12  ;;  %vm19388_vm3 = vcmp.ge.s32.totalorder %v12180_v41, 0  ;;  %v19402_v41 = vmov 0 }
  0xb1   : > { %v798_v17 = vsel %vm738_vm9, 1.0, %v11755_v42  ;;  %vm12326_vm4 = vmand %vm633_vm1, %vm12206_vm5 }
  0xb2   : > { %v10953_v24 = vpack.c.bf16 %v798_v17, %v798_v17  ;;  %vm12337_vm14 = vmand %vm634_vm10, %vm12206_vm5  ;;  %vm19392_vm10 = vcmp.eq.s32.totalorder %v12120_v27, %v575_v61  ;;  %v19422_v61 = vmov 0 }
  0xb3   : > { %vm12346_vm1 = vmand %vm19388_vm3, %vm19387_vm2  ;;  %vm19393_vm3 = vnez %v19366_v60  ;;  %vm19408_vm2 = vcmp.eq.s32.totalorder %v12120_v27, %v584_v5  ;;  %v602_v17 = vpop.permute.xlu1 %601 }
  0xb4   : > { %vm11641_vm9 = vmpackc.low %vm12265_vm8, %vm12199_vm12  ;;  %1052 = vst [vmem:[#allocation2 + $0x44] sm:$0xf] %v10953_v24  ;;  %vm640_vm12 = vcmp.eq.s32.totalorder %v12117_v26, %v581_v22  ;;  %vm19404_vm8 = vcmp.lt.s32.totalorder %v12219_v50, 300 }
  0xb5   : > { %11642 = vmatprep.mubr.msk.bf16.mxu0 %vm11641_vm9, %v11756_v30  ;;  %vm735_vm6 = vmand %vm19392_vm10, %vm12206_vm5  ;;  %vm19394_vm9 = vnez %v19363_v56  ;;  %vm19395_vm5 = vcmp.eq.s32.totalorder %v12098_v19, %v584_v5 }
  0xb6   : > { %vm11643_vm0 = vmpackc.low %vm19393_vm3, %vm12187_vm11  ;;  %v795_v32 = vsel %vm735_vm6, 1.0, %v11755_v42  ;;  %vm19398_vm11 = vnez %v19343_v37  ;;  %vm19401_vm6 = vcmp.eq.s32.totalorder %v12117_v26, %v584_v5  ;;  %v19435_v5 = vmov 0 }
  0xb7   : > { %11644 = vmatmul.mubr.msk.bf16.vlgmr.msra.gmra.mxu0 %vm11643_vm0, %v11756_v30  ;;  %vm12375_vm10 = vmand %vm19395_vm5, %vm19394_vm9  ;;  %vm19399_vm0 = vnez %v19359_v55  ;;  %v10951_v40 = vpack.c.bf16 %v795_v32, %v795_v32  ;;  %v11227_v51 = vld [vmem:[#allocation2 + $0x8] ss:$12 sps:$4 sm:$0xff]   ;;  %v12452_v55 = vadd.s32 128, %v12067_v7  ;;  %v12572_v37 = vadd.s32 144, %v12067_v7 }
  0xb8   : > { %v19397_v34 = vsel %vm12375_vm10, 4294967295, %v19396_v34  ;;  %vm11645_vm3 = vmpackc.low %vm19399_vm0, %vm19398_vm11  ;;  %vm19405_vm11 = vcmp.ge.s32.totalorder %v12219_v50, 0  ;;  %vm641_vm10 = vcmp.eq.s32.totalorder %v12120_v27, %v581_v22  ;;  %1734 = vmatmul.mubr.bf16.vlgmr.msra.gmra.mxu1 %v11227_v51  ;;  %v19465_v51 = vmov 0 }
  0xb9   : > { %11646 = vmatprep.mubr.msk.bf16.mxu0 %vm11645_vm3, %v11756_v30  ;;  %vm12392_vm5 = vmand %vm19401_vm6, %vm19394_vm9  ;;  %1050 = vst [vmem:[#allocation2 + $0x38] sm:$0xf] %v10951_v40  ;;  %vm19416_vm3 = vcmp.ge.s32.totalorder %v12245_v57, 0  ;;  %1742 = vmatprep.mubr.bf16.mxu1 %v19143_v0  ;;  %v493_v12 = vadd.s32 %v12073_v9, %v12452_v55  ;;  %v599_v40 = vpop.permute.xlu0 %598 }
  0xba   : > { %v19403_v41 = vsel %vm12392_vm5, 4294967295, %v19402_v41  ;;  %vm12401_vm0 = vmand %vm19405_vm11, %vm19404_vm8  ;;  %vm19409_vm8 = vcmp.eq.s32.totalorder %v12098_v19, %v581_v22  ;;  %19419 = vst [vmem:[#allocation28_spill] sm:$0xff] %v12452_v55  ;;  %v11228_v22 = vld [vmem:[#allocation2 + $0x20] ss:$12 sps:$4 sm:$0xff]  }
  0xbb   : > { %vm744_vm6 = vmand %vm19408_vm2, %vm19394_vm9  ;;  %vm648_vm2 = vcmp.eq.s32.totalorder %v12098_v19, %v590_v36  ;;  %19451 = vst [vmem:[#allocation29_spill] sm:$0xff] %v12572_v37 }
  0xbc   : > { %v804_v44 = vsel %vm744_vm6, 1.0, %v11755_v42  ;;  %vm12419_vm11 = vmand %vm19409_vm8, %vm12274_vm15  ;;  %vm649_vm6 = vcmp.eq.s32.totalorder %v12117_v26, %v590_v36  ;;  %vm19415_vm8 = vcmp.lt.s32.totalorder %v12245_v57, 300  ;;  %v19420_v57 = vmov 0 }
  0xbd   : > { %v19411_v45 = vsel %vm12419_vm11, 4294967295, %v19410_v45  ;;  %v10957_v49 = vpack.c.bf16 %v804_v44, %v804_v44  ;;  %vm12429_vm9 = vmand %vm640_vm12, %vm12274_vm15 }
  0xbe   : > { %vm12438_vm5 = vmand %vm19416_vm3, %vm19415_vm8  ;;  %vm19428_vm8 = vnez %v19341_v35 }
  0xbf   : > { %vm741_vm12 = vmand %vm641_vm10, %vm12274_vm15  ;;  %1056 = vst [vmem:[#allocation2 + $0x5c] sm:$0xf] %v10957_v49  ;;  %vm647_vm10 = vcmp.eq.s32.totalorder %v12120_v27, %v587_v47  ;;  %v608_v49 = vpop.permute.xlu1 %607 }
  0xc0   : > { %v801_v56 = vsel %vm741_vm12, 1.0, %v11755_v42  ;;  %vm12457_vm3 = vmand %vm648_vm2, %vm12315_vm7  ;;  %vm19424_vm12 = vcmp.lt.s32.totalorder %v12299_v6, 300  ;;  %vm19425_vm2 = vcmp.ge.s32.totalorder %v12299_v6, 0  ;;  %1743 = vmatmul.mubr.bf16.gmra.mxu1 %v11228_v22 }
  0xc1   : > { %v19421_v57 = vsel %vm12457_vm3, 4294967295, %v19420_v57  ;;  %v10955_v60 = vpack.c.bf16 %v801_v56, %v801_v56  ;;  %vm12464_vm15 = vmand %vm649_vm6, %vm12315_vm7  ;;  %vm19429_vm3 = vnez %v19357_v52  ;;  %v19432_v52 = vmov 0  ;;  %1752 = vmatprep.mubr.bf16.mxu1 %v19143_v0  ;;  %v11229_v56 = vld [vmem:[#allocation2 + $0x38] ss:$12 sps:$4 sm:$0xff]  }
  0xc2   : > { %v19423_v61 = vsel %vm12464_vm15, 4294967295, %v19422_v61  ;;  %vm12473_vm11 = vmand %vm19425_vm2, %vm19424_vm12  ;;  %vm19430_vm12 = vcmp.eq.s32.totalorder %v12120_v27, %v590_v36  ;;  %v19449_v36 = vmov 0 }
  0xc3   : > { %v19427_v62 = vsel %vm12473_vm11, 4294967295, %v19426_v62  ;;  %vm11649_vm6 = vmpackc.low %vm19429_vm3, %vm19428_vm8  ;;  %1054 = vst [vmem:[#allocation2 + $0x50] sm:$0xf] %v10955_v60  ;;  %vm19431_vm8 = vcmp.eq.s32.totalorder %v12098_v19, %v587_v47  ;;  %vm656_vm11 = vcmp.eq.s32.totalorder %v12120_v27, %v596_v59  ;;  %v19472_v60 = vmov 0  ;;  %v614_v6 = vpop.permute.xlu1 %613 }
  0xc4   : > { %11650 = vmatmul.mubr.msk.bf16.gmra.mxu0 %vm11649_vm6, %v11756_v30  ;;  %vm750_vm2 = vmand %vm19430_vm12, %vm12315_vm7  ;;  %vm654_vm7 = vcmp.eq.s32.totalorder %v12098_v19, %v596_v59 }
  0xc5   : > { %vm11651_vm3 = vmpackc.low %vm12305_vm13, %vm12337_vm14  ;;  %v810_v35 = vsel %vm750_vm2, 1.0, %v11755_v42  ;;  %vm19434_vm13 = vcmp.eq.s32.totalorder %v12117_v26, %v587_v47  ;;  %vm655_vm2 = vcmp.eq.s32.totalorder %v12117_v26, %v596_v59 }
  0xc6   : > { %11652 = vmatprep.mubr.msk.bf16.mxu0 %vm11651_vm3, %v11756_v30  ;;  %vm12502_vm6 = vmand %vm19431_vm8, %vm12346_vm1  ;;  %v10961_v3 = vpack.c.bf16 %v810_v35, %v810_v35  ;;  %vm19437_vm3 = vcmp.lt.s32.totalorder %v12333_v23, 300  ;;  %vm19438_vm8 = vcmp.ge.s32.totalorder %v12333_v23, 0  ;;  %v474_v23 = vadd.s32 152, %v12067_v7 }
  0xc7   : > { %v19433_v52 = vsel %vm12502_vm6, 4294967295, %v19432_v52  ;;  %vm12512_vm14 = vmand %vm19434_vm13, %vm12346_vm1 }
  0xc8   : > { %v19436_v5 = vsel %vm12512_vm14, 4294967295, %v19435_v5  ;;  %vm12521_vm15 = vmand %vm19438_vm8, %vm19437_vm3  ;;  %1060 = vst [vmem:[#allocation2 + $0x74] sm:$0xf] %v10961_v3  ;;  %vm651_vm8 = vcmp.eq.s32.totalorder %v12098_v19, %v593_v1  ;;  %vm19456_vm14 = vcmp.ge.s32.totalorder %v12444_v54, 0  ;;  %v496_v21 = vadd.s32 %v12073_v9, %v474_v23  ;;  %1753 = vmatmul.mubr.bf16.gmra.mxu1 %v11229_v56 }
  0xc9   : > { %vm747_vm13 = vmand %vm647_vm10, %vm12346_vm1  ;;  %vm652_vm10 = vcmp.eq.s32.totalorder %v12117_v26, %v593_v1  ;;  %1762 = vmatprep.mubr.bf16.mxu1 %v19143_v0  ;;  %v19482_v3 = vmov 0 }
  0xca   : > { %v807_v13 = vsel %vm747_vm13, 1.0, %v11755_v42  ;;  %vm12537_vm3 = vmand %vm654_vm7, %vm12401_vm0  ;;  %vm19445_vm7 = vcmp.lt.s32.totalorder %v492_v43, 300  ;;  %vm19446_vm13 = vcmp.ge.s32.totalorder %v492_v43, 0 }
  0xcb   : > { %v19442_v16 = vsel %vm12537_vm3, 4294967295, %v19441_v16  ;;  %v10959_v24 = vpack.c.bf16 %v807_v13, %v807_v13  ;;  %vm12547_vm1 = vmand %vm655_vm2, %vm12401_vm0  ;;  %vm653_vm3 = vcmp.eq.s32.totalorder %v12120_v27, %v593_v1 }
  0xcc   : > { %v19444_v28 = vsel %vm12547_vm1, 4294967295, %v19443_v28  ;;  %vm12554_vm6 = vmand %vm19446_vm13, %vm19445_vm7  ;;  %vm19455_vm13 = vcmp.lt.s32.totalorder %v12444_v54, 300  ;;  %v495_v54 = vadd.s32 %v12073_v9, %v12572_v37  ;;  %v605_v9 = vpop.permute.xlu0 %604 }
  0xcd   : > { %vm756_vm12 = vmand %vm656_vm11, %vm12401_vm0  ;;  %1058 = vst [vmem:[#allocation2 + $0x68] sm:$0xf] %v10959_v24  ;;  %vm19452_vm0 = vnez %v19376_v4  ;;  %v11230_v24 = vld [vmem:[#allocation2 + $0x50] ss:$12 sps:$4 sm:$0xff]   ;;  %v19502_v4 = vmov 0 }
  0xce   : > { %v816_v32 = vsel %vm756_vm12, 1.0, %v11755_v42  ;;  %vm12565_vm2 = vmand %vm651_vm8, %vm12438_vm5  ;;  %vm19461_vm8 = vcmp.eq.s32.totalorder %v12098_v19, %v602_v17 }
  0xcf   : > { %v19450_v36 = vsel %vm12565_vm2, 4294967295, %v19449_v36  ;;  %vm11655_vm11 = vmpackc.low %vm19452_vm0, %vm12326_vm4  ;;  %v10965_v43 = vpack.c.bf16 %v816_v32, %v816_v32  ;;  %vm19459_vm4 = vnez %v19403_v41  ;;  %v19462_v41 = vmov 0 }
  0xd0   : > { %11656 = vmatmul.mubr.msk.bf16.gmra.mxu0 %vm11655_vm11, %v11756_v30  ;;  %vm12583_vm12 = vmand %vm652_vm10, %vm12438_vm5  ;;  %vm662_vm11 = vcmp.eq.s32.totalorder %v12120_v27, %v602_v17  ;;  %v611_v13 = vpop.permute.xlu0 %610  ;;  %v19500_v32 = vmov 0  ;;  %1763 = vmatmul.mubr.bf16.gmra.mxu1 %v11230_v24 }
  0xd1   : > { %vm12592_vm7 = vmand %vm19456_vm14, %vm19455_vm13  ;;  %1064 = vst [vmem:[#allocation2 + $0x8c] sm:$0xf] %v10965_v43  ;;  %vm19460_vm13 = vnez %v19427_v62  ;;  %1772 = vmatprep.mubr.bf16.mxu1 %v19143_v0 }
  0xd2   : > { %vm11657_vm10 = vmpackc.low %vm19459_vm4, %vm12429_vm9  ;;  %vm19477_vm9 = vcmp.ge.s32.totalorder %v493_v12, 0 }
  0xd3   : > { %11658 = vmatprep.mubr.msk.bf16.mxu0 %vm11657_vm10, %v11756_v30  ;;  %vm753_vm0 = vmand %vm653_vm3, %vm12438_vm5  ;;  %vm19464_vm5 = vcmp.eq.s32.totalorder %v12117_v26, %v602_v17  ;;  %vm658_vm10 = vcmp.eq.s32.totalorder %v12117_v26, %v599_v40 }
  0xd4   : > { %v813_v47 = vsel %vm753_vm0, 1.0, %v11755_v42  ;;  %vm12612_vm2 = vmand %vm19461_vm8, %vm19460_vm13  ;;  %vm19467_vm8 = vcmp.lt.s32.totalorder %v12485_v63, 300  ;;  %vm19468_vm0 = vcmp.ge.s32.totalorder %v12485_v63, 0  ;;  %v19474_v63 = vmov 0 }
  0xd5   : > { %v19463_v41 = vsel %vm12612_vm2, 4294967295, %v19462_v41  ;;  %v10963_v50 = vpack.c.bf16 %v813_v47, %v813_v47  ;;  %vm12621_vm3 = vmand %vm19464_vm5, %vm19460_vm13  ;;  %vm659_vm5 = vcmp.eq.s32.totalorder %v12120_v27, %v599_v40 }
  0xd6   : > { %v19466_v51 = vsel %vm12621_vm3, 4294967295, %v19465_v51  ;;  %vm12630_vm14 = vmand %vm19468_vm0, %vm19467_vm8  ;;  %vm19471_vm8 = vcmp.eq.s32.totalorder %v12098_v19, %v599_v40  ;;  %vm666_vm3 = vcmp.eq.s32.totalorder %v12098_v19, %v608_v49  ;;  %v620_v40 = vpop.permute.xlu1 %619 }
  0xd7   : > { %vm762_vm4 = vmand %vm662_vm11, %vm19460_vm13  ;;  %1062 = vst [vmem:[#allocation2 + $0x80] sm:$0xf] %v10963_v50  ;;  %vm667_vm13 = vcmp.eq.s32.totalorder %v12117_v26, %v608_v49  ;;  %v11231_v50 = vld [vmem:[#allocation2 + $0x68] ss:$12 sps:$4 sm:$0xff]  }
  0xd8   : > { %v822_v59 = vsel %vm762_vm4, 1.0, %v11755_v42  ;;  %vm12644_vm0 = vmand %vm19471_vm8, %vm12521_vm15  ;;  %vm19476_vm4 = vcmp.lt.s32.totalorder %v493_v12, 300  ;;  %v19493_v12 = vmov 0  ;;  %1773 = vmatmul.mubr.bf16.gmra.mxu1 %v11231_v50 }
  0xd9   : > { %v19473_v60 = vsel %vm12644_vm0, 4294967295, %v19472_v60  ;;  %v10969_v62 = vpack.c.bf16 %v822_v59, %v822_v59  ;;  %vm12651_vm11 = vmand %vm658_vm10, %vm12521_vm15  ;;  %vm19480_vm10 = vnez %v19411_v45  ;;  %vm19485_vm0 = vnez %v19423_v61  ;;  %1782 = vmatprep.mubr.bf16.mxu1 %v19143_v0 }
  0xda   : > { %v19475_v63 = vsel %vm12651_vm11, 4294967295, %v19474_v63  ;;  %vm12658_vm2 = vmand %vm19477_vm9, %vm19476_vm4  ;;  %vm19481_vm11 = vnez %v19397_v34  ;;  %vm19484_vm4 = vnez %v19436_v5 }
  0xdb   : > { %vm759_vm8 = vmand %vm659_vm5, %vm12521_vm15  ;;  %1068 = vst [vmem:[#allocation2 + $0xa4] sm:$0xf] %v10969_v62  ;;  %vm663_vm15 = vcmp.eq.s32.totalorder %v12098_v19, %v605_v9 }
  0xdc   : > { %vm11661_vm1 = vmpackc.low %vm19481_vm11, %vm19480_vm10  ;;  %v819_v1 = vsel %vm759_vm8, 1.0, %v11755_v42  ;;  %vm19488_vm8 = vcmp.lt.s32.totalorder %v496_v21, 300  ;;  %vm19489_vm10 = vcmp.ge.s32.totalorder %v496_v21, 0  ;;  %v617_v21 = vpop.permute.xlu0 %616 }
  0xdd   : > { %11662 = vmatmul.mubr.msk.bf16.gmra.mxu0 %vm11661_vm1, %v11756_v30  ;;  %vm12674_vm9 = vmand %vm666_vm3, %vm12554_vm6  ;;  %v10967_v34 = vpack.c.bf16 %v819_v1, %v819_v1  ;;  %vm664_vm3 = vcmp.eq.s32.totalorder %v12117_v26, %v605_v9 }
  0xde   : > { %v19483_v3 = vsel %vm12674_vm9, 4294967295, %v19482_v3  ;;  %vm11663_vm11 = vmpackc.low %vm19485_vm0, %vm19484_vm4  ;;  %vm535_vm0 = vcmp.lt.s32.totalorder %v495_v54, 300  ;;  %vm19492_vm4 = vcmp.eq.s32.totalorder %v12120_v27, %v608_v49  ;;  %vm665_vm9 = vcmp.eq.s32.totalorder %v12120_v27, %v605_v9  ;;  %v11232_v59 = vld [vmem:[#allocation2 + $0x80] ss:$12 sps:$4 sm:$0xff]  }
  0xdf   : > { %11664 = vmatprep.mubr.msk.bf16.mxu0 %vm11663_vm11, %v11756_v30  ;;  %vm12688_vm1 = vmand %vm667_vm13, %vm12554_vm6  ;;  %1066 = vst [vmem:[#allocation2 + $0x98] sm:$0xf] %v10967_v34  ;;  %v19512_v49 = vmov 0 }
  0xe0   : > { %vm12695_vm5 = vmand %vm19489_vm10, %vm19488_vm8  ;;  %vm672_vm8 = vcmp.eq.s32.totalorder %v12098_v19, %v614_v6  ;;  %1783 = vmatmul.mubr.bf16.gmra.mxu1 %v11232_v59 }
  0xe1   : > { %vm768_vm11 = vmand %vm19492_vm4, %vm12554_vm6  ;;  %vm673_vm6 = vcmp.eq.s32.totalorder %v12117_v26, %v614_v6  ;;  %vm19497_vm4 = vcmp.ge.s32.totalorder %v495_v54, 0  ;;  %1792 = vmatprep.mubr.bf16.mxu1 %v19143_v0 }
  0xe2   : > { %v828_v61 = vsel %vm768_vm11, 1.0, %v11755_v42  ;;  %vm12707_vm13 = vmand %vm663_vm15, %vm12592_vm7 }
  0xe3   : > { %v19494_v12 = vsel %vm12707_vm13, 4294967295, %v19493_v12  ;;  %v10973_v17 = vpack.c.bf16 %v828_v61, %v828_v61  ;;  %vm12714_vm10 = vmand %vm664_vm3, %vm12592_vm7  ;;  %vm674_vm13 = vcmp.eq.s32.totalorder %v12120_v27, %v614_v6 }
  0xe4   : > { %vm12720_vm11 = vmand %vm19497_vm4, %vm535_vm0 }
  0xe5   : > { %vm765_vm15 = vmand %vm665_vm9, %vm12592_vm7  ;;  %1072 = vst [vmem:[#allocation2 + $0xbc] sm:$0xf] %v10973_v17  ;;  %vm670_vm7 = vcmp.eq.s32.totalorder %v12117_v26, %v611_v13  ;;  %vm19504_vm9 = vnez %v19433_v52 }
  0xe6   : > { %v825_v29 = vsel %vm765_vm15, 1.0, %v11755_v42  ;;  %vm12730_vm3 = vmand %vm672_vm8, %vm12630_vm14  ;;  %vm19505_vm8 = vnez %v19421_v57 }
  0xe7   : > { %v19501_v32 = vsel %vm12730_vm3, 4294967295, %v19500_v32  ;;  %v10971_v43 = vpack.c.bf16 %v825_v29, %v825_v29  ;;  %vm12737_vm4 = vmand %vm673_vm6, %vm12630_vm14  ;;  %vm671_vm3 = vcmp.eq.s32.totalorder %v12120_v27, %v611_v13  ;;  %vm19506_vm6 = vnez %v19444_v28 }
  0xe8   : > { %v19503_v4 = vsel %vm12737_vm4, 4294967295, %v19502_v4  ;;  %vm11667_vm15 = vmpackc.low %vm19505_vm8, %vm19504_vm9  ;;  %vm19507_vm9 = vcmp.eq.s32.totalorder %v12098_v19, %v611_v13 }
  0xe9   : > { %11668 = vmatmul.mubr.msk.bf16.gmra.mxu0 %vm11667_vm15, %v11756_v30  ;;  %vm774_vm0 = vmand %vm674_vm13, %vm12630_vm14  ;;  %1070 = vst [vmem:[#allocation2 + $0xb0] sm:$0xf] %v10971_v43  ;;  %vm678_vm14 = vcmp.eq.s32.totalorder %v12098_v19, %v620_v40  ;;  %vm679_vm13 = vcmp.eq.s32.totalorder %v12117_v26, %v620_v40 }
  0xea   : > { %vm11669_vm4 = vmpackc.low %vm19506_vm6, %vm12583_vm12  ;;  %v834_v52 = vsel %vm774_vm0, 1.0, %v11755_v42 }
  0xeb   : > { %11670 = vmatprep.mubr.msk.bf16.mxu0 %vm11669_vm4, %v11756_v30  ;;  %vm12761_vm8 = vmand %vm19507_vm9, %vm12658_vm2  ;;  %v10977_v44 = vpack.c.bf16 %v834_v52, %v834_v52  ;;  %vm680_vm4 = vcmp.eq.s32.totalorder %v12120_v27, %v620_v40  ;;  %vm677_vm9 = vcmp.eq.s32.totalorder %v12120_v27, %v617_v21 }
  0xec   : > { %vm12768_vm12 = vmand %vm670_vm7, %vm12658_vm2  ;;  %vm675_vm7 = vcmp.eq.s32.totalorder %v12098_v19, %v617_v21  ;;  %v19516_v19 = vmov 0 }
  0xed   : > { %vm771_vm0 = vmand %vm671_vm3, %vm12658_vm2  ;;  %1076 = vst [vmem:[#allocation2 + $0xd4] sm:$0xf] %v10977_v44  ;;  %vm676_vm2 = vcmp.eq.s32.totalorder %v12117_v26, %v617_v21 }
  0xee   : > { %v831_v47 = vsel %vm771_vm0, 1.0, %v11755_v42  ;;  %vm12779_vm15 = vmand %vm678_vm14, %vm12695_vm5  ;;  %vm19519_vm0 = vnez %v19442_v16 }
  0xef   : > { %v19513_v49 = vsel %vm12779_vm15, 4294967295, %v19512_v49  ;;  %v10975_v53 = vpack.c.bf16 %v831_v47, %v831_v47  ;;  %vm12786_vm6 = vmand %vm679_vm13, %vm12695_vm5  ;;  %vm19518_vm13 = vnez %v19450_v36 }
  0xf0   : > { %vm780_vm3 = vmand %vm680_vm4, %vm12695_vm5  ;;  %vm19522_vm4 = vnez %v19475_v63 }
  0xf1   : > { %1074 = vst [vmem:[#allocation2 + $0xc8] sm:$0xf] %v10975_v53  ;;  %v840_v56 = vsel %vm780_vm3, 1.0, %v11755_v42  ;;  %vm12797_vm14 = vmand %vm675_vm7, %vm12720_vm11  ;;  %vm19523_vm7 = vnez %v19466_v51 }
  0xf2   : > { %v19517_v19 = vsel %vm12797_vm14, 4294967295, %v19516_v19  ;;  %vm11673_vm15 = vmpackc.low %vm19519_vm0, %vm19518_vm13  ;;  %v10981_v26 = vpack.c.bf16 %v840_v56, %v840_v56 }
  0xf3   : > { %11674 = vmatmul.mubr.msk.bf16.gmra.mxu0 %vm11673_vm15, %v11756_v30  ;;  %vm12809_vm5 = vmand %vm676_vm2, %vm12720_vm11  ;;  %vm19524_vm15 = vnez %v19473_v60  ;;  %vm19525_vm2 = vnez %v19463_v41  ;;  %v11234_v41 = vld [vmem:[#allocation2 + $0xb0] ss:$12 sps:$4 sm:$0xff]  }
  0xf4   : > { %vm11675_vm3 = vmpackc.low %vm19523_vm7, %vm19522_vm4  ;;  %1080 = vst [vmem:[#allocation2 + $0xec] sm:$0xf] %v10981_v26  ;;  %vm19528_vm4 = vnez %v19503_v4 }
  0xf5   : > { %11676 = vmatprep.mubr.msk.bf16.mxu0 %vm11675_vm3, %v11756_v30  ;;  %vm777_vm14 = vmand %vm677_vm9, %vm12720_vm11  ;;  %vm19526_vm9 = vnez %v19494_v12 }
  0xf6   : > { %v837_v16 = vsel %vm777_vm14, 1.0, %v11755_v42  ;;  %vm11679_vm13 = vmpackc.low %vm19525_vm2, %vm19524_vm15  ;;  %v11233_v42 = vld [vmem:[#allocation2 + $0x98] ss:$12 sps:$4 sm:$0xff]   ;;  %vm19527_vm14 = vnez %v19483_v3  ;;  %vm19531_vm15 = vnez %v19513_v49 }
  0xf7   : > { %v10979_v36 = vpack.c.bf16 %v837_v16, %v837_v16  ;;  %vm11681_vm11 = vmpackc.low %vm12688_vm1, %vm12714_vm10  ;;  %1793 = vmatmul.mubr.bf16.gmra.mxu1 %v11233_v42  ;;  %vm19529_vm1 = vnez %v19501_v32 }
  0xf8   : > { %1802 = vmatprep.mubr.bf16.mxu1 %v19143_v0  ;;  %vm11685_vm0 = vmpackc.low %vm19527_vm14, %vm19526_vm9  ;;  %v11235_v51 = vld [vmem:[#allocation2 + $0xc8] ss:$12 sps:$4 sm:$0xff]   ;;  %vm19187_vm9 = vcmask 1041408   ;;  %vm19186_vm14 = vcmask 1040384  }
  0xf9   : > { %1078 = vst [vmem:[#allocation2 + $0xe0] sm:$0xf] %v10979_v36  ;;  %vm11687_vm7 = vmpackc.low %vm19528_vm4, %vm12768_vm12  ;;  %vm19530_vm12 = vnez %v19517_v19 }
  0xfa   : > { %vm11691_vm10 = vmpackc.low %vm19529_vm1, %vm12761_vm8  ;;  %vm19184_vm8 = vcmask 1043456   ;;  %vm3037_vm1 = vcmask 125952  }
  0xfb   : > { %11680 = vmatmul.mubr.msk.bf16.gmra.mxu0 %vm11679_vm13, %v11756_v30  ;;  %vm11693_vm3 = vmpackc.low %vm12786_vm6, %vm12809_vm5  ;;  %vm19174_vm6 = vcmask 1046528   ;;  %vm19173_vm5 = vcmask 1045504   ;;  %vm19175_vm13 = vcmask 1044480  }
  0xfc   : > { %11682 = vmatprep.mubr.msk.bf16.mxu0 %vm11681_vm11, %v11756_v30  ;;  %vm11696_vm2 = vmpackc.low %vm19531_vm15, %vm19530_vm12  ;;  %vm2308_vm11 = vcmask 1042432   ;;  %vm3622_vm12 = vcmask 1045508   ;;  %vm3924_vm15 = vcmask 1044484  }
  0xff   : > { %1803 = vmatmul.mubr.bf16.gmra.mxu1 %v11234_v41 }
 0x100   : > { %1812 = vmatprep.mubr.bf16.mxu1 %v19143_v0  ;;  %v11236_v60 = vld [vmem:[#allocation2 + $0xe0] ss:$12 sps:$4 sm:$0xff]  }
 0x103   : > { %11686 = vmatmul.mubr.msk.bf16.gmra.mxu0 %vm11685_vm0, %v11756_v30 }
 0x104   : > { %11688 = vmatprep.mubr.msk.bf16.mxu0 %vm11687_vm7, %v11756_v30 }
 0x107   : > { %1813 = vmatmul.mubr.bf16.gmra.mxu1 %v11235_v51 }
 0x108   : > { %1822 = vmatprep.mubr.bf16.mxu1 %v19143_v0 }
 0x10b   : > { %11692 = vmatmul.mubr.msk.bf16.gmra.mxu0 %vm11691_vm10, %v11756_v30  ;;  %vm3320_vm10 = vcmask 1046532  }
 0x10c   : > { %11694 = vmatprep.mubr.msk.bf16.mxu0 %vm11693_vm3, %v11756_v30 }
 0x10f   : > { %1823 = vmatmul.mubr.bf16.gmra.mxu1 %v11236_v60 }
 0x113   : > { %11697 = vmatmul.mubr.msk.bf16.gmra.mxu0 %vm11696_vm2, %v11756_v30 }
 0x177   : > { %v1603_v9 = vpop.f32.mrf.mxu0 }
 0x178   : > { %v1735_v63 = vpop.f32.mrf.mxu1 }
 0x179   : > { %v1605_v62 = vpop.f32.mrf.mxu0  ;;  %v12860_v3 = vadd.f32 %v1735_v63, %v1603_v9 }
 0x17a   : > { %v1737_v1 = vpop.f32.mrf.mxu1 }
 0x17b   : > { %v1606_v35 = vpop.f32.mrf.mxu0  ;;  %v2195_v30 = vrot.slane %v12860_v3, 4  ;;  %v1853_v12 = vrot.slane %v12860_v3, 1  ;;  %v1967_v40 = vrot.slane %v12860_v3, 2  ;;  %v2081_v44 = vrot.slane %v12860_v3, 3 }
 0x17c   : > { %v1738_v6 = vpop.f32.mrf.mxu1  ;;  %v2309_v53 = vrot.slane %v12860_v3, 5  ;;  %v2423_v16 = vrot.slane %v12860_v3, 6  ;;  %v2538_v9 = vrot.slane %v12860_v3, 7 }
 0x17d   : > { %v12862_v34 = vpop.f32.mrf.mxu0  ;;  %v12864_v45 = vadd.f32 %v1738_v6, %v1606_v35 }
 0x17e   : > { %v12866_v5 = vpop.f32.mrf.mxu1 }
 0x17f   : > { %v2196_v61 = vrot.slane %v12864_v45, 4  ;;  %v1854_v13 = vrot.slane %v12864_v45, 1  ;;  %v1968_v32 = vrot.slane %v12864_v45, 2  ;;  %v2082_v57 = vrot.slane %v12864_v45, 3 }
 0x180   : > { %v1744_v17 = vpop.f32.mrf.mxu1  ;;  %v2310_v49 = vrot.slane %v12864_v45, 5  ;;  %v2424_v19 = vrot.slane %v12864_v45, 6  ;;  %v2539_v59 = vrot.slane %v12864_v45, 7 }
 0x181   : > { %v2197_v24 = vsel %vm19184_vm8, %v2195_v30, %v2196_v61  ;;  %v1855_v29 = vsel %vm19174_vm6, %v1853_v12, %v1854_v13  ;;  %v1969_v4 = vsel %vm19173_vm5, %v1967_v40, %v1968_v32  ;;  %v2083_v28 = vsel %vm19175_vm13, %v2081_v44, %v2082_v57 }
 0x182   : > { %2232 = vrot.lane.b32.xlu1 %v2197_v24, %s11757_s19  ;;  %1890 = vrot.lane.b32.xlu0 %v1855_v29, %s11758_s17  ;;  %v2311_v54 = vsel %vm2308_vm11, %v2309_v53, %v2310_v49  ;;  %v1746_v27 = vpop.f32.mrf.mxu1  ;;  %v2425_v42 = vsel %vm19187_vm9, %v2423_v16, %v2424_v19  ;;  %v2540_v35 = vsel %vm19186_vm14, %v2538_v9, %v2539_v59 }
 0x184   : > { %v1612_v22 = vpop.f32.mrf.mxu0  ;;  %v1748_v60 = vpop.f32.mrf.mxu1 }
 0x185   : > { %v12872_v23 = vadd.f32 %v1744_v17, %v1612_v22 }
 0x186   : > { %2004 = vrot.lane.b32.xlu0 %v1969_v4, %s11759_s20  ;;  %v1614_v36 = vpop.f32.mrf.mxu0  ;;  %v1750_v40 = vpop.f32.mrf.mxu1 }
 0x187   : > { %v1856_v43 = vrot.slane %v12872_v23, 1  ;;  %v1970_v21 = vrot.slane %v12872_v23, 2  ;;  %v2084_v50 = vrot.slane %v12872_v23, 3  ;;  %v2312_v26 = vrot.slane %v12872_v23, 5 }
 0x188   : > { %v2426_v51 = vrot.slane %v12872_v23, 6  ;;  %v12915_v62 = vadd.f32 %v1746_v27, %v1614_v36  ;;  %v1616_v63 = vpop.f32.mrf.mxu0  ;;  %v2198_v30 = vrot.slane %v12872_v23, 4  ;;  %v2541_v12 = vrot.slane %v12872_v23, 7 }
 0x189   : > { %v1857_v52 = vsel %vm19174_vm6, %v1854_v13, %v1856_v43  ;;  %v1971_v47 = vsel %vm19173_vm5, %v1968_v32, %v1970_v21  ;;  %v2085_v56 = vsel %vm19175_vm13, %v2082_v57, %v2084_v50  ;;  %v2313_v41 = vsel %vm2308_vm11, %v2310_v49, %v2312_v26  ;;  %v1754_v57 = vpop.f32.mrf.mxu1 }
 0x18a   : > { %1892 = vrot.lane.b32.xlu1 %v1857_v52, %s11758_s17  ;;  %2118 = vrot.lane.b32.xlu0 %v2083_v28, %s11760_s30  ;;  %v12918_v1 = vadd.f32 %v1748_v60, %v1616_v63  ;;  %v2427_v6 = vsel %vm19187_vm9, %v2424_v19, %v2426_v51  ;;  %v12927_v13 = vadd.f32 %v12866_v5, %v12862_v34  ;;  %v2692_v17 = vrot.slane %v12915_v62, 1 }
 0x18b   : > { %v2199_v22 = vsel %vm19184_vm8, %v2196_v61, %v2198_v30  ;;  %v2542_v24 = vsel %vm19186_vm14, %v2539_v59, %v2541_v12  ;;  %v1618_v61 = vpop.f32.mrf.mxu0 }
 0x18c   : > { %v2086_v29 = vrot.slane %v12918_v1, 3  ;;  %v2691_v32 = vrot.slane %v12927_v13, 1  ;;  %v2200_v4 = vrot.slane %v12918_v1, 4  ;;  %v1858_v52 = vrot.slane %v12918_v1, 1 }
 0x18d   : > { %v1972_v49 = vrot.slane %v12918_v1, 2  ;;  %v12952_v53 = vadd.f32 %v1750_v40, %v1618_v61  ;;  %v2428_v27 = vrot.slane %v12918_v1, 6 }
 0x18e   : > { %2006 = vrot.lane.b32.xlu1 %v1971_v47, %s11759_s20  ;;  %2346 = vrot.lane.b32.xlu0 %v2311_v54, %s11761_s13  ;;  %v2693_v34 = vsel %vm19174_vm6, %v2691_v32, %v2692_v17  ;;  %v2087_v5 = vsel %vm19175_vm13, %v2084_v50, %v2086_v29  ;;  %v2201_v44 = vsel %vm19184_vm8, %v2198_v30, %v2200_v4  ;;  %v2314_v47 = vrot.slane %v12918_v1, 5 }
 0x18f   : > { %v1859_v28 = vsel %vm19174_vm6, %v1856_v43, %v1858_v52  ;;  %v1973_v19 = vsel %vm19173_vm5, %v1970_v21, %v1972_v49  ;;  %v2543_v43 = vrot.slane %v12918_v1, 7  ;;  %v2694_v16 = vrot.slane %v12952_v53, 1  ;;  %v1756_v21 = vpop.f32.mrf.mxu1 }
 0x190   : > { %v1622_v50 = vpop.f32.mrf.mxu0  ;;  %v2429_v59 = vsel %vm19187_vm9, %v2426_v51, %v2428_v27 }
 0x191   : > { %v12954_v54 = vadd.f32 %v1754_v57, %v1622_v50  ;;  %v2544_v36 = vsel %vm19186_vm14, %v2541_v12, %v2543_v43 }
 0x192   : > { %2120 = vrot.lane.b32.xlu1 %v2085_v56, %s11760_s30  ;;  %2460 = vrot.lane.b32.xlu0 %v2425_v42, %s11762_s16  ;;  %v2315_v56 = vsel %vm2308_vm11, %v2312_v26, %v2314_v47  ;;  %v2695_v42 = vsel %vm19174_vm6, %v2692_v17, %v2694_v16  ;;  %v1624_v51 = vpop.f32.mrf.mxu0  ;;  %v1758_v17 = vpop.f32.mrf.mxu1 }
 0x193   : > { %v1974_v26 = vrot.slane %v12954_v54, 2  ;;  %v2088_v60 = vrot.slane %v12954_v54, 3  ;;  %v1860_v9 = vrot.slane %v12954_v54, 1  ;;  %v12976_v63 = vadd.f32 %v1756_v21, %v1624_v51 }
 0x194   : > { %v2316_v30 = vrot.slane %v12954_v54, 5  ;;  %v2202_v12 = vrot.slane %v12954_v54, 4  ;;  %v2545_v61 = vrot.slane %v12954_v54, 7 }
 0x196   : > { %2348 = vrot.lane.b32.xlu1 %v2313_v41, %s11761_s13  ;;  %2577 = vrot.lane.b32.xlu0 %v2540_v35, %s11763_s26  ;;  %v1975_v41 = vsel %vm19173_vm5, %v1972_v49, %v1974_v26  ;;  %v2089_v35 = vsel %vm19175_vm13, %v2086_v29, %v2088_v60  ;;  %v2317_v40 = vsel %vm2308_vm11, %v2314_v47, %v2316_v30 }
 0x197   : > { %v2203_v29 = vsel %vm19184_vm8, %v2200_v4, %v2202_v12  ;;  %v2546_v4 = vsel %vm19186_vm14, %v2543_v43, %v2545_v61 }
 0x19a   : > { %2462 = vrot.lane.b32.xlu1 %v2427_v6, %s11762_s16  ;;  %2234 = vrot.lane.b32.xlu0 %v2199_v22, %s11757_s19  ;;  %v1861_v6 = vsel %vm19174_vm6, %v1858_v52, %v1860_v9  ;;  %v2696_v22 = vrot.slane %v12976_v63, 1 }
 0x19c   : > { %v2697_v52 = vsel %vm19174_vm6, %v2694_v16, %v2696_v22 }
 0x19e   : > { %2579 = vrot.lane.b32.xlu1 %v2542_v24, %s11763_s26  ;;  %2728 = vrot.lane.b32.xlu0 %v2693_v34, %s11758_s17  ;;  %v1626_v24 = vpop.f32.mrf.mxu0  ;;  %v2430_v34 = vrot.slane %v12954_v54, 6 }
 0x19f   : > { %v12985_v32 = vadd.f32 %v1758_v17, %v1626_v24 }
 0x1a0   : > { %v1628_v50 = vpop.f32.mrf.mxu0 }
 0x1a1   : > { %v2090_v57 = vrot.slane %v12985_v32, 3  ;;  %v2204_v47 = vrot.slane %v12985_v32, 4  ;;  %v1862_v49 = vrot.slane %v12985_v32, 1  ;;  %v2318_v16 = vrot.slane %v12985_v32, 5 }
 0x1a2   : > { %2122 = vrot.lane.b32.xlu1 %v2087_v5, %s11760_s30  ;;  %1894 = vrot.lane.b32.xlu0 %v1859_v28, %s11758_s17  ;;  %v2431_v5 = vsel %vm19187_vm9, %v2428_v27, %v2430_v34  ;;  %v1976_v43 = vrot.slane %v12985_v32, 2 }
 0x1a3   : > { %v2091_v28 = vsel %vm19175_vm13, %v2088_v60, %v2090_v57  ;;  %v1863_v27 = vsel %vm19174_vm6, %v1860_v9, %v1862_v49  ;;  %v2432_v60 = vrot.slane %v12985_v32, 6  ;;  %v2547_v9 = vrot.slane %v12985_v32, 7 }
 0x1a6   : > { %2236 = vrot.lane.b32.xlu1 %v2201_v44, %s11757_s19  ;;  %2008 = vrot.lane.b32.xlu0 %v1973_v19, %s11759_s20  ;;  %v1760_v44 = vpop.f32.mrf.mxu1  ;;  %v2205_v19 = vsel %vm19184_vm8, %v2202_v12, %v2204_v47 }
 0x1aa   : > { %2350 = vrot.lane.b32.xlu1 %v2315_v56, %s11761_s13  ;;  %2464 = vrot.lane.b32.xlu0 %v2429_v59, %s11762_s16  ;;  %v1764_v56 = vpop.f32.mrf.mxu1  ;;  %v13010_v59 = vadd.f32 %v1760_v44, %v1628_v50 }
 0x1ac   : > { %v2698_v51 = vrot.slane %v13010_v59, 1 }
 0x1ae   : > { %2581 = vrot.lane.b32.xlu1 %v2544_v36, %s11763_s26  ;;  %2010 = vrot.lane.b32.xlu0 %v1975_v41, %s11759_s20  ;;  %v1632_v36 = vpop.f32.mrf.mxu0  ;;  %v1977_v41 = vsel %vm19173_vm5, %v1974_v26, %v1976_v43  ;;  %v1766_v26 = vpop.f32.mrf.mxu1 }
 0x1af   : > { %v13012_v21 = vadd.f32 %v1764_v56, %v1632_v36 }
 0x1b1   : > { %v1978_v12 = vrot.slane %v13012_v21, 2  ;;  %v2092_v24 = vrot.slane %v13012_v21, 3 }
 0x1b2   : > { %2730 = vrot.lane.b32.xlu1 %v2695_v42, %s11758_s17  ;;  %2124 = vrot.lane.b32.xlu0 %v2089_v35, %s11760_s30  ;;  %v2319_v42 = vsel %vm2308_vm11, %v2316_v30, %v2318_v16  ;;  %v2433_v35 = vsel %vm19187_vm9, %v2430_v34, %v2432_v60  ;;  %v2699_v30 = vsel %vm19174_vm6, %v2696_v22, %v2698_v51  ;;  %v1768_v34 = vpop.f32.mrf.mxu1  ;;  %v2320_v22 = vrot.slane %v13012_v21, 5 }
 0x1b3   : > { %v1979_v17 = vsel %vm19173_vm5, %v1976_v43, %v1978_v12 }
 0x1b4   : > { %v2321_v56 = vsel %vm2308_vm11, %v2318_v16, %v2320_v22 }
 0x1b6   : > { %1896 = vrot.lane.b32.xlu1 %v1861_v6, %s11758_s17  ;;  %2352 = vrot.lane.b32.xlu0 %v2317_v40, %s11761_s13  ;;  %v2548_v6 = vsel %vm19186_vm14, %v2545_v61, %v2547_v9  ;;  %v1864_v40 = vrot.slane %v13012_v21, 1  ;;  %v2206_v61 = vrot.slane %v13012_v21, 4 }
 0x1b8   : > { %v2207_v50 = vsel %vm19184_vm8, %v2204_v47, %v2206_v61 }
 0x1ba   : > { %2238 = vrot.lane.b32.xlu1 %v2203_v29, %s11757_s19  ;;  %2466 = vrot.lane.b32.xlu0 %v2431_v5, %s11762_s16  ;;  %v1634_v29 = vpop.f32.mrf.mxu0  ;;  %v2093_v5 = vsel %vm19175_vm13, %v2090_v57, %v2092_v24  ;;  %v2549_v57 = vrot.slane %v13012_v21, 7 }
 0x1bc   : > { %v1636_v44 = vpop.f32.mrf.mxu0  ;;  %v2550_v43 = vsel %vm19186_vm14, %v2547_v9, %v2549_v57 }
 0x1be   : > { %2732 = vrot.lane.b32.xlu1 %v2697_v52, %s11758_s17  ;;  %2583 = vrot.lane.b32.xlu0 %v2546_v4, %s11763_s26  ;;  %v1865_v52 = vsel %vm19174_vm6, %v1862_v49, %v1864_v40  ;;  %v13038_v4 = vadd.f32 %v1766_v26, %v1634_v29  ;;  %v2434_v49 = vrot.slane %v13012_v21, 6  ;;  %v1638_v47 = vpop.f32.mrf.mxu0 }
 0x1c0   : > { %v2435_v36 = vsel %vm19187_vm9, %v2432_v60, %v2434_v49  ;;  %v1642_v60 = vpop.f32.mrf.mxu0 }
 0x1c2   : > { %2126 = vrot.lane.b32.xlu1 %v2091_v28, %s11760_s30  ;;  %1898 = vrot.lane.b32.xlu0 %v1863_v27, %s11758_s17  ;;  %v13040_v28 = vadd.f32 %v1768_v34, %v1636_v44  ;;  %v1770_v27 = vpop.f32.mrf.mxu1 }
 0x1c4   : > { %v1774_v16 = vpop.f32.mrf.mxu1  ;;  %v1866_v26 = vrot.slane %v13040_v28, 1  ;;  %v2551_v29 = vrot.slane %v13040_v28, 7 }
 0x1c5   : > { %v13060_v9 = vadd.f32 %v1774_v16, %v1642_v60 }
 0x1c6   : > { %2240 = vrot.lane.b32.xlu1 %v2205_v19, %s11757_s19  ;;  %2012 = vrot.lane.b32.xlu0 %v1977_v41, %s11759_s20  ;;  %v2700_v19 = vrot.slane %v13038_v4, 1 }
 0x1c7   : > { %19532 = vst [vmem:[#allocation30_spill] sm:$0xff] %v13060_v9 }
 0x1c8   : > { %v2701_v41 = vsel %vm19174_vm6, %v2698_v51, %v2700_v19  ;;  %v1980_v51 = vrot.slane %v13040_v28, 2 }
 0x1ca   : > { %2354 = vrot.lane.b32.xlu1 %v2319_v42, %s11761_s13  ;;  %2585 = vrot.lane.b32.xlu0 %v2548_v6, %s11763_s26  ;;  %v2094_v42 = vrot.slane %v13040_v28, 3  ;;  %v2208_v6 = vrot.slane %v13040_v28, 4  ;;  %v1981_v34 = vsel %vm19173_vm5, %v1978_v12, %v1980_v51 }
 0x1ce   : > { %2468 = vrot.lane.b32.xlu1 %v2433_v35, %s11762_s16  ;;  %2014 = vrot.lane.b32.xlu0 %v1979_v17, %s11759_s20  ;;  %v2095_v35 = vsel %vm19175_vm13, %v2092_v24, %v2094_v42  ;;  %v1867_v17 = vsel %vm19174_vm6, %v1864_v40, %v1866_v26  ;;  %v2552_v24 = vsel %vm19186_vm14, %v2549_v57, %v2551_v29  ;;  %v1776_v57 = vpop.f32.mrf.mxu1 }
 0x1cf   : > { %v13074_v40 = vadd.f32 %v1770_v27, %v1638_v47 }
 0x1d1   : > { %v2702_v12 = vrot.slane %v13074_v40, 1 }
 0x1d2   : > { %2734 = vrot.lane.b32.xlu1 %v2699_v30, %s11758_s17  ;;  %2128 = vrot.lane.b32.xlu0 %v2093_v5, %s11760_s30  ;;  %v2209_v30 = vsel %vm19184_vm8, %v2206_v61, %v2208_v6  ;;  %v2322_v5 = vrot.slane %v13040_v28, 5 }
 0x1d3   : > { %v2703_v16 = vsel %vm19174_vm6, %v2700_v19, %v2702_v12 }
 0x1d4   : > { %v2323_v61 = vsel %vm2308_vm11, %v2320_v22, %v2322_v5  ;;  %v1644_v22 = vpop.f32.mrf.mxu0 }
 0x1d5   : > { %v13088_v47 = vadd.f32 %v1776_v57, %v1644_v22  ;;  %v2553_v57 = vrot.slane %v13060_v9, 7 }
 0x1d6   : > { %1900 = vrot.lane.b32.xlu1 %v1865_v52, %s11758_s17  ;;  %2242 = vrot.lane.b32.xlu0 %v2207_v50, %s11757_s19  ;;  %v1868_v52 = vrot.slane %v13060_v9, 1  ;;  %v2436_v50 = vrot.slane %v13040_v28, 6  ;;  %v1646_v60 = vpop.f32.mrf.mxu0 }
 0x1d7   : > { %19533 = vst [vmem:[#allocation31_spill] sm:$0xff] %v13088_v47 }
 0x1d8   : > { %v1869_v44 = vsel %vm19174_vm6, %v1866_v26, %v1868_v52  ;;  %v1778_v26 = vpop.f32.mrf.mxu1 }
 0x1da   : > { %2356 = vrot.lane.b32.xlu1 %v2321_v56, %s11761_s13  ;;  %2587 = vrot.lane.b32.xlu0 %v2550_v43, %s11763_s26  ;;  %v1982_v56 = vrot.slane %v13060_v9, 2  ;;  %v2437_v43 = vsel %vm19187_vm9, %v2434_v49, %v2436_v50  ;;  %v2438_v49 = vrot.slane %v13060_v9, 6 }
 0x1dc   : > { %v1983_v27 = vsel %vm19173_vm5, %v1980_v51, %v1982_v56 }
 0x1de   : > { %2470 = vrot.lane.b32.xlu1 %v2435_v36, %s11762_s16  ;;  %2130 = vrot.lane.b32.xlu0 %v2095_v35, %s11760_s30  ;;  %v2324_v36 = vrot.slane %v13060_v9, 5  ;;  %v2096_v35 = vrot.slane %v13060_v9, 3 }
 0x1e0   : > { %v2097_v19 = vsel %vm19175_vm13, %v2094_v42, %v2096_v35 }
 0x1e2   : > { %2736 = vrot.lane.b32.xlu1 %v2701_v41, %s11758_s17  ;;  %2244 = vrot.lane.b32.xlu0 %v2209_v30, %s11757_s19  ;;  %v2325_v41 = vsel %vm2308_vm11, %v2322_v5, %v2324_v36  ;;  %v19150_v30 = vrot.slane %v13088_v47, 1  ;;  %v2210_v5 = vrot.slane %v13060_v9, 4 }
 0x1e4   : > { %v2705_v42 = vsel %vm19174_vm6, %v2702_v12, %v19150_v30 }
 0x1e6   : > { %1902 = vrot.lane.b32.xlu1 %v1867_v17, %s11758_s17  ;;  %2589 = vrot.lane.b32.xlu0 %v2552_v24, %s11763_s26  ;;  %v13099_v24 = vadd.f32 %v1778_v26, %v1646_v60  ;;  %v2554_v26 = vsel %vm19186_vm14, %v2551_v29, %v2553_v57  ;;  %v1648_v60 = vpop.f32.mrf.mxu0 }
 0x1e8   : > { %19534 = vst [vmem:[#allocation32_spill] sm:$0xff] %v13099_v24  ;;  %v19146_v12 = vrot.slane %v13099_v24, 3  ;;  %v1652_v0 = vpop.f32.mrf.mxu0 }
 0x1ea   : > { %2016 = vrot.lane.b32.xlu1 %v1981_v34, %s11759_s20  ;;  %1904 = vrot.lane.b32.xlu0 %v1869_v44, %s11758_s17  ;;  %v2439_v34 = vsel %vm19187_vm9, %v2436_v50, %v2438_v49  ;;  %v1780_v50 = vpop.f32.mrf.mxu1  ;;  %v2099_v29 = vsel %vm19175_vm13, %v2096_v35, %v19146_v12  ;;  %v19151_v35 = vrot.slane %v13099_v24, 6 }
 0x1ee   : > { %2358 = vrot.lane.b32.xlu1 %v2323_v61, %s11761_s13  ;;  %2018 = vrot.lane.b32.xlu0 %v1983_v27, %s11759_s20  ;;  %v19145_v27 = vrot.slane %v13099_v24, 1 }
 0x1f2   : > { %2472 = vrot.lane.b32.xlu1 %v2437_v43, %s11762_s16  ;;  %2360 = vrot.lane.b32.xlu0 %v2325_v41, %s11761_s13  ;;  %v2211_v43 = vsel %vm19184_vm8, %v2208_v6, %v2210_v5  ;;  %v1871_v6 = vsel %vm19174_vm6, %v1868_v52, %v19145_v27 }
 0x1f4   : > { %v2233_v17 = vpop.permute.xlu1 %2232  ;;  %v1891_v51 = vpop.permute.xlu0 %1890 }
 0x1f5   : > { %v1947_v22 = vadd.f32 %v1891_v51, %v12860_v3 }
 0x1f6   : > { %2738 = vrot.lane.b32.xlu1 %v2703_v16, %s11758_s17  ;;  %2474 = vrot.lane.b32.xlu0 %v2439_v34, %s11762_s16  ;;  %v19147_v34 = vrot.slane %v13099_v24, 2 }
 0x1f8   : > { %v2005_v44 = vpop.permute.xlu0 %2004  ;;  %v1985_v52 = vsel %vm19173_vm5, %v1982_v56, %v19147_v34  ;;  %v1654_v56 = vpop.f32.mrf.mxu0 }
 0x1fa   : > { %2132 = vrot.lane.b32.xlu1 %v2097_v19, %s11760_s30  ;;  %2740 = vrot.lane.b32.xlu0 %v2705_v42, %s11758_s17  ;;  %v2061_v19 = vadd.f32 %v2005_v44, %v1947_v22  ;;  %v19148_v44 = vrot.slane %v13099_v24, 4  ;;  %v19149_v22 = vrot.slane %v13099_v24, 5 }
 0x1fc   : > { %v1893_v61 = vpop.permute.xlu1 %1892  ;;  %v2119_v41 = vpop.permute.xlu0 %2118  ;;  %v2213_v34 = vsel %vm19184_vm8, %v2210_v5, %v19148_v44 }
 0x1fd   : > { %v2175_v3 = vadd.f32 %v2119_v41, %v2061_v19  ;;  %v13135_v19 = vadd.f32 %v1780_v50, %v1648_v60 }
 0x1fe   : > { %2246 = vrot.lane.b32.xlu1 %v2211_v43, %s11757_s19  ;;  %1906 = vrot.lane.b32.xlu0 %v1871_v6, %s11758_s17  ;;  %v1784_v43 = vpop.f32.mrf.mxu1 }
 0x1ff   : > { %19535 = vst [vmem:[#allocation33_spill] sm:$0xff] %v13135_v19  ;;  %v13138_v12 = vadd.f32 %v1784_v43, %v1652_v0  ;;  %v19154_v60 = vrot.slane %v13135_v19, 1 }
 0x200   : > { %v2007_v16 = vpop.permute.xlu1 %2006  ;;  %v2347_v42 = vpop.permute.xlu0 %2346 }
 0x201   : > { %v1786_v41 = vpop.f32.mrf.mxu1  ;;  %19536 = vst [vmem:[#allocation34_spill] sm:$0xff] %v13138_v12  ;;  %v19549_v48 = vrot.slane %v13138_v12, 2 }
 0x202   : > { %2591 = vrot.lane.b32.xlu1 %v2554_v26, %s11763_s26  ;;  %2020 = vrot.lane.b32.xlu0 %v1985_v52, %s11759_s20  ;;  %v2289_v26 = vadd.f32 %v2233_v17, %v2175_v3  ;;  %v19153_v17 = vrot.slane %v13099_v24, 7  ;;  %v13160_v3 = vstv %s10565_s15  ;;  %v1656_v52 = vpop.f32.mrf.mxu0 }
 0x203   : > { %v1788_v0 = vpop.f32.mrf.mxu1 }
 0x204   : > { %v2121_v51 = vpop.permute.xlu1 %2120  ;;  %v2461_v27 = vpop.permute.xlu0 %2460  ;;  %v2403_v50 = vadd.f32 %v2347_v42, %v2289_v26  ;;  %v2556_v42 = vsel %vm19186_vm14, %v2553_v57, %v19153_v17  ;;  %v19152_v26 = vrot.slane %v13138_v12, 1 }
 0x206   : > { %2134 = vrot.lane.b32.xlu1 %v2099_v29, %s11760_s30  ;;  %v2327_v29 = vsel %vm2308_vm11, %v2324_v36, %v19149_v22  ;;  %v2441_v36 = vsel %vm19187_vm9, %v2438_v49, %v19151_v35  ;;  %v2517_v44 = vadd.f32 %v2461_v27, %v2403_v50  ;;  %v2806_v49 = vadd.s32 %v13160_v3, %v12067_v7  ;;  %v1658_v27 = vpop.f32.mrf.mxu0 }
 0x207   : > { %2362 = vrot.lane.b32.xlu0 %v2327_v29, %s11761_s13  ;;  %v1790_v29 = vpop.f32.mrf.mxu1 }
 0x208   : > { %v2349_v6 = vpop.permute.xlu1 %2348  ;;  %v2578_v5 = vpop.permute.xlu0 %2577  ;;  %vm2825_vm0 = vcmp.ge.s32.totalorder %v2806_v49, 0  ;;  %vm2844_vm4 = vcmp.lt.s32.totalorder %v2806_v49, 300 }
 0x209   : > { %v2634_v30 = vadd.f32 %v2578_v5, %v2517_v44  ;;  %v19155_v44 = vrot.slane %v13138_v12, 3  ;;  %v19156_v5 = vrot.slane %v13138_v12, 2  ;;  %vm2863_vm7 = vmand %vm2825_vm0, %vm2844_vm4  ;;  %vm3061_vm4 = vsmask.f32 3328 }
 0x20a   : > { %2248 = vrot.lane.b32.xlu1 %v2213_v34, %s11757_s19  ;;  %v1948_v34 = vadd.f32 %v1893_v61, %v12864_v45  ;;  %v19537_v61 = vrot.slane %v13088_v47, 1 }
 0x20b   : > { %2593 = vrot.lane.b32.xlu0 %v2556_v42, %s11763_s26 }
 0x20c   : > { %v13153_v43 = vpop.permute.xlu1 %2462  ;;  %v2062_v22 = vadd.f32 %v2007_v16, %v1948_v34  ;;  %v2235_v45 = vpop.permute.xlu0 %2234  ;;  %v2707_v57 = vsel %vm19174_vm6, %v19537_v61, %v19154_v60  ;;  %v2653_v61 = vadd.f32 %v2634_v30, %v12927_v13  ;;  %v19541_v30 = vrot.slane %v13099_v24, 2 }
 0x20d   : > { %v1794_v34 = vpop.f32.mrf.mxu1 }
 0x20e   : > { %2476 = vrot.lane.b32.xlu1 %v2441_v36, %s11762_s16  ;;  %v2176_v50 = vadd.f32 %v2121_v51, %v2062_v22  ;;  %v19538_v36 = vrot.slane %v13099_v24, 1  ;;  %v13188_v51 = vadd.f32 %v1786_v41, %v1654_v56  ;;  %v1987_v41 = vsel %vm19173_vm5, %v19541_v30, %v19156_v5 }
 0x20f   : > { %v2214_v56 = vrot.slane %v13138_v12, 4  ;;  %v1796_v49 = vpop.f32.mrf.mxu1  ;;  %v19543_v30 = vrot.slane %v13138_v12, 5  ;;  %v19544_v5 = vrot.slane %v13099_v24, 5 }
 0x210   : > { %v13171_v35 = vpop.permute.xlu1 %2579  ;;  %v1873_v16 = vsel %vm19174_vm6, %v19538_v36, %v19152_v26  ;;  %v2290_v42 = vadd.f32 %v2235_v45, %v2176_v50  ;;  %19539 = vst [vmem:[#allocation35_spill] sm:$0xff] %v13188_v51  ;;  %v13193_v36 = vld [vmem:[%s19126_s2] ss:$0 sm:$0xff]  ;;  %v2729_v26 = vpop.permute.xlu0 %2728  ;;  %v19540_v45 = vrot.slane %v13099_v24, 3 }
 0x211   : > { %1908 = vrot.lane.b32.xlu0 %v1873_v16, %s11758_s17  ;;  %v2785_v60 = vadd.f32 %v2729_v26, %v2653_v61  ;;  %v13209_v26 = vadd.f32 %v1788_v0, %v1656_v52  ;;  %v2708_v61 = vrot.slane %v13188_v51, 1  ;;  %v19545_v0 = vrot.slane %v13099_v24, 4 }
 0x212   : > { %2742 = vrot.lane.b32.xlu1 %v2707_v57, %s11758_s17  ;;  %v1662_v57 = vpop.f32.mrf.mxu0  ;;  %v2101_v13 = vsel %vm19175_vm13, %v19540_v45, %v19155_v44  ;;  %v2404_v50 = vadd.f32 %v2349_v6, %v2290_v42  ;;  %v13213_v45 = vadd.f32 %v1790_v29, %v1658_v27  ;;  %v2557_v27 = vrot.slane %v13138_v12, 7 }
 0x213   : > { %v2889_v16 = vadd.f32 %v13193_v36, %v2785_v60  ;;  %v2215_v6 = vsel %vm19184_vm8, %v19545_v0, %v2214_v56  ;;  %v2442_v60 = vrot.slane %v13138_v12, 6  ;;  %v2807_v0 = vadd.s32 %v13160_v3, %v12079_v11 }
 0x214   : > { %v2123_v22 = vpop.permute.xlu1 %2122  ;;  %19542 = vst [vmem:[#allocation36_spill] sm:$0xff] %v13213_v45  ;;  %v1895_v17 = vpop.permute.xlu0 %1894  ;;  %v2518_v42 = vadd.f32 %v13153_v43, %v2404_v50  ;;  %v19547_v43 = vrot.slane %v13099_v24, 6 }
 0x215   : > { %2022 = vrot.lane.b32.xlu0 %v1987_v41, %s11759_s20  ;;  %v1664_v7 = vpop.f32.mrf.mxu0  ;;  %v2946_v41 = vsel %vm2863_vm7, %v2889_v16, 0.0  ;;  %v1949_v16 = vadd.f32 %v1895_v17, %v12872_v23  ;;  %vm2826_vm3 = vcmp.ge.s32.totalorder %v2807_v0, 0  ;;  %vm2845_vm2 = vcmp.lt.s32.totalorder %v2807_v0, 300  ;;  %vm13353_vm7 = vmor %vm2308_vm11, %vm3320_vm10 }
 0x216   : > { %2136 = vrot.lane.b32.xlu1 %v2101_v13, %s11760_s30  ;;  %v2329_v13 = vsel %vm2308_vm11, %v19544_v5, %v19543_v30  ;;  %v13224_v52 = vadd.f32 %v1796_v49, %v1664_v7  ;;  %v13226_v29 = vpack.c.bf16 %v2946_v41, %v2946_v41  ;;  %v1798_v5 = vpop.f32.mrf.mxu1  ;;  %v1988_v30 = vrot.slane %v13209_v26, 2  ;;  %vm13322_vm0 = vmand %vm2826_vm3, %vm2845_vm2 }
 0x217   : > { %v2710_v7 = vrot.slane %v13213_v45, 1  ;;  %v13237_v49 = vadd.f32 %v1794_v34, %v1662_v57  ;;  %v1666_v23 = vpop.f32.mrf.mxu0  ;;  %v2443_v50 = vsel %vm19187_vm9, %v19547_v43, %v2442_v60  ;;  %v1874_v34 = vrot.slane %v13209_v26, 1  ;;  %vm13373_vm10 = vmor %vm19186_vm14, %vm3924_vm15 }
 0x218   : > { %v2237_v44 = vpop.permute.xlu1 %2236  ;;  %3038 = vst.msk [vmem:[#allocation3] sm:$0xf] %vm3037_vm1, %v13226_v29  ;;  %v13251_v55 = vadd.f32 %v1798_v5, %v1666_v23  ;;  %v1989_v57 = vsel %vm19173_vm5, %v19549_v48, %v1988_v30  ;;  %v2635_v5 = vadd.f32 %v13171_v35, %v2518_v42  ;;  %v19551_v48 = vrot.slane %v13138_v12, 1 }
 0x219   : > { %2250 = vrot.lane.b32.xlu0 %v2215_v6, %s11757_s19  ;;  %v19546_v6 = vrot.slane %v13135_v19, 1  ;;  %v19552_v35 = vrot.slane %v13209_v26, 5  ;;  %v19553_v42 = vrot.slane %v13138_v12, 5  ;;  %vm3062_vm2 = vsmask.f32 7440  ;;  %v13405_v45 = vpop.f32.mrf.mxu0 }
 0x21a   : > { %2364 = vrot.lane.b32.xlu1 %v2329_v13, %s11761_s13  ;;  %v2009_v13 = vpop.permute.xlu0 %2008  ;;  %v1875_v31 = vsel %vm19174_vm6, %v19551_v48, %v1874_v34  ;;  %v13286_v48 = vsel %vm19174_vm6, %v2708_v61, %v2710_v7  ;;  %vm13416_vm15 = vmor %vm3061_vm4, %vm3062_vm2  ;;  %vm4056_vm4 = vsmask.f32 4368 }
 0x21b   : > { %v2709_v37 = vsel %vm19174_vm6, %v19546_v6, %v2708_v61  ;;  %v2063_v17 = vadd.f32 %v2009_v13, %v1949_v16  ;;  %v19548_v6 = vrot.slane %v13099_v24, 7  ;;  %v2331_v38 = vsel %vm2308_vm11, %v19553_v42, %v19552_v35 }
 0x21c   : > { %v2351_v41 = vpop.permute.xlu1 %2350  ;;  %v2654_v42 = vadd.f32 %v2635_v5, %v12915_v62  ;;  %v19176_v5 = vrot.slane %v13237_v49, 4 }
 0x21d   : > { %2478 = vrot.lane.b32.xlu0 %v2443_v50, %s11762_s16  ;;  %v2558_v16 = vsel %vm19186_vm14, %v19548_v6, %v2557_v27  ;;  %v2177_v43 = vadd.f32 %v2123_v22, %v2063_v17  ;;  %v19172_v6 = vrot.slane %v13209_v26, 6  ;;  %v13290_v22 = vadd.s32 %v13160_v3, %v12071_v8 }
 0x21e   : > { %2744 = vrot.lane.b32.xlu1 %v2709_v37, %s11758_s17  ;;  %v2465_v50 = vpop.permute.xlu0 %2464  ;;  %v19550_v37 = vrot.slane %v13209_v26, 4  ;;  %v19558_v8 = vrot.slane %v13237_v49, 2 }
 0x21f   : > { %v2291_v17 = vadd.f32 %v2237_v44, %v2177_v43  ;;  %v19555_v44 = vrot.slane %v13138_v12, 3  ;;  %v2445_v61 = vsel %vm19187_vm9, %v2442_v60, %v19172_v6  ;;  %vm2846_vm3 = vcmp.lt.s32.totalorder %v13290_v22, 300 }
 0x220   : > { %v2582_v23 = vpop.permute.xlu1 %2581  ;;  %v2217_v11 = vsel %vm19184_vm8, %v2214_v56, %v19550_v37  ;;  %v19554_v37 = vrot.slane %v13209_v26, 3  ;;  %v13316_v58 = vsel %vm19173_vm5, %v1988_v30, %v19558_v8  ;;  %vm3452_vm5 = vsmask.f32 2304 }
 0x221   : > { %2595 = vrot.lane.b32.xlu0 %v2558_v16, %s11763_s26  ;;  %v2405_v35 = vadd.f32 %v2351_v41, %v2291_v17  ;;  %v13294_v16 = vshrl.u32 %v13226_v29, 16  ;;  %v19557_v41 = vrot.slane %v13237_v49, 1  ;;  %vm19578_vm2 = vcmp.ge.s32.totalorder %v13290_v22, 0  ;;  %v13449_v22 = vpop.f32.mrf.mxu0 }
 0x222   : > { %2024 = vrot.lane.b32.xlu1 %v1989_v57, %s11759_s20  ;;  %v2103_v43 = vsel %vm19175_vm13, %v19555_v44, %v19554_v37  ;;  %v13297_v57 = vshll.u32 %v13226_v29, 16  ;;  %v2011_v13 = vpop.permute.xlu0 %2010  ;;  %v19556_v37 = vrot.slane %v13209_v26, 7  ;;  %vm3754_vm13 = vsmask.f32 1280 }
 0x223   : > { %v13310_v62 = vsel %vm19174_vm6, %v1874_v34, %v19557_v41  ;;  %v19561_v34 = vrot.slane %v13224_v52, 1 }
 0x224   : > { %v2731_v56 = vpop.permute.xlu1 %2730  ;;  %v13305_v44 = vsel %vm19186_vm14, %v2557_v27, %v19556_v37  ;;  %v10587_v27 = vrot.slane %v13226_v29, 10 }
 0x225   : > { %v2786_v17 = vadd.f32 %v2731_v56, %v2654_v42  ;;  %1910 = vrot.lane.b32.xlu0 %v1875_v31, %s11758_s17  ;;  %v13331_v56 = vsel %vm19174_vm6, %v2710_v7, %v19561_v34  ;;  %v2519_v42 = vadd.f32 %v2465_v50, %v2405_v35  ;;  %v3070_v31 = vrot.slane %v13297_v57, 5 }
 0x226   : > { %2252 = vrot.lane.b32.xlu1 %v2217_v11, %s11757_s19  ;;  %v3067_v11 = vrot.slane %v13294_v16, 4  ;;  %v2125_v41 = vpop.permute.xlu0 %2124  ;;  %v19562_v7 = vrot.slane %v13209_v26, 4  ;;  %vm3453_vm6 = vsmask.f32 6416 }
 0x227   : > { %v2890_v0 = vadd.f32 %v13193_v36, %v2786_v17  ;;  %v10586_v17 = vrot.slane %v13226_v29, 9  ;;  %vm13426_vm14 = vmor %vm3452_vm5, %vm3453_vm6  ;;  %vm19584_vm6 = vcmask 1044480  }
 0x228   : > { %v1897_v37 = vpop.permute.xlu1 %1896  ;;  %v13345_v34 = vsel %vm19184_vm8, %v19562_v7, %v19176_v5  ;;  %v2636_v7 = vadd.f32 %v2582_v23, %v2519_v42  ;;  %v3071_v6 = vor.u32 %v3070_v31, %v3067_v11  ;;  %v3757_v11 = vrot.slane %v13294_v16, 6 }
 0x229   : > { %v2947_v50 = vsel %vm13322_vm0, %v2890_v0, 0.0  ;;  %v1950_v35 = vadd.f32 %v1897_v37, %v12918_v1  ;;  %2138 = vrot.lane.b32.xlu0 %v2103_v43, %s11760_s30  ;;  %v3455_v0 = vrot.slane %v13294_v16, 5  ;;  %v3456_v1 = vrot.slane %v13297_v57, 6  ;;  %vm13366_vm0 = vmor %vm19187_vm9, %vm3622_vm12 }
 0x22a   : > { %v13357_v8 = vpack.c.bf16 %v2947_v50, %v2947_v50  ;;  %2366 = vrot.lane.b32.xlu1 %v2331_v38, %s11761_s13  ;;  %v10588_v50 = vrot.slane %v13226_v29, 11  ;;  %v19567_v38 = vmov 0  ;;  %v2353_v60 = vpop.permute.xlu0 %2352  ;;  %v13385_v29 = vpop.f32.mrf.mxu1  ;;  %v3758_v31 = vrot.slane %v13297_v57, 7  ;;  %vm13434_vm9 = vmand %vm19578_vm2, %vm2846_vm3 }
 0x22b   : > { %v2064_v5 = vadd.f32 %v2011_v13, %v1950_v35  ;;  %v19568_v38 = vsel %vm13373_vm10, 4294967295, %v19567_v38  ;;  %vm3755_vm12 = vsmask.f32 5392  ;;  %vm3056_vm8 = vsmask.f32 256 }
 0x22c   : > { %19569 = vst [vmem:[#allocation37_spill] sm:$0xff] %v19568_v38  ;;  %v2239_v43 = vpop.permute.xlu1 %2238  ;;  %v3324_v2 = vrot.slane %v13357_v8, 5  ;;  %v19185_v39 = vrot.slane %v13357_v8, 6  ;;  %v3074_v23 = vshll.u32 %v13357_v8, 16  ;;  %3039 = vst.msk [vmem:[#allocation3 + $0x8] sm:$0xf] %vm3037_vm1, %v13357_v8 }
 0x22d   : > { %4277 = vst.msk [vmem:[#allocation3 + $0x4] sm:$0xf] %vm3037_vm1, %v13357_v8  ;;  %v2178_v13 = vadd.f32 %v2125_v41, %v2064_v5  ;;  %v13388_v42 = vshrl.u32 %v13357_v8, 16  ;;  %2480 = vrot.lane.b32.xlu0 %v2445_v61, %s11762_s16  ;;  %v3457_v41 = vor.u32 %v3456_v1, %v3455_v0  ;;  %v2655_v61 = vadd.f32 %v2636_v7, %v12952_v53  ;;  %v13421_v7 = vpop.f32.mrf.mxu1  ;;  %vm13475_vm5 = vmor %vm3754_vm13, %vm3755_vm12 }
 0x22e   : > { %2746 = vrot.lane.b32.xlu1 %v13286_v48, %s11758_s17  ;;  %v13397_v35 = vsel %vm13353_vm7, %v10586_v17, %v3324_v2  ;;  %v13403_v5 = vsel %vm13366_vm0, %v10587_v27, %v19185_v39  ;;  %v19572_v46 = vrot.slane %v13357_v8, 7  ;;  %v2467_v0 = vpop.permute.xlu0 %2466  ;;  %v3076_v1 = vrot.slane %v3074_v23, 5  ;;  %vm13491_vm13 = vmor %vm3056_vm8, %vm4056_vm4 }
 0x22f   : > { %19570 = vst [vmem:[#allocation38_spill] sm:$0xff] %v13397_v35  ;;  %19571 = vst [vmem:[#allocation39_spill] sm:$0xff] %v13403_v5  ;;  %v2292_v57 = vadd.f32 %v2239_v43, %v2178_v13  ;;  %v3072_v39 = vrot.slane %v3071_v6, 4  ;;  %v3459_v43 = vrot.slane %v13388_v42, 5  ;;  %v3460_v53 = vrot.slane %v3074_v23, 6 }
 0x230   : > { %v13412_v48 = vsel %vm13373_vm10, %v10588_v50, %v19572_v46  ;;  %v2733_v27 = vpop.permute.xlu1 %2732  ;;  %v3080_v46 = vrot.slane %v13388_v42, 4  ;;  %v3762_v51 = vrot.slane %v3074_v23, 7  ;;  %v19593_v6 = vrot.slane %v13357_v8, 6  ;;  %v11419_v50 = vld [vmem:[%s19129_s5 + $0x204] ss:$8 sps:$4 sm:$0xff]  }
 0x231   : > { %19573 = vst [vmem:[#allocation40_spill] sm:$0xff] %v13412_v48  ;;  %v2787_v13 = vadd.f32 %v2733_v27, %v2655_v61  ;;  %v3759_v48 = vor.u32 %v3758_v31, %v3757_v11  ;;  %2597 = vrot.lane.b32.xlu0 %v13305_v44, %s11763_s26  ;;  %v13444_v61 = vsel %vm13416_vm15, %v3072_v39, %v3076_v1  ;;  %v3458_v31 = vrot.slane %v3457_v41, 4 }
 0x232   : > { %1912 = vrot.lane.b32.xlu1 %v13310_v62, %s11758_s17  ;;  %19581 = vst [vmem:[#allocation41_spill] sm:$0xff] %v13444_v61  ;;  %v13446_v11 = vor.u32 %v3460_v53, %v3459_v43  ;;  %v3761_v27 = vrot.slane %v13388_v42, 6  ;;  %v2406_v5 = vadd.f32 %v2353_v60, %v2292_v57  ;;  %v13455_v62 = vpop.permute.xlu0 %2583  ;;  %v19582_v39 = vrot.slane %v13237_v49, 3 }
 0x233   : > { %v2891_v35 = vadd.f32 %v13193_v36, %v2787_v13  ;;  %v19583_v43 = vrot.slane %v13209_v26, 3  ;;  %v19585_v53 = vrot.slane %v13237_v49, 5  ;;  %v19586_v61 = vrot.slane %v13209_v26, 5 }
 0x234   : > { %v13453_v12 = vpop.permute.xlu1 %2126  ;;  %v13471_v13 = vsel %vm13426_vm14, %v3458_v31, %v13446_v11  ;;  %v3081_v25 = vor.u32 %v3080_v46, %v3076_v1  ;;  %v3326_v31 = vrot.slane %v3324_v2, 4  ;;  %v1674_v1 = vpop.f32.mrf.mxu0  ;;  %v2520_v46 = vadd.f32 %v2467_v0, %v2406_v5 }
 0x235   : > { %v2105_v41 = vsel %vm19584_vm6, %v19583_v43, %v19582_v39  ;;  %v2333_v60 = vsel %vm2308_vm11, %v19586_v61, %v19585_v53  ;;  %19587 = vst [vmem:[#allocation42_spill] sm:$0xff] %v13471_v13  ;;  %v13479_v39 = vpop.f32.mrf.mxu1  ;;  %v2948_v43 = vsel %vm13434_vm9, %v2891_v35, 0.0  ;;  %v3763_v61 = vor.u32 %v3762_v51, %v3761_v27  ;;  %2026 = vrot.lane.b32.xlu0 %v13316_v58, %s11759_s20 }
 0x236   : > { %v3760_v53 = vrot.slane %v3759_v48, 4  ;;  %v13483_v57 = vpack.c.bf16 %v2948_v43, %v2948_v43  ;;  %2254 = vrot.lane.b32.xlu1 %v13345_v34, %s11757_s19  ;;  %v10589_v35 = vrot.slane %v13294_v16, 11  ;;  %v19592_v51 = vrot.slane %v13388_v42, 7  ;;  %v1899_v19 = vpop.permute.xlu0 %1898 }
 0x237   : > { %v3628_v58 = vrot.slane %v19593_v6, 4  ;;  %v19594_v27 = vrot.slane %v13357_v8, 7  ;;  %v13516_v8 = vpop.f32.mrf.mxu1  ;;  %v1951_v0 = vadd.f32 %v1899_v19, %v12954_v54  ;;  %vm19602_vm9 = vcmask 1041408  }
 0x238   : > { %v4061_v48 = vor.u32 %v19592_v51, %v3074_v23  ;;  %v13504_v2 = vsel %vm13475_vm5, %v3760_v53, %v3763_v61  ;;  %v2241_v43 = vpop.permute.xlu1 %2240  ;;  %v19195_v33 = vrot.slane %v13483_v57, 5  ;;  %v19196_v16 = vrot.slane %v13483_v57, 6  ;;  %3040 = vst.msk [vmem:[#allocation3 + $0x10] sm:$0xf] %vm3037_vm1, %v13483_v57  ;;  %4278 = vst.msk [vmem:[#allocation3 + $0xc] sm:$0xf] %vm3037_vm1, %v13483_v57 }
 0x239   : > { %v3930_v34 = vrot.slane %v19594_v27, 4  ;;  %19595 = vst [vmem:[#allocation43_spill] sm:$0xff] %v13504_v2  ;;  %v19197_v23 = vrot.slane %v13483_v57, 7  ;;  %v13510_v5 = vshll.u32 %v13483_v57, 16  ;;  %v3082_v53 = vrot.slane %v3081_v25, 4  ;;  %2140 = vrot.lane.b32.xlu0 %v2105_v41, %s11760_s30  ;;  %v1676_v41 = vpop.f32.mrf.mxu0 }
 0x23a   : > { %v13520_v51 = vshrl.u32 %v13483_v57, 16  ;;  %v13524_v6 = vsel %vm13491_vm13, %v10589_v35, %v4061_v48  ;;  %2368 = vrot.lane.b32.xlu1 %v2333_v60, %s11761_s13  ;;  %v13532_v27 = vsel %vm13353_vm7, %v3326_v31, %v19195_v33  ;;  %v13538_v25 = vsel %vm13366_vm0, %v3628_v58, %v19196_v16  ;;  %v2013_v58 = vpop.permute.xlu0 %2012 }
 0x23b   : > { %19596 = vst [vmem:[#allocation44_spill] sm:$0xff] %v13524_v6  ;;  %19597 = vst [vmem:[#allocation45_spill] sm:$0xff] %v13532_v27  ;;  %v13544_v54 = vsel %vm13373_vm10, %v3930_v34, %v19197_v23  ;;  %v19202_v19 = vrot.slane %v13510_v5, 5  ;;  %v3465_v31 = vrot.slane %v13510_v5, 6  ;;  %v3767_v48 = vrot.slane %v13510_v5, 7 }
 0x23c   : > { %19598 = vst [vmem:[#allocation46_spill] sm:$0xff] %v13538_v25  ;;  %19599 = vst [vmem:[#allocation47_spill] sm:$0xff] %v13544_v54  ;;  %v3464_v60 = vrot.slane %v13520_v51, 5  ;;  %v3766_v35 = vrot.slane %v13520_v51, 6  ;;  %v2355_v33 = vpop.permute.xlu1 %2354  ;;  %v19600_v16 = vrot.slane %v13237_v49, 6  ;;  %v19601_v6 = vrot.slane %v13209_v26, 6  ;;  %v1810_v25 = vpop.f32.mrf.mxu1 }
 0x23d   : > { %v13560_v23 = vsel %vm13416_vm15, %v3082_v53, %v19202_v19  ;;  %v3463_v2 = vrot.slane %v13446_v11, 4  ;;  %v19201_v54 = vrot.slane %v13520_v51, 7  ;;  %v2065_v27 = vadd.f32 %v2013_v58, %v1951_v0 }
 0x23e   : > { %v2447_v34 = vsel %vm19602_vm9, %v19601_v6, %v19600_v16  ;;  %v13564_v24 = vor.u32 %v3465_v31, %v3464_v60  ;;  %v3765_v47 = vrot.slane %v3763_v61, 4  ;;  %v13566_v9 = vor.u32 %v3767_v48, %v3766_v35  ;;  %2748 = vrot.lane.b32.xlu1 %v13331_v56, %s11758_s17  ;;  %v1678_v61 = vpop.f32.mrf.mxu0 }
 0x23f   : > { %2482 = vrot.lane.b32.xlu0 %v2447_v34, %s11762_s16  ;;  %v2809_v16 = vadd.s32 %v13160_v3, %v12076_v10  ;;  %v19603_v53 = vrot.slane %v13388_v42, 7  ;;  %v13580_v0 = vor.u32 %v19201_v54, %v13510_v5  ;;  %v2637_v6 = vadd.f32 %v13455_v62, %v2520_v46 }
 0x240   : > { %v2179_v60 = vadd.f32 %v13453_v12, %v2065_v27  ;;  %v13587_v56 = vsel %vm13426_vm14, %v3463_v2, %v13564_v24  ;;  %v13592_v42 = vsel %vm13475_vm5, %v3765_v47, %v13566_v9  ;;  %v13596_v31 = vadd.f32 %v13385_v29, %v13405_v45  ;;  %v2469_v62 = vpop.permute.xlu1 %2468  ;;  %v13602_v12 = vpop.permute.xlu0 %2585 }
 0x241   : > { %v13575_v11 = vrot.slane %v19603_v53, 4  ;;  %19604 = vst [vmem:[#allocation48_spill] sm:$0xff] %v13580_v0  ;;  %v13600_v35 = vadd.f32 %v13421_v7, %v13449_v22  ;;  %v13608_v2 = vpop.f32.mrf.mxu1  ;;  %v19605_v47 = vrot.slane %v13251_v55, 1  ;;  %v19606_v27 = vrot.slane %v13237_v49, 1 }
 0x242   : > { %vm19607_vm3 = vcmask 1046528   ;;  %v19608_v29 = vrot.slane %v13237_v49, 7  ;;  %v19609_v7 = vrot.slane %v13209_v26, 7  ;;  %vm19610_vm12 = vcmask 1040384  }
 0x243   : > { %v1879_v45 = vsel %vm19607_vm3, %v19606_v27, %v19605_v47  ;;  %v19203_v48 = vrot.slane %v13251_v55, 4  ;;  %v19204_v58 = vrot.slane %v13251_v55, 2  ;;  %v13623_v34 = vadd.f32 %v13479_v39, %v1674_v1  ;;  %v13629_v47 = vpop.f32.mrf.mxu0 }
 0x244   : > { %v2562_v22 = vsel %vm19610_vm12, %v19609_v7, %v19608_v29  ;;  %v13625_v53 = vadd.f32 %v1810_v25, %v1678_v61  ;;  %1914 = vrot.lane.b32.xlu1 %v1879_v45, %s11758_s17  ;;  %v2293_v27 = vadd.f32 %v2241_v43, %v2179_v60  ;;  %vm2828_vm4 = vcmp.ge.s32.totalorder %v2809_v16, 0  ;;  %v2735_v46 = vpop.permute.xlu1 %2734  ;;  %v2015_v54 = vpop.permute.xlu0 %2014 }
 0x245   : > { %19611 = vst [vmem:[#allocation49_spill] sm:$0xff] %v13623_v34  ;;  %2599 = vrot.lane.b32.xlu0 %v2562_v22, %s11763_s26  ;;  %vm2847_vm2 = vcmp.lt.s32.totalorder %v2809_v16, 300  ;;  %v2656_v29 = vadd.f32 %v2637_v6, %v12976_v63  ;;  %v19207_v7 = vrot.slane %v13596_v31, 1  ;;  %v19205_v39 = vrot.slane %v13251_v55, 5  ;;  %v1816_v61 = vpop.f32.mrf.mxu1 }
 0x246   : > { %19612 = vst [vmem:[#allocation50_spill] sm:$0xff] %v13625_v53  ;;  %v19206_v1 = vrot.slane %v13251_v55, 3  ;;  %v19613_v43 = vrot.slane %v13237_v49, 4  ;;  %vm19614_vm6 = vcmask 1043456   ;;  %v19615_v63 = vrot.slane %v13237_v49, 2  ;;  %vm2866_vm3 = vmand %vm2828_vm4, %vm2847_vm2 }
 0x247   : > { %v2788_v45 = vadd.f32 %v2735_v46, %v2656_v29  ;;  %vm19616_vm9 = vcmask 1045504   ;;  %v19208_v22 = vrot.slane %v13600_v35, 1  ;;  %v3090_v46 = vrot.slane %v13520_v51, 4 }
 0x248   : > { %v2221_v60 = vsel %vm19614_vm6, %v19613_v43, %v19203_v48  ;;  %v1993_v6 = vsel %vm19616_vm9, %v19615_v63, %v19204_v58  ;;  %v13653_v29 = vadd.f32 %v13516_v8, %v1676_v41  ;;  %v1684_v48 = vpop.f32.mrf.mxu0  ;;  %v2407_v25 = vadd.f32 %v2355_v33, %v2293_v27  ;;  %v1901_v19 = vpop.permute.xlu1 %1900 }
 0x249   : > { %2256 = vrot.lane.b32.xlu1 %v2221_v60, %s11757_s19  ;;  %2028 = vrot.lane.b32.xlu0 %v1993_v6, %s11759_s20  ;;  %v2892_v63 = vadd.f32 %v13193_v36, %v2788_v45  ;;  %v13657_v58 = vadd.f32 %v1816_v61, %v1684_v48  ;;  %v2129_v16 = vpop.permute.xlu0 %2128  ;;  %v19617_v60 = vrot.slane %v13237_v49, 5  ;;  %v19618_v8 = vrot.slane %v13237_v49, 3 }
 0x24a   : > { %vm19619_vm12 = vcmask 1044480   ;;  %v19620_v33 = vrot.slane %v13224_v52, 1  ;;  %vm19621_vm4 = vcmask 1046528   ;;  %v1952_v61 = vadd.f32 %v1901_v19, %v12985_v32 }
 0x24b   : > { %v2335_v6 = vsel %vm2308_vm11, %v19617_v60, %v19205_v39  ;;  %v2107_v41 = vsel %vm19619_vm12, %v19618_v8, %v19206_v1  ;;  %v2949_v27 = vsel %vm2866_vm3, %v2892_v63, 0.0  ;;  %v19622_v45 = vrot.slane %v13251_v55, 6  ;;  %vm19626_vm6 = vmmov %vm19621_vm4 }
 0x24c   : > { %v2715_v48 = vsel %vm19621_vm4, %v19620_v33, %v19207_v7  ;;  %v19623_v43 = vrot.slane %v13237_v49, 6  ;;  %vm19624_vm2 = vcmask 1041408   ;;  %v19625_v39 = vrot.slane %v13251_v55, 1 }
 0x24d   : > { %v13685_v1 = vpack.c.bf16 %v2949_v27, %v2949_v27  ;;  %2370 = vrot.lane.b32.xlu1 %v2335_v6, %s11761_s13  ;;  %2142 = vrot.lane.b32.xlu0 %v2107_v41, %s11760_s30  ;;  %v19627_v63 = vrot.slane %v13510_v5, 5  ;;  %v2243_v6 = vpop.permute.xlu0 %2242  ;;  %v19632_v19 = vrot.slane %v13251_v55, 7  ;;  %vm19634_vm9 = vcmask 1040384  }
 0x24e   : > { %v2449_v60 = vsel %vm19624_vm2, %v19623_v43, %v19622_v45  ;;  %v1881_v8 = vsel %vm19626_vm6, %v19625_v39, %v19208_v22  ;;  %v2521_v43 = vadd.f32 %v2469_v62, %v2407_v25  ;;  %v19628_v39 = vrot.slane %v13483_v57, 5  ;;  %v13697_v22 = vpop.permute.xlu1 %2356 }
 0x24f   : > { %v3091_v33 = vor.u32 %v3090_v46, %v19627_v63  ;;  %v13700_v41 = vshll.u32 %v13685_v1, 16  ;;  %v19211_v32 = vrot.slane %v13685_v1, 5  ;;  %3041 = vst.msk [vmem:[#allocation3 + $0x18] sm:$0xf] %vm3037_vm1, %v13685_v1  ;;  %4279 = vst.msk [vmem:[#allocation3 + $0x14] sm:$0xf] %vm3037_vm1, %v13685_v1  ;;  %v2066_v62 = vadd.f32 %v2015_v54, %v1952_v61 }
 0x250   : > { %v3329_v27 = vrot.slane %v19628_v39, 4  ;;  %v2810_v25 = vadd.s32 %v13160_v3, %v12089_v15  ;;  %v19629_v46 = vrot.slane %v13483_v57, 6  ;;  %v13714_v39 = vshrl.u32 %v13685_v1, 16 }
 0x251   : > { %2750 = vrot.lane.b32.xlu1 %v2715_v48, %s11758_s17  ;;  %2484 = vrot.lane.b32.xlu0 %v2449_v60, %s11762_s16  ;;  %v3092_v7 = vrot.slane %v3091_v33, 4  ;;  %v3096_v45 = vrot.slane %v13700_v41, 5  ;;  %v19631_v61 = vrot.slane %v13483_v57, 7  ;;  %v19633_v48 = vrot.slane %v13237_v49, 7  ;;  %v13742_v57 = vpop.permute.xlu0 %2587 }
 0x252   : > { %v3631_v63 = vrot.slane %v19629_v46, 4  ;;  %v13723_v54 = vsel %vm13353_vm7, %v3329_v27, %v19211_v32  ;;  %v2638_v46 = vadd.f32 %v13602_v12, %v2521_v43  ;;  %v19635_v15 = vrot.slane %v13685_v1, 6  ;;  %v13740_v27 = vpop.permute.xlu1 %2470 }
 0x253   : > { %19630 = vst [vmem:[#allocation51_spill] sm:$0xff] %v13723_v54  ;;  %v3933_v5 = vrot.slane %v19631_v61, 4  ;;  %v2564_v60 = vsel %vm19634_vm9, %v19633_v48, %v19632_v19  ;;  %v19637_v12 = vrot.slane %v13600_v35, 4  ;;  %v19638_v43 = vrot.slane %v13251_v55, 4 }
 0x254   : > { %v13738_v10 = vsel %vm13366_vm0, %v3631_v63, %v19635_v15  ;;  %vm19639_vm3 = vcmask 1043456   ;;  %v13751_v19 = vsel %vm13416_vm15, %v3092_v7, %v3096_v45  ;;  %v19641_v48 = vrot.slane %v13685_v1, 7 }
 0x255   : > { %19636 = vst [vmem:[#allocation52_spill] sm:$0xff] %v13738_v10  ;;  %v2223_v61 = vsel %vm19639_vm3, %v19638_v43, %v19637_v12  ;;  %19640 = vst [vmem:[#allocation53_spill] sm:$0xff] %v13751_v19  ;;  %v3469_v63 = vrot.slane %v13714_v39, 5  ;;  %v2180_v32 = vadd.f32 %v2129_v16, %v2066_v62  ;;  %v19643_v33 = vrot.slane %v13600_v35, 2  ;;  %1916 = vrot.lane.b32.xlu1 %v1881_v8, %s11758_s17  ;;  %v2131_v12 = vpop.permute.xlu0 %2130 }
 0x256   : > { %v13757_v15 = vsel %vm13373_vm10, %v3933_v5, %v19641_v48  ;;  %v19644_v10 = vrot.slane %v13251_v55, 2  ;;  %vm19645_vm12 = vcmask 1045504   ;;  %v3470_v7 = vrot.slane %v13700_v41, 6  ;;  %2601 = vrot.lane.b32.xlu0 %v2564_v60, %s11763_s26 }
 0x257   : > { %19642 = vst [vmem:[#allocation54_spill] sm:$0xff] %v13757_v15  ;;  %vm2829_vm4 = vcmp.ge.s32.totalorder %v2810_v25, 0  ;;  %v3771_v5 = vrot.slane %v13714_v39, 6  ;;  %v3772_v43 = vrot.slane %v13700_v41, 7  ;;  %v19214_v16 = vrot.slane %v13714_v39, 7 }
 0x258   : > { %v1995_v54 = vsel %vm19645_vm12, %v19644_v10, %v19643_v33  ;;  %vm2848_vm2 = vcmp.lt.s32.totalorder %v2810_v25, 300  ;;  %v2657_v62 = vadd.f32 %v2638_v46, %v13010_v59  ;;  %v13773_v48 = vor.u32 %v3470_v7, %v3469_v63  ;;  %v2737_v33 = vpop.permute.xlu1 %2736 }
 0x259   : > { %v3468_v10 = vrot.slane %v13564_v24, 4  ;;  %v13776_v15 = vor.u32 %v3772_v43, %v3771_v5  ;;  %v3770_v8 = vrot.slane %v13566_v9, 4  ;;  %v19646_v60 = vrot.slane %v13520_v51, 7  ;;  %vm13795_vm6 = vmand %vm2829_vm4, %vm2848_vm2  ;;  %2258 = vrot.lane.b32.xlu1 %v2223_v61, %s11757_s19 }
 0x25a   : > { %v13786_v0 = vor.u32 %v19214_v16, %v13700_v41  ;;  %v2294_v59 = vadd.f32 %v2243_v6, %v2180_v32  ;;  %v2789_v46 = vadd.f32 %v2737_v33, %v2657_v62  ;;  %v3100_v63 = vrot.slane %v13714_v39, 4  ;;  %2030 = vrot.lane.b32.xlu0 %v1995_v54, %s11759_s20 }
 0x25b   : > { %v13781_v19 = vrot.slane %v19646_v60, 4  ;;  %v13792_v24 = vsel %vm13426_vm14, %v3468_v10, %v13773_v48  ;;  %v13806_v6 = vsel %vm13475_vm5, %v3770_v8, %v13776_v15  ;;  %v13814_v25 = vadd.f32 %v13608_v2, %v13629_v47  ;;  %v2245_v10 = vpop.permute.xlu0 %2244 }
 0x25c   : > { %19648 = vst [vmem:[#allocation56_spill] sm:$0xff] %v13786_v0  ;;  %19649 = vst [vmem:[#allocation57_spill] sm:$0xff] %v13792_v24  ;;  %v2893_v61 = vadd.f32 %v13193_v36, %v2789_v46  ;;  %v19653_v7 = vrot.slane %v13623_v34, 1  ;;  %v19654_v5 = vrot.slane %v13596_v31, 1  ;;  %vm19655_vm9 = vcmask 1046528   ;;  %v1903_v62 = vpop.permute.xlu1 %1902 }
 0x25d   : > { %19647 = vst [vmem:[#allocation55_spill] sm:$0xff] %v13781_v19  ;;  %19652 = vst [vmem:[#allocation58_spill] sm:$0xff] %v13806_v6  ;;  %v19656_v33 = vrot.slane %v13600_v35, 5  ;;  %v19657_v8 = vrot.slane %v13251_v55, 5  ;;  %v19658_v2 = vrot.slane %v13600_v35, 3  ;;  %v19659_v47 = vrot.slane %v13251_v55, 3 }
 0x25e   : > { %v2717_v43 = vsel %vm19655_vm9, %v19654_v5, %v19653_v7  ;;  %vm19660_vm3 = vcmask 1044480   ;;  %v19661_v41 = vrot.slane %v13600_v35, 6  ;;  %v19662_v54 = vrot.slane %v13251_v55, 6  ;;  %vm19666_vm4 = vmmov %vm19655_vm9 }
 0x25f   : > { %v2337_v60 = vsel %vm2308_vm11, %v19657_v8, %v19656_v33  ;;  %v2109_v46 = vsel %vm19660_vm3, %v19659_v47, %v19658_v2  ;;  %vm19663_vm12 = vcmask 1041408   ;;  %v2408_v16 = vadd.f32 %v13697_v22, %v2294_v59 }
 0x260   : > { %v2451_v7 = vsel %vm19663_vm12, %v19662_v54, %v19661_v41  ;;  %v2950_v32 = vsel %vm13795_vm6, %v2893_v61, 0.0  ;;  %v3101_v8 = vor.u32 %v3100_v63, %v3096_v45  ;;  %2372 = vrot.lane.b32.xlu1 %v2337_v60, %s11761_s13  ;;  %2144 = vrot.lane.b32.xlu0 %v2109_v46, %s11760_s30  ;;  %v19664_v2 = vrot.slane %v13653_v29, 1 }
 0x261   : > { %v13843_v51 = vpack.c.bf16 %v2950_v32, %v2950_v32  ;;  %v19665_v41 = vrot.slane %v13600_v35, 1  ;;  %v19667_v22 = vrot.slane %v13600_v35, 7  ;;  %v19668_v59 = vrot.slane %v13251_v55, 7 }
 0x262   : > { %vm19669_vm2 = vcmask 1040384   ;;  %v1953_v63 = vadd.f32 %v1903_v62, %v13012_v21  ;;  %v19670_v32 = vrot.slane %v13685_v1, 5  ;;  %v19671_v60 = vrot.slane %v13685_v1, 6 }
 0x263   : > { %v1883_v54 = vsel %vm19666_vm4, %v19665_v41, %v19664_v2  ;;  %v2566_v9 = vsel %vm19669_vm2, %v19668_v59, %v19667_v22  ;;  %v19672_v46 = vrot.slane %v13685_v1, 7  ;;  %v2017_v2 = vpop.permute.xlu1 %2016  ;;  %v13865_v41 = vpop.permute.xlu0 %2589  ;;  %v19215_v5 = vrot.slane %v13843_v51, 5  ;;  %3042 = vst.msk [vmem:[#allocation3 + $0x20] sm:$0xf] %vm3037_vm1, %v13843_v51  ;;  %4280 = vst.msk [vmem:[#allocation3 + $0x1c] sm:$0xf] %vm3037_vm1, %v13843_v51 }
 0x264   : > { %v3332_v61 = vrot.slane %v19670_v32, 4  ;;  %v3634_v47 = vrot.slane %v19671_v60, 4  ;;  %v19218_v22 = vrot.slane %v13843_v51, 6  ;;  %v19217_v59 = vrot.slane %v13843_v51, 7  ;;  %v1818_v1 = vpop.f32.mrf.mxu1  ;;  %2752 = vrot.lane.b32.xlu1 %v2717_v43, %s11758_s17  ;;  %2486 = vrot.lane.b32.xlu0 %v2451_v7, %s11762_s16  ;;  %v1686_v7 = vpop.f32.mrf.mxu0  ;;  %vm19691_vm12 = vmmov %vm19669_vm2 }
 0x265   : > { %v3936_v33 = vrot.slane %v19672_v46, 4  ;;  %v13871_v21 = vshll.u32 %v13843_v51, 16  ;;  %v2522_v62 = vadd.f32 %v13740_v27, %v2408_v16  ;;  %v2067_v32 = vadd.f32 %v2017_v2, %v1953_v63 }
 0x266   : > { %v3102_v60 = vrot.slane %v3101_v8, 4  ;;  %v13879_v46 = vshrl.u32 %v13843_v51, 16  ;;  %v13887_v45 = vsel %vm13353_vm7, %v3332_v61, %v19215_v5  ;;  %v13893_v27 = vsel %vm13366_vm0, %v3634_v47, %v19218_v22 }
 0x267   : > { %v13899_v16 = vsel %vm13373_vm10, %v3936_v33, %v19217_v59  ;;  %v19220_v43 = vrot.slane %v13871_v21, 5  ;;  %v2181_v8 = vadd.f32 %v2131_v12, %v2067_v32  ;;  %v3475_v61 = vrot.slane %v13871_v21, 6  ;;  %v2359_v5 = vpop.permute.xlu1 %2358  ;;  %v1905_v0 = vpop.permute.xlu0 %1904 }
 0x268   : > { %19673 = vst [vmem:[#allocation59_spill] sm:$0xff] %v13899_v16  ;;  %v3474_v63 = vrot.slane %v13879_v46, 5  ;;  %v3776_v2 = vrot.slane %v13879_v46, 6  ;;  %v3777_v59 = vrot.slane %v13871_v21, 7  ;;  %v19222_v12 = vrot.slane %v13879_v46, 7  ;;  %v1820_v32 = vpop.f32.mrf.mxu1  ;;  %1918 = vrot.lane.b32.xlu1 %v1883_v54, %s11758_s17  ;;  %2603 = vrot.lane.b32.xlu0 %v2566_v9, %s11763_s26 }
 0x269   : > { %v13910_v33 = vsel %vm13416_vm15, %v3102_v60, %v19220_v43  ;;  %v2295_v22 = vadd.f32 %v2245_v10, %v2181_v8  ;;  %v19225_v19 = vrot.slane %v13653_v29, 7  ;;  %v3473_v6 = vrot.slane %v13773_v48, 4  ;;  %v1688_v48 = vpop.f32.mrf.mxu0 }
 0x26a   : > { %19674 = vst [vmem:[#allocation60_spill] sm:$0xff] %v13910_v33  ;;  %v13916_v24 = vor.u32 %v3475_v61, %v3474_v63  ;;  %v3775_v47 = vrot.slane %v13776_v15, 4  ;;  %v13921_v60 = vor.u32 %v3777_v59, %v3776_v2  ;;  %v19675_v43 = vrot.slane %v13714_v39, 7 }
 0x26b   : > { %v13930_v10 = vor.u32 %v19222_v12, %v13871_v21  ;;  %v2639_v8 = vadd.f32 %v13742_v57, %v2522_v62  ;;  %v2409_v63 = vadd.f32 %v2359_v5, %v2295_v22  ;;  %v2811_v54 = vadd.s32 %v13160_v3, %v12086_v14  ;;  %v2473_v59 = vpop.permute.xlu1 %2472 }
 0x26c   : > { %v13925_v33 = vrot.slane %v19675_v43, 4  ;;  %v13938_v15 = vsel %vm13426_vm14, %v3473_v6, %v13916_v24  ;;  %v13940_v39 = vadd.f32 %v1818_v1, %v1686_v7  ;;  %v13942_v9 = vadd.f32 %v1820_v32, %v1688_v48  ;;  %v2019_v43 = vpop.permute.xlu0 %2018 }
 0x26d   : > { %19677 = vst [vmem:[#allocation62_spill] sm:$0xff] %v13930_v10  ;;  %19678 = vst [vmem:[#allocation63_spill] sm:$0xff] %v13938_v15  ;;  %v13947_v61 = vsel %vm13475_vm5, %v3775_v47, %v13921_v60  ;;  %v19680_v5 = vrot.slane %v13653_v29, 4  ;;  %v19681_v6 = vrot.slane %v13600_v35, 4  ;;  %vm19682_vm6 = vcmask 1043456  }
 0x26e   : > { %19676 = vst [vmem:[#allocation61_spill] sm:$0xff] %v13925_v33  ;;  %19679 = vst [vmem:[#allocation64_spill] sm:$0xff] %v13947_v61  ;;  %v19683_v1 = vrot.slane %v13653_v29, 2  ;;  %v19684_v62 = vrot.slane %v13600_v35, 2  ;;  %vm19685_vm9 = vcmask 1045504   ;;  %v19686_v2 = vrot.slane %v13653_v29, 5 }
 0x26f   : > { %v2225_v22 = vsel %vm19682_vm6, %v19681_v6, %v19680_v5  ;;  %v19687_v47 = vrot.slane %v13600_v35, 5  ;;  %v19688_v5 = vrot.slane %v13653_v29, 3  ;;  %v19689_v6 = vrot.slane %v13600_v35, 3 }
 0x270   : > { %v1997_v7 = vsel %vm19685_vm9, %v19684_v62, %v19683_v1  ;;  %2260 = vrot.lane.b32.xlu1 %v2225_v22, %s11757_s19  ;;  %v19690_v1 = vrot.slane %v13600_v35, 7  ;;  %v2523_v12 = vadd.f32 %v2473_v59, %v2409_v63  ;;  %vm2830_vm4 = vcmp.ge.s32.totalorder %v2811_v54, 0  ;;  %v2361_v48 = vpop.permute.xlu0 %2360 }
 0x271   : > { %v2339_v32 = vsel %vm2308_vm11, %v19687_v47, %v19686_v2  ;;  %2032 = vrot.lane.b32.xlu0 %v1997_v7, %s11759_s20  ;;  %v2111_v57 = vsel %vm19660_vm3, %v19689_v6, %v19688_v5  ;;  %v1884_v2 = vrot.slane %v13814_v25, 1  ;;  %vm2849_vm2 = vcmp.lt.s32.totalorder %v2811_v54, 300  ;;  %v2739_v7 = vpop.permute.xlu1 %2738 }
 0x272   : > { %v2568_v62 = vsel %vm19691_vm12, %v19690_v1, %v19225_v19  ;;  %v2658_v22 = vadd.f32 %v2639_v8, %v13038_v4  ;;  %v19692_v14 = vrot.slane %v13625_v53, 1  ;;  %v19693_v5 = vrot.slane %v13623_v34, 1  ;;  %vm14000_vm3 = vmand %vm2830_vm4, %vm2849_vm2 }
 0x273   : > { %vm19694_vm6 = vcmask 1046528   ;;  %v19695_v63 = vrot.slane %v13653_v29, 6  ;;  %v19696_v54 = vrot.slane %v13600_v35, 6  ;;  %vm19697_vm9 = vcmask 1041408  }
 0x274   : > { %v2719_v6 = vsel %vm19694_vm6, %v19693_v5, %v19692_v14  ;;  %v2790_v47 = vadd.f32 %v2739_v7, %v2658_v22  ;;  %v2812_v8 = vadd.s32 %v13160_v3, %v12101_v20  ;;  %2374 = vrot.lane.b32.xlu1 %v2339_v32, %s11761_s13  ;;  %v19700_v22 = vrot.slane %v13653_v29, 1  ;;  %vm19701_vm12 = vmmov %vm19694_vm6  ;;  %v2475_v33 = vpop.permute.xlu0 %2474 }
 0x275   : > { %v2453_v4 = vsel %vm19697_vm9, %v19696_v54, %v19695_v63  ;;  %2146 = vrot.lane.b32.xlu0 %v2111_v57, %s11760_s30  ;;  %v19702_v5 = vrot.slane %v13814_v25, 4  ;;  %v19703_v63 = vrot.slane %v13653_v29, 4  ;;  %vm19704_vm6 = vcmask 1043456   ;;  %vm19707_vm4 = vmmov %vm19701_vm12  ;;  %v2133_v20 = vpop.permute.xlu1 %2132 }
 0x276   : > { %v1885_v7 = vsel %vm19701_vm12, %v19700_v22, %v1884_v2  ;;  %v19705_v59 = vrot.slane %v13657_v58, 1  ;;  %v19706_v19 = vrot.slane %v13625_v53, 1  ;;  %v1954_v32 = vadd.f32 %v1905_v0, %v13040_v28  ;;  %vm19715_vm12 = vmmov %vm19707_vm4 }
 0x277   : > { %v2227_v54 = vsel %vm19704_vm6, %v19703_v63, %v19702_v5  ;;  %v2640_v57 = vadd.f32 %v13865_v41, %v2523_v12  ;;  %v2894_v10 = vadd.f32 %v13193_v36, %v2790_v47  ;;  %v3110_v22 = vrot.slane %v13879_v46, 4 }
 0x278   : > { %v14019_v1 = vsel %vm19707_vm4, %v19706_v19, %v19705_v59  ;;  %v19708_v61 = vrot.slane %v13814_v25, 2  ;;  %v19709_v5 = vrot.slane %v13653_v29, 2  ;;  %vm19710_vm2 = vcmask 1045504   ;;  %2605 = vrot.lane.b32.xlu1 %v2568_v62, %s11763_s26  ;;  %v2741_v62 = vpop.permute.xlu0 %2740 }
 0x279   : > { %v19711_v53 = vrot.slane %v13814_v25, 3  ;;  %v19712_v19 = vrot.slane %v13653_v29, 3  ;;  %vm19713_vm9 = vcmask 1044480   ;;  %v19714_v0 = vrot.slane %v13940_v39, 1  ;;  %2488 = vrot.lane.b32.xlu0 %v2453_v4, %s11762_s16 }
 0x27a   : > { %v1999_v63 = vsel %vm19710_vm2, %v19709_v5, %v19708_v61  ;;  %v2068_v12 = vadd.f32 %v2019_v43, %v1954_v32  ;;  %v2951_v47 = vsel %vm14000_vm3, %v2894_v10, 0.0  ;;  %vm2831_vm6 = vcmp.ge.s32.totalorder %v2812_v8, 0  ;;  %vm19736_vm2 = vmmov %vm19713_vm9 }
 0x27b   : > { %v14035_v28 = vsel %vm19713_vm9, %v19712_v19, %v19711_v53  ;;  %v14040_v36 = vsel %vm19715_vm12, %v1884_v2, %v19714_v0  ;;  %v19716_v61 = vrot.slane %v13814_v25, 5  ;;  %v19717_v59 = vrot.slane %v13653_v29, 5 }
 0x27c   : > { %v10987_v53 = vpack.c.bf16 %v2951_v47, %v2951_v47  ;;  %vm2850_vm4 = vcmp.lt.s32.totalorder %v2812_v8, 300  ;;  %v19718_v2 = vrot.slane %v13843_v51, 5  ;;  %v19719_v14 = vrot.slane %v13843_v51, 6  ;;  %1920 = vrot.lane.b32.xlu1 %v1885_v7, %s11758_s17  ;;  %v14097_v7 = vld [vmem:[%s19126_s2] ss:$0 sm:$0xff] }
 0x27d   : > { %v14050_v5 = vsel %vm2308_vm11, %v19717_v59, %v19716_v61  ;;  %v2182_v32 = vadd.f32 %v2133_v20, %v2068_v12  ;;  %v2659_v19 = vadd.f32 %v2640_v57, %v13074_v40  ;;  %v19720_v0 = vrot.slane %v13843_v51, 7  ;;  %v2247_v59 = vpop.permute.xlu1 %2246  ;;  %vm14075_vm3 = vmand %vm2831_vm6, %vm2850_vm4  ;;  %2754 = vrot.lane.b32.xlu0 %v2719_v6, %s11758_s17 }
 0x27e   : > { %v3335_v43 = vrot.slane %v19718_v2, 4  ;;  %v3637_v10 = vrot.slane %v19719_v14, 4  ;;  %v19721_v61 = vrot.slane %v13871_v21, 5  ;;  %v3336_v15 = vrot.slane %v10987_v53, 5  ;;  %3043 = vst.msk [vmem:[#allocation3 + $0x28] sm:$0xf] %vm3037_vm1, %v10987_v53 }
 0x27f   : > { %v3939_v41 = vrot.slane %v19720_v0, 4  ;;  %v3638_v4 = vrot.slane %v10987_v53, 6  ;;  %v3940_v34 = vrot.slane %v10987_v53, 7  ;;  %v14063_v16 = vshll.u32 %v10987_v53, 16  ;;  %4281 = vst.msk [vmem:[#allocation3 + $0x24] sm:$0xf] %vm3037_vm1, %v10987_v53 }
 0x280   : > { %v3111_v47 = vor.u32 %v3110_v22, %v19721_v61  ;;  %v2296_v20 = vadd.f32 %v2247_v59, %v2182_v32  ;;  %v2791_v12 = vadd.f32 %v2741_v62, %v2659_v19  ;;  %v14069_v40 = vadd.s32 %v13160_v3, %v12096_v18  ;;  %v1907_v19 = vpop.permute.xlu0 %1906  ;;  %2262 = vrot.lane.b32.xlu1 %v2227_v54, %s11757_s19 }
 0x281   : > { %v14071_v51 = vshrl.u32 %v10987_v53, 16  ;;  %v14084_v22 = vsel %vm13353_vm7, %v3335_v43, %v3336_v15  ;;  %v14088_v53 = vsel %vm13366_vm0, %v3637_v10, %v3638_v4  ;;  %v14092_v8 = vsel %vm13373_vm10, %v3939_v41, %v3940_v34  ;;  %v2592_v32 = vpop.permute.xlu1 %2591  ;;  %2034 = vrot.lane.b32.xlu0 %v1999_v63, %s11759_s20 }
 0x282   : > { %19724 = vst [vmem:[#allocation65_spill] sm:$0xff] %v14088_v53  ;;  %19725 = vst [vmem:[#allocation66_spill] sm:$0xff] %v14092_v8  ;;  %v2410_v2 = vadd.f32 %v2361_v48, %v2296_v20  ;;  %v2895_v6 = vadd.f32 %v14097_v7, %v2791_v12  ;;  %v3112_v14 = vrot.slane %v3111_v47, 4  ;;  %v3116_v43 = vrot.slane %v14063_v16, 5  ;;  %v19727_v8 = vld [vmem:[#allocation30_spill] sm:$0xff] }
 0x283   : > { %v3120_v10 = vrot.slane %v14071_v51, 4  ;;  %v3478_v0 = vrot.slane %v13916_v24, 4  ;;  %v3479_v41 = vrot.slane %v14071_v51, 5  ;;  %v3480_v48 = vrot.slane %v14063_v16, 6 }
 0x284   : > { %v2952_v61 = vsel %vm14075_vm3, %v2895_v6, 0.0  ;;  %v3338_v59 = vrot.slane %v3336_v15, 4  ;;  %v14109_v62 = vsel %vm13416_vm15, %v3112_v14, %v3116_v43  ;;  %v3780_v47 = vrot.slane %v13921_v60, 4  ;;  %v2021_v14 = vpop.permute.xlu0 %2020  ;;  %2756 = vrot.lane.b32.xlu1 %v14019_v1, %s11758_s17 }
 0x285   : > { %19726 = vst [vmem:[#allocation67_spill] sm:$0xff] %v14109_v62  ;;  %v14112_v20 = vpack.c.bf16 %v2952_v61, %v2952_v61  ;;  %v3640_v24 = vrot.slane %v3638_v4, 4  ;;  %v3942_v12 = vrot.slane %v3940_v34, 4  ;;  %v3481_v57 = vor.u32 %v3480_v48, %v3479_v41  ;;  %v2135_v53 = vpop.permute.xlu1 %2134  ;;  %2148 = vrot.lane.b32.xlu0 %v14035_v28, %s11760_s30 }
 0x286   : > { %v2524_v18 = vadd.f32 %v2475_v33, %v2410_v2  ;;  %v1955_v21 = vadd.f32 %v1907_v19, %v19727_v8  ;;  %v3121_v6 = vor.u32 %v3120_v10, %v3116_v43  ;;  %v3781_v15 = vrot.slane %v14071_v51, 6 }
 0x287   : > { %v19234_v62 = vrot.slane %v14112_v20, 5  ;;  %v19233_v60 = vrot.slane %v14112_v20, 6  ;;  %v19232_v61 = vrot.slane %v14112_v20, 7  ;;  %v3782_v54 = vrot.slane %v14063_v16, 7  ;;  %3044 = vst.msk [vmem:[#allocation3 + $0x30] sm:$0xf] %vm3037_vm1, %v14112_v20 }
 0x288   : > { %4282 = vst.msk [vmem:[#allocation3 + $0x2c] sm:$0xf] %vm3037_vm1, %v14112_v20  ;;  %v2069_v34 = vadd.f32 %v2021_v14, %v1955_v21  ;;  %v14127_v33 = vshll.u32 %v14112_v20, 16  ;;  %v14131_v63 = vsel %vm13426_vm14, %v3478_v0, %v3481_v57  ;;  %v4076_v4 = vrot.slane %v14071_v51, 7  ;;  %v2363_v41 = vpop.permute.xlu0 %2362  ;;  %1922 = vrot.lane.b32.xlu1 %v14040_v36, %s11758_s17 }
 0x289   : > { %v14142_v8 = vsel %vm13353_vm7, %v3338_v59, %v19234_v62  ;;  %v14148_v2 = vsel %vm13366_vm0, %v3640_v24, %v19233_v60  ;;  %v14154_v1 = vsel %vm13373_vm10, %v3942_v12, %v19232_v61  ;;  %v14157_v28 = vshrl.u32 %v14112_v20, 16  ;;  %v2249_v0 = vpop.permute.xlu1 %2248  ;;  %2376 = vrot.lane.b32.xlu0 %v14050_v5, %s11761_s13  ;;  %v19742_v60 = vld [vmem:[#allocation31_spill] sm:$0xff] }
 0x28a   : > { %v2183_v51 = vadd.f32 %v2135_v53, %v2069_v34  ;;  %v3122_v43 = vrot.slane %v3121_v6, 4  ;;  %v19236_v19 = vrot.slane %v14127_v33, 5  ;;  %v3485_v10 = vrot.slane %v14127_v33, 6 }
 0x28b   : > { %v3484_v48 = vrot.slane %v14157_v28, 5  ;;  %v3783_v59 = vor.u32 %v3782_v54, %v3781_v15  ;;  %v3786_v24 = vrot.slane %v14157_v28, 6  ;;  %v3787_v21 = vrot.slane %v14127_v33, 7 }
 0x28c   : > { %v14168_v12 = vsel %vm13416_vm15, %v3122_v43, %v19236_v19  ;;  %v3483_v53 = vrot.slane %v3481_v57, 4  ;;  %v19728_v6 = vrot.slane %v13879_v46, 7  ;;  %v14175_v34 = vor.u32 %v4076_v4, %v14063_v16  ;;  %v2594_v5 = vpop.permute.xlu0 %2593 }
 0x28d   : > { %v14181_v15 = vor.u32 %v3485_v10, %v3484_v48  ;;  %v14185_v54 = vsel %vm13475_vm5, %v3780_v47, %v3783_v59  ;;  %v3785_v57 = vrot.slane %v3783_v59, 4  ;;  %v14187_v43 = vor.u32 %v3787_v21, %v3786_v24  ;;  %v2477_v61 = vpop.permute.xlu1 %2476 }
 0x28e   : > { %v14172_v14 = vrot.slane %v19728_v6, 4  ;;  %19730 = vst [vmem:[#allocation68_spill] sm:$0xff] %v14175_v34  ;;  %19731 = vst [vmem:[#allocation69_spill] sm:$0xff] %v14185_v54  ;;  %v2641_v46 = vadd.f32 %v2592_v32, %v2524_v18  ;;  %v2297_v6 = vadd.f32 %v2249_v0, %v2183_v51  ;;  %v19235_v36 = vrot.slane %v14157_v28, 7  ;;  %v1824_v32 = vpop.f32.mrf.mxu1 }
 0x28f   : > { %v19237_v10 = vrot.slane %v13940_v39, 4  ;;  %v2569_v48 = vrot.slane %v13814_v25, 7  ;;  %v14199_v47 = vsel %vm13426_vm14, %v3483_v53, %v14181_v15  ;;  %v14204_v18 = vsel %vm13475_vm5, %v3785_v57, %v14187_v43 }
 0x290   : > { %19729 = vst [vmem:[#allocation30_spill] sm:$0xff] %v14172_v14  ;;  %19732 = vst [vmem:[#allocation70_spill] sm:$0xff] %v14199_v47  ;;  %v19734_v51 = vrot.slane %v13940_v39, 3  ;;  %v19735_v0 = vrot.slane %v13814_v25, 3  ;;  %v19737_v24 = vrot.slane %v13814_v25, 6  ;;  %v19738_v21 = vrot.slane %v13653_v29, 6 }
 0x291   : > { %19733 = vst [vmem:[#allocation71_spill] sm:$0xff] %v14204_v18  ;;  %vm19739_vm9 = vcmask 1041408   ;;  %v14216_v53 = vrot.slane %v4076_v4, 4  ;;  %v14221_v57 = vor.u32 %v19235_v36, %v14127_v33  ;;  %vm2832_vm12 = vcmp.ge.s32.totalorder %v14069_v40, 0  ;;  %v1909_v36 = vpop.permute.xlu0 %1908 }
 0x292   : > { %v2115_v59 = vsel %vm19736_vm2, %v19735_v0, %v19734_v51  ;;  %v2455_v16 = vsel %vm19739_vm9, %v19738_v21, %v19737_v24  ;;  %v1692_v51 = vpop.f32.mrf.mxu0  ;;  %v2411_v0 = vadd.f32 %v2363_v41, %v2297_v6  ;;  %vm2851_vm6 = vcmp.lt.s32.totalorder %v14069_v40, 300 }
 0x293   : > { %19740 = vst [vmem:[#allocation72_spill] sm:$0xff] %v14216_v53  ;;  %19741 = vst [vmem:[#allocation73_spill] sm:$0xff] %v14221_v57  ;;  %2150 = vrot.lane.b32.xlu1 %v2115_v59, %s11760_s30  ;;  %2490 = vrot.lane.b32.xlu0 %v2455_v16, %s11762_s16  ;;  %v2660_v62 = vadd.f32 %v2641_v46, %v19742_v60  ;;  %v14233_v21 = vadd.f32 %v1824_v32, %v1692_v51  ;;  %v2743_v59 = vpop.permute.xlu1 %2742  ;;  %v19743_v16 = vrot.slane %v13814_v25, 4  ;;  %vm19744_vm4 = vcmask 1043456  }
 0x294   : > { %v19240_v6 = vrot.slane %v13940_v39, 5  ;;  %v19745_v46 = vrot.slane %v13653_v29, 7  ;;  %vm19746_vm3 = vcmask 1040384   ;;  %v3130_v32 = vrot.slane %v14157_v28, 4  ;;  %vm2870_vm2 = vmand %vm2832_vm12, %vm2851_vm6 }
 0x295   : > { %v2229_v41 = vsel %vm19744_vm4, %v19743_v16, %v19237_v10  ;;  %v2792_v60 = vadd.f32 %v2743_v59, %v2660_v62  ;;  %v2525_v16 = vadd.f32 %v2477_v61, %v2411_v0  ;;  %v19747_v59 = vld [vmem:[#allocation32_spill] sm:$0xff]  ;;  %v19748_v4 = vrot.slane %v13814_v25, 5  ;;  %vm19757_vm6 = vmmov %vm19746_vm3 }
 0x296   : > { %v2570_v19 = vsel %vm19746_vm3, %v19745_v46, %v2569_v48  ;;  %v1956_v10 = vadd.f32 %v1909_v36, %v19747_v59  ;;  %v2023_v46 = vpop.permute.xlu0 %2022  ;;  %v19750_v61 = vrot.slane %v13657_v58, 1  ;;  %vm19751_vm9 = vcmask 1046528  }
 0x297   : > { %2264 = vrot.lane.b32.xlu1 %v2229_v41, %s11757_s19  ;;  %2607 = vrot.lane.b32.xlu0 %v2570_v19, %s11763_s26  ;;  %v2896_v62 = vadd.f32 %v14097_v7, %v2792_v60  ;;  %v2137_v24 = vpop.permute.xlu1 %2136  ;;  %v2343_v40 = vsel %vm2308_vm11, %v19748_v4, %v19240_v6  ;;  %v19749_v19 = vrot.slane %v13942_v9, 1  ;;  %v19752_v59 = vrot.slane %v13940_v39, 2 }
 0x298   : > { %v2070_v36 = vadd.f32 %v2023_v46, %v1956_v10  ;;  %v19753_v51 = vrot.slane %v13814_v25, 2  ;;  %vm19754_vm12 = vcmask 1045504   ;;  %v19755_v4 = vrot.slane %v14127_v33, 5  ;;  %v19758_v10 = vld [vmem:[#allocation20_spill] sm:$0xff] }
 0x299   : > { %v2723_v0 = vsel %vm19751_vm9, %v19750_v61, %v19749_v19  ;;  %v2953_v60 = vsel %vm2870_vm2, %v2896_v62, 0.0  ;;  %v19756_v41 = vrot.slane %v13940_v39, 7  ;;  %v2814_v46 = vadd.s32 %v13160_v3, %v19758_v10 }
 0x29a   : > { %v2001_v53 = vsel %vm19754_vm12, %v19753_v51, %v19752_v59  ;;  %v3131_v6 = vor.u32 %v3130_v32, %v19755_v4  ;;  %v14272_v57 = vpack.c.bf16 %v2953_v60, %v2953_v60  ;;  %v2642_v61 = vadd.f32 %v2594_v5, %v2525_v16  ;;  %v2251_v4 = vpop.permute.xlu0 %2250 }
 0x29b   : > { %2378 = vrot.lane.b32.xlu1 %v2343_v40, %s11761_s13  ;;  %2036 = vrot.lane.b32.xlu0 %v2001_v53, %s11759_s20  ;;  %v2572_v62 = vsel %vm19757_vm6, %v2569_v48, %v19756_v41  ;;  %v2184_v51 = vadd.f32 %v2137_v24, %v2070_v36  ;;  %v19759_v33 = vrot.slane %v14112_v20, 5  ;;  %v19760_v60 = vrot.slane %v14112_v20, 6  ;;  %v2365_v40 = vpop.permute.xlu1 %2364 }
 0x29c   : > { %v3342_v53 = vrot.slane %v14272_v57, 5  ;;  %v3134_v34 = vshll.u32 %v14272_v57, 16  ;;  %v3644_v48 = vrot.slane %v14272_v57, 6  ;;  %v3946_v41 = vrot.slane %v14272_v57, 7  ;;  %3045 = vst.msk [vmem:[#allocation3 + $0x38] sm:$0xf] %vm3037_vm1, %v14272_v57 }
 0x29d   : > { %v3341_v32 = vrot.slane %v19759_v33, 4  ;;  %v3643_v59 = vrot.slane %v19760_v60, 4  ;;  %4283 = vst.msk [vmem:[#allocation3 + $0x34] sm:$0xf] %vm3037_vm1, %v14272_v57  ;;  %v19761_v5 = vrot.slane %v13940_v39, 6  ;;  %v19762_v24 = vrot.slane %v13814_v25, 6 }
 0x29e   : > { %vm19763_vm4 = vcmask 1041408   ;;  %v3132_v36 = vrot.slane %v3131_v6, 4  ;;  %v19764_v33 = vrot.slane %v14112_v20, 7  ;;  %v14302_v19 = vshrl.u32 %v14272_v57, 16  ;;  %v19767_v20 = vld [vmem:[#allocation33_spill] sm:$0xff] }
 0x29f   : > { %v2457_v16 = vsel %vm19763_vm4, %v19762_v24, %v19761_v5  ;;  %v2298_v10 = vadd.f32 %v2251_v4, %v2184_v51  ;;  %2609 = vrot.lane.b32.xlu1 %v2572_v62, %s11763_s26  ;;  %v14308_v14 = vsel %vm13353_vm7, %v3341_v32, %v3342_v53  ;;  %v3136_v18 = vrot.slane %v3134_v34, 5  ;;  %v2745_v62 = vpop.permute.xlu1 %2744  ;;  %v2479_v51 = vpop.permute.xlu0 %2478 }
 0x2a0   : > { %v3945_v60 = vrot.slane %v19764_v33, 4  ;;  %2492 = vrot.lane.b32.xlu0 %v2457_v16, %s11762_s16  ;;  %19765 = vst [vmem:[#allocation31_spill] sm:$0xff] %v14308_v14  ;;  %v14312_v5 = vsel %vm13366_vm0, %v3643_v59, %v3644_v48  ;;  %vm2833_vm3 = vcmp.ge.s32.totalorder %v2814_v46, 0  ;;  %vm2852_vm2 = vcmp.lt.s32.totalorder %v2814_v46, 300 }
 0x2a1   : > { %19766 = vst [vmem:[#allocation32_spill] sm:$0xff] %v14312_v5  ;;  %v2661_v6 = vadd.f32 %v2642_v61, %v19767_v20  ;;  %v14321_v4 = vsel %vm13416_vm15, %v3132_v36, %v3136_v18  ;;  %v3489_v32 = vrot.slane %v14302_v19, 5  ;;  %v3490_v24 = vrot.slane %v3134_v34, 6  ;;  %vm14327_vm9 = vmand %vm2833_vm3, %vm2852_vm2 }
 0x2a2   : > { %v14317_v57 = vsel %vm13373_vm10, %v3945_v60, %v3946_v41  ;;  %19769 = vst [vmem:[#allocation74_spill] sm:$0xff] %v14321_v4  ;;  %v3791_v59 = vrot.slane %v14302_v19, 6  ;;  %v2002_v46 = vrot.slane %v14233_v21, 2  ;;  %v3792_v33 = vrot.slane %v3134_v34, 7 }
 0x2a3   : > { %19768 = vst [vmem:[#allocation33_spill] sm:$0xff] %v14317_v57  ;;  %v2793_v16 = vadd.f32 %v2745_v62, %v2661_v6  ;;  %v2412_v20 = vadd.f32 %v2365_v40, %v2298_v10  ;;  %v19772_v36 = vrot.slane %v14233_v21, 1  ;;  %v3488_v57 = vrot.slane %v14181_v15, 4  ;;  %v2025_v40 = vpop.permute.xlu1 %2024 }
 0x2a4   : > { %2758 = vrot.lane.b32.xlu0 %v2723_v0, %s11758_s17  ;;  %v14336_v5 = vor.u32 %v3490_v24, %v3489_v32  ;;  %v3790_v6 = vrot.slane %v14187_v43, 4  ;;  %v14340_v61 = vor.u32 %v3792_v33, %v3791_v59  ;;  %v19773_v4 = vrot.slane %v14302_v19, 7  ;;  %v19778_v59 = vld [vmem:[#allocation19_spill] sm:$0xff] }
 0x2a5   : > { %1926 = vrot.lane.b32.xlu1 %v19772_v36, %s11758_s17  ;;  %v2897_v62 = vadd.f32 %v14097_v7, %v2793_v16  ;;  %v3140_v10 = vrot.slane %v14302_v19, 4  ;;  %v2596_v36 = vpop.permute.xlu0 %2595  ;;  %v19776_v32 = vrot.slane %v14157_v28, 7  ;;  %v14363_v16 = vadd.s32 %v13160_v3, %v19778_v59 }
 0x2a6   : > { %v14344_v14 = vor.u32 %v19773_v4, %v3134_v34  ;;  %v14352_v43 = vsel %vm13426_vm14, %v3488_v57, %v14336_v5  ;;  %v14368_v33 = vsel %vm13475_vm5, %v3790_v6, %v14340_v61  ;;  %v19780_v28 = vrot.slane %v14233_v21, 4  ;;  %v1826_v6 = vpop.f32.mrf.mxu1 }
 0x2a7   : > { %19775 = vst [vmem:[#allocation76_spill] sm:$0xff] %v14352_v43  ;;  %v14356_v24 = vrot.slane %v19776_v32, 4  ;;  %v2954_v34 = vsel %vm14327_vm9, %v2897_v62, 0.0  ;;  %19779 = vst [vmem:[#allocation78_spill] sm:$0xff] %v14368_v33  ;;  %v19781_v60 = vrot.slane %v13940_v39, 2  ;;  %v3344_v32 = vrot.slane %v3342_v53, 4  ;;  %v2253_v33 = vpop.permute.xlu1 %2252 }
 0x2a8   : > { %19774 = vst [vmem:[#allocation75_spill] sm:$0xff] %v14344_v14  ;;  %v14370_v57 = vpack.c.bf16 %v2954_v34, %v2954_v34  ;;  %2040 = vrot.lane.b32.xlu0 %v2002_v46, %s11759_s20  ;;  %v2526_v15 = vadd.f32 %v2479_v51, %v2412_v20  ;;  %v3646_v34 = vrot.slane %v3644_v48, 4  ;;  %v3948_v0 = vrot.slane %v3946_v41, 4  ;;  %v1694_v48 = vpop.f32.mrf.mxu0 }
 0x2a9   : > { %19777 = vst [vmem:[#allocation77_spill] sm:$0xff] %v14356_v24  ;;  %2268 = vrot.lane.b32.xlu1 %v19780_v28, %s11757_s19  ;;  %v2003_v62 = vsel %vm19754_vm12, %v19781_v60, %v2002_v46  ;;  %v3141_v59 = vor.u32 %v3140_v10, %v3136_v18  ;;  %v1911_v43 = vpop.permute.xlu0 %1910  ;;  %v19782_v18 = vld [vmem:[#allocation34_spill] sm:$0xff]  ;;  %vm2834_vm6 = vcmp.ge.s32.totalorder %v14363_v16, 0  ;;  %v19783_v20 = vrot.slane %v14233_v21, 6 }
 0x2aa   : > { %v19244_v28 = vrot.slane %v14370_v57, 5  ;;  %v19246_v54 = vrot.slane %v14370_v57, 6  ;;  %v19248_v47 = vrot.slane %v14370_v57, 7  ;;  %v14387_v53 = vshll.u32 %v14370_v57, 16  ;;  %3046 = vst.msk [vmem:[#allocation3 + $0x40] sm:$0xf] %vm3037_vm1, %v14370_v57 }
 0x2ab   : > { %4284 = vst.msk [vmem:[#allocation3 + $0x3c] sm:$0xf] %vm3037_vm1, %v14370_v57  ;;  %v2643_v41 = vadd.f32 %v2596_v36, %v2526_v15  ;;  %v1957_v51 = vadd.f32 %v1911_v43, %v19782_v18  ;;  %v14396_v46 = vshrl.u32 %v14370_v57, 16  ;;  %v19784_v10 = vrot.slane %v14233_v21, 3  ;;  %v1828_v18 = vpop.f32.mrf.mxu1 }
 0x2ac   : > { %v14408_v36 = vsel %vm13353_vm7, %v3344_v32, %v19244_v28  ;;  %v14414_v15 = vsel %vm13366_vm0, %v3646_v34, %v19246_v54  ;;  %v14420_v43 = vsel %vm13373_vm10, %v3948_v0, %v19248_v47  ;;  %v3495_v60 = vrot.slane %v14387_v53, 6  ;;  %v2367_v28 = vpop.permute.xlu1 %2366  ;;  %v1696_v47 = vpop.f32.mrf.mxu0 }
 0x2ad   : > { %2496 = vrot.lane.b32.xlu1 %v19783_v20, %s11762_s16  ;;  %2154 = vrot.lane.b32.xlu0 %v19784_v10, %s11760_s30  ;;  %19785 = vst [vmem:[#allocation34_spill] sm:$0xff] %v14408_v36  ;;  %19786 = vst [vmem:[#allocation79_spill] sm:$0xff] %v14414_v15  ;;  %v2071_v20 = vadd.f32 %v2025_v40, %v1957_v51  ;;  %v3494_v10 = vrot.slane %v14396_v46, 5  ;;  %v3796_v32 = vrot.slane %v14396_v46, 6  ;;  %v3797_v4 = vrot.slane %v14387_v53, 7  ;;  %v2139_v14 = vpop.permute.xlu0 %2138 }
 0x2ae   : > { %19787 = vst [vmem:[#allocation80_spill] sm:$0xff] %v14420_v43  ;;  %v3493_v34 = vrot.slane %v14336_v5, 4  ;;  %v19249_v54 = vrot.slane %v14396_v46, 7  ;;  %v3142_v24 = vrot.slane %v3141_v59, 4  ;;  %v3146_v0 = vrot.slane %v14387_v53, 5 }
 0x2af   : > { %v2185_v43 = vadd.f32 %v2139_v14, %v2071_v20  ;;  %v14429_v15 = vor.u32 %v3495_v60, %v3494_v10  ;;  %v3795_v40 = vrot.slane %v14340_v61, 4  ;;  %v14432_v51 = vor.u32 %v3797_v4, %v3796_v32  ;;  %v1830_v4 = vpop.f32.mrf.mxu1  ;;  %v19793_v60 = vld [vmem:[#allocation35_spill] sm:$0xff] }
 0x2b0   : > { %v19788_v36 = vrot.slane %v14233_v21, 5  ;;  %vm2853_vm4 = vcmp.lt.s32.totalorder %v14363_v16, 300  ;;  %v19789_v5 = vrot.slane %v14302_v19, 7  ;;  %v14446_v14 = vor.u32 %v19249_v54, %v14387_v53  ;;  %v2747_v10 = vpop.permute.xlu1 %2746 }
 0x2b1   : > { %2038 = vrot.lane.b32.xlu1 %v2003_v62, %s11759_s20  ;;  %v14450_v61 = vsel %vm13416_vm15, %v3142_v24, %v3146_v0  ;;  %v2299_v62 = vadd.f32 %v2253_v33, %v2185_v43  ;;  %v2662_v20 = vadd.f32 %v2643_v41, %v19793_v60  ;;  %v14461_v19 = vsel %vm13475_vm5, %v3795_v40, %v14432_v51  ;;  %v2481_v32 = vpop.permute.xlu0 %2480  ;;  %v1698_v41 = vpop.f32.mrf.mxu0  ;;  %vm2872_vm9 = vmand %vm2834_vm6, %vm2853_vm4 }
 0x2b2   : > { %2382 = vrot.lane.b32.xlu0 %v19788_v36, %s11761_s13  ;;  %v14441_v59 = vrot.slane %v19789_v5, 4  ;;  %19791 = vst [vmem:[#allocation82_spill] sm:$0xff] %v14446_v14  ;;  %19792 = vst [vmem:[#allocation83_spill] sm:$0xff] %v14450_v61  ;;  %v14456_v36 = vsel %vm13426_vm14, %v3493_v34, %v14429_v15  ;;  %v14463_v53 = vadd.f32 %v1826_v6, %v1694_v48  ;;  %v19796_v34 = vrot.slane %v14233_v21, 3 }
 0x2b3   : > { %19794 = vst [vmem:[#allocation35_spill] sm:$0xff] %v14456_v36  ;;  %19795 = vst [vmem:[#allocation84_spill] sm:$0xff] %v14461_v19  ;;  %v1829_v33 = vadd.f32 %v1828_v18, %v1696_v47  ;;  %v2794_v43 = vadd.f32 %v2747_v10, %v2662_v20  ;;  %v19797_v5 = vrot.slane %v13940_v39, 3  ;;  %vm19798_vm3 = vcmask 1044480  }
 0x2b4   : > { %19790 = vst [vmem:[#allocation81_spill] sm:$0xff] %v14441_v59  ;;  %v19799_v40 = vrot.slane %v14233_v21, 1  ;;  %v19800_v6 = vrot.slane %v13940_v39, 1  ;;  %vm19801_vm2 = vcmask 1046528   ;;  %v14479_v54 = vadd.f32 %v1830_v4, %v1698_v41  ;;  %v1913_v4 = vpop.permute.xlu1 %1912 }
 0x2b5   : > { %v2117_v60 = vsel %vm19798_vm3, %v19797_v5, %v19796_v34  ;;  %v2413_v47 = vadd.f32 %v2367_v28, %v2299_v62  ;;  %v3150_v18 = vrot.slane %v14396_v46, 4  ;;  %v2898_v20 = vadd.f32 %v14097_v7, %v2794_v43  ;;  %v2598_v41 = vpop.permute.xlu0 %2597 }
 0x2b6   : > { %v1889_v48 = vsel %vm19801_vm2, %v19800_v6, %v19799_v40  ;;  %2152 = vrot.lane.b32.xlu1 %v2117_v60, %s11760_s30  ;;  %v2573_v10 = vrot.slane %v14233_v21, 7  ;;  %v2575_v5 = vrot.slane %v1829_v33, 7  ;;  %v19802_v16 = vrot.slane %v14233_v21, 6 }
 0x2b7   : > { %1924 = vrot.lane.b32.xlu0 %v1889_v48, %s11758_s17  ;;  %v2955_v40 = vsel %vm2872_vm9, %v2898_v20, 0.0  ;;  %v19803_v28 = vrot.slane %v13940_v39, 6  ;;  %vm19804_vm12 = vcmask 1041408   ;;  %v19805_v60 = vrot.slane %v14233_v21, 4 }
 0x2b8   : > { %v19806_v6 = vrot.slane %v13940_v39, 4  ;;  %vm19807_vm6 = vcmask 1043456   ;;  %v14502_v24 = vpack.c.bf16 %v2955_v40, %v2955_v40  ;;  %v2527_v34 = vadd.f32 %v2481_v32, %v2413_v47 }
 0x2b9   : > { %v2459_v62 = vsel %vm19804_vm12, %v19803_v28, %v19802_v16  ;;  %v3151_v33 = vor.u32 %v3150_v18, %v3146_v0  ;;  %v19808_v20 = vrot.slane %v13940_v39, 7  ;;  %vm19809_vm4 = vcmask 1040384   ;;  %v2027_v48 = vpop.permute.xlu0 %2026 }
 0x2ba   : > { %v2231_v43 = vsel %vm19807_vm6, %v19806_v6, %v19805_v60  ;;  %2494 = vrot.lane.b32.xlu1 %v2459_v62, %s11762_s16  ;;  %v19810_v28 = vrot.slane %v14233_v21, 5  ;;  %v19811_v61 = vrot.slane %v13940_v39, 5  ;;  %v19812_v6 = vld [vmem:[#allocation22_spill] sm:$0xff]  ;;  %v19813_v32 = vrot.slane %v14370_v57, 6  ;;  %v2255_v62 = vpop.permute.xlu1 %2254  ;;  %3047 = vst.msk [vmem:[#allocation3 + $0x48] sm:$0xf] %vm3037_vm1, %v14502_v24  ;;  %vm19823_vm3 = vmmov %vm19809_vm4 }
 0x2bb   : > { %2266 = vrot.lane.b32.xlu0 %v2231_v43, %s11757_s19  ;;  %v2574_v16 = vsel %vm19809_vm4, %v19808_v20, %v2573_v10  ;;  %v2816_v40 = vadd.s32 %v13160_v3, %v19812_v6  ;;  %4285 = vst.msk [vmem:[#allocation3 + $0x44] sm:$0xf] %vm3037_vm1, %v14502_v24  ;;  %v19814_v18 = vrot.slane %v14370_v57, 7  ;;  %v19815_v20 = vrot.slane %v14370_v57, 5  ;;  %v11237_v57 = vld [vmem:[%s19127_s3 + $0x38] sm:$0xff]  }
 0x2bc   : > { %v2345_v60 = vsel %vm2308_vm11, %v19811_v61, %v19810_v28  ;;  %v3649_v47 = vrot.slane %v19813_v32, 4  ;;  %v19253_v61 = vrot.slane %v14502_v24, 7  ;;  %v1958_v32 = vadd.f32 %v1913_v4, %v13209_v26  ;;  %vm19822_vm11 = vmmov %vm19801_vm2  ;;  %4764 = vmatpush1.bf16.msra.mxu1 %v11237_v57 }
 0x2bd   : > { %v3951_v43 = vrot.slane %v19814_v18, 4  ;;  %v3347_v28 = vrot.slane %v19815_v20, 4  ;;  %v19254_v6 = vrot.slane %v14502_v24, 5  ;;  %v14531_v0 = vshll.u32 %v14502_v24, 16  ;;  %vm19832_vm12 = vmmov %vm19822_vm11 }
 0x2be   : > { %v14534_v14 = vshrl.u32 %v14502_v24, 16  ;;  %v2644_v59 = vadd.f32 %v2598_v41, %v2527_v34  ;;  %2611 = vrot.lane.b32.xlu1 %v2574_v16, %s11763_s26  ;;  %v19816_v18 = vrot.slane %v14502_v24, 6  ;;  %v3152_v34 = vrot.slane %v3151_v33, 4  ;;  %v11238_v33 = vld [vmem:[%s19127_s3 + $0x30] sm:$0xff]  }
 0x2bf   : > { %2380 = vrot.lane.b32.xlu0 %v2345_v60, %s11761_s13  ;;  %v14551_v4 = vsel %vm13373_vm10, %v3951_v43, %v19253_v61  ;;  %v2072_v41 = vadd.f32 %v2027_v48, %v1958_v32  ;;  %v14557_v16 = vsel %vm13353_vm7, %v3347_v28, %v19254_v6  ;;  %v3156_v60 = vrot.slane %v14531_v0, 5 }
 0x2c0   : > { %v14545_v26 = vsel %vm13366_vm0, %v3649_v47, %v19816_v18  ;;  %19818 = vst [vmem:[#allocation86_spill] sm:$0xff] %v14551_v4  ;;  %19819 = vst [vmem:[#allocation87_spill] sm:$0xff] %v14557_v16  ;;  %v3499_v20 = vrot.slane %v14534_v14, 5  ;;  %v2369_v47 = vpop.permute.xlu1 %2368  ;;  %v2141_v18 = vpop.permute.xlu0 %2140  ;;  %v19821_v19 = vrot.slane %v13942_v9, 1  ;;  %v2576_v48 = vsel %vm19823_vm3, %v2573_v10, %v2575_v5 }
 0x2c1   : > { %19817 = vst [vmem:[#allocation85_spill] sm:$0xff] %v14545_v26  ;;  %v19820_v26 = vrot.slane %v14463_v53, 1  ;;  %vm2835_vm2 = vcmp.ge.s32.totalorder %v2816_v40, 0  ;;  %v3500_v28 = vrot.slane %v14531_v0, 6  ;;  %v2186_v32 = vadd.f32 %v2141_v18, %v2072_v41  ;;  %v19826_v41 = vld [vmem:[#allocation36_spill] sm:$0xff] }
 0x2c2   : > { %v19824_v61 = vmov 0   ;;  %v14574_v6 = vsel %vm13416_vm15, %v3152_v34, %v3156_v60  ;;  %v3801_v16 = vrot.slane %v14534_v14, 6  ;;  %vm2854_vm9 = vcmp.lt.s32.totalorder %v2816_v40, 300 }
 0x2c3   : > { %v2725_v43 = vsel %vm19822_vm11, %v19821_v19, %v19820_v26  ;;  %4765 = vmatprep.subr.bf16.mxu1 %v19824_v61  ;;  %19825 = vst [vmem:[#allocation88_spill] sm:$0xff] %v14574_v6  ;;  %v3802_v19 = vrot.slane %v14531_v0, 7  ;;  %2613 = vrot.lane.b32.xlu0 %v2576_v48, %s11763_s26  ;;  %v3498_v10 = vrot.slane %v14429_v15, 4  ;;  %v14581_v5 = vor.u32 %v3500_v28, %v3499_v20  ;;  %vm2873_vm6 = vmand %vm2835_vm2, %vm2854_vm9 }
 0x2c4   : > { %2760 = vrot.lane.b32.xlu1 %v2725_v43, %s11758_s17  ;;  %v19256_v57 = vrot.slane %v14534_v14, 7  ;;  %v2300_v26 = vadd.f32 %v2255_v62, %v2186_v32  ;;  %v2663_v18 = vadd.f32 %v2644_v59, %v19826_v41  ;;  %v3800_v34 = vrot.slane %v14432_v51, 4  ;;  %v2749_v4 = vpop.permute.xlu1 %2748  ;;  %v2483_v36 = vpop.permute.xlu0 %2482  ;;  %4766 = vmatpush1.bf16.msra.mxu1 %v11238_v33  ;;  %v11239_v43 = vld [vmem:[%s19127_s3 + $0x28] sm:$0xff]   ;;  %v11240_v41 = vld [vmem:[%s19127_s3 + $0x20] sm:$0xff]  }
 0x2c5   : > { %v14586_v6 = vor.u32 %v3802_v19, %v3801_v16  ;;  %v14594_v15 = vsel %vm13426_vm14, %v3498_v10, %v14581_v5  ;;  %v19827_v62 = vrot.slane %v14396_v46, 7  ;;  %v19830_v48 = vrot.slane %v14479_v54, 1  ;;  %4767 = vmatprep.subr.bf16.mxu1 %v19824_v61 }
 0x2c6   : > { %v14603_v51 = vor.u32 %v19256_v57, %v14531_v0  ;;  %v2795_v59 = vadd.f32 %v2749_v4, %v2663_v18  ;;  %v2414_v16 = vadd.f32 %v2369_v47, %v2300_v26  ;;  %v19831_v33 = vrot.slane %v14463_v53, 1  ;;  %v19841_v57 = vld [vmem:[#allocation46_spill] sm:$0xff] }
 0x2c7   : > { %v14598_v20 = vrot.slane %v19827_v62, 4  ;;  %v14614_v46 = vsel %vm13475_vm5, %v3800_v34, %v14586_v6  ;;  %v19834_v0 = vmov %v19830_v48  ;;  %v3160_v32 = vrot.slane %v14534_v14, 4  ;;  %v19835_v34 = vld [vmem:[#allocation45_spill] sm:$0xff]  ;;  %v19836_v62 = vld [vmem:[#allocation38_spill] sm:$0xff] }
 0x2c8   : > { %19829 = vst [vmem:[#allocation89_spill] sm:$0xff] %v14603_v51  ;;  %v2727_v28 = vsel %vm19832_vm12, %v19831_v33, %v19830_v48  ;;  %19833 = vst [vmem:[#allocation90_spill] sm:$0xff] %v14614_v46  ;;  %2764 = vrot.lane.b32.xlu1 %v19834_v0, %s11758_s17  ;;  %v2899_v47 = vadd.f32 %v14097_v7, %v2795_v59  ;;  %v1915_v19 = vpop.permute.xlu1 %1914  ;;  %v2600_v10 = vpop.permute.xlu0 %2599  ;;  %4768 = vmatpush1.bf16.msra.mxu1 %v11239_v43  ;;  %v19837_v59 = vld [vmem:[#allocation21_spill] sm:$0xff]  ;;  %v19839_v33 = vrot.slane %v14502_v24, 6  ;;  %v19845_v46 = vld [vmem:[#allocation47_spill] sm:$0xff] }
 0x2c9   : > { %19828 = vst [vmem:[#allocation36_spill] sm:$0xff] %v14598_v20  ;;  %2762 = vrot.lane.b32.xlu0 %v2727_v28, %s11758_s17  ;;  %v2528_v26 = vadd.f32 %v2483_v36, %v2414_v16  ;;  %4769 = vmatprep.subr.bf16.mxu1 %v19824_v61  ;;  %v2817_v48 = vadd.s32 %v13160_v3, %v19837_v59  ;;  %v19838_v36 = vrot.slane %v14502_v24, 5 }
 0x2ca   : > { %v2956_v40 = vsel %vm2873_vm6, %v2899_v47, 0.0  ;;  %v1959_v43 = vadd.f32 %v1915_v19, %v13237_v49  ;;  %v3652_v28 = vrot.slane %v19839_v33, 4  ;;  %v3161_v0 = vor.u32 %v3160_v32, %v3156_v60  ;;  %v11241_v60 = vld [vmem:[%s19127_s3 + $0x18] sm:$0xff]   ;;  %v19842_v19 = vld [vmem:[#allocation39_spill] sm:$0xff] }
 0x2cb   : > { %v14632_v18 = vpack.c.bf16 %v2956_v40, %v2956_v40  ;;  %v3350_v16 = vrot.slane %v19838_v36, 4  ;;  %v2645_v36 = vadd.f32 %v2600_v10, %v2528_v26  ;;  %v19840_v32 = vrot.slane %v14502_v24, 7 }
 0x2cc   : > { %3377 = vrot.lane.b32.xlu1 %v19835_v34, %s11762_s16  ;;  %v2257_v47 = vpop.permute.xlu1 %2256  ;;  %v2029_v40 = vpop.permute.xlu0 %2028  ;;  %4770 = vmatpush1.bf16.msra.mxu1 %v11240_v41  ;;  %vm2836_vm4 = vcmp.ge.s32.totalorder %v2817_v48, 0  ;;  %v3162_v59 = vrot.slane %v3161_v0, 4  ;;  %vm2855_vm11 = vcmp.lt.s32.totalorder %v2817_v48, 300  ;;  %v19846_v0 = vld [vmem:[#allocation40_spill] sm:$0xff]  ;;  %v11244_v48 = vld [vmem:[%s19127_s3] sm:$0xff]  }
 0x2cd   : > { %3375 = vrot.lane.b32.xlu0 %v19836_v62, %s11762_s16  ;;  %3048 = vst.msk [vmem:[#allocation3 + $0x50] sm:$0xf] %vm3037_vm1, %v14632_v18  ;;  %4286 = vst.msk [vmem:[#allocation3 + $0x4c] sm:$0xf] %vm3037_vm1, %v14632_v18  ;;  %v19257_v34 = vrot.slane %v14632_v18, 5  ;;  %v19259_v49 = vrot.slane %v14632_v18, 6  ;;  %4771 = vmatprep.subr.bf16.mxu1 %v19824_v61  ;;  %v2073_v4 = vadd.f32 %v2029_v40, %v1959_v43 }
 0x2ce   : > { %v3164_v62 = vshll.u32 %v14632_v18, 16  ;;  %v3954_v33 = vrot.slane %v19840_v32, 4  ;;  %v14660_v41 = vshrl.u32 %v14632_v18, 16  ;;  %v19843_v26 = vrot.slane %v14632_v18, 7  ;;  %vm2874_vm3 = vmand %vm2836_vm4, %vm2855_vm11 }
 0x2cf   : > { %v14670_v10 = vsel %vm13353_vm7, %v3350_v16, %v19257_v34  ;;  %v14676_v24 = vsel %vm13366_vm0, %v3652_v28, %v19259_v49  ;;  %v19848_v28 = vrot.slane %v14534_v14, 7 }
 0x2d0   : > { %3679 = vrot.lane.b32.xlu1 %v19841_v57, %s11757_s19  ;;  %v14682_v57 = vsel %vm13373_vm10, %v3954_v33, %v19843_v26  ;;  %v3504_v43 = vrot.slane %v14660_v41, 5  ;;  %v3505_v40 = vrot.slane %v3164_v62, 6  ;;  %v2371_v32 = vpop.permute.xlu1 %2370  ;;  %v2143_v16 = vpop.permute.xlu0 %2142  ;;  %4772 = vmatpush1.bf16.msra.mxu1 %v11241_v60  ;;  %v3807_v34 = vrot.slane %v3164_v62, 7  ;;  %v11242_v33 = vld [vmem:[%s19127_s3 + $0x10] sm:$0xff]  }
 0x2d1   : > { %3677 = vrot.lane.b32.xlu0 %v19842_v19, %s11757_s19  ;;  %19844 = vst [vmem:[#allocation45_spill] sm:$0xff] %v14682_v57  ;;  %v3806_v19 = vrot.slane %v14660_v41, 6  ;;  %v3166_v51 = vrot.slane %v3164_v62, 5  ;;  %v2187_v49 = vadd.f32 %v2143_v16, %v2073_v4  ;;  %4773 = vmatprep.subr.bf16.mxu1 %v19824_v61  ;;  %v3503_v26 = vrot.slane %v14581_v5, 4 }
 0x2d2   : > { %v14692_v20 = vor.u32 %v3505_v40, %v3504_v43  ;;  %v3805_v60 = vrot.slane %v14586_v6, 4  ;;  %v14707_v57 = vrot.slane %v19848_v28, 4  ;;  %v2664_v43 = vadd.f32 %v2645_v36, %v13224_v52  ;;  %v11243_v52 = vld [vmem:[%s19127_s3 + $0x8] sm:$0xff]  }
 0x2d3   : > { %v14699_v4 = vor.u32 %v3807_v34, %v3806_v19  ;;  %v14703_v16 = vsel %vm13416_vm15, %v3162_v59, %v3166_v51  ;;  %v2301_v5 = vadd.f32 %v2257_v47, %v2187_v49  ;;  %v19850_v6 = vrot.slane %v14660_v41, 7 }
 0x2d4   : > { %3981 = vrot.lane.b32.xlu1 %v19845_v46, %s11759_s20  ;;  %19847 = vst [vmem:[#allocation38_spill] sm:$0xff] %v14703_v16  ;;  %19849 = vst [vmem:[#allocation46_spill] sm:$0xff] %v14707_v57  ;;  %v14713_v46 = vsel %vm13426_vm14, %v3503_v26, %v14692_v20  ;;  %v2751_v40 = vpop.permute.xlu1 %2750  ;;  %v2485_v19 = vpop.permute.xlu0 %2484  ;;  %4774 = vmatpush1.bf16.msra.mxu1 %v11242_v33  ;;  %v3170_v49 = vrot.slane %v14660_v41, 4 }
 0x2d5   : > { %3979 = vrot.lane.b32.xlu0 %v19846_v0, %s11759_s20  ;;  %v14717_v34 = vor.u32 %v19850_v6, %v3164_v62  ;;  %v14722_v14 = vsel %vm13475_vm5, %v3805_v60, %v14699_v4  ;;  %v2796_v59 = vadd.f32 %v2751_v40, %v2664_v43  ;;  %4775 = vmatprep.subr.bf16.mxu1 %v19824_v61  ;;  %v19852_v62 = vld [vmem:[#allocation41_spill] sm:$0xff]  ;;  %v19853_v6 = vld [vmem:[#allocation42_spill] sm:$0xff] }
 0x2d6   : > { %v2415_v28 = vadd.f32 %v2371_v32, %v2301_v5  ;;  %v3171_v60 = vor.u32 %v3170_v49, %v3166_v51  ;;  %v19854_v5 = vrot.slane %v14632_v18, 6 }
 0x2d7   : > { %19851 = vst [vmem:[#allocation39_spill] sm:$0xff] %v14717_v34  ;;  %v2900_v36 = vadd.f32 %v14097_v7, %v2796_v59  ;;  %v19855_v59 = vrot.slane %v14632_v18, 5 }
 0x2d8   : > { %3244 = vrot.lane.b32.xlu1 %v13560_v23, %s11763_s26  ;;  %v1917_v33 = vpop.permute.xlu1 %1916  ;;  %v2602_v26 = vpop.permute.xlu0 %2601  ;;  %4776 = vmatpush1.bf16.msra.mxu1 %v11243_v52  ;;  %v2529_v32 = vadd.f32 %v2485_v19, %v2415_v28  ;;  %v3655_v40 = vrot.slane %v19854_v5, 4 }
 0x2d9   : > { %3242 = vrot.lane.b32.xlu0 %v19852_v62, %s11763_s26  ;;  %v2957_v0 = vsel %vm2874_vm3, %v2900_v36, 0.0  ;;  %4777 = vmatprep.subr.bf16.mxu1 %v19824_v61  ;;  %v3353_v52 = vrot.slane %v19855_v59, 4  ;;  %v19856_v62 = vrot.slane %v14632_v18, 7 }
 0x2da   : > { %v14744_v43 = vpack.c.bf16 %v2957_v0, %v2957_v0  ;;  %v1960_v0 = vadd.f32 %v1917_v33, %v13251_v55 }
 0x2db   : > { %v3957_v36 = vrot.slane %v19856_v62, 4  ;;  %v19858_v62 = vld [vmem:[#allocation43_spill] sm:$0xff] }
 0x2dc   : > { %3546 = vrot.lane.b32.xlu1 %v13587_v56, %s11761_s13  ;;  %v2259_v47 = vpop.permute.xlu1 %2258  ;;  %v2031_v51 = vpop.permute.xlu0 %2030  ;;  %3049 = vst.msk [vmem:[#allocation3 + $0x58] sm:$0xf] %vm3037_vm1, %v14744_v43  ;;  %4287 = vst.msk [vmem:[#allocation3 + $0x54] sm:$0xf] %vm3037_vm1, %v14744_v43  ;;  %4778 = vmatpush1.bf16.msra.mxu1 %v11244_v48  ;;  %v11245_v56 = vld [vmem:[%s19127_s3 + $0x48] sm:$0xff]   ;;  %v3656_v19 = vrot.slane %v14744_v43, 6 }
 0x2dd   : > { %3544 = vrot.lane.b32.xlu0 %v19853_v6, %s11761_s13  ;;  %v3354_v49 = vrot.slane %v14744_v43, 5  ;;  %v3958_v18 = vrot.slane %v14744_v43, 7  ;;  %v3174_v28 = vshll.u32 %v14744_v43, 16  ;;  %v19857_v6 = vld [vmem:[#allocation24_spill] sm:$0xff]  ;;  %4791 = vmatprep.subr.bf16.mxu1 %v19824_v61  ;;  %v3172_v48 = vrot.slane %v3171_v60, 4 }
 0x2de   : > { %v2818_v5 = vadd.s32 %v13160_v3, %v19857_v6  ;;  %v14772_v59 = vshrl.u32 %v14744_v43, 16  ;;  %v14780_v34 = vsel %vm13366_vm0, %v3655_v40, %v3656_v19  ;;  %v2646_v43 = vadd.f32 %v2602_v26, %v2529_v32  ;;  %v11246_v40 = vld [vmem:[%s19127_s3 + $0x40] sm:$0xff]  }
 0x2df   : > { %v14784_v55 = vsel %vm13353_vm7, %v3353_v52, %v3354_v49  ;;  %v14788_v33 = vsel %vm13373_vm10, %v3957_v36, %v3958_v18  ;;  %v3176_v60 = vrot.slane %v3174_v28, 5  ;;  %v2074_v6 = vadd.f32 %v2031_v51, %v1960_v0 }
 0x2e0   : > { %3848 = vrot.lane.b32.xlu1 %v13592_v42, %s11760_s30  ;;  %19859 = vst [vmem:[#allocation47_spill] sm:$0xff] %v14784_v55  ;;  %19860 = vst [vmem:[#allocation40_spill] sm:$0xff] %v14788_v33  ;;  %v3509_v42 = vrot.slane %v14772_v59, 5  ;;  %v3510_v57 = vrot.slane %v3174_v28, 6  ;;  %v2373_v16 = vpop.permute.xlu1 %2372  ;;  %4792 = vmatpush2.bf16.msra.mxu1 %v11245_v56  ;;  %v3811_v36 = vrot.slane %v14772_v59, 6  ;;  %v3812_v33 = vrot.slane %v3174_v28, 7 }
 0x2e1   : > { %3846 = vrot.lane.b32.xlu0 %v19858_v62, %s11760_s30  ;;  %v2145_v62 = vpop.permute.xlu0 %2144  ;;  %v14796_v52 = vsel %vm13416_vm15, %v3172_v48, %v3176_v60  ;;  %4793 = vmatprep.subr.bf16.mxu1 %v19824_v61  ;;  %v3508_v26 = vrot.slane %v14692_v20, 4  ;;  %v4100_v51 = vrot.slane %v14772_v59, 7  ;;  %v19861_v56 = vld [vmem:[#allocation48_spill] sm:$0xff]  ;;  %vm2837_vm2 = vcmp.ge.s32.totalorder %v2818_v5, 0 }
 0x2e2   : > { %v2188_v55 = vadd.f32 %v2145_v62, %v2074_v6  ;;  %v14801_v32 = vor.u32 %v3510_v57, %v3509_v42  ;;  %v19862_v0 = vsel %vm13491_vm13, %v13575_v11, %v19861_v56  ;;  %v19863_v48 = vld [vmem:[#allocation44_spill] sm:$0xff]  ;;  %vm2856_vm9 = vcmp.lt.s32.totalorder %v2818_v5, 300  ;;  %v19868_v5 = vld [vmem:[#allocation51_spill] sm:$0xff] }
 0x2e3   : > { %v3810_v6 = vrot.slane %v14699_v4, 4  ;;  %v14813_v62 = vor.u32 %v3812_v33, %v3811_v36  ;;  %v2665_v20 = vadd.f32 %v2646_v43, %v13596_v31  ;;  %v19864_v42 = vrot.slane %v14660_v41, 7  ;;  %vm2875_vm12 = vmand %vm2837_vm2, %vm2856_vm9 }
 0x2e4   : > { %4130 = vrot.lane.b32.xlu1 %v19862_v0, %s11758_s17  ;;  %v14819_v57 = vsel %vm13426_vm14, %v3508_v26, %v14801_v32  ;;  %v14825_v56 = vor.u32 %v4100_v51, %v3174_v28  ;;  %v2753_v0 = vpop.permute.xlu1 %2752  ;;  %4794 = vmatpush2.bf16.msra.mxu1 %v11246_v40  ;;  %v2302_v31 = vadd.f32 %v2259_v47, %v2188_v55  ;;  %v3180_v41 = vrot.slane %v14772_v59, 4  ;;  %v19867_v28 = vld [vmem:[#allocation53_spill] sm:$0xff] }
 0x2e5   : > { %4128 = vrot.lane.b32.xlu0 %v19863_v48, %s11758_s17  ;;  %v14823_v11 = vrot.slane %v19864_v42, 4  ;;  %v2487_v48 = vpop.permute.xlu0 %2486  ;;  %v14830_v4 = vsel %vm13475_vm5, %v3810_v6, %v14813_v62  ;;  %v2797_v33 = vadd.f32 %v2753_v0, %v2665_v20  ;;  %v3356_v59 = vrot.slane %v3354_v49, 4 }
 0x2e6   : > { %19866 = vst [vmem:[#allocation42_spill] sm:$0xff] %v14825_v56  ;;  %v2416_v26 = vadd.f32 %v2373_v16, %v2302_v31  ;;  %v3181_v6 = vor.u32 %v3180_v41, %v3176_v60  ;;  %v3658_v42 = vrot.slane %v3656_v19, 4  ;;  %v3960_v0 = vrot.slane %v3958_v18, 4 }
 0x2e7   : > { %19865 = vst [vmem:[#allocation41_spill] sm:$0xff] %v14823_v11  ;;  %v2901_v40 = vadd.f32 %v14097_v7, %v2797_v33  ;;  %v19869_v33 = vld [vmem:[#allocation52_spill] sm:$0xff] }
 0x2e8   : > { %4477 = vrot.lane.b32.xlu1 %v19867_v28, %s11763_s26  ;;  %v1919_v47 = vpop.permute.xlu1 %1918  ;;  %v2530_v49 = vadd.f32 %v2487_v48, %v2416_v26  ;;  %v3182_v31 = vrot.slane %v3181_v6, 4 }
 0x2e9   : > { %4475 = vrot.lane.b32.xlu0 %v13560_v23, %s11763_s26  ;;  %v2604_v55 = vpop.permute.xlu0 %2603  ;;  %v2958_v36 = vsel %vm2875_vm12, %v2901_v40, 0.0  ;;  %v1961_v19 = vadd.f32 %v1919_v47, %v13600_v35 }
 0x2ea   : > { %v14844_v20 = vpack.c.bf16 %v2958_v36, %v2958_v36 }
 0x2ec   : > { %3381 = vrot.lane.b32.xlu1 %v13887_v45, %s11762_s16  ;;  %v2261_v43 = vpop.permute.xlu1 %2260  ;;  %3050 = vst.msk [vmem:[#allocation3 + $0x60] sm:$0xf] %vm3037_vm1, %v14844_v20  ;;  %4288 = vst.msk [vmem:[#allocation3 + $0x5c] sm:$0xf] %vm3037_vm1, %v14844_v20  ;;  %v19266_v7 = vrot.slane %v14844_v20, 5  ;;  %v19265_v16 = vrot.slane %v14844_v20, 6 }
 0x2ed   : > { %3379 = vrot.lane.b32.xlu0 %v19868_v5, %s11762_s16  ;;  %v2033_v23 = vpop.permute.xlu0 %2032  ;;  %v19264_v45 = vrot.slane %v14844_v20, 7  ;;  %v14858_v60 = vshll.u32 %v14844_v20, 16  ;;  %v14862_v18 = vshrl.u32 %v14844_v20, 16 }
 0x2ee   : > { %v14872_v41 = vsel %vm13353_vm7, %v3356_v59, %v19266_v7  ;;  %v14878_v35 = vsel %vm13366_vm0, %v3658_v42, %v19265_v16  ;;  %v2075_v40 = vadd.f32 %v2033_v23, %v1961_v19  ;;  %v3815_v59 = vrot.slane %v14813_v62, 4  ;;  %v19874_v62 = vld [vmem:[#allocation59_spill] sm:$0xff] }
 0x2ef   : > { %v3817_v48 = vrot.slane %v14858_v60, 7  ;;  %v3816_v47 = vrot.slane %v14862_v18, 6  ;;  %v3186_v36 = vrot.slane %v14858_v60, 5  ;;  %v19267_v26 = vrot.slane %v14862_v18, 7  ;;  %v19876_v7 = vld [vmem:[#allocation23_spill] sm:$0xff] }
 0x2f0   : > { %3683 = vrot.lane.b32.xlu1 %v13893_v27, %s11757_s19  ;;  %v14884_v27 = vsel %vm13373_vm10, %v3960_v0, %v19264_v45  ;;  %v2375_v6 = vpop.permute.xlu1 %2374  ;;  %v14891_v42 = vrot.slane %v4100_v51, 4  ;;  %v3515_v0 = vrot.slane %v14858_v60, 6  ;;  %v19875_v51 = vld [vmem:[#allocation54_spill] sm:$0xff] }
 0x2f1   : > { %3681 = vrot.lane.b32.xlu0 %v19869_v33, %s11757_s19  ;;  %19870 = vst [vmem:[#allocation43_spill] sm:$0xff] %v14884_v27  ;;  %v2147_v5 = vpop.permute.xlu0 %2146  ;;  %v3514_v33 = vrot.slane %v14862_v18, 5  ;;  %v14895_v16 = vor.u32 %v3817_v48, %v3816_v47  ;;  %v14899_v23 = vsel %vm13416_vm15, %v3182_v31, %v3186_v36  ;;  %v14904_v19 = vor.u32 %v19267_v26, %v14858_v60 }
 0x2f2   : > { %19871 = vst [vmem:[#allocation48_spill] sm:$0xff] %v14891_v42  ;;  %v2189_v45 = vadd.f32 %v2147_v5, %v2075_v40  ;;  %19872 = vst [vmem:[#allocation44_spill] sm:$0xff] %v14899_v23  ;;  %v2819_v40 = vadd.s32 %v13160_v3, %v19876_v7  ;;  %v3513_v48 = vrot.slane %v14801_v32, 4  ;;  %v2647_v31 = vadd.f32 %v2604_v55, %v2530_v49  ;;  %v19881_v7 = vld [vmem:[#allocation63_spill] sm:$0xff]  ;;  %v19892_v23 = vld [vmem:[#allocation61_spill] sm:$0xff] }
 0x2f3   : > { %19873 = vst [vmem:[#allocation53_spill] sm:$0xff] %v14904_v19  ;;  %v14913_v47 = vor.u32 %v3515_v0, %v3514_v33  ;;  %v14918_v60 = vsel %vm13475_vm5, %v3815_v59, %v14895_v16 }
 0x2f4   : > { %3985 = vrot.lane.b32.xlu1 %v19874_v62, %s11759_s20  ;;  %v2303_v5 = vadd.f32 %v2261_v43, %v2189_v45  ;;  %19877 = vst [vmem:[#allocation51_spill] sm:$0xff] %v14918_v60  ;;  %v19879_v43 = vld [vmem:[#allocation60_spill] sm:$0xff]  ;;  %v19880_v45 = vld [vmem:[#allocation49_spill] sm:$0xff]  ;;  %vm2838_vm6 = vcmp.ge.s32.totalorder %v2819_v40, 0  ;;  %vm2857_vm4 = vcmp.lt.s32.totalorder %v2819_v40, 300  ;;  %v19893_v60 = vld [vmem:[#allocation62_spill] sm:$0xff] }
 0x2f5   : > { %3983 = vrot.lane.b32.xlu0 %v19875_v51, %s11759_s20  ;;  %v2606_v51 = vpop.permute.xlu1 %2605  ;;  %v2489_v26 = vpop.permute.xlu0 %2488  ;;  %v14927_v32 = vsel %vm13426_vm14, %v3513_v48, %v14913_v47  ;;  %v2666_v49 = vadd.f32 %v2647_v31, %v19880_v45  ;;  %vm2876_vm11 = vmand %vm2838_vm6, %vm2857_vm4  ;;  %v19883_v48 = vld [vmem:[#allocation26_spill] sm:$0xff]  ;;  %v14944_v40 = vld [vmem:[%s19126_s2] ss:$0 sm:$0xff]  ;;  %v19894_v56 = vsel %vm13491_vm13, %v19892_v23, %v19893_v60  ;;  %v3518_v11 = vrot.slane %v14913_v47, 4 }
 0x2f6   : > { %19878 = vst [vmem:[#allocation52_spill] sm:$0xff] %v14927_v32  ;;  %v2417_v33 = vadd.f32 %v2375_v6, %v2303_v5  ;;  %v19882_v6 = vld [vmem:[#allocation57_spill] sm:$0xff]  ;;  %v2820_v5 = vadd.s32 %v13160_v3, %v19883_v48  ;;  %v19886_v48 = vld [vmem:[#allocation50_spill] sm:$0xff] }
 0x2f8   : > { %3248 = vrot.lane.b32.xlu1 %v19879_v43, %s11763_s26  ;;  %v2531_v55 = vadd.f32 %v2489_v26, %v2417_v33  ;;  %vm2839_vm3 = vcmp.ge.s32.totalorder %v2820_v5, 0  ;;  %vm2858_vm2 = vcmp.lt.s32.totalorder %v2820_v5, 300 }
 0x2f9   : > { %3246 = vrot.lane.b32.xlu0 %v19867_v28, %s11763_s26  ;;  %v1921_v59 = vpop.permute.xlu1 %1920  ;;  %v2755_v0 = vpop.permute.xlu0 %2754  ;;  %v3190_v28 = vrot.slane %v14862_v18, 4  ;;  %vm14977_vm9 = vmand %vm2839_vm3, %vm2858_vm2 }
 0x2fa   : > { %v2798_v62 = vadd.f32 %v2755_v0, %v2666_v49  ;;  %v2648_v26 = vadd.f32 %v2606_v51, %v2531_v55  ;;  %v19884_v0 = vld [vmem:[#allocation64_spill] sm:$0xff]  ;;  %v1962_v55 = vadd.f32 %v1921_v59, %v13653_v29 }
 0x2fb   : > { %v3191_v51 = vor.u32 %v3190_v28, %v3186_v36  ;;  %v19888_v28 = vrot.slane %v14844_v20, 6 }
 0x2fc   : > { %3550 = vrot.lane.b32.xlu1 %v19881_v7, %s11761_s13  ;;  %v2902_v31 = vadd.f32 %v14944_v40, %v2798_v62  ;;  %v2667_v61 = vadd.f32 %v2648_v26, %v19886_v48  ;;  %v19887_v62 = vrot.slane %v14844_v20, 5 }
 0x2fd   : > { %3548 = vrot.lane.b32.xlu0 %v19882_v6, %s11761_s13  ;;  %v14947_v33 = vpop.permute.xlu1 %2262  ;;  %v2035_v45 = vpop.permute.xlu0 %2034  ;;  %v19885_v6 = vld [vmem:[#allocation58_spill] sm:$0xff]  ;;  %v3661_v26 = vrot.slane %v19888_v28, 4 }
 0x2fe   : > { %v2959_v7 = vsel %vm2876_vm11, %v2902_v31, 0.0  ;;  %v3359_v32 = vrot.slane %v19887_v62, 4  ;;  %v2076_v62 = vadd.f32 %v2035_v45, %v1962_v55  ;;  %v3192_v45 = vrot.slane %v3191_v51, 4 }
 0x2ff   : > { %v14949_v49 = vpack.c.bf16 %v2959_v7, %v2959_v7 }
 0x300   : > { %3852 = vrot.lane.b32.xlu1 %v19884_v0, %s11760_s30  ;;  %v19889_v0 = vrot.slane %v14844_v20, 7  ;;  %v19896_v20 = vld [vmem:[#allocation56_spill] sm:$0xff] }
 0x301   : > { %3850 = vrot.lane.b32.xlu0 %v19885_v6, %s11760_s30  ;;  %v2757_v19 = vpop.permute.xlu1 %2756  ;;  %v2149_v31 = vpop.permute.xlu0 %2148  ;;  %3051 = vst.msk [vmem:[#allocation3 + $0x68] sm:$0xf] %vm3037_vm1, %v14949_v49  ;;  %4289 = vst.msk [vmem:[#allocation3 + $0x64] sm:$0xf] %vm3037_vm1, %v14949_v49  ;;  %v14964_v7 = vshll.u32 %v14949_v49, 16  ;;  %v3360_v36 = vrot.slane %v14949_v49, 5 }
 0x302   : > { %v3662_v29 = vrot.slane %v14949_v49, 6  ;;  %v14969_v59 = vshrl.u32 %v14949_v49, 16  ;;  %v2799_v48 = vadd.f32 %v2757_v19, %v2667_v61  ;;  %v3963_v6 = vrot.slane %v19889_v0, 4  ;;  %v19895_v61 = vld [vmem:[#allocation55_spill] sm:$0xff] }
 0x303   : > { %v19897_v19 = vsel %vm13491_vm13, %v19895_v61, %v19896_v20  ;;  %v3196_v5 = vrot.slane %v14964_v7, 5  ;;  %v14996_v55 = vsel %vm13353_vm7, %v3359_v32, %v3360_v36  ;;  %v3964_v60 = vrot.slane %v14949_v49, 7 }
 0x304   : > { %4134 = vrot.lane.b32.xlu1 %v19894_v56, %s11758_s17  ;;  %19898 = vst [vmem:[#allocation59_spill] sm:$0xff] %v14996_v55  ;;  %v2903_v28 = vadd.f32 %v14944_v40, %v2799_v48  ;;  %v15001_v23 = vsel %vm13366_vm0, %v3661_v26, %v3662_v29  ;;  %v3821_v56 = vrot.slane %v14969_v59, 6  ;;  %v3822_v32 = vrot.slane %v14964_v7, 7 }
 0x305   : > { %4132 = vrot.lane.b32.xlu0 %v19897_v19, %s11758_s17  ;;  %19899 = vst [vmem:[#allocation54_spill] sm:$0xff] %v15001_v23  ;;  %v15005_v0 = vpop.permute.xlu1 %1922  ;;  %v2377_v61 = vpop.permute.xlu0 %2376  ;;  %v15009_v51 = vsel %vm13416_vm15, %v3192_v45, %v3196_v5  ;;  %v3200_v20 = vrot.slane %v14969_v59, 4  ;;  %v3519_v48 = vrot.slane %v14969_v59, 5  ;;  %v2190_v19 = vadd.f32 %v2149_v31, %v2076_v62 }
 0x306   : > { %19900 = vst [vmem:[#allocation60_spill] sm:$0xff] %v15009_v51  ;;  %v2960_v26 = vsel %vm14977_vm9, %v2903_v28, 0.0  ;;  %v3820_v23 = vrot.slane %v14895_v16, 4  ;;  %v3520_v49 = vrot.slane %v14964_v7, 6  ;;  %v3823_v45 = vor.u32 %v3822_v32, %v3821_v56 }
 0x307   : > { %v15018_v55 = vpack.c.bf16 %v2960_v26, %v2960_v26  ;;  %v3201_v51 = vor.u32 %v3200_v20, %v3196_v5  ;;  %v3362_v27 = vrot.slane %v3360_v36, 4  ;;  %v3664_v42 = vrot.slane %v3662_v29, 4 }
 0x308   : > { %3383 = vrot.lane.b32.xlu1 %v14084_v22, %s11762_s16  ;;  %v3521_v28 = vor.u32 %v3520_v49, %v3519_v48  ;;  %v15027_v16 = vsel %vm13373_vm10, %v3963_v6, %v3964_v60  ;;  %v4108_v36 = vrot.slane %v14969_v59, 7  ;;  %v19904_v56 = vrot.slane %v14862_v18, 7 }
 0x309   : > { %4479 = vrot.lane.b32.xlu0 %v19879_v43, %s11763_s26  ;;  %19901 = vst [vmem:[#allocation49_spill] sm:$0xff] %v15027_v16  ;;  %v15029_v31 = vpop.permute.xlu1 %2150  ;;  %v2491_v62 = vpop.permute.xlu0 %2490  ;;  %3052 = vst.msk [vmem:[#allocation3 + $0x70] sm:$0xf] %vm3037_vm1, %v15018_v55  ;;  %v19276_v22 = vrot.slane %v15018_v55, 5  ;;  %v19275_v47 = vrot.slane %v15018_v55, 6  ;;  %v15039_v43 = vsel %vm13475_vm5, %v3820_v23, %v3823_v45  ;;  %v15043_v29 = vshll.u32 %v15018_v55, 16 }
 0x30a   : > { %4290 = vst.msk [vmem:[#allocation3 + $0x6c] sm:$0xf] %vm3037_vm1, %v15018_v55  ;;  %19902 = vst [vmem:[#allocation63_spill] sm:$0xff] %v15039_v43  ;;  %v15047_v6 = vsel %vm13426_vm14, %v3518_v11, %v3521_v28  ;;  %v15050_v5 = vshrl.u32 %v15018_v55, 16  ;;  %v15054_v32 = vrot.slane %v19904_v56, 4  ;;  %v2304_v20 = vadd.f32 %v14947_v33, %v2190_v19  ;;  %v19905_v23 = vld [vmem:[#allocation65_spill] sm:$0xff] }
 0x30b   : > { %19903 = vst [vmem:[#allocation57_spill] sm:$0xff] %v15047_v6  ;;  %v15065_v11 = vsel %vm13353_vm7, %v3362_v27, %v19276_v22  ;;  %v15071_v18 = vsel %vm13366_vm0, %v3664_v42, %v19275_v47  ;;  %v3202_v59 = vrot.slane %v3201_v51, 4  ;;  %v3206_v33 = vrot.slane %v15043_v29, 5  ;;  %v19906_v6 = vld [vmem:[#allocation66_spill] sm:$0xff] }
 0x30c   : > { %3685 = vrot.lane.b32.xlu1 %v19905_v23, %s11757_s19  ;;  %v3524_v48 = vrot.slane %v15050_v5, 5  ;;  %v3525_v26 = vrot.slane %v15043_v29, 6  ;;  %v3827_v27 = vrot.slane %v15043_v29, 7  ;;  %v15081_v56 = vor.u32 %v4108_v36, %v14964_v7 }
 0x30d   : > { %3385 = vrot.lane.b32.xlu0 %v14142_v8, %s11762_s16  ;;  %v3826_v8 = vrot.slane %v15050_v5, 6  ;;  %v15077_v19 = vpop.permute.xlu1 %2264  ;;  %v2608_v49 = vpop.permute.xlu0 %2607  ;;  %v3966_v23 = vrot.slane %v3964_v60, 4  ;;  %v19278_v42 = vrot.slane %v15018_v55, 7  ;;  %v15086_v51 = vsel %vm13416_vm15, %v3202_v59, %v3206_v33 }
 0x30e   : > { %v3523_v47 = vrot.slane %v3521_v28, 4  ;;  %v15088_v22 = vor.u32 %v3525_v26, %v3524_v48  ;;  %v19277_v16 = vrot.slane %v15050_v5, 7  ;;  %v3825_v7 = vrot.slane %v3823_v45, 4 }
 0x30f   : > { %v15095_v43 = vor.u32 %v3827_v27, %v3826_v8  ;;  %v15105_v28 = vsel %vm13373_vm10, %v3966_v23, %v19278_v42  ;;  %v2418_v59 = vadd.f32 %v2377_v61, %v2304_v20  ;;  %v19911_v20 = vld [vmem:[#allocation25_spill] sm:$0xff] }
 0x310   : > { %3987 = vrot.lane.b32.xlu1 %v19906_v6, %s11759_s20  ;;  %19907 = vst [vmem:[#allocation64_spill] sm:$0xff] %v15105_v28  ;;  %v15110_v6 = vsel %vm13426_vm14, %v3523_v47, %v15088_v22  ;;  %v15117_v45 = vor.u32 %v19277_v16, %v15043_v29  ;;  %v2821_v27 = vadd.s32 %v13160_v3, %v19911_v20  ;;  %v3210_v47 = vrot.slane %v15050_v5, 4 }
 0x311   : > { %3687 = vrot.lane.b32.xlu0 %v14148_v2, %s11757_s19  ;;  %v15112_v2 = vrot.slane %v4108_v36, 4  ;;  %v15119_v48 = vpop.permute.xlu1 %2378  ;;  %v2037_v26 = vpop.permute.xlu0 %2036  ;;  %v15124_v8 = vsel %vm13475_vm5, %v3825_v7, %v15095_v43  ;;  %v2532_v61 = vadd.f32 %v2491_v62, %v2418_v59  ;;  %v19910_v36 = vld [vmem:[#allocation67_spill] sm:$0xff] }
 0x312   : > { %19909 = vst [vmem:[#allocation50_spill] sm:$0xff] %v15117_v45  ;;  %vm2840_vm12 = vcmp.ge.s32.totalorder %v2821_v27, 0  ;;  %vm2859_vm6 = vcmp.lt.s32.totalorder %v2821_v27, 300  ;;  %v3211_v42 = vor.u32 %v3210_v47, %v3206_v33  ;;  %v19921_v33 = vld [vmem:[#allocation73_spill] sm:$0xff] }
 0x313   : > { %19908 = vst [vmem:[#allocation58_spill] sm:$0xff] %v15112_v2  ;;  %v2649_v29 = vadd.f32 %v2608_v49, %v2532_v61  ;;  %v1963_v49 = vadd.f32 %v15005_v0, %v13814_v25  ;;  %vm2878_vm4 = vmand %vm2840_vm12, %vm2859_vm6  ;;  %v19913_v25 = vld [vmem:[#allocation69_spill] sm:$0xff]  ;;  %v19914_v0 = vld [vmem:[#allocation71_spill] sm:$0xff] }
 0x314   : > { %4481 = vrot.lane.b32.xlu1 %v19910_v36, %s11763_s26 }
 0x315   : > { %3989 = vrot.lane.b32.xlu0 %v14154_v1, %s11759_s20  ;;  %v15136_v23 = vpop.permute.xlu1 %2609  ;;  %v15138_v7 = vpop.permute.xlu0 %2492  ;;  %v2668_v62 = vadd.f32 %v2649_v29, %v13657_v58  ;;  %v2077_v60 = vadd.f32 %v2037_v26, %v1963_v49 }
 0x318   : > { %3250 = vrot.lane.b32.xlu1 %v19910_v36, %s11763_s26  ;;  %v19912_v36 = vld [vmem:[#allocation70_spill] sm:$0xff] }
 0x319   : > { %3252 = vrot.lane.b32.xlu0 %v14168_v12, %s11763_s26  ;;  %v1927_v59 = vpop.permute.xlu1 %1926  ;;  %v2759_v1 = vpop.permute.xlu0 %2758 }
 0x31a   : > { %v2800_v61 = vadd.f32 %v2759_v1, %v2668_v62  ;;  %v19915_v62 = vrot.slane %v15018_v55, 5 }
 0x31c   : > { %3552 = vrot.lane.b32.xlu1 %v14131_v63, %s11761_s13  ;;  %v2904_v58 = vadd.f32 %v14944_v40, %v2800_v61  ;;  %v2191_v63 = vadd.f32 %v15029_v31, %v2077_v60  ;;  %v3365_v1 = vrot.slane %v19915_v62, 4  ;;  %v3212_v60 = vrot.slane %v3211_v42, 4  ;;  %v19920_v62 = vld [vmem:[#allocation72_spill] sm:$0xff] }
 0x31d   : > { %3554 = vrot.lane.b32.xlu0 %v19912_v36, %s11761_s13  ;;  %v2269_v29 = vpop.permute.xlu1 %2268  ;;  %v2041_v27 = vpop.permute.xlu0 %2040  ;;  %v19916_v61 = vrot.slane %v15018_v55, 6  ;;  %v19922_v45 = vsel %vm13491_vm13, %v19920_v62, %v19921_v33 }
 0x31e   : > { %v2961_v16 = vsel %vm2878_vm4, %v2904_v58, 0.0  ;;  %v19917_v58 = vld [vmem:[#allocation30_spill] sm:$0xff] }
 0x31f   : > { %v15153_v20 = vpack.c.bf16 %v2961_v16, %v2961_v16  ;;  %v3667_v36 = vrot.slane %v19916_v61, 4 }
 0x320   : > { %3854 = vrot.lane.b32.xlu1 %v19913_v25, %s11760_s30  ;;  %v19918_v25 = vld [vmem:[#allocation68_spill] sm:$0xff] }
 0x321   : > { %3856 = vrot.lane.b32.xlu0 %v19914_v0, %s11760_s30  ;;  %v15162_v26 = vpop.permute.xlu1 %2496  ;;  %v2155_v49 = vpop.permute.xlu0 %2154  ;;  %3053 = vst.msk [vmem:[#allocation3 + $0x78] sm:$0xf] %vm3037_vm1, %v15153_v20  ;;  %4291 = vst.msk [vmem:[#allocation3 + $0x74] sm:$0xf] %vm3037_vm1, %v15153_v20  ;;  %v15169_v16 = vshll.u32 %v15153_v20, 16  ;;  %v15173_v47 = vshrl.u32 %v15153_v20, 16  ;;  %v19919_v0 = vsel %vm13491_vm13, %v19917_v58, %v19918_v25  ;;  %v2305_v25 = vadd.f32 %v15077_v19, %v2191_v63 }
 0x322   : > { %v19923_v42 = vrot.slane %v15153_v20, 5 }
 0x323   : > { %v3529_v2 = vrot.slane %v15173_v47, 5  ;;  %v3530_v28 = vrot.slane %v15169_v16, 6  ;;  %v3831_v19 = vrot.slane %v15173_v47, 6 }
 0x324   : > { %4136 = vrot.lane.b32.xlu1 %v19919_v0, %s11758_s17  ;;  %v15195_v61 = vsel %vm13353_vm7, %v3365_v1, %v19923_v42  ;;  %v1965_v0 = vadd.f32 %v1927_v59, %v14233_v21  ;;  %v19927_v1 = vrot.slane %v15169_v16, 5  ;;  %v3832_v21 = vrot.slane %v15169_v16, 7 }
 0x325   : > { %4138 = vrot.lane.b32.xlu0 %v19922_v45, %s11758_s17  ;;  %19924 = vst [vmem:[#allocation61_spill] sm:$0xff] %v15195_v61  ;;  %v19925_v45 = vrot.slane %v15153_v20, 6  ;;  %v2039_v62 = vpop.permute.xlu1 %2038  ;;  %v2383_v31 = vpop.permute.xlu0 %2382  ;;  %v19928_v59 = vrot.slane %v15018_v55, 7  ;;  %v3528_v61 = vrot.slane %v15088_v22, 4  ;;  %v19281_v22 = vrot.slane %v15173_v47, 7 }
 0x326   : > { %v15212_v42 = vsel %vm13416_vm15, %v3212_v60, %v19927_v1  ;;  %v2079_v58 = vadd.f32 %v2041_v27, %v1965_v0  ;;  %v3830_v60 = vrot.slane %v15095_v43, 4  ;;  %v15226_v1 = vor.u32 %v3832_v21, %v3831_v19 }
 0x327   : > { %v15206_v33 = vsel %vm13366_vm0, %v3667_v36, %v19925_v45  ;;  %v3969_v63 = vrot.slane %v19928_v59, 4  ;;  %v15219_v36 = vor.u32 %v3530_v28, %v3529_v2  ;;  %v19929_v45 = vld [vmem:[#allocation31_spill] sm:$0xff]  ;;  %v2419_v28 = vadd.f32 %v15119_v48, %v2305_v25 }
 0x328   : > { %19926 = vst [vmem:[#allocation62_spill] sm:$0xff] %v15206_v33  ;;  %4483 = vrot.lane.b32.xlu1 %v14168_v12, %s11763_s26  ;;  %v19930_v33 = vrot.slane %v15153_v20, 7  ;;  %v2193_v2 = vadd.f32 %v2155_v49, %v2079_v58  ;;  %v15244_v0 = vsel %vm13475_vm5, %v3830_v60, %v15226_v1  ;;  %v15253_v48 = vor.u32 %v19281_v22, %v15169_v16  ;;  %v19936_v58 = vld [vmem:[#allocation32_spill] sm:$0xff] }
 0x329   : > { %3387 = vrot.lane.b32.xlu0 %v19929_v45, %s11762_s16  ;;  %v15239_v12 = vsel %vm13426_vm14, %v3528_v61, %v15219_v36  ;;  %v2153_v27 = vpop.permute.xlu1 %2152  ;;  %v1925_v43 = vpop.permute.xlu0 %1924  ;;  %v19935_v61 = vld [vmem:[#allocation74_spill] sm:$0xff]  ;;  %v2533_v25 = vadd.f32 %v15138_v7, %v2419_v28  ;;  %v19941_v28 = vld [vmem:[#allocation27_spill] sm:$0xff] }
 0x32a   : > { %v15232_v55 = vsel %vm13373_vm10, %v3969_v63, %v19930_v33  ;;  %v19932_v33 = vrot.slane %v15050_v5, 7  ;;  %19934 = vst [vmem:[#allocation65_spill] sm:$0xff] %v15253_v48  ;;  %v1964_v49 = vadd.f32 %v1925_v43, %v13940_v39  ;;  %v2307_v21 = vadd.f32 %v2269_v29, %v2193_v2  ;;  %v19937_v39 = vld [vmem:[#allocation34_spill] sm:$0xff]  ;;  %v19938_v43 = vld [vmem:[#allocation33_spill] sm:$0xff] }
 0x32b   : > { %19931 = vst [vmem:[#allocation55_spill] sm:$0xff] %v15232_v55  ;;  %v2650_v22 = vadd.f32 %v15136_v23, %v2533_v25  ;;  %v2823_v2 = vadd.s32 %v13160_v3, %v19941_v28 }
 0x32c   : > { %v15248_v19 = vrot.slane %v19932_v33, 4  ;;  %3254 = vrot.lane.b32.xlu1 %v19935_v61, %s11763_s26  ;;  %v2078_v59 = vadd.f32 %v2039_v62, %v1964_v49  ;;  %v19939_v33 = vld [vmem:[#allocation28_spill] sm:$0xff]  ;;  %v2421_v55 = vadd.f32 %v2383_v31, %v2307_v21  ;;  %v19940_v62 = vld [vmem:[#allocation79_spill] sm:$0xff]  ;;  %v19942_v21 = vld [vmem:[#allocation29_spill] sm:$0xff] }
 0x32d   : > { %3689 = vrot.lane.b32.xlu0 %v19936_v58, %s11757_s19  ;;  %v2495_v63 = vpop.permute.xlu1 %2494  ;;  %v2267_v45 = vpop.permute.xlu0 %2266  ;;  %v2822_v58 = vadd.s32 %v13160_v3, %v19939_v33  ;;  %v2669_v49 = vadd.f32 %v2650_v22, %v13942_v9  ;;  %vm2842_vm9 = vcmp.ge.s32.totalorder %v2823_v2, 0  ;;  %vm2861_vm12 = vcmp.lt.s32.totalorder %v2823_v2, 300  ;;  %v19968_v33 = vld [vmem:[#allocation85_spill] sm:$0xff] }
 0x32e   : > { %19933 = vst [vmem:[#allocation56_spill] sm:$0xff] %v15248_v19  ;;  %v2192_v60 = vadd.f32 %v2153_v27, %v2078_v59  ;;  %v2535_v23 = vadd.f32 %v15162_v26, %v2421_v55 }
 0x32f   : > { %vm2841_vm11 = vcmp.ge.s32.totalorder %v2822_v58, 0  ;;  %vm2860_vm3 = vcmp.lt.s32.totalorder %v2822_v58, 300 }
 0x330   : > { %3389 = vrot.lane.b32.xlu1 %v19937_v39, %s11762_s16  ;;  %v2306_v5 = vadd.f32 %v2267_v45, %v2192_v60  ;;  %vm2879_vm2 = vmand %vm2841_vm11, %vm2860_vm3  ;;  %v19943_v39 = vld [vmem:[#allocation80_spill] sm:$0xff] }
 0x331   : > { %3991 = vrot.lane.b32.xlu0 %v19938_v43, %s11759_s20  ;;  %v2612_v48 = vpop.permute.xlu1 %2611  ;;  %v2381_v7 = vpop.permute.xlu0 %2380  ;;  %vm15294_vm11 = vmand %vm2842_vm9, %vm2861_vm12  ;;  %vm19292_vm9 = vcmask 388352   ;;  %vm3055_vm12 = vcmask 122880  }
 0x332   : > { %v2420_v29 = vadd.f32 %v2381_v7, %v2306_v5  ;;  %v2824_v5 = vadd.s32 %v13160_v3, %v19942_v21  ;;  %v19945_v7 = vrot.slane %v15169_v16, 5 }
 0x334   : > { %3691 = vrot.lane.b32.xlu1 %v19940_v62, %s11757_s19  ;;  %v2534_v27 = vadd.f32 %v2495_v63, %v2420_v29  ;;  %v19944_v63 = vld [vmem:[#allocation76_spill] sm:$0xff]  ;;  %vm2843_vm6 = vcmp.ge.s32.totalorder %v2824_v5, 0  ;;  %vm2862_vm4 = vcmp.lt.s32.totalorder %v2824_v5, 300 }
 0x335   : > { %4485 = vrot.lane.b32.xlu0 %v19935_v61, %s11763_s26  ;;  %v2614_v25 = vpop.permute.xlu0 %2613  ;;  %v3220_v61 = vrot.slane %v15173_v47, 4  ;;  %vm15302_vm3 = vmand %vm2843_vm6, %vm2862_vm4  ;;  %vm19293_vm4 = vcmask 650752  }
 0x336   : > { %v2761_v31 = vpop.permute.xlu1 %2760  ;;  %v2652_v45 = vadd.f32 %v2614_v25, %v2535_v23  ;;  %v2651_v60 = vadd.f32 %v2612_v48, %v2534_v27  ;;  %v19952_v23 = vrot.slane %v15153_v20, 5  ;;  %v19953_v25 = vrot.slane %v15153_v20, 6  ;;  %vm15442_vm6 = vmand %vm3055_vm12, %vm3056_vm8 }
 0x337   : > { %v2801_v59 = vadd.f32 %v2761_v31, %v2669_v49  ;;  %v3221_v29 = vor.u32 %v3220_v61, %v19945_v7  ;;  %vm19289_vm12 = vcmask 1044352  }
 0x338   : > { %3993 = vrot.lane.b32.xlu1 %v19943_v39, %s11759_s20  ;;  %v2671_v26 = vadd.f32 %v2652_v45, %v14479_v54  ;;  %v2670_v55 = vadd.f32 %v2651_v60, %v14463_v53  ;;  %v19948_v54 = vld [vmem:[#allocation35_spill] sm:$0xff]  ;;  %v19949_v53 = vld [vmem:[#allocation78_spill] sm:$0xff]  ;;  %v3368_v31 = vrot.slane %v19952_v23, 4  ;;  %v3670_v21 = vrot.slane %v19953_v25, 4 }
 0x339   : > { %3556 = vrot.lane.b32.xlu0 %v19944_v63, %s11761_s13  ;;  %v2905_v9 = vadd.f32 %v14944_v40, %v2801_v59  ;;  %v3222_v63 = vrot.slane %v3221_v29, 4 }
 0x33a   : > { %v2765_v3 = vpop.permute.xlu1 %2764 }
 0x33b   : > { %v2763_v22 = vpop.permute.xlu0 %2762  ;;  %v2962_v48 = vsel %vm2879_vm2, %v2905_v9, 0.0  ;;  %v2803_v43 = vadd.f32 %v2765_v3, %v2671_v26  ;;  %v19954_v9 = vrot.slane %v15153_v20, 7  ;;  %vm3296_vm2 = vcmask 257152  }
 0x33c   : > { %v2802_v58 = vadd.f32 %v2763_v22, %v2670_v55  ;;  %v15292_v62 = vpack.c.bf16 %v2962_v48, %v2962_v48  ;;  %3558 = vrot.lane.b32.xlu1 %v19948_v54, %s11761_s13  ;;  %v19955_v48 = vld [vmem:[#allocation84_spill] sm:$0xff] }
 0x33d   : > { %3858 = vrot.lane.b32.xlu0 %v19949_v53, %s11760_s30  ;;  %v2907_v49 = vadd.f32 %v14944_v40, %v2803_v43  ;;  %v3972_v26 = vrot.slane %v19954_v9, 4  ;;  %v19956_v43 = vld [vmem:[#allocation77_spill] sm:$0xff] }
 0x33e   : > { %v2906_v16 = vadd.f32 %v14944_v40, %v2802_v58  ;;  %v15312_v5 = vpop.permute.xlu1 %3377  ;;  %3054 = vst.msk [vmem:[#allocation3 + $0x80] sm:$0xf] %vm3037_vm1, %v15292_v62  ;;  %4292 = vst.msk [vmem:[#allocation3 + $0x7c] sm:$0xf] %vm3037_vm1, %v15292_v62  ;;  %v3224_v45 = vshll.u32 %v15292_v62, 16  ;;  %v3369_v40 = vrot.slane %v15292_v62, 5 }
 0x33f   : > { %v15314_v59 = vpop.permute.xlu0 %3375  ;;  %v15323_v60 = vshrl.u32 %v15292_v62, 16  ;;  %v3671_v61 = vrot.slane %v15292_v62, 6  ;;  %v3973_v55 = vrot.slane %v15292_v62, 7  ;;  %v2964_v3 = vsel %vm15302_vm3, %v2907_v49, 0.0  ;;  %v19957_v58 = vld [vmem:[#allocation75_spill] sm:$0xff] }
 0x340   : > { %v2963_v39 = vsel %vm15294_vm11, %v2906_v16, 0.0  ;;  %3860 = vrot.lane.b32.xlu1 %v19955_v48, %s11760_s30  ;;  %v19958_v7 = vsel %vm13491_vm13, %v19956_v43, %v19957_v58  ;;  %v3226_v20 = vrot.slane %v3224_v45, 5  ;;  %v15345_v29 = vsel %vm13353_vm7, %v3368_v31, %v3369_v40  ;;  %v19960_v48 = vld [vmem:[#allocation81_spill] sm:$0xff]  ;;  %v19961_v43 = vld [vmem:[#allocation82_spill] sm:$0xff] }
 0x341   : > { %v15333_v22 = vpack.c.bf16 %v2963_v39, %v2963_v39  ;;  %4140 = vrot.lane.b32.xlu0 %v19958_v7, %s11758_s17  ;;  %v3534_v62 = vrot.slane %v15323_v60, 5  ;;  %v3535_v27 = vrot.slane %v3224_v45, 6  ;;  %v15350_v54 = vsel %vm13366_vm0, %v3670_v21, %v3671_v61 }
 0x342   : > { %v3836_v53 = vrot.slane %v15323_v60, 6  ;;  %v15353_v2 = vpop.permute.xlu1 %3679  ;;  %v15364_v23 = vsel %vm13416_vm15, %v3222_v63, %v3226_v20  ;;  %v3533_v31 = vrot.slane %v15219_v36, 4  ;;  %v3837_v21 = vrot.slane %v3224_v45, 7  ;;  %v19963_v63 = vld [vmem:[#allocation83_spill] sm:$0xff] }
 0x343   : > { %v15355_v49 = vpop.permute.xlu0 %3677  ;;  %4293 = vst.msk [vmem:[#allocation3 + $0x84] sm:$0xf] %vm3037_vm1, %v15333_v22  ;;  %v15360_v16 = vshrl.u32 %v15333_v22, 16  ;;  %v3536_v25 = vor.u32 %v3535_v27, %v3534_v62  ;;  %v15369_v39 = vsel %vm13373_vm10, %v3972_v26, %v3973_v55  ;;  %v15371_v9 = vpack.c.bf16 %v2964_v3, %v2964_v3 }
 0x344   : > { %19959 = vst [vmem:[#allocation66_spill] sm:$0xff] %v15369_v39  ;;  %v19962_v58 = vsel %vm13491_vm13, %v19960_v48, %v19961_v43  ;;  %vm19291_vm1 = vcmask 519552   ;;  %v3835_v7 = vrot.slane %v15226_v1, 4  ;;  %v19964_v26 = vrot.slane %v15173_v47, 7 }
 0x345   : > { %4142 = vrot.lane.b32.xlu1 %v19962_v58, %s11758_s17  ;;  %3256 = vrot.lane.b32.xlu0 %v19963_v63, %s11763_s26  ;;  %v15390_v27 = vsel %vm13426_vm14, %v3533_v31, %v3536_v25  ;;  %v3838_v48 = vor.u32 %v3837_v21, %v3836_v53  ;;  %v4120_v43 = vrot.slane %v15323_v60, 7  ;;  %v3230_v47 = vrot.slane %v15323_v60, 4 }
 0x346   : > { %v15385_v62 = vrot.slane %v19964_v26, 4  ;;  %v15393_v58 = vpop.permute.xlu1 %3981  ;;  %v3234_v26 = vshll.u32 %v15333_v22, 16  ;;  %v3371_v53 = vrot.slane %v3369_v40, 4  ;;  %v3673_v21 = vrot.slane %v3671_v61, 4 }
 0x347   : > { %v15395_v28 = vpop.permute.xlu0 %3979  ;;  %v15403_v3 = vsel %vm13475_vm5, %v3835_v7, %v3838_v48  ;;  %v15405_v31 = vor.u32 %v4120_v43, %v3224_v45  ;;  %v3231_v36 = vor.u32 %v3230_v47, %v3226_v20  ;;  %v19969_v45 = vrot.slane %v15333_v22, 5 }
 0x348   : > { %19965 = vst [vmem:[#allocation67_spill] sm:$0xff] %v15385_v62  ;;  %19966 = vst [vmem:[#allocation70_spill] sm:$0xff] %v15403_v3  ;;  %v3236_v60 = vrot.slane %v3234_v26, 5  ;;  %v3540_v19 = vrot.slane %v3234_v26, 6  ;;  %v3975_v20 = vrot.slane %v3973_v55, 4  ;;  %v3538_v39 = vrot.slane %v3536_v25, 4 }
 0x349   : > { %19967 = vst [vmem:[#allocation69_spill] sm:$0xff] %v15405_v31  ;;  %3693 = vrot.lane.b32.xlu1 %v19968_v33, %s11757_s19  ;;  %4487 = vrot.lane.b32.xlu0 %v19963_v63, %s11763_s26  ;;  %v15420_v40 = vsel %vm13353_vm7, %v3371_v53, %v19969_v45  ;;  %v19970_v33 = vrot.slane %v15333_v22, 6  ;;  %v3232_v1 = vrot.slane %v3231_v36, 4  ;;  %v19971_v3 = vrot.slane %v15360_v16, 5  ;;  %v3058_v62 = vld [vmem:[#allocation3 + $0x88] sm:$0x1] }
 0x34a   : > { %v3245_v63 = vpop.permute.xlu1 %3244  ;;  %v3842_v31 = vrot.slane %v3234_v26, 7  ;;  %v19972_v53 = vrot.slane %v15333_v22, 7  ;;  %v3840_v55 = vrot.slane %v3838_v48, 4  ;;  %v4124_v45 = vrot.slane %v15360_v16, 7  ;;  %v4294_v36 = vld [vmem:[#allocation3 + $0x8c] sm:$0x1] }
 0x34b   : > { %v15426_v61 = vsel %vm13366_vm0, %v3673_v21, %v19970_v33  ;;  %v3243_v47 = vpop.permute.xlu0 %3242  ;;  %v3541_v7 = vor.u32 %v3540_v19, %v19971_v3  ;;  %3298 = vst.msk [vmem:[#allocation3 + $0x8] sm:$0xf] %vm3296_vm2, %v3245_v63  ;;  %v4463_v25 = vrot.slane %v15360_v16, 4  ;;  %v19975_v3 = vld [vmem:[#allocation86_spill] sm:$0xff]  ;;  %v19976_v33 = vld [vmem:[#allocation87_spill] sm:$0xff]  ;;  %v15456_v48 = vsel %vm13416_vm15, %v3232_v1, %v3236_v60 }
 0x34c   : > { %3297 = vst.msk [vmem:[#allocation3] sm:$0xf] %vm3296_vm2, %v3243_v47  ;;  %v15436_v21 = vsel %vm13373_vm10, %v3975_v20, %v19972_v53  ;;  %v19977_v63 = vrot.slane %v15360_v16, 6  ;;  %v4467_v53 = vshll.u32 %v15371_v9, 16  ;;  %vm19294_vm11 = vcmask 781952  }
 0x34d   : > { %3995 = vrot.lane.b32.xlu1 %v19975_v3, %s11759_s20  ;;  %3391 = vrot.lane.b32.xlu0 %v19976_v33, %s11762_s16  ;;  %3431 = vst.msk [vmem:[#allocation3 + $0x8] sm:$0xf] %vm19292_vm9, %v15312_v5  ;;  %3430 = vst.msk [vmem:[#allocation3] sm:$0xf] %vm19292_vm9, %v15314_v59  ;;  %v15460_v20 = vsel %vm13426_vm14, %v3538_v39, %v3541_v7  ;;  %v4464_v3 = vor.u32 %v4463_v25, %v3236_v60  ;;  %v15465_v33 = vrot.slane %v4120_v43, 4  ;;  %v19978_v7 = vld [vmem:[#allocation88_spill] sm:$0xff] }
 0x34e   : > { %v3843_v47 = vor.u32 %v3842_v31, %v19977_v63  ;;  %v15469_v5 = vor.u32 %v4124_v45, %v3234_v26  ;;  %v3547_v59 = vpop.permute.xlu1 %3546  ;;  %v3059_v39 = vsel %vm15442_vm6, %v15333_v22, %v3058_v62  ;;  %v4295_v31 = vsel %vm15442_vm6, %v15371_v9, %v4294_v36  ;;  %v19982_v63 = vld [vmem:[#allocation89_spill] sm:$0xff] }
 0x34f   : > { %v3545_v1 = vpop.permute.xlu0 %3544  ;;  %3600 = vst.msk [vmem:[#allocation3 + $0x8] sm:$0xf] %vm19291_vm1, %v3547_v59  ;;  %v4465_v43 = vrot.slane %v4464_v3, 4  ;;  %v4469_v26 = vrot.slane %v4467_v53, 5  ;;  %3060 = vst [vmem:[#allocation3 + $0x88] sm:$0x1] %v3059_v39 }
 0x350   : > { %v15473_v38 = vsel %vm13475_vm5, %v3840_v55, %v3843_v47  ;;  %3599 = vst.msk [vmem:[#allocation3] sm:$0xf] %vm19291_vm1, %v3545_v1  ;;  %v4126_v60 = vsel %vm13491_vm13, %v15465_v33, %v15469_v5  ;;  %4296 = vst [vmem:[#allocation3 + $0x8c] sm:$0x1] %v4295_v31  ;;  %vm19288_vm3 = vcmask 913152   ;;  %vm19290_vm6 = vcmask 261120  }
 0x351   : > { %4489 = vrot.lane.b32.xlu1 %v19978_v7, %s11763_s26  ;;  %3258 = vrot.lane.b32.xlu0 %v19978_v7, %s11763_s26  ;;  %3733 = vst.msk [vmem:[#allocation3 + $0x8] sm:$0xf] %vm19293_vm4, %v15353_v2  ;;  %3732 = vst.msk [vmem:[#allocation3] sm:$0xf] %vm19293_vm4, %v15355_v49  ;;  %v15497_v62 = vsel %vm13416_vm15, %v4465_v43, %v4469_v26  ;;  %v19984_v39 = vld [vmem:[#allocation38_spill] sm:$0xff]  ;;  %v19986_v31 = vld [vmem:[#allocation39_spill] sm:$0xff] }
 0x352   : > { %v3849_v55 = vpop.permute.xlu1 %3848 }
 0x353   : > { %v3847_v25 = vpop.permute.xlu0 %3846  ;;  %3902 = vst.msk [vmem:[#allocation3 + $0x8] sm:$0xf] %vm19294_vm11, %v3849_v55 }
 0x354   : > { %3901 = vst.msk [vmem:[#allocation3] sm:$0xf] %vm19294_vm11, %v3847_v25  ;;  %v19988_v25 = vld [vmem:[#allocation47_spill] sm:$0xff] }
 0x355   : > { %3393 = vrot.lane.b32.xlu1 %v14670_v10, %s11762_s16  ;;  %3695 = vrot.lane.b32.xlu0 %v14676_v24, %s11757_s19  ;;  %4035 = vst.msk [vmem:[#allocation3 + $0x8] sm:$0xf] %vm19288_vm3, %v15393_v58  ;;  %4034 = vst.msk [vmem:[#allocation3] sm:$0xf] %vm19288_vm3, %v15395_v28  ;;  %v19979_v10 = vld [vmem:[#allocation45_spill] sm:$0xff]  ;;  %v19980_v28 = vld [vmem:[#allocation90_spill] sm:$0xff] }
 0x356   : > { %v4131_v2 = vpop.permute.xlu1 %4130 }
 0x357   : > { %v4129_v49 = vpop.permute.xlu0 %4128  ;;  %4184 = vst.msk [vmem:[#allocation3 + $0x8] sm:$0xf] %vm19289_vm12, %v4131_v2  ;;  %v19989_v2 = vld [vmem:[#allocation40_spill] sm:$0xff] }
 0x358   : > { %4183 = vst.msk [vmem:[#allocation3] sm:$0xf] %vm19289_vm12, %v4129_v49 }
 0x359   : > { %3560 = vrot.lane.b32.xlu1 %v14594_v15, %s11761_s13  ;;  %3997 = vrot.lane.b32.xlu0 %v19979_v10, %s11759_s20  ;;  %v19981_v15 = vld [vmem:[#allocation36_spill] sm:$0xff] }
 0x35a   : > { %v4478_v24 = vpop.permute.xlu1 %4477  ;;  %v19983_v47 = vsel %vm13491_vm13, %v19981_v15, %v19982_v63 }
 0x35b   : > { %v4476_v19 = vpop.permute.xlu0 %4475  ;;  %4530 = vst.msk [vmem:[#allocation3 + $0xc] sm:$0xf] %vm3296_vm2, %v4478_v24 }
 0x35c   : > { %4529 = vst.msk [vmem:[#allocation3 + $0x4] sm:$0xf] %vm3296_vm2, %v4476_v19 }
 0x35d   : > { %3862 = vrot.lane.b32.xlu1 %v19980_v28, %s11760_s30  ;;  %3562 = vrot.lane.b32.xlu0 %v14713_v46, %s11761_s13  ;;  %v19985_v46 = vld [vmem:[#allocation46_spill] sm:$0xff] }
 0x35e   : > { %v3382_v58 = vpop.permute.xlu1 %3381  ;;  %v19987_v43 = vsel %vm13491_vm13, %v19985_v46, %v19986_v31 }
 0x35f   : > { %v3380_v36 = vpop.permute.xlu0 %3379  ;;  %v11247_v59 = vld [vmem:[#allocation3] ss:$8 sps:$4 sm:$0xff]  }
 0x361   : > { %4144 = vrot.lane.b32.xlu1 %v19983_v47, %s11758_s17  ;;  %3864 = vrot.lane.b32.xlu0 %v14722_v14, %s11760_s30 }
 0x362   : > { %v3684_v53 = vpop.permute.xlu1 %3683 }
 0x363   : > { %v3682_v3 = vpop.permute.xlu0 %3681  ;;  %v11249_v1 = vld [vmem:[#allocation3 + $0x4] ss:$8 sps:$4 sm:$0xff]  }
 0x364   : > { %10638 = vmatprep.mubr.msk.bf16.mxu1 %vm19290_vm6, %v11249_v1  ;;  %v19997_v1 = vld [vmem:[#allocation53_spill] sm:$0xff] }
 0x365   : > { %3260 = vrot.lane.b32.xlu1 %v19984_v39, %s11763_s26  ;;  %4146 = vrot.lane.b32.xlu0 %v19987_v43, %s11758_s17  ;;  %v19999_v43 = vld [vmem:[#allocation60_spill] sm:$0xff] }
 0x366   : > { %v3986_v26 = vpop.permute.xlu1 %3985  ;;  %4796 = vmatmul.mubr.bf16.vlgmr.msra.gmra.mxu1 %v11247_v59  ;;  %v19996_v59 = vld [vmem:[#allocation48_spill] sm:$0xff] }
 0x367   : > { %v3984_v14 = vpop.permute.xlu0 %3983 }
 0x369   : > { %4491 = vrot.lane.b32.xlu1 %v19984_v39, %s11763_s26  ;;  %3697 = vrot.lane.b32.xlu0 %v14780_v34, %s11757_s19  ;;  %v19998_v39 = vsel %vm13491_vm13, %v19996_v59, %v19997_v1  ;;  %v20007_v59 = vrot.slane %v15333_v22, 6 }
 0x36a   : > { %v3249_v7 = vpop.permute.xlu1 %3248 }
 0x36b   : > { %v3247_v55 = vpop.permute.xlu0 %3246  ;;  %3300 = vst.msk [vmem:[#allocation3 + $0x18] sm:$0xf] %vm3296_vm2, %v3249_v7  ;;  %v3676_v1 = vrot.slane %v20007_v59, 4 }
 0x36c   : > { %3299 = vst.msk [vmem:[#allocation3 + $0x10] sm:$0xf] %vm3296_vm2, %v3247_v55  ;;  %v20001_v55 = vld [vmem:[#allocation59_spill] sm:$0xff] }
 0x36d   : > { %3433 = vst.msk [vmem:[#allocation3 + $0x18] sm:$0xf] %vm19292_vm9, %v3382_v58  ;;  %3432 = vst.msk [vmem:[#allocation3 + $0x10] sm:$0xf] %vm19292_vm9, %v3380_v36  ;;  %3395 = vrot.lane.b32.xlu1 %v19988_v25, %s11762_s16  ;;  %3999 = vrot.lane.b32.xlu0 %v19989_v2, %s11759_s20  ;;  %v19992_v36 = vld [vmem:[#allocation42_spill] sm:$0xff] }
 0x36e   : > { %v3551_v49 = vpop.permute.xlu1 %3550 }
 0x36f   : > { %v3549_v10 = vpop.permute.xlu0 %3548  ;;  %3602 = vst.msk [vmem:[#allocation3 + $0x18] sm:$0xf] %vm19291_vm1, %v3551_v49 }
 0x370   : > { %3601 = vst.msk [vmem:[#allocation3 + $0x10] sm:$0xf] %vm19291_vm1, %v3549_v10 }
 0x371   : > { %3735 = vst.msk [vmem:[#allocation3 + $0x18] sm:$0xf] %vm19293_vm4, %v3684_v53  ;;  %3734 = vst.msk [vmem:[#allocation3 + $0x10] sm:$0xf] %vm19293_vm4, %v3682_v3  ;;  %3262 = vrot.lane.b32.xlu1 %v14796_v52, %s11763_s26  ;;  %4493 = vrot.lane.b32.xlu0 %v14796_v52, %s11763_s26 }
 0x372   : > { %v3853_v34 = vpop.permute.xlu1 %3852 }
 0x373   : > { %v3851_v24 = vpop.permute.xlu0 %3850  ;;  %3904 = vst.msk [vmem:[#allocation3 + $0x18] sm:$0xf] %vm19294_vm11, %v3853_v34 }
 0x374   : > { %3903 = vst.msk [vmem:[#allocation3 + $0x10] sm:$0xf] %vm19294_vm11, %v3851_v24 }
 0x375   : > { %4037 = vst.msk [vmem:[#allocation3 + $0x18] sm:$0xf] %vm19288_vm3, %v3986_v26  ;;  %4036 = vst.msk [vmem:[#allocation3 + $0x10] sm:$0xf] %vm19288_vm3, %v3984_v14  ;;  %3564 = vrot.lane.b32.xlu1 %v14819_v57, %s11761_s13  ;;  %3397 = vrot.lane.b32.xlu0 %v14872_v41, %s11762_s16  ;;  %v19990_v57 = vld [vmem:[#allocation43_spill] sm:$0xff]  ;;  %v19991_v41 = vld [vmem:[#allocation41_spill] sm:$0xff] }
 0x376   : > { %v4135_v19 = vpop.permute.xlu1 %4134  ;;  %v19993_v15 = vsel %vm13491_vm13, %v19991_v41, %v19992_v36  ;;  %v20000_v26 = vld [vmem:[#allocation52_spill] sm:$0xff] }
 0x377   : > { %v4133_v28 = vpop.permute.xlu0 %4132  ;;  %4186 = vst.msk [vmem:[#allocation3 + $0x18] sm:$0xf] %vm19289_vm12, %v4135_v19 }
 0x378   : > { %4185 = vst.msk [vmem:[#allocation3 + $0x10] sm:$0xf] %vm19289_vm12, %v4133_v28 }
 0x379   : > { %3699 = vrot.lane.b32.xlu1 %v14878_v35, %s11757_s19  ;;  %3866 = vrot.lane.b32.xlu0 %v14830_v4, %s11760_s30  ;;  %v19994_v35 = vld [vmem:[#allocation51_spill] sm:$0xff]  ;;  %v19995_v4 = vld [vmem:[#allocation44_spill] sm:$0xff] }
 0x37a   : > { %v3384_v52 = vpop.permute.xlu1 %3383 }
 0x37b   : > { %v4480_v58 = vpop.permute.xlu0 %4479 }
 0x37c   : > { %4531 = vst.msk [vmem:[#allocation3 + $0x14] sm:$0xf] %vm3296_vm2, %v4480_v58 }
 0x37d   : > { %4001 = vrot.lane.b32.xlu1 %v19990_v57, %s11759_s20  ;;  %4148 = vrot.lane.b32.xlu0 %v19993_v15, %s11758_s17  ;;  %v20004_v57 = vld [vmem:[#allocation57_spill] sm:$0xff] }
 0x37e   : > { %v3686_v63 = vpop.permute.xlu1 %3685 }
 0x37f   : > { %v3386_v47 = vpop.permute.xlu0 %3385 }
 0x381   : > { %3868 = vrot.lane.b32.xlu1 %v19994_v35, %s11760_s30  ;;  %3264 = vrot.lane.b32.xlu0 %v19995_v4, %s11763_s26 }
 0x382   : > { %v3988_v53 = vpop.permute.xlu1 %3987 }
 0x383   : > { %v3688_v3 = vpop.permute.xlu0 %3687  ;;  %v4551_v49 = vld [vmem:[#allocation3 + $0x10] sm:$0xff] }
 0x385   : > { %4150 = vrot.lane.b32.xlu1 %v19998_v39, %s11758_s17  ;;  %4495 = vrot.lane.b32.xlu0 %v19995_v4, %s11763_s26  ;;  %v20006_v4 = vrot.slane %v15360_v16, 5  ;;  %v20008_v39 = vrot.slane %v15360_v16, 6 }
 0x386   : > { %v4482_v46 = vpop.permute.xlu1 %4481 }
 0x387   : > { %v3990_v31 = vpop.permute.xlu0 %3989  ;;  %4532 = vst.msk [vmem:[#allocation3 + $0x1c] sm:$0xf] %vm3296_vm2, %v4482_v46  ;;  %v3845_v46 = vrot.slane %v20008_v39, 4  ;;  %v20022_v39 = vld [vmem:[#allocation69_spill] sm:$0xff] }
 0x389   : > { %4497 = vrot.lane.b32.xlu1 %v19999_v43, %s11763_s26  ;;  %3566 = vrot.lane.b32.xlu0 %v20000_v26, %s11761_s13  ;;  %v20009_v26 = vld [vmem:[#allocation49_spill] sm:$0xff] }
 0x38a   : > { %v3251_v14 = vpop.permute.xlu1 %3250 }
 0x38b   : > { %v3253_v7 = vpop.permute.xlu0 %3252  ;;  %3301 = vst.msk [vmem:[#allocation3 + $0x20] sm:$0xf] %vm3296_vm2, %v3251_v14 }
 0x38c   : > { %3302 = vst.msk [vmem:[#allocation3 + $0x28] sm:$0xf] %vm3296_vm2, %v3253_v7 }
 0x38d   : > { %3434 = vst.msk [vmem:[#allocation3 + $0x20] sm:$0xf] %vm19292_vm9, %v3384_v52  ;;  %3435 = vst.msk [vmem:[#allocation3 + $0x28] sm:$0xf] %vm19292_vm9, %v3386_v47  ;;  %3401 = vrot.lane.b32.xlu1 %v15065_v11, %s11762_s16  ;;  %3399 = vrot.lane.b32.xlu0 %v20001_v55, %s11762_s16  ;;  %v20002_v11 = vld [vmem:[#allocation54_spill] sm:$0xff]  ;;  %v20003_v52 = vld [vmem:[#allocation63_spill] sm:$0xff]  ;;  %v20010_v55 = vsel %vm13491_vm13, %v15054_v32, %v15081_v56 }
 0x38e   : > { %v3553_v25 = vpop.permute.xlu1 %3552  ;;  %v4552_v10 = vld [vmem:[#allocation3 + $0x18] sm:$0xff]  ;;  %v20005_v47 = vrot.slane %v15333_v22, 5  ;;  %v20013_v32 = vld [vmem:[#allocation50_spill] sm:$0xff] }
 0x38f   : > { %v3555_v2 = vpop.permute.xlu0 %3554  ;;  %v11250_v34 = vld [vmem:[#allocation3 + $0x14] ss:$8 sps:$4 sm:$0xff]   ;;  %3603 = vst.msk [vmem:[#allocation3 + $0x20] sm:$0xf] %vm19291_vm1, %v3553_v25  ;;  %v10612_v24 = vcombine.low %v4551_v49, %v4552_v10 }
 0x390   : > { %3604 = vst.msk [vmem:[#allocation3 + $0x28] sm:$0xf] %vm19291_vm1, %v3555_v2  ;;  %10639 = vmatprep.mubr.msk.bf16.mxu1 %vm19290_vm6, %v11250_v34  ;;  %v3374_v35 = vrot.slane %v20005_v47, 4  ;;  %v20011_v25 = vld [vmem:[#allocation64_spill] sm:$0xff]  ;;  %v20012_v34 = vld [vmem:[#allocation58_spill] sm:$0xff] }
 0x391   : > { %3736 = vst.msk [vmem:[#allocation3 + $0x20] sm:$0xf] %vm19293_vm4, %v3686_v63  ;;  %3737 = vst.msk [vmem:[#allocation3 + $0x28] sm:$0xf] %vm19293_vm4, %v3688_v3  ;;  %3703 = vrot.lane.b32.xlu1 %v15071_v18, %s11757_s19  ;;  %3701 = vrot.lane.b32.xlu0 %v20002_v11, %s11757_s19  ;;  %v20014_v56 = vsel %vm13491_vm13, %v20012_v34, %v20013_v32 }
 0x392   : > { %v3855_v19 = vpop.permute.xlu1 %3854  ;;  %4804 = vmatmul.mubr.bf16.gmra.mxu1 %v10612_v24 }
 0x393   : > { %v3857_v28 = vpop.permute.xlu0 %3856  ;;  %3905 = vst.msk [vmem:[#allocation3 + $0x20] sm:$0xf] %vm19294_vm11, %v3855_v19 }
 0x394   : > { %3906 = vst.msk [vmem:[#allocation3 + $0x28] sm:$0xf] %vm19294_vm11, %v3857_v28  ;;  %v20015_v28 = vld [vmem:[#allocation61_spill] sm:$0xff] }
 0x395   : > { %4038 = vst.msk [vmem:[#allocation3 + $0x20] sm:$0xf] %vm19288_vm3, %v3988_v53  ;;  %4039 = vst.msk [vmem:[#allocation3 + $0x28] sm:$0xf] %vm19288_vm3, %v3990_v31  ;;  %3870 = vrot.lane.b32.xlu1 %v20003_v52, %s11760_s30  ;;  %3266 = vrot.lane.b32.xlu0 %v19999_v43, %s11763_s26  ;;  %v3543_v53 = vrot.slane %v20006_v4, 4 }
 0x396   : > { %v4137_v18 = vpop.permute.xlu1 %4136 }
 0x397   : > { %v4139_v58 = vpop.permute.xlu0 %4138  ;;  %4187 = vst.msk [vmem:[#allocation3 + $0x20] sm:$0xf] %vm19289_vm12, %v4137_v18 }
 0x398   : > { %4188 = vst.msk [vmem:[#allocation3 + $0x28] sm:$0xf] %vm19289_vm12, %v4139_v58 }
 0x399   : > { %3268 = vrot.lane.b32.xlu1 %v15086_v51, %s11763_s26  ;;  %3568 = vrot.lane.b32.xlu0 %v20004_v57, %s11761_s13  ;;  %v20016_v57 = vld [vmem:[#allocation62_spill] sm:$0xff] }
 0x39a   : > { %v4484_v41 = vpop.permute.xlu1 %4483 }
 0x39b   : > { %v3388_v36 = vpop.permute.xlu0 %3387  ;;  %4533 = vst.msk [vmem:[#allocation3 + $0x24] sm:$0xf] %vm3296_vm2, %v4484_v41 }
 0x39d   : > { %3570 = vrot.lane.b32.xlu1 %v15110_v6, %s11761_s13  ;;  %3276 = vrot.lane.b32.xlu0 %v15360_v16, %s11763_s26 }
 0x39e   : > { %v3255_v15 = vpop.permute.xlu1 %3254 }
 0x39f   : > { %v3690_v63 = vpop.permute.xlu0 %3689  ;;  %3303 = vst.msk [vmem:[#allocation3 + $0x30] sm:$0xf] %vm3296_vm2, %v3255_v15  ;;  %v20017_v15 = vrot.slane %v15333_v22, 7  ;;  %v20020_v22 = vld [vmem:[#allocation55_spill] sm:$0xff] }
 0x3a0   : > { %3436 = vst.msk [vmem:[#allocation3 + $0x30] sm:$0xf] %vm19292_vm9, %v3388_v36 }
 0x3a1   : > { %3409 = vrot.lane.b32.xlu1 %v3374_v35, %s11762_s16  ;;  %3578 = vrot.lane.b32.xlu0 %v3543_v53, %s11761_s13 }
 0x3a2   : > { %v3390_v6 = vpop.permute.xlu1 %3389 }
 0x3a3   : > { %v3992_v3 = vpop.permute.xlu0 %3991 }
 0x3a5   : > { %3711 = vrot.lane.b32.xlu1 %v3676_v1, %s11757_s19  ;;  %3880 = vrot.lane.b32.xlu0 %v3845_v46, %s11760_s30  ;;  %v20021_v1 = vld [vmem:[#allocation67_spill] sm:$0xff] }
 0x3a6   : > { %v3692_v31 = vpop.permute.xlu1 %3691  ;;  %v20023_v46 = vsel %vm13491_vm13, %v20021_v1, %v20022_v39 }
 0x3a7   : > { %v4486_v43 = vpop.permute.xlu0 %4485 }
 0x3a8   : > { %4534 = vst.msk [vmem:[#allocation3 + $0x2c] sm:$0xf] %vm3296_vm2, %v4486_v43  ;;  %v20025_v43 = vld [vmem:[#allocation65_spill] sm:$0xff] }
 0x3a9   : > { %4003 = vrot.lane.b32.xlu1 %v20009_v26, %s11759_s20  ;;  %3872 = vrot.lane.b32.xlu0 %v15124_v8, %s11760_s30  ;;  %v11254_v8 = vld [vmem:[#allocation3 + $0x20] ss:$8 sps:$4 sm:$0xff]  }
 0x3aa   : > { %v3994_v14 = vpop.permute.xlu1 %3993 }
 0x3ab   : > { %v3557_v7 = vpop.permute.xlu0 %3556 }
 0x3ac   : > { %3605 = vst.msk [vmem:[#allocation3 + $0x30] sm:$0xf] %vm19291_vm1, %v3557_v7 }
 0x3ad   : > { %3738 = vst.msk [vmem:[#allocation3 + $0x30] sm:$0xf] %vm19293_vm4, %v3690_v63  ;;  %4152 = vrot.lane.b32.xlu1 %v20010_v55, %s11758_s17  ;;  %4005 = vrot.lane.b32.xlu0 %v20011_v25, %s11759_s20  ;;  %v3978_v63 = vrot.slane %v20017_v15, 4 }
 0x3ae   : > { %v3559_v2 = vpop.permute.xlu1 %3558 }
 0x3af   : > { %v3859_v49 = vpop.permute.xlu0 %3858  ;;  %v11252_v10 = vld [vmem:[#allocation3 + $0x24] ss:$8 sps:$4 sm:$0xff]  }
 0x3b0   : > { %3907 = vst.msk [vmem:[#allocation3 + $0x30] sm:$0xf] %vm19294_vm11, %v3859_v49  ;;  %10640 = vmatprep.mubr.msk.bf16.mxu1 %vm19290_vm6, %v11252_v10 }
 0x3b1   : > { %4040 = vst.msk [vmem:[#allocation3 + $0x30] sm:$0xf] %vm19288_vm3, %v3992_v3  ;;  %4499 = vrot.lane.b32.xlu1 %v15086_v51, %s11763_s26  ;;  %4154 = vrot.lane.b32.xlu0 %v20014_v56, %s11758_s17 }
 0x3b2   : > { %v3861_v24 = vpop.permute.xlu1 %3860  ;;  %4812 = vmatmul.mubr.bf16.gmra.mxu1 %v11254_v8  ;;  %v4471_v8 = vshrl.u32 %v15371_v9, 16 }
 0x3b3   : > { %v4141_v11 = vpop.permute.xlu0 %4140 }
 0x3b4   : > { %4189 = vst.msk [vmem:[#allocation3 + $0x30] sm:$0xf] %vm19289_vm12, %v4141_v11 }
 0x3b5   : > { %3270 = vrot.lane.b32.xlu1 %v15212_v42, %s11763_s26  ;;  %4501 = vrot.lane.b32.xlu0 %v15212_v42, %s11763_s26 }
 0x3b7   : > { %v4143_v51 = vpop.permute.xlu1 %4142  ;;  %v3257_v19 = vpop.permute.xlu0 %3256 }
 0x3b8   : > { %3304 = vst.msk [vmem:[#allocation3 + $0x38] sm:$0xf] %vm3296_vm2, %v3257_v19 }
 0x3b9   : > { %3437 = vst.msk [vmem:[#allocation3 + $0x38] sm:$0xf] %vm19292_vm9, %v3390_v6  ;;  %3403 = vrot.lane.b32.xlu1 %v20015_v28, %s11762_s16  ;;  %3272 = vrot.lane.b32.xlu0 %v15364_v23, %s11763_s26 }
 0x3ba   : > { %3606 = vst.msk [vmem:[#allocation3 + $0x38] sm:$0xf] %vm19291_vm1, %v3559_v2 }
 0x3bb   : > { %3739 = vst.msk [vmem:[#allocation3 + $0x38] sm:$0xf] %vm19293_vm4, %v3692_v31  ;;  %v3694_v52 = vpop.permute.xlu1 %3693  ;;  %v4488_v18 = vpop.permute.xlu0 %4487  ;;  %v20024_v31 = vld [vmem:[#allocation56_spill] sm:$0xff] }
 0x3bc   : > { %3908 = vst.msk [vmem:[#allocation3 + $0x38] sm:$0xf] %vm19294_vm11, %v3861_v24  ;;  %v20026_v26 = vsel %vm13491_vm13, %v20024_v31, %v20025_v43  ;;  %v11270_v43 = vld [vmem:[%s19129_s5 + $0x70] ss:$8 sps:$4 sm:$0xff]  }
 0x3bd   : > { %4535 = vst.msk [vmem:[#allocation3 + $0x34] sm:$0xf] %vm3296_vm2, %v4488_v18  ;;  %3572 = vrot.lane.b32.xlu1 %v15239_v12, %s11761_s13  ;;  %3405 = vrot.lane.b32.xlu0 %v15345_v29, %s11762_s16 }
 0x3be   : > { %4041 = vst.msk [vmem:[#allocation3 + $0x38] sm:$0xf] %vm19288_vm3, %v3994_v14 }
 0x3bf   : > { %4190 = vst.msk [vmem:[#allocation3 + $0x38] sm:$0xf] %vm19289_vm12, %v4143_v51  ;;  %v3996_v42 = vpop.permute.xlu1 %3995  ;;  %v3392_v58 = vpop.permute.xlu0 %3391 }
 0x3c1   : > { %3705 = vrot.lane.b32.xlu1 %v20016_v57, %s11757_s19  ;;  %3574 = vrot.lane.b32.xlu0 %v15390_v27, %s11761_s13  ;;  %v20018_v27 = vld [vmem:[#allocation70_spill] sm:$0xff] }
 0x3c3   : > { %v4490_v41 = vpop.permute.xlu1 %4489  ;;  %v3259_v36 = vpop.permute.xlu0 %3258 }
 0x3c4   : > { %4536 = vst.msk [vmem:[#allocation3 + $0x3c] sm:$0xf] %vm3296_vm2, %v4490_v41  ;;  %3305 = vst.msk [vmem:[#allocation3 + $0x40] sm:$0xf] %vm3296_vm2, %v3259_v36  ;;  %v4555_v4 = vld [vmem:[#allocation3 + $0x30] sm:$0xff] }
 0x3c5   : > { %3438 = vst.msk [vmem:[#allocation3 + $0x40] sm:$0xf] %vm19292_vm9, %v3392_v58  ;;  %3874 = vrot.lane.b32.xlu1 %v15244_v0, %s11760_s30  ;;  %3707 = vrot.lane.b32.xlu0 %v15350_v54, %s11757_s19  ;;  %v20019_v54 = vld [vmem:[#allocation66_spill] sm:$0xff] }
 0x3c7   : > { %v3394_v12 = vpop.permute.xlu1 %3393  ;;  %v3696_v29 = vpop.permute.xlu0 %3695 }
 0x3c9   : > { %4013 = vrot.lane.b32.xlu1 %v3978_v63, %s11759_s20  ;;  %3876 = vrot.lane.b32.xlu0 %v20018_v27, %s11760_s30  ;;  %v3316_v63 = vld [vmem:[#allocation3 + $0x88] sm:$0x1] }
 0x3cb   : > { %v3561_v47 = vpop.permute.xlu1 %3560  ;;  %v3998_v35 = vpop.permute.xlu0 %3997  ;;  %v4556_v53 = vld [vmem:[#allocation3 + $0x38] sm:$0xff] }
 0x3cc   : > { %v11255_v6 = vld [vmem:[#allocation3 + $0x34] ss:$8 sps:$4 sm:$0xff]   ;;  %3607 = vst.msk [vmem:[#allocation3 + $0x40] sm:$0xf] %vm19291_vm1, %v3561_v47  ;;  %v10616_v0 = vcombine.low %v4555_v4, %v4556_v53 }
 0x3cd   : > { %3740 = vst.msk [vmem:[#allocation3 + $0x40] sm:$0xf] %vm19293_vm4, %v3694_v52  ;;  %4009 = vrot.lane.b32.xlu1 %v20019_v54, %s11759_s20  ;;  %4007 = vrot.lane.b32.xlu0 %v20020_v22, %s11759_s20 }
 0x3ce   : > { %10641 = vmatprep.mubr.msk.bf16.mxu1 %vm19290_vm6, %v11255_v6 }
 0x3cf   : > { %v3863_v3 = vpop.permute.xlu1 %3862  ;;  %4820 = vmatmul.mubr.bf16.gmra.mxu1 %v10616_v0  ;;  %v3563_v59 = vpop.permute.xlu0 %3562 }
 0x3d0   : > { %3909 = vst.msk [vmem:[#allocation3 + $0x40] sm:$0xf] %vm19294_vm11, %v3863_v3 }
 0x3d1   : > { %4042 = vst.msk [vmem:[#allocation3 + $0x40] sm:$0xf] %vm19288_vm3, %v3996_v42  ;;  %4158 = vrot.lane.b32.xlu1 %v20023_v46, %s11758_s17  ;;  %4156 = vrot.lane.b32.xlu0 %v20026_v26, %s11758_s17  ;;  %v20030_v46 = vld [vmem:[#allocation11_spill] sm:$0xff]  ;;  %v11272_v26 = vld [vmem:[%s19129_s5 + $0x74] ss:$8 sps:$4 sm:$0xff]  }
 0x3d2   : > { %7038 = vmatprep.subr.bf16.mxu0 %v11272_v26 }
 0x3d3   : > { %v4145_v14 = vpop.permute.xlu1 %4144  ;;  %v3865_v7 = vpop.permute.xlu0 %3864  ;;  %7039 = vmatpush1.bf16.msra.mxu0 %v11270_v43 }
 0x3d4   : > { %4191 = vst.msk [vmem:[#allocation3 + $0x40] sm:$0xf] %vm19289_vm12, %v4145_v14 }
 0x3d5   : > { %4505 = vrot.lane.b32.xlu1 %v15456_v48, %s11763_s26  ;;  %4503 = vrot.lane.b32.xlu0 %v15364_v23, %s11763_s26 }
 0x3d7   : > { %v3261_v55 = vpop.permute.xlu1 %3260  ;;  %v4147_v25 = vpop.permute.xlu0 %4146 }
 0x3d8   : > { %3306 = vst.msk [vmem:[#allocation3 + $0x48] sm:$0xf] %vm3296_vm2, %v3261_v55 }
 0x3d9   : > { %3439 = vst.msk [vmem:[#allocation3 + $0x48] sm:$0xf] %vm19292_vm9, %v3394_v12  ;;  %3407 = vrot.lane.b32.xlu1 %v15420_v40, %s11762_s16  ;;  %3274 = vrot.lane.b32.xlu0 %v15456_v48, %s11763_s26  ;;  %s11084_s16 = smul.u32 520, %s417_s0 }
 0x3da   : > { %3608 = vst.msk [vmem:[#allocation3 + $0x48] sm:$0xf] %vm19291_vm1, %v3563_v59  ;;  %s11086_s0 = smul.u32 (%p11875_p5), 195, %s11740_s24 }
 0x3db   : > { %3741 = vst.msk [vmem:[#allocation3 + $0x48] sm:$0xf] %vm19293_vm4, %v3696_v29  ;;  %v4492_v2 = vpop.permute.xlu1 %4491  ;;  %v3698_v49 = vpop.permute.xlu0 %3697  ;;  %v20027_v29 = vmov 0  ;;  %s18543_s21 = scalar_lea.vmem [#allocation5], %s11084_s16 }
 0x3dc   : > { %3910 = vst.msk [vmem:[#allocation3 + $0x48] sm:$0xf] %vm19294_vm11, %v3865_v7 }
 0x3dd   : > { %4537 = vst.msk [vmem:[#allocation3 + $0x44] sm:$0xf] %vm3296_vm2, %v4492_v2  ;;  %3709 = vrot.lane.b32.xlu1 %v15426_v61, %s11757_s19  ;;  %3576 = vrot.lane.b32.xlu0 %v15460_v20, %s11761_s13  ;;  %v4127_v61 = vrot.slane %v4124_v45, 4  ;;  %v11273_v2 = vld [vmem:[%s19129_s5 + $0x60] ss:$8 sps:$4 sm:$0xff]  }
 0x3de   : > { %4043 = vst.msk [vmem:[#allocation3 + $0x48] sm:$0xf] %vm19288_vm3, %v3998_v35 }
 0x3df   : > { %4192 = vst.msk [vmem:[#allocation3 + $0x48] sm:$0xf] %vm19289_vm12, %v4147_v25  ;;  %v3396_v23 = vpop.permute.xlu1 %3395  ;;  %v4000_v40 = vpop.permute.xlu0 %3999 }
 0x3e1   : > { %4011 = vrot.lane.b32.xlu1 %v15436_v21, %s11759_s20  ;;  %3878 = vrot.lane.b32.xlu0 %v15473_v38, %s11760_s30 }
 0x3e3   : > { %v3263_v48 = vpop.permute.xlu1 %3262  ;;  %v4494_v10 = vpop.permute.xlu0 %4493 }
 0x3e4   : > { %3307 = vst.msk [vmem:[#allocation3 + $0x50] sm:$0xf] %vm3296_vm2, %v3263_v48  ;;  %4538 = vst.msk [vmem:[#allocation3 + $0x4c] sm:$0xf] %vm3296_vm2, %v4494_v10  ;;  %v11278_v48 = vld [vmem:[%s19129_s5 + $0x54] ss:$8 sps:$4 sm:$0xff]  }
 0x3e5   : > { %3440 = vst.msk [vmem:[#allocation3 + $0x50] sm:$0xf] %vm19292_vm9, %v3396_v23  ;;  %4509 = vrot.lane.b32.xlu1 %v4471_v8, %s11763_s26  ;;  %4162 = vrot.lane.b32.xlu0 %v4127_v61, %s11758_s17  ;;  %v20033_v23 = vld [vmem:[#allocation14_spill] sm:$0xff]  ;;  %v15848_v61 = vld [vmem:[%s19128_s4] ss:$0 sm:$0xff] }
 0x3e6   : > { %v11259_v45 = vld [vmem:[#allocation3 + $0x40] ss:$8 sps:$4 sm:$0xff]   ;;  %v11281_v8 = vld [vmem:[%s19129_s5 + $0x174] ss:$8 sps:$4 sm:$0xff]  }
 0x3e7   : > { %v3565_v21 = vpop.permute.xlu1 %3564  ;;  %v3398_v20 = vpop.permute.xlu0 %3397  ;;  %v11279_v10 = vld [vmem:[%s19129_s5 + $0x170] ss:$8 sps:$4 sm:$0xff]   ;;  %7151 = vmatprep.subr.bf16.mxu1 %v11281_v8 }
 0x3e8   : > { %3609 = vst.msk [vmem:[#allocation3 + $0x50] sm:$0xf] %vm19291_vm1, %v3565_v21  ;;  %v11276_v21 = vld [vmem:[%s19129_s5 + $0x50] ss:$8 sps:$4 sm:$0xff]   ;;  %7152 = vmatpush1.bf16.msra.mxu1 %v11279_v10 }
 0x3e9   : > { %3742 = vst.msk [vmem:[#allocation3 + $0x50] sm:$0xf] %vm19293_vm4, %v3698_v49  ;;  %4507 = vrot.lane.b32.xlu1 %v15497_v62, %s11763_s26  ;;  %4160 = vrot.lane.b32.xlu0 %v4126_v60, %s11758_s17  ;;  %s10647_s17 = sadd.s32 4294967292, %s11903_s28  ;;  %v11275_v49 = vld [vmem:[%s19129_s5 + $0x64] ss:$8 sps:$4 sm:$0xff]   ;;  %s9755_s28 = sadd.s32 (%p11875_p5), %s11736_s23, %s11086_s0 }
 0x3ea   : > { %v15813_v59 = vstv %s10647_s17  ;;  %7040 = vmatprep.subr.bf16.mxu0 %v11275_v49  ;;  %v11288_v10 = vld [vmem:[%s19129_s5 + $0x30] ss:$8 sps:$4 sm:$0xff]   ;;  %s18546_s17 = scalar_lea.vmem [#allocation6], %s11084_s16  ;;  %s10938_s30 = sshll.u32 (%p11875_p5), %s9755_s28, 3 }
 0x3eb   : > { %v3700_v38 = vpop.permute.xlu1 %3699  ;;  %v3867_v16 = vpop.permute.xlu0 %3866  ;;  %v11257_v9 = vld [vmem:[#allocation3 + $0x44] ss:$8 sps:$4 sm:$0xff]   ;;  %v4870_v31 = vadd.s32 %v15813_v59, %v20030_v46  ;;  %7041 = vmatpush1.bf16.msra.mxu0 %v11273_v2  ;;  %s18844_s16 = scalar_lea.vmem (%p11875_p5), %s19135_s11, %s10938_s30 }
 0x3ec   : > { %3911 = vst.msk [vmem:[#allocation3 + $0x50] sm:$0xf] %vm19294_vm11, %v3867_v16  ;;  %10642 = vmatprep.mubr.msk.bf16.mxu1 %vm19290_vm6, %v11257_v9  ;;  %7042 = vmatprep.subr.bf16.mxu0 %v11278_v48  ;;  %v11291_v16 = vld [vmem:[%s19129_s5 + $0x150] ss:$8 sps:$4 sm:$0xff]  }
 0x3ed   : > { %4044 = vst.msk [vmem:[#allocation3 + $0x50] sm:$0xf] %vm19288_vm3, %v4000_v40  ;;  %4828 = vmatmul.mubr.bf16.gmra.mxu1 %v11259_v45  ;;  %v4871_v40 = vadd.s32 %v15813_v59, %v20033_v23 }
 0x3ef   : > { %v4002_v34 = vpop.permute.xlu1 %4001  ;;  %v4149_v62 = vpop.permute.xlu0 %4148  ;;  %7043 = vmatpush1.bf16.msra.mxu0 %v11276_v21 }
 0x3f0   : > { %4193 = vst.msk [vmem:[#allocation3 + $0x50] sm:$0xf] %vm19289_vm12, %v4149_v62  ;;  %v11282_v62 = vld [vmem:[%s19129_s5 + $0x40] ss:$8 sps:$4 sm:$0xff]  }
 0x3f3   : > { %v3869_v32 = vpop.permute.xlu1 %3868  ;;  %v3265_v56 = vpop.permute.xlu0 %3264 }
 0x3f4   : > { %3308 = vst.msk [vmem:[#allocation3 + $0x58] sm:$0xf] %vm3296_vm2, %v3265_v56  ;;  %v11285_v56 = vld [vmem:[%s19129_s5 + $0x160] ss:$8 sps:$4 sm:$0xff]  }
 0x3f5   : > { %3441 = vst.msk [vmem:[#allocation3 + $0x58] sm:$0xf] %vm19292_vm9, %v3398_v20 }
 0x3f7   : > { %v4151_v33 = vpop.permute.xlu1 %4150  ;;  %v4496_v5 = vpop.permute.xlu0 %4495 }
 0x3f8   : > { %4539 = vst.msk [vmem:[#allocation3 + $0x54] sm:$0xf] %vm3296_vm2, %v4496_v5 }
 0x3fb   : > { %v4498_v60 = vpop.permute.xlu1 %4497  ;;  %v3567_v24 = vpop.permute.xlu0 %3566 }
 0x3fc   : > { %4540 = vst.msk [vmem:[#allocation3 + $0x5c] sm:$0xf] %vm3296_vm2, %v4498_v60  ;;  %v11287_v60 = vld [vmem:[%s19129_s5 + $0x164] ss:$8 sps:$4 sm:$0xff]  }
 0x3fd   : > { %3610 = vst.msk [vmem:[#allocation3 + $0x58] sm:$0xf] %vm19291_vm1, %v3567_v24  ;;  %7153 = vmatprep.subr.bf16.mxu1 %v11287_v60  ;;  %v11294_v60 = vld [vmem:[%s19129_s5 + $0x20] ss:$8 sps:$4 sm:$0xff]  }
 0x3fe   : > { %3743 = vst.msk [vmem:[#allocation3 + $0x58] sm:$0xf] %vm19293_vm4, %v3700_v38  ;;  %7154 = vmatpush1.bf16.msra.mxu1 %v11285_v56 }
 0x3ff   : > { %3912 = vst.msk [vmem:[#allocation3 + $0x58] sm:$0xf] %vm19294_vm11, %v3869_v32  ;;  %v3402_v11 = vpop.permute.xlu1 %3401  ;;  %v3400_v51 = vpop.permute.xlu0 %3399  ;;  %v4559_v42 = vld [vmem:[#allocation3 + $0x50] sm:$0xff] }
 0x400   : > { %4045 = vst.msk [vmem:[#allocation3 + $0x58] sm:$0xf] %vm19288_vm3, %v4002_v34  ;;  %vm3314_vm3 = vcmask 254080   ;;  %v11284_v32 = vld [vmem:[%s19129_s5 + $0x44] ss:$8 sps:$4 sm:$0xff]  }
 0x401   : > { %4194 = vst.msk [vmem:[#allocation3 + $0x58] sm:$0xf] %vm19289_vm12, %v4151_v33  ;;  %vm15796_vm12 = vmand %vm3314_vm3, %vm3056_vm8  ;;  %7044 = vmatprep.subr.bf16.mxu0 %v11284_v32 }
 0x402   : > { %v20028_v29 = vsel %vm15796_vm12, 4294967295, %v20027_v29  ;;  %7045 = vmatpush1.bf16.msra.mxu0 %v11282_v62 }
 0x403   : > { %v3704_v19 = vpop.permute.xlu1 %3703  ;;  %v3702_v28 = vpop.permute.xlu0 %3701  ;;  %v11260_v57 = vld [vmem:[#allocation3 + $0x54] ss:$8 sps:$4 sm:$0xff]  }
 0x404   : > { %10643 = vmatprep.mubr.msk.bf16.mxu1 %vm19290_vm6, %v11260_v57  ;;  %vm3447_vm6 = vcmask 385280  }
 0x405   : > { %vm3448_vm3 = vmand %vm3447_vm6, %vm3056_vm8  ;;  %vm20032_vm6 = vcmask 913152  }
 0x407   : > { %v3871_v52 = vpop.permute.xlu1 %3870  ;;  %v3267_v18 = vpop.permute.xlu0 %3266 }
 0x408   : > { %v4560_v58 = vld [vmem:[#allocation3 + $0x58] sm:$0xff]  ;;  %3309 = vst.msk [vmem:[#allocation3 + $0x60] sm:$0xf] %vm3296_vm2, %v3267_v18 }
 0x409   : > { %v10620_v41 = vcombine.low %v4559_v42, %v4560_v58  ;;  %3442 = vst.msk [vmem:[#allocation3 + $0x60] sm:$0xf] %vm19292_vm9, %v3400_v51 }
 0x40b   : > { %4836 = vmatmul.mubr.bf16.gmra.mxu1 %v10620_v41  ;;  %v3269_v36 = vpop.permute.xlu1 %3268  ;;  %v3569_v12 = vpop.permute.xlu0 %3568 }
 0x40c   : > { %3310 = vst.msk [vmem:[#allocation3 + $0x68] sm:$0xf] %vm3296_vm2, %v3269_v36 }
 0x40d   : > { %3611 = vst.msk [vmem:[#allocation3 + $0x60] sm:$0xf] %vm19291_vm1, %v3569_v12 }
 0x40e   : > { %3443 = vst.msk [vmem:[#allocation3 + $0x68] sm:$0xf] %vm19292_vm9, %v3402_v11  ;;  %vm20029_vm9 = vcmask 913152  }
 0x40f   : > { %3744 = vst.msk [vmem:[#allocation3 + $0x60] sm:$0xf] %vm19293_vm4, %v3702_v28  ;;  %v3571_v15 = vpop.permute.xlu1 %3570  ;;  %v3277_v27 = vpop.permute.xlu0 %3276 }
 0x410   : > { %3913 = vst.msk [vmem:[#allocation3 + $0x60] sm:$0xf] %vm19294_vm11, %v3871_v52  ;;  %v3317_v47 = vsel %vm15796_vm12, %v3277_v27, %v3316_v63  ;;  %vm4907_vm12 = vcmp.lt.s32.totalorder %v4871_v40, 300 }
 0x411   : > { %3612 = vst.msk [vmem:[#allocation3 + $0x68] sm:$0xf] %vm19291_vm1, %v3571_v15  ;;  %3318 = vst [vmem:[#allocation3 + $0x88] sm:$0x1] %v3317_v47  ;;  %vm3616_vm1 = vcmask 516480  }
 0x412   : > { %3745 = vst.msk [vmem:[#allocation3 + $0x68] sm:$0xf] %vm19293_vm4, %v3704_v19  ;;  %vm3617_vm4 = vmand %vm3616_vm1, %vm3056_vm8  ;;  %vm4888_vm1 = vcmp.ge.s32.totalorder %v4870_v31, 0 }
 0x413   : > { %v3410_v35 = vpop.permute.xlu1 %3409  ;;  %v3579_v4 = vpop.permute.xlu0 %3578 }
 0x417   : > { %v15806_v53 = vpop.permute.xlu1 %3711  ;;  %v15808_v6 = vpop.permute.xlu0 %3880 }
 0x418   : > { %v3449_v0 = vld [vmem:[#allocation3 + $0x88] sm:$0x1] }
 0x419   : > { %v3450_v54 = vsel %vm3448_vm3, %v3410_v35, %v3449_v0  ;;  %vm4906_vm3 = vcmp.lt.s32.totalorder %v4870_v31, 300  ;;  %v11305_v0 = vld [vmem:[%s19129_s5 + $0x134] ss:$8 sps:$4 sm:$0xff]  }
 0x41a   : > { %3451 = vst [vmem:[#allocation3 + $0x88] sm:$0x1] %v3450_v54 }
 0x41b   : > { %v4004_v22 = vpop.permute.xlu1 %4003  ;;  %v3873_v3 = vpop.permute.xlu0 %3872 }
 0x41c   : > { %4046 = vst.msk [vmem:[#allocation3 + $0x60] sm:$0xf] %vm20029_vm9, %v4004_v22  ;;  %vm20031_vm9 = vcmask 1044352  }
 0x41d   : > { %3914 = vst.msk [vmem:[#allocation3 + $0x68] sm:$0xf] %vm19294_vm11, %v3873_v3  ;;  %vm4889_vm11 = vcmp.ge.s32.totalorder %v4871_v40, 0 }
 0x41f   : > { %v4153_v1 = vpop.permute.xlu1 %4152  ;;  %v4006_v39 = vpop.permute.xlu0 %4005 }
 0x420   : > { %4195 = vst.msk [vmem:[#allocation3 + $0x60] sm:$0xf] %vm20031_vm9, %v4153_v1 }
 0x421   : > { %4047 = vst.msk [vmem:[#allocation3 + $0x68] sm:$0xf] %vm20032_vm6, %v4006_v39  ;;  %v3618_v14 = vld [vmem:[#allocation3 + $0x88] sm:$0x1]  ;;  %vm4924_vm6 = vmand %vm4888_vm1, %vm4906_vm3  ;;  %vm5060_vm1 = vcmask 519168  }
 0x422   : > { %v3619_v7 = vsel %vm3617_vm4, %v3579_v4, %v3618_v14  ;;  %vm3749_vm4 = vcmask 647680   ;;  %vm4925_vm3 = vmand %vm4889_vm11, %vm4907_vm12  ;;  %vm3918_vm11 = vcmask 778880   ;;  %vm20037_vm12 = vcmask 519552  }
 0x423   : > { %3620 = vst [vmem:[#allocation3 + $0x88] sm:$0x1] %v3619_v7  ;;  %v4500_v55 = vpop.permute.xlu1 %4499  ;;  %v4155_v25 = vpop.permute.xlu0 %4154 }
 0x424   : > { %4541 = vst.msk [vmem:[#allocation3 + $0x64] sm:$0xf] %vm3296_vm2, %v4500_v55 }
 0x425   : > { %4196 = vst.msk [vmem:[#allocation3 + $0x68] sm:$0xf] %vm20031_vm9, %v4155_v25  ;;  %vm15856_vm9 = vmand %vm3749_vm4, %vm3056_vm8  ;;  %vm20036_vm4 = vcmask 388352  }
 0x426   : > { %v4797_v38 = vpop.f32.mrf.mxu1 }
 0x427   : > { %v3271_v20 = vpop.permute.xlu1 %3270  ;;  %v4798_v9 = vadd.f32 %v15848_v61, %v4797_v38  ;;  %v4502_v45 = vpop.permute.xlu0 %4501  ;;  %v11290_v38 = vld [vmem:[%s19129_s5 + $0x34] ss:$8 sps:$4 sm:$0xff]  }
 0x428   : > { %3311 = vst.msk [vmem:[#allocation3 + $0x70] sm:$0xf] %vm3296_vm2, %v3271_v20  ;;  %4542 = vst.msk [vmem:[#allocation3 + $0x6c] sm:$0xf] %vm3296_vm2, %v4502_v45  ;;  %v4799_v34 = vpop.f32.mrf.mxu1  ;;  %v11293_v45 = vld [vmem:[%s19129_s5 + $0x154] ss:$8 sps:$4 sm:$0xff]   ;;  %7046 = vmatprep.subr.bf16.mxu0 %v11290_v38 }
 0x429   : > { %v4978_v5 = vsel %vm4924_vm6, %v4798_v9, 0.0  ;;  %vm15897_vm6 = vmand %vm3918_vm11, %vm3056_vm8  ;;  %7155 = vmatprep.subr.bf16.mxu1 %v11293_v45  ;;  %7047 = vmatpush1.bf16.msra.mxu0 %v11288_v10  ;;  %v11320_v38 = vld [vmem:[%s19129_s5 + $0xe4] ss:$8 sps:$4 sm:$0xff]  }
 0x42a   : > { %v3751_v33 = vld [vmem:[#allocation3 + $0x88] sm:$0x1]  ;;  %v15878_v11 = vpack.c.bf16 %v4978_v5, %v4978_v5  ;;  %v4800_v19 = vpop.f32.mrf.mxu1  ;;  %vm20043_vm11 = vmmov %vm20037_vm12  ;;  %7156 = vmatpush1.bf16.msra.mxu1 %v11291_v16  ;;  %v11323_v16 = vld [vmem:[%s19129_s5 + $0x104] ss:$8 sps:$4 sm:$0xff]  }
 0x42b   : > { %v3752_v24 = vsel %vm15856_vm9, %v15806_v53, %v3751_v33  ;;  %v3404_v51 = vpop.permute.xlu1 %3403  ;;  %v4801_v28 = vadd.f32 %v15848_v61, %v4800_v19  ;;  %v3273_v52 = vpop.permute.xlu0 %3272  ;;  %v4561_v47 = vld [vmem:[#allocation3 + $0x60] sm:$0xff]  ;;  %vm20040_vm9 = vmmov %vm20036_vm4 }
 0x42c   : > { %3753 = vst [vmem:[#allocation3 + $0x88] sm:$0x1] %v3752_v24  ;;  %3444 = vst.msk [vmem:[#allocation3 + $0x70] sm:$0xf] %vm20036_vm4, %v3404_v51  ;;  %v4802_v18 = vpop.f32.mrf.mxu1  ;;  %v15886_v42 = vshrl.u32 %v15878_v11, 16  ;;  %v5085_v58 = vshll.u32 %v15878_v11, 16 }
 0x42d   : > { %3312 = vst.msk [vmem:[#allocation3 + $0x78] sm:$0xf] %vm3296_vm2, %v3273_v52  ;;  %v4979_v57 = vsel %vm4925_vm3, %v4801_v28, 0.0  ;;  %vm20041_vm3 = vcmask 261120   ;;  %vm20042_vm4 = vcmask 650752   ;;  %v10665_v48 = vrot.slane %v15878_v11, 9 }
 0x42e   : > { %5061 = vst.msk [vmem:[#allocation4] sm:$0xf] %vm5060_vm1, %v15878_v11  ;;  %v15891_v41 = vpack.c.bf16 %v4979_v57, %v4979_v57  ;;  %v5084_v12 = vrot.slane %v15886_v42, 4  ;;  %v5087_v15 = vrot.slane %v5085_v58, 5  ;;  %v5391_v63 = vrot.slane %v15886_v42, 5 }
 0x42f   : > { %v3573_v36 = vpop.permute.xlu1 %3572  ;;  %v3406_v27 = vpop.permute.xlu0 %3405  ;;  %v4562_v35 = vld [vmem:[#allocation3 + $0x68] sm:$0xff]  ;;  %v5392_v53 = vrot.slane %v5085_v58, 6  ;;  %v5621_v31 = vrot.slane %v15886_v42, 6  ;;  %v5622_v43 = vrot.slane %v5085_v58, 7  ;;  %v10666_v56 = vrot.slane %v15878_v11, 10 }
 0x430   : > { %3613 = vst.msk [vmem:[#allocation3 + $0x70] sm:$0xf] %vm20037_vm12, %v3573_v36  ;;  %v11262_v4 = vld [vmem:[#allocation3 + $0x64] ss:$8 sps:$4 sm:$0xff]   ;;  %v10622_v54 = vcombine.low %v4561_v47, %v4562_v35  ;;  %v5088_v22 = vor.u32 %v5087_v15, %v5084_v12  ;;  %v15903_v3 = vshll.u32 %v15891_v41, 16  ;;  %v15906_v1 = vshrl.u32 %v15891_v41, 16 }
 0x431   : > { %3445 = vst.msk [vmem:[#allocation3 + $0x78] sm:$0xf] %vm20040_vm9, %v3406_v27  ;;  %10644 = vmatprep.mubr.msk.bf16.mxu1 %vm20041_vm3, %v11262_v4  ;;  %v5393_v39 = vor.u32 %v5392_v53, %v5391_v63  ;;  %v5312_v26 = vrot.slane %v15891_v41, 5  ;;  %vm4051_vm12 = vcmask 910080   ;;  %v5623_v32 = vor.u32 %v5622_v43, %v5621_v31  ;;  %v11296_v24 = vld [vmem:[%s19129_s5 + $0x24] ss:$8 sps:$4 sm:$0xff]   ;;  %vm20045_vm9 = vmmov %vm20042_vm4 }
 0x432   : > { %5062 = vst.msk [vmem:[#allocation4 + $0x14] sm:$0xf] %vm5060_vm1, %v15891_v41  ;;  %6042 = vst.msk [vmem:[#allocation4 + $0x10] sm:$0xf] %vm5060_vm1, %v15891_v41  ;;  %4844 = vmatmul.mubr.bf16.gmra.mxu1 %v10622_v54  ;;  %v5089_v55 = vrot.slane %v5088_v22, 4  ;;  %v5093_v25 = vrot.slane %v15903_v3, 5  ;;  %7048 = vmatprep.subr.bf16.mxu0 %v11296_v24 }
 0x433   : > { %v3920_v14 = vld [vmem:[#allocation3 + $0x88] sm:$0x1]  ;;  %v3706_v7 = vpop.permute.xlu1 %3705  ;;  %v5395_v2 = vrot.slane %v15906_v1, 5  ;;  %v5396_v49 = vrot.slane %v15903_v3, 6  ;;  %v3575_v40 = vpop.permute.xlu0 %3574  ;;  %v5626_v20 = vrot.slane %v15903_v3, 7  ;;  %v5313_v9 = vsel %vm13353_vm7, %v10665_v48, %v5312_v26  ;;  %vm15977_vm3 = vmand %vm4051_vm12, %vm3056_vm8  ;;  %7049 = vmatpush1.bf16.msra.mxu0 %v11294_v60  ;;  %v20054_v60 = vld [vmem:[#allocation12_spill] sm:$0xff] }
 0x434   : > { %v3921_v23 = vsel %vm15897_vm6, %v15808_v6, %v3920_v14  ;;  %3746 = vst.msk [vmem:[#allocation3 + $0x70] sm:$0xf] %vm20042_vm4, %v3706_v7  ;;  %v5094_v8 = vsel %vm13416_vm15, %v5089_v55, %v5093_v25  ;;  %v5625_v6 = vrot.slane %v15906_v1, 6  ;;  %v5394_v62 = vrot.slane %v5393_v39, 4  ;;  %v11297_v18 = vld [vmem:[%s19129_s5 + $0x140] ss:$8 sps:$4 sm:$0xff]  }
 0x435   : > { %3922 = vst [vmem:[#allocation3 + $0x88] sm:$0x1] %v3921_v23  ;;  %3614 = vst.msk [vmem:[#allocation3 + $0x78] sm:$0xf] %vm20043_vm11, %v3575_v40  ;;  %v15931_v21 = vor.u32 %v5396_v49, %v5395_v2  ;;  %5245 = vrot.lane.b32.xlu0 %v5094_v8, %s11757_s19  ;;  %vm20044_vm6 = vcmask 781952   ;;  %v5542_v5 = vrot.slane %v15891_v41, 6  ;;  %v4872_v24 = vadd.s32 %v15813_v59, %v20054_v60 }
 0x436   : > { %5375 = vst.msk [vmem:[#allocation4 + $0x4] sm:$0xf] %vm5060_vm1, %v5313_v9  ;;  %v10667_v51 = vrot.slane %v15878_v11, 11  ;;  %v15964_v28 = vor.u32 %v5626_v20, %v5625_v6  ;;  %v5851_v52 = vrot.slane %v15906_v1, 7  ;;  %v11299_v58 = vld [vmem:[%s19129_s5 + $0x144] ss:$8 sps:$4 sm:$0xff]   ;;  %vm20049_vm4 = vmmov %vm20044_vm6 }
 0x437   : > { %v3875_v34 = vpop.permute.xlu1 %3874  ;;  %v3708_v33 = vpop.permute.xlu0 %3707  ;;  %v5398_v19 = vsel %vm13426_vm14, %v5394_v62, %v15931_v21  ;;  %v5770_v11 = vrot.slane %v15891_v41, 7  ;;  %v5543_v36 = vsel %vm13366_vm0, %v10666_v56, %v5542_v5  ;;  %v5624_v15 = vrot.slane %v5623_v32, 4  ;;  %7157 = vmatprep.subr.bf16.mxu1 %v11299_v58  ;;  %v11302_v47 = vld [vmem:[%s19129_s5 + $0x14] ss:$8 sps:$4 sm:$0xff]   ;;  %v11300_v53 = vld [vmem:[%s19129_s5 + $0x10] ss:$8 sps:$4 sm:$0xff]  }
 0x438   : > { %3915 = vst.msk [vmem:[#allocation3 + $0x70] sm:$0xf] %vm20044_vm6, %v3875_v34  ;;  %v5852_v39 = vor.u32 %v5851_v52, %v15903_v3  ;;  %7158 = vmatpush1.bf16.msra.mxu1 %v11297_v18  ;;  %7050 = vmatprep.subr.bf16.mxu0 %v11302_v47  ;;  %v11303_v31 = vld [vmem:[%s19129_s5 + $0x130] ss:$8 sps:$4 sm:$0xff]   ;;  %v11308_v43 = vld [vmem:[%s19129_s5 + $0x4] ss:$8 sps:$4 sm:$0xff]  }
 0x439   : > { %3747 = vst.msk [vmem:[#allocation3 + $0x78] sm:$0xf] %vm20045_vm9, %v3708_v33  ;;  %5476 = vrot.lane.b32.xlu0 %v5398_v19, %s11757_s19  ;;  %v5771_v27 = vsel %vm13373_vm10, %v10667_v51, %v5770_v11  ;;  %v5628_v22 = vsel %vm13475_vm5, %v5624_v15, %v15964_v28  ;;  %7159 = vmatprep.subr.bf16.mxu1 %v11305_v0  ;;  %v11311_v14 = vld [vmem:[%s19129_s5 + $0x124] ss:$8 sps:$4 sm:$0xff]   ;;  %v10668_v55 = vrot.slane %v15886_v42, 11  ;;  %vm20050_vm11 = vcmask 913152  }
 0x43a   : > { %5605 = vst.msk [vmem:[#allocation4 + $0x8] sm:$0xf] %vm5060_vm1, %v5543_v36  ;;  %5833 = vst.msk [vmem:[#allocation4 + $0xc] sm:$0xf] %vm5060_vm1, %v5771_v27  ;;  %7051 = vmatpush1.bf16.msra.mxu0 %v11300_v53  ;;  %v11306_v49 = vld [vmem:[%s19129_s5] ss:$8 sps:$4 sm:$0xff]  }
 0x43b   : > { %v4014_v12 = vpop.permute.xlu1 %4013  ;;  %v3877_v4 = vpop.permute.xlu0 %3876  ;;  %vm20051_vm12 = vmmov %vm20050_vm11  ;;  %v5853_v23 = vsel %vm13491_vm13, %v10668_v55, %v5852_v39  ;;  %7052 = vmatprep.subr.bf16.mxu0 %v11308_v43  ;;  %v11309_v40 = vld [vmem:[%s19129_s5 + $0x120] ss:$8 sps:$4 sm:$0xff]   ;;  %v11314_v42 = vld [vmem:[%s19129_s5 + $0xf4] ss:$8 sps:$4 sm:$0xff]   ;;  %vm20052_vm6 = vcmask 1044352   ;;  %v5097_v53 = vrot.slane %v15906_v1, 4 }
 0x43c   : > { %v4053_v35 = vld [vmem:[#allocation3 + $0x88] sm:$0x1]  ;;  %3916 = vst.msk [vmem:[#allocation3 + $0x78] sm:$0xf] %vm20049_vm4, %v3877_v4  ;;  %7160 = vmatpush1.bf16.msra.mxu1 %v11303_v31  ;;  %v11317_v48 = vld [vmem:[%s19129_s5 + $0x114] ss:$8 sps:$4 sm:$0xff]   ;;  %vm20053_vm9 = vmmov %vm20052_vm6 }
 0x43d   : > { %v4054_v54 = vsel %vm15977_vm3, %v4014_v12, %v4053_v35  ;;  %5704 = vrot.lane.b32.xlu0 %v5628_v22, %s11757_s19  ;;  %7161 = vmatprep.subr.bf16.mxu1 %v11311_v14  ;;  %v11312_v6 = vld [vmem:[%s19129_s5 + $0xf0] ss:$8 sps:$4 sm:$0xff]   ;;  %v11318_v34 = vld [vmem:[%s19129_s5 + $0xe0] ss:$8 sps:$4 sm:$0xff]   ;;  %v11326_v32 = vld [vmem:[%s19129_s5 + $0xd4] ss:$8 sps:$4 sm:$0xff]  }
 0x43e   : > { %4055 = vst [vmem:[#allocation3 + $0x88] sm:$0x1] %v4054_v54  ;;  %7053 = vmatpush1.bf16.msra.mxu0 %v11306_v49  ;;  %v11315_v20 = vld [vmem:[%s19129_s5 + $0x110] ss:$8 sps:$4 sm:$0xff]   ;;  %v11321_v62 = vld [vmem:[%s19129_s5 + $0x100] ss:$8 sps:$4 sm:$0xff]  }
 0x43f   : > { %v4010_v7 = vpop.permute.xlu1 %4009  ;;  %v4008_v2 = vpop.permute.xlu0 %4007  ;;  %7054 = vmatprep.subr.bf16.mxu0 %v11314_v42  ;;  %v11329_v56 = vld [vmem:[%s19129_s5 + $0x1f4] ss:$8 sps:$4 sm:$0xff]   ;;  %v11324_v19 = vld [vmem:[%s19129_s5 + $0xd0] ss:$8 sps:$4 sm:$0xff]   ;;  %vm20055_vm3 = vcmask 388352   ;;  %vm4890_vm4 = vcmp.ge.s32.totalorder %v4872_v24, 0 }
 0x440   : > { %4049 = vst.msk [vmem:[#allocation3 + $0x78] sm:$0xf] %vm20050_vm11, %v4010_v7  ;;  %7162 = vmatpush1.bf16.msra.mxu1 %v11309_v40  ;;  %v11327_v18 = vld [vmem:[%s19129_s5 + $0x1f0] ss:$8 sps:$4 sm:$0xff]   ;;  %vm4908_vm11 = vcmp.lt.s32.totalorder %v4872_v24, 300 }
 0x441   : > { %4048 = vst.msk [vmem:[#allocation3 + $0x70] sm:$0xf] %vm20051_vm12, %v4008_v2  ;;  %5914 = vrot.lane.b32.xlu0 %v5853_v23, %s11757_s19  ;;  %7163 = vmatprep.subr.bf16.mxu1 %v11317_v48  ;;  %v20056_v15 = vld [vmem:[#allocation13_spill] sm:$0xff]  ;;  %vm20057_vm12 = vcmask 519552   ;;  %v11330_v47 = vld [vmem:[%s19129_s5 + $0xc0] ss:$8 sps:$4 sm:$0xff]   ;;  %v5098_v48 = vor.u32 %v5097_v53, %v5093_v25 }
 0x442   : > { %7055 = vmatpush2.bf16.msra.mxu0 %v11312_v6  ;;  %v4873_v27 = vadd.s32 %v15813_v59, %v20056_v15  ;;  %v11332_v35 = vld [vmem:[%s19129_s5 + $0xc4] ss:$8 sps:$4 sm:$0xff]   ;;  %v11333_v4 = vld [vmem:[%s19129_s5 + $0x1e0] ss:$8 sps:$4 sm:$0xff]   ;;  %v11336_v14 = vld [vmem:[%s19129_s5 + $0xb0] ss:$8 sps:$4 sm:$0xff]  }
 0x443   : > { %v4159_v10 = vpop.permute.xlu1 %4158  ;;  %v4157_v8 = vpop.permute.xlu0 %4156  ;;  %7056 = vmatprep.subr.bf16.mxu0 %v11320_v38  ;;  %v11335_v0 = vld [vmem:[%s19129_s5 + $0x1e4] ss:$8 sps:$4 sm:$0xff]   ;;  %v11338_v7 = vld [vmem:[%s19129_s5 + $0xb4] ss:$8 sps:$4 sm:$0xff]   ;;  %v11339_v2 = vld [vmem:[%s19129_s5 + $0x1d0] ss:$8 sps:$4 sm:$0xff]  }
 0x444   : > { %4198 = vst.msk [vmem:[#allocation3 + $0x78] sm:$0xf] %vm20052_vm6, %v4159_v10  ;;  %7164 = vmatpush1.bf16.msra.mxu1 %v11315_v20  ;;  %vm20058_vm6 = vcmask 650752   ;;  %v11341_v49 = vld [vmem:[%s19129_s5 + $0x1d4] ss:$8 sps:$4 sm:$0xff]  }
 0x445   : > { %4197 = vst.msk [vmem:[#allocation3 + $0x70] sm:$0xf] %vm20053_vm9, %v4157_v8  ;;  %7165 = vmatprep.subr.bf16.mxu1 %v11323_v16  ;;  %vm20059_vm9 = vcmask 261120   ;;  %v11344_v23 = vld [vmem:[%s19129_s5 + $0xa4] ss:$8 sps:$4 sm:$0xff]  }
 0x446   : > { %7057 = vmatpush2.bf16.msra.mxu0 %v11318_v34  ;;  %v11347_v10 = vld [vmem:[%s19129_s5 + $0x1c4] ss:$8 sps:$4 sm:$0xff]   ;;  %v4546_v6 = vld [vmem:[#allocation3 + $0x8c] sm:$0x1]  ;;  %v11342_v34 = vld [vmem:[%s19129_s5 + $0xa0] ss:$8 sps:$4 sm:$0xff]  }
 0x447   : > { %v4506_v9 = vpop.permute.xlu1 %4505  ;;  %v4504_v45 = vpop.permute.xlu0 %4503  ;;  %7058 = vmatprep.subr.bf16.mxu0 %v11326_v32  ;;  %v11350_v60 = vld [vmem:[%s19129_s5 + $0x94] ss:$8 sps:$4 sm:$0xff]   ;;  %v11351_v39 = vld [vmem:[%s19129_s5 + $0x1b0] ss:$8 sps:$4 sm:$0xff]   ;;  %v11357_v16 = vld [vmem:[%s19129_s5 + $0x1a0] ss:$8 sps:$4 sm:$0xff]  }
 0x448   : > { %4544 = vst.msk [vmem:[#allocation3 + $0x7c] sm:$0xf] %vm3296_vm2, %v4506_v9  ;;  %4543 = vst.msk [vmem:[#allocation3 + $0x74] sm:$0xf] %vm3296_vm2, %v4504_v45  ;;  %7166 = vmatpush1.bf16.msra.mxu1 %v11321_v62  ;;  %v4202_v9 = vld [vmem:[#allocation3 + $0x88] sm:$0x1] }
 0x449   : > { %7167 = vmatprep.subr.bf16.mxu1 %v11329_v56 }
 0x44a   : > { %7059 = vmatpush2.bf16.msra.mxu0 %v11324_v19 }
 0x44b   : > { %v3408_v33 = vpop.permute.xlu1 %3407  ;;  %v3275_v51 = vpop.permute.xlu0 %3274  ;;  %7060 = vmatprep.subr.bf16.mxu0 %v11332_v35 }
 0x44c   : > { %3313 = vst.msk [vmem:[#allocation3 + $0x80] sm:$0xf] %vm3296_vm2, %v3275_v51  ;;  %v11266_v12 = vld [vmem:[#allocation3 + $0x70] ss:$8 sps:$4 sm:$0xff]   ;;  %7168 = vmatpush2.bf16.msra.mxu1 %v11327_v18  ;;  %v5099_v51 = vrot.slane %v5098_v48, 4 }
 0x44d   : > { %3446 = vst.msk [vmem:[#allocation3 + $0x80] sm:$0xf] %vm20055_vm3, %v3408_v33  ;;  %vm16095_vm3 = vmand %vm4890_vm4, %vm4908_vm11  ;;  %7169 = vmatprep.subr.bf16.mxu1 %v11335_v0  ;;  %vm20062_vm4 = vcmask 781952   ;;  %vm20063_vm11 = vcmask 913152   ;;  %v11345_v33 = vld [vmem:[%s19129_s5 + $0x1c0] ss:$8 sps:$4 sm:$0xff]  }
 0x44e   : > { %7061 = vmatpush2.bf16.msra.mxu0 %v11330_v47 }
 0x44f   : > { %v3710_v58 = vpop.permute.xlu1 %3709  ;;  %v3577_v57 = vpop.permute.xlu0 %3576  ;;  %v11264_v36 = vld [vmem:[#allocation3 + $0x74] ss:$8 sps:$4 sm:$0xff]   ;;  %7062 = vmatprep.subr.bf16.mxu0 %v11338_v7  ;;  %v5314_v7 = vrot.slane %v5312_v26, 4 }
 0x450   : > { %3615 = vst.msk [vmem:[#allocation3 + $0x80] sm:$0xf] %vm20057_vm12, %v3577_v57  ;;  %10645 = vmatprep.mubr.msk.bf16.mxu1 %vm20059_vm9, %v11264_v36  ;;  %vm4200_vm12 = vcmask 1041280   ;;  %vm4909_vm9 = vcmp.lt.s32.totalorder %v4873_v27, 300  ;;  %7170 = vmatpush2.bf16.msra.mxu1 %v11333_v4  ;;  %v11348_v4 = vld [vmem:[%s19129_s5 + $0x90] ss:$8 sps:$4 sm:$0xff]  }
 0x451   : > { %3748 = vst.msk [vmem:[#allocation3 + $0x80] sm:$0xf] %vm20058_vm6, %v3710_v58  ;;  %4852 = vmatmul.mubr.bf16.gmra.mxu1 %v11266_v12  ;;  %vm4891_vm6 = vcmp.ge.s32.totalorder %v4873_v27, 0  ;;  %7171 = vmatprep.subr.bf16.mxu1 %v11341_v49  ;;  %v11353_v12 = vld [vmem:[%s19129_s5 + $0x1b4] ss:$8 sps:$4 sm:$0xff]  }
 0x452   : > { %v4805_v22 = vpop.f32.mrf.mxu1  ;;  %7063 = vmatpush2.bf16.msra.mxu0 %v11336_v14 }
 0x453   : > { %v4012_v54 = vpop.permute.xlu1 %4011  ;;  %v4806_v31 = vadd.f32 %v15848_v61, %v4805_v22  ;;  %v3879_v43 = vpop.permute.xlu0 %3878  ;;  %7064 = vmatprep.subr.bf16.mxu0 %v11344_v23 }
 0x454   : > { %3917 = vst.msk [vmem:[#allocation3 + $0x80] sm:$0xf] %vm20062_vm4, %v3879_v43  ;;  %v4807_v55 = vpop.f32.mrf.mxu1  ;;  %vm16121_vm4 = vmand %vm4200_vm12, %vm3056_vm8  ;;  %vm20068_vm8 = vnez %v20028_v29  ;;  %7172 = vmatpush2.bf16.msra.mxu1 %v11339_v2  ;;  %vm20069_vm12 = vcmask 1044352   ;;  %v5399_v43 = vrot.slane %v15931_v21, 4  ;;  %v11359_v2 = vld [vmem:[%s19129_s5 + $0x1a4] ss:$8 sps:$4 sm:$0xff]  }
 0x455   : > { %v4980_v40 = vsel %vm16095_vm3, %v4806_v31, 0.0  ;;  %4050 = vst.msk [vmem:[#allocation3 + $0x80] sm:$0xf] %vm20063_vm11, %v4012_v54  ;;  %vm16134_vm3 = vmand %vm4891_vm6, %vm4909_vm9  ;;  %7173 = vmatprep.subr.bf16.mxu1 %v11347_v10  ;;  %v11356_v31 = vld [vmem:[%s19129_s5 + $0x84] ss:$8 sps:$4 sm:$0xff]  }
 0x456   : > { %v16130_v8 = vpack.c.bf16 %v4980_v40, %v4980_v40  ;;  %v4808_v38 = vpop.f32.mrf.mxu1  ;;  %7065 = vmatpush2.bf16.msra.mxu0 %v11342_v34  ;;  %v5544_v40 = vrot.slane %v5542_v5, 4 }
 0x457   : > { %v4510_v20 = vpop.permute.xlu1 %4509  ;;  %v4809_v25 = vadd.f32 %v15848_v61, %v4808_v38  ;;  %v4163_v45 = vpop.permute.xlu0 %4162  ;;  %7066 = vmatprep.subr.bf16.mxu0 %v11350_v60 }
 0x458   : > { %v4547_v3 = vsel %vm20068_vm8, %v4510_v20, %v4546_v6  ;;  %v4203_v62 = vsel %vm16121_vm4, %v4163_v45, %v4202_v9  ;;  %v4810_v32 = vpop.f32.mrf.mxu1  ;;  %v16147_v56 = vshll.u32 %v16130_v8, 16  ;;  %v16150_v29 = vshrl.u32 %v16130_v8, 16  ;;  %5063 = vst.msk [vmem:[#allocation4 + $0x28] sm:$0xf] %vm5060_vm1, %v16130_v8  ;;  %6043 = vst.msk [vmem:[#allocation4 + $0x24] sm:$0xf] %vm5060_vm1, %v16130_v8  ;;  %7174 = vmatpush2.bf16.msra.mxu1 %v11345_v33 }
 0x459   : > { %4548 = vst [vmem:[#allocation3 + $0x8c] sm:$0x1] %v4547_v3  ;;  %v4981_v24 = vsel %vm16134_vm3, %v4809_v25, 0.0  ;;  %4204 = vst [vmem:[#allocation3 + $0x88] sm:$0x1] %v4203_v62  ;;  %v5315_v55 = vrot.slane %v16130_v8, 5  ;;  %7175 = vmatprep.subr.bf16.mxu1 %v11353_v12 }
 0x45a   : > { %v16164_v19 = vpack.c.bf16 %v4981_v24, %v4981_v24  ;;  %v5103_v58 = vrot.slane %v16147_v56, 5  ;;  %v5400_v57 = vrot.slane %v16150_v29, 5  ;;  %v5401_v36 = vrot.slane %v16147_v56, 6  ;;  %7067 = vmatpush2.bf16.msra.mxu0 %v11348_v4  ;;  %v11354_v6 = vld [vmem:[%s19129_s5 + $0x80] ss:$8 sps:$4 sm:$0xff]  }
 0x45b   : > { %v4508_v18 = vpop.permute.xlu1 %4507  ;;  %v4161_v15 = vpop.permute.xlu0 %4160  ;;  %v5107_v27 = vrot.slane %v16150_v29, 4  ;;  %v5630_v47 = vrot.slane %v16150_v29, 6  ;;  %v5631_v35 = vrot.slane %v16147_v56, 7  ;;  %v5545_v21 = vrot.slane %v16130_v8, 6  ;;  %7068 = vmatprep.subr.bf16.mxu0 %v11356_v31  ;;  %v11363_v62 = vld [vmem:[%s19129_s5 + $0x190] ss:$8 sps:$4 sm:$0xff]  }
 0x45c   : > { %4545 = vst.msk [vmem:[#allocation3 + $0x84] sm:$0xf] %vm3296_vm2, %v4508_v18  ;;  %v5104_v53 = vsel %vm13416_vm15, %v5099_v51, %v5103_v58  ;;  %v5402_v0 = vor.u32 %v5401_v36, %v5400_v57  ;;  %v16183_v54 = vshll.u32 %v16164_v19, 16  ;;  %v16186_v22 = vshrl.u32 %v16164_v19, 16  ;;  %7176 = vmatpush2.bf16.msra.mxu1 %v11351_v39  ;;  %v11366_v39 = vld [vmem:[%s19129_s5 + $0x180] ss:$8 sps:$4 sm:$0xff]  }
 0x45d   : > { %4199 = vst.msk [vmem:[#allocation3 + $0x80] sm:$0xf] %vm20069_vm12, %v4161_v15  ;;  %5247 = vrot.lane.b32.xlu1 %v5104_v53, %s11757_s19  ;;  %6226 = vrot.lane.b32.xlu0 %v5104_v53, %s11757_s19  ;;  %v5108_v14 = vor.u32 %v5107_v27, %v5103_v58  ;;  %v5632_v48 = vor.u32 %v5631_v35, %v5630_v47  ;;  %v5855_v10 = vrot.slane %v16150_v29, 7  ;;  %v5629_v25 = vrot.slane %v15964_v28, 4  ;;  %v11365_v28 = vld [vmem:[%s19129_s5 + $0x194] ss:$8 sps:$4 sm:$0xff]  }
 0x45e   : > { %5064 = vst.msk [vmem:[#allocation4 + $0x3c] sm:$0xf] %vm5060_vm1, %v16164_v19  ;;  %6044 = vst.msk [vmem:[#allocation4 + $0x38] sm:$0xf] %vm5060_vm1, %v16164_v19  ;;  %v5113_v49 = vrot.slane %v16183_v54, 5  ;;  %v5405_v23 = vrot.slane %v16186_v22, 5  ;;  %v5403_v20 = vsel %vm13426_vm14, %v5399_v43, %v5402_v0  ;;  %v5316_v45 = vsel %vm13353_vm7, %v5314_v7, %v5315_v55  ;;  %7177 = vmatprep.subr.bf16.mxu1 %v11359_v2 }
 0x45f   : > { %v5109_v42 = vrot.slane %v5108_v14, 4  ;;  %v5406_v26 = vrot.slane %v16183_v54, 6  ;;  %v5635_v38 = vrot.slane %v16186_v22, 6  ;;  %v5636_v5 = vrot.slane %v16183_v54, 7  ;;  %5376 = vst.msk [vmem:[#allocation4 + $0x18] sm:$0xf] %vm5060_vm1, %v5316_v45  ;;  %7069 = vmatpush2.bf16.msra.mxu0 %v11354_v6 }
 0x460   : > { %v5546_v34 = vsel %vm13366_vm0, %v5544_v40, %v5545_v21  ;;  %v5633_v32 = vsel %vm13475_vm5, %v5629_v25, %v5632_v48  ;;  %v5404_v33 = vrot.slane %v5402_v0, 4  ;;  %v5856_v24 = vor.u32 %v5855_v10, %v16147_v56  ;;  %7178 = vmatpush2.bf16.msra.mxu1 %v11357_v16  ;;  %v11368_v27 = vld [vmem:[%s19129_s5 + $0x184] ss:$8 sps:$4 sm:$0xff]  }
 0x461   : > { %5478 = vrot.lane.b32.xlu1 %v5403_v20, %s11757_s19  ;;  %v5114_v3 = vsel %vm13416_vm15, %v5109_v42, %v5113_v49  ;;  %v16230_v9 = vor.u32 %v5406_v26, %v5405_v23  ;;  %5606 = vst.msk [vmem:[#allocation4 + $0x1c] sm:$0xf] %vm5060_vm1, %v5546_v34  ;;  %v5772_v51 = vrot.slane %v5770_v11, 4  ;;  %v16252_v58 = vor.u32 %v5636_v5, %v5635_v38 }
 0x462   : > { %5249 = vrot.lane.b32.xlu0 %v5114_v3, %s11757_s19  ;;  %v5859_v57 = vrot.slane %v16186_v22, 7  ;;  %v5317_v36 = vrot.slane %v5315_v55, 4  ;;  %v5318_v12 = vrot.slane %v16164_v19, 5  ;;  %vm20070_vm2 = vcmask 261120   ;;  %7179 = vmatprep.subr.bf16.mxu1 %v11365_v28  ;;  %v20071_v55 = vld [vmem:[#allocation16_spill] sm:$0xff] }
 0x463   : > { %v11267_v60 = vld [vmem:[#allocation3 + $0x84] ss:$8 sps:$4 sm:$0x1f]   ;;  %v5408_v56 = vsel %vm13426_vm14, %v5404_v33, %v16230_v9  ;;  %v5773_v41 = vrot.slane %v16130_v8, 7  ;;  %v5547_v11 = vrot.slane %v5545_v21, 4  ;;  %v5548_v15 = vrot.slane %v16164_v19, 6 }
 0x464   : > { %v11269_v18 = vld [vmem:[#allocation3 + $0x80] ss:$8 sps:$4 sm:$0x1f]   ;;  %10646 = vmatprep.mubr.msk.bf16.mxu1 %vm20070_vm2, %v11267_v60  ;;  %v5854_v47 = vrot.slane %v5851_v52, 4  ;;  %v5319_v35 = vsel %vm13353_vm7, %v5317_v36, %v5318_v12  ;;  %v5776_v8 = vrot.slane %v16164_v19, 7  ;;  %v5634_v4 = vrot.slane %v5632_v48, 4  ;;  %7180 = vmatpush2.bf16.msra.mxu1 %v11363_v62 }
 0x465   : > { %5706 = vrot.lane.b32.xlu1 %v5633_v32, %s11757_s19  ;;  %4860 = vmatmul.mubr.bf16.gmra.mxu1 %v11269_v18  ;;  %5377 = vst.msk [vmem:[#allocation4 + $0x2c] sm:$0xf] %vm5060_vm1, %v5319_v35  ;;  %v5774_v53 = vsel %vm13373_vm10, %v5772_v51, %v5773_v41  ;;  %v5549_v0 = vsel %vm13366_vm0, %v5547_v11, %v5548_v15  ;;  %v5775_v1 = vrot.slane %v5773_v41, 4  ;;  %v5858_v7 = vrot.slane %v5855_v10, 4  ;;  %v20073_v21 = vld [vmem:[#allocation15_spill] sm:$0xff] }
 0x466   : > { %5480 = vrot.lane.b32.xlu0 %v5408_v56, %s11757_s19  ;;  %v5857_v52 = vsel %vm13491_vm13, %v5854_v47, %v5856_v24  ;;  %5834 = vst.msk [vmem:[#allocation4 + $0x20] sm:$0xf] %vm5060_vm1, %v5774_v53  ;;  %5607 = vst.msk [vmem:[#allocation4 + $0x30] sm:$0xf] %vm5060_vm1, %v5549_v0  ;;  %v5638_v31 = vsel %vm13475_vm5, %v5634_v4, %v16252_v58  ;;  %v5860_v43 = vor.u32 %v5859_v57, %v16183_v54  ;;  %v20072_v40 = vmov 0  }
 0x467   : > { %v5777_v14 = vsel %vm13373_vm10, %v5775_v1, %v5776_v8  ;;  %7181 = vmatprep.subr.bf16.mxu1 %v11368_v27  ;;  %v4874_v2 = vadd.s32 %v15813_v59, %v20071_v55  ;;  %v4875_v42 = vadd.s32 %v15813_v59, %v20073_v21  ;;  %v5117_v29 = vrot.slane %v16186_v22, 4 }
 0x468   : > { %5835 = vst.msk [vmem:[#allocation4 + $0x34] sm:$0xf] %vm5060_vm1, %v5777_v14  ;;  %7182 = vmatpush2.bf16.msra.mxu1 %v11366_v39  ;;  %v5861_v23 = vsel %vm13491_vm13, %v5858_v7, %v5860_v43  ;;  %v5409_v41 = vrot.slane %v16230_v9, 4  ;;  %v5320_v27 = vrot.slane %v5318_v12, 4  ;;  %v5550_v53 = vrot.slane %v5548_v15, 4 }
 0x469   : > { %5916 = vrot.lane.b32.xlu1 %v5857_v52, %s11757_s19  ;;  %8239 = vmatprep.subr.bf16.mxu1 %v20072_v40  ;;  %vm4892_vm6 = vcmp.ge.s32.totalorder %v4874_v2, 0  ;;  %vm4910_vm9 = vcmp.lt.s32.totalorder %v4874_v2, 300  ;;  %vm4893_vm4 = vcmp.ge.s32.totalorder %v4875_v42, 0  ;;  %vm4911_vm3 = vcmp.lt.s32.totalorder %v4875_v42, 300 }
 0x46a   : > { %5708 = vrot.lane.b32.xlu0 %v5638_v31, %s11757_s19  ;;  %vm4928_vm11 = vmand %vm4892_vm6, %vm4910_vm9  ;;  %v5118_v20 = vor.u32 %v5117_v29, %v5113_v49  ;;  %v5778_v2 = vrot.slane %v5776_v8, 4 }
 0x46b   : > { %vm4929_vm8 = vmand %vm4893_vm4, %vm4911_vm3  ;;  %vm5293_vm3 = vcmask 1043968  }
 0x46c   : > { %v5119_v49 = vrot.slane %v5118_v20, 4 }
 0x46d   : > { %6228 = vrot.lane.b32.xlu1 %v5114_v3, %s11757_s19 }
 0x46e   : > { %5918 = vrot.lane.b32.xlu0 %v5861_v23, %s11757_s19  ;;  %v5639_v23 = vrot.slane %v16252_v58, 4 }
 0x472   : > { %v4813_v48 = vpop.f32.mrf.mxu1 }
 0x473   : > { %v4814_v26 = vadd.f32 %v15848_v61, %v4813_v48 }
 0x474   : > { %v4815_v10 = vpop.f32.mrf.mxu1 }
 0x475   : > { %v4982_v6 = vsel %vm4928_vm11, %v4814_v26, 0.0 }
 0x476   : > { %v16316_v38 = vpack.c.bf16 %v4982_v6, %v4982_v6  ;;  %v4816_v5 = vpop.f32.mrf.mxu1 }
 0x477   : > { %v4817_v16 = vadd.f32 %v15848_v61, %v4816_v5  ;;  %v5862_v5 = vrot.slane %v5859_v57, 4 }
 0x478   : > { %v4818_v3 = vpop.f32.mrf.mxu1  ;;  %v5121_v25 = vshll.u32 %v16316_v38, 16  ;;  %v16321_v45 = vshrl.u32 %v16316_v38, 16  ;;  %5065 = vst.msk [vmem:[#allocation4 + $0x50] sm:$0xf] %vm5060_vm1, %v16316_v38  ;;  %6045 = vst.msk [vmem:[#allocation4 + $0x4c] sm:$0xf] %vm5060_vm1, %v16316_v38 }
 0x479   : > { %v4983_v54 = vsel %vm4929_vm8, %v4817_v16, 0.0  ;;  %v5321_v47 = vrot.slane %v16316_v38, 5  ;;  %v5551_v0 = vrot.slane %v16316_v38, 6  ;;  %v5779_v39 = vrot.slane %v16316_v38, 7 }
 0x47a   : > { %v16327_v34 = vpack.c.bf16 %v4983_v54, %v4983_v54  ;;  %v5123_v62 = vrot.slane %v5121_v25, 5  ;;  %v5410_v28 = vrot.slane %v16321_v45, 5  ;;  %v5411_v32 = vrot.slane %v5121_v25, 6  ;;  %v20074_v54 = vld [vmem:[#allocation18_spill] sm:$0xff] }
 0x47b   : > { %v5127_v33 = vrot.slane %v16321_v45, 4  ;;  %v5640_v60 = vrot.slane %v16321_v45, 6  ;;  %v5641_v24 = vrot.slane %v5121_v25, 7  ;;  %v5863_v9 = vrot.slane %v16321_v45, 7 }
 0x47c   : > { %v5124_v51 = vsel %vm13416_vm15, %v5119_v49, %v5123_v62  ;;  %v5412_v18 = vor.u32 %v5411_v32, %v5410_v28  ;;  %v16335_v36 = vshll.u32 %v16327_v34, 16  ;;  %v16338_v56 = vshrl.u32 %v16327_v34, 16  ;;  %5066 = vst.msk [vmem:[#allocation4 + $0x64] sm:$0xf] %vm5060_vm1, %v16327_v34  ;;  %6046 = vst.msk [vmem:[#allocation4 + $0x60] sm:$0xf] %vm5060_vm1, %v16327_v34 }
 0x47d   : > { %5251 = vrot.lane.b32.xlu1 %v5124_v51, %s11757_s19  ;;  %6230 = vrot.lane.b32.xlu0 %v5124_v51, %s11757_s19  ;;  %v5128_v11 = vor.u32 %v5127_v33, %v5123_v62  ;;  %v5642_v31 = vor.u32 %v5641_v24, %v5640_v60  ;;  %v5322_v55 = vsel %vm13353_vm7, %v5320_v27, %v5321_v47  ;;  %v5323_v29 = vrot.slane %v5321_v47, 4  ;;  %v20075_v24 = vld [vmem:[#allocation17_spill] sm:$0xff] }
 0x47e   : > { %v5133_v35 = vrot.slane %v16335_v36, 5  ;;  %v5415_v4 = vrot.slane %v16338_v56, 5  ;;  %v5416_v52 = vrot.slane %v16335_v36, 6  ;;  %v5413_v12 = vsel %vm13426_vm14, %v5409_v41, %v5412_v18  ;;  %5378 = vst.msk [vmem:[#allocation4 + $0x40] sm:$0xf] %vm5060_vm1, %v5322_v55 }
 0x47f   : > { %v5129_v1 = vrot.slane %v5128_v11, 4  ;;  %v5645_v43 = vrot.slane %v16338_v56, 6  ;;  %v5646_v14 = vrot.slane %v16335_v36, 7  ;;  %v5552_v21 = vsel %vm13366_vm0, %v5550_v53, %v5551_v0 }
 0x480   : > { %v16367_v7 = vor.u32 %v5416_v52, %v5415_v4  ;;  %v5414_v42 = vrot.slane %v5412_v18, 4  ;;  %5608 = vst.msk [vmem:[#allocation4 + $0x44] sm:$0xf] %vm5060_vm1, %v5552_v21  ;;  %v5324_v48 = vrot.slane %v16327_v34, 5  ;;  %v5780_v26 = vsel %vm13373_vm10, %v5778_v2, %v5779_v39 }
 0x481   : > { %5482 = vrot.lane.b32.xlu1 %v5413_v12, %s11757_s19  ;;  %v5134_v15 = vsel %vm13416_vm15, %v5129_v1, %v5133_v35  ;;  %v5643_v19 = vsel %vm13475_vm5, %v5639_v23, %v5642_v31  ;;  %v5864_v8 = vor.u32 %v5863_v9, %v5121_v25  ;;  %v16384_v10 = vor.u32 %v5646_v14, %v5645_v43 }
 0x482   : > { %5253 = vrot.lane.b32.xlu0 %v5134_v15, %s11757_s19  ;;  %5836 = vst.msk [vmem:[#allocation4 + $0x48] sm:$0xf] %vm5060_vm1, %v5780_v26  ;;  %v5418_v58 = vsel %vm13426_vm14, %v5414_v42, %v16367_v7  ;;  %v5325_v6 = vsel %vm13353_vm7, %v5323_v29, %v5324_v48  ;;  %v5553_v20 = vrot.slane %v5551_v0, 4  ;;  %v5554_v38 = vrot.slane %v16327_v34, 6 }
 0x483   : > { %5379 = vst.msk [vmem:[#allocation4 + $0x54] sm:$0xf] %vm5060_vm1, %v5325_v6  ;;  %v5867_v16 = vrot.slane %v16338_v56, 7  ;;  %v5781_v3 = vrot.slane %v5779_v39, 4  ;;  %v5782_v25 = vrot.slane %v16327_v34, 7  ;;  %v5644_v45 = vrot.slane %v5642_v31, 4 }
 0x484   : > { %v4876_v49 = vadd.s32 %v15813_v59, %v20074_v54  ;;  %v5555_v62 = vsel %vm13366_vm0, %v5553_v20, %v5554_v38  ;;  %v5865_v28 = vsel %vm13491_vm13, %v5862_v5, %v5864_v8  ;;  %v16407_v22 = vrot.slane %v5863_v9, 4 }
 0x485   : > { %5710 = vrot.lane.b32.xlu1 %v5643_v19, %s11757_s19  ;;  %5609 = vst.msk [vmem:[#allocation4 + $0x58] sm:$0xf] %vm5060_vm1, %v5555_v62  ;;  %v16412_v57 = vor.u32 %v5867_v16, %v16335_v36  ;;  %v5783_v32 = vsel %vm13373_vm10, %v5781_v3, %v5782_v25  ;;  %v5648_v33 = vsel %vm13475_vm5, %v5644_v45, %v16384_v10  ;;  %v5137_v18 = vrot.slane %v16338_v56, 4 }
 0x486   : > { %5484 = vrot.lane.b32.xlu0 %v5418_v58, %s11757_s19  ;;  %5837 = vst.msk [vmem:[#allocation4 + $0x5c] sm:$0xf] %vm5060_vm1, %v5783_v32  ;;  %vm4894_vm12 = vcmp.ge.s32.totalorder %v4876_v49, 0  ;;  %vm4912_vm2 = vcmp.lt.s32.totalorder %v4876_v49, 300  ;;  %v4877_v51 = vadd.s32 %v15813_v59, %v20075_v24  ;;  %v5326_v31 = vrot.slane %v5324_v48, 4 }
 0x487   : > { %vm4930_vm6 = vmand %vm4894_vm12, %vm4912_vm2  ;;  %v5138_v47 = vor.u32 %v5137_v18, %v5133_v35  ;;  %v5556_v43 = vrot.slane %v5554_v38, 4  ;;  %v5419_v20 = vrot.slane %v16367_v7, 4  ;;  %v5649_v45 = vrot.slane %v16384_v10, 4 }
 0x488   : > { %vm4895_vm9 = vcmp.ge.s32.totalorder %v4877_v51, 0  ;;  %vm4913_vm11 = vcmp.lt.s32.totalorder %v4877_v51, 300 }
 0x489   : > { %5920 = vrot.lane.b32.xlu1 %v5865_v28, %s11757_s19  ;;  %vm4931_vm4 = vmand %vm4895_vm9, %vm4913_vm11  ;;  %v5139_v9 = vrot.slane %v5138_v47, 4 }
 0x48a   : > { %5712 = vrot.lane.b32.xlu0 %v5648_v33, %s11757_s19 }
 0x48d   : > { %6232 = vrot.lane.b32.xlu1 %v5134_v15, %s11757_s19 }
 0x48f   : > { %v4821_v41 = vpop.f32.mrf.mxu1 }
 0x490   : > { %v4822_v11 = vadd.f32 %v15848_v61, %v4821_v41 }
 0x491   : > { %v4823_v27 = vpop.f32.mrf.mxu1 }
 0x492   : > { %v4984_v4 = vsel %vm4930_vm6, %v4822_v11, 0.0 }
 0x493   : > { %v16435_v53 = vpack.c.bf16 %v4984_v4, %v4984_v4  ;;  %v4824_v0 = vpop.f32.mrf.mxu1  ;;  %v5784_v4 = vrot.slane %v5782_v25, 4 }
 0x494   : > { %v4825_v1 = vadd.f32 %v15848_v61, %v4824_v0 }
 0x495   : > { %v4826_v52 = vpop.f32.mrf.mxu1  ;;  %v16439_v39 = vshll.u32 %v16435_v53, 16  ;;  %v16442_v12 = vshrl.u32 %v16435_v53, 16  ;;  %5067 = vst.msk [vmem:[#allocation4 + $0x78] sm:$0xf] %vm5060_vm1, %v16435_v53  ;;  %6047 = vst.msk [vmem:[#allocation4 + $0x74] sm:$0xf] %vm5060_vm1, %v16435_v53 }
 0x496   : > { %v5327_v36 = vrot.slane %v16435_v53, 5  ;;  %v4985_v35 = vsel %vm4931_vm4, %v4825_v1, 0.0  ;;  %v5557_v61 = vrot.slane %v16435_v53, 6  ;;  %v5785_v51 = vrot.slane %v16435_v53, 7 }
 0x497   : > { %v16450_v14 = vpack.c.bf16 %v4985_v35, %v4985_v35  ;;  %v5143_v15 = vrot.slane %v16439_v39, 5  ;;  %v5420_v55 = vrot.slane %v16442_v12, 5  ;;  %v5421_v2 = vrot.slane %v16439_v39, 6 }
 0x498   : > { %v5147_v23 = vrot.slane %v16442_v12, 4  ;;  %v5650_v21 = vrot.slane %v16442_v12, 6  ;;  %v5651_v42 = vrot.slane %v16439_v39, 7  ;;  %v5328_v29 = vsel %vm13353_vm7, %v5326_v31, %v5327_v36 }
 0x499   : > { %v16462_v48 = vsel %vm13416_vm15, %v5139_v9, %v5143_v15  ;;  %v5422_v26 = vor.u32 %v5421_v2, %v5420_v55  ;;  %v16465_v19 = vshll.u32 %v16450_v14, 16  ;;  %v16468_v8 = vshrl.u32 %v16450_v14, 16  ;;  %5068 = vst.msk [vmem:[#allocation4 + $0x8c] sm:$0xf] %vm5060_vm1, %v16450_v14  ;;  %6048 = vst.msk [vmem:[#allocation4 + $0x88] sm:$0xf] %vm5060_vm1, %v16450_v14 }
 0x49a   : > { %5380 = vst.msk [vmem:[#allocation4 + $0x68] sm:$0xf] %vm5060_vm1, %v5328_v29  ;;  %5255 = vrot.lane.b32.xlu1 %v16462_v48, %s11757_s19  ;;  %v5148_v58 = vor.u32 %v5147_v23, %v5143_v15  ;;  %v5558_v6 = vsel %vm13366_vm0, %v5556_v43, %v5557_v61  ;;  %v5652_v54 = vor.u32 %v5651_v42, %v5650_v21  ;;  %v5329_v28 = vrot.slane %v5327_v36, 4  ;;  %v20077_v21 = vld [vmem:[#allocation19_spill] sm:$0xff] }
 0x49b   : > { %v5153_v38 = vrot.slane %v16465_v19, 5  ;;  %v5425_v5 = vrot.slane %v16468_v8, 5  ;;  %5610 = vst.msk [vmem:[#allocation4 + $0x6c] sm:$0xf] %vm5060_vm1, %v5558_v6  ;;  %v5426_v49 = vrot.slane %v16465_v19, 6  ;;  %v5423_v62 = vsel %vm13426_vm14, %v5419_v20, %v5422_v26 }
 0x49c   : > { %v5149_v3 = vrot.slane %v5148_v58, 4  ;;  %v5330_v32 = vrot.slane %v16450_v14, 5  ;;  %v5655_v7 = vrot.slane %v16468_v8, 6  ;;  %v5656_v24 = vrot.slane %v16465_v19, 7  ;;  %v16572_v6 = vld [vmem:[%s19128_s4] ss:$0 sm:$0xff] }
 0x49d   : > { %v16496_v10 = vor.u32 %v5426_v49, %v5425_v5  ;;  %v5424_v18 = vrot.slane %v5422_v26, 4  ;;  %v5653_v11 = vsel %vm13475_vm5, %v5649_v45, %v5652_v54  ;;  %v5654_v27 = vrot.slane %v5652_v54, 4 }
 0x49e   : > { %5486 = vrot.lane.b32.xlu1 %v5423_v62, %s11757_s19  ;;  %v16494_v33 = vsel %vm13416_vm15, %v5149_v3, %v5153_v38  ;;  %v5331_v41 = vsel %vm13353_vm7, %v5329_v28, %v5330_v32  ;;  %v16509_v47 = vor.u32 %v5656_v24, %v5655_v7  ;;  %v5871_v0 = vrot.slane %v16442_v12, 7 }
 0x49f   : > { %5257 = vrot.lane.b32.xlu0 %v16494_v33, %s11757_s19  ;;  %5381 = vst.msk [vmem:[#allocation4 + $0x7c] sm:$0xf] %vm5060_vm1, %v5331_v41  ;;  %v5428_v53 = vsel %vm13426_vm14, %v5424_v18, %v16496_v10  ;;  %v5875_v1 = vrot.slane %v16468_v8, 7  ;;  %v5560_v52 = vrot.slane %v16450_v14, 6  ;;  %v5559_v36 = vrot.slane %v5557_v61, 4 }
 0x4a0   : > { %v16523_v9 = vsel %vm13475_vm5, %v5654_v27, %v16509_v47  ;;  %v5787_v34 = vrot.slane %v5785_v51, 4  ;;  %v5788_v25 = vrot.slane %v16450_v14, 7  ;;  %v16527_v35 = vrot.slane %v5871_v0, 4 }
 0x4a1   : > { %v16532_v12 = vor.u32 %v5875_v1, %v16465_v19  ;;  %v16536_v31 = vrot.slane %v5867_v16, 4  ;;  %v16539_v43 = vor.u32 %v5871_v0, %v16439_v39  ;;  %v5561_v61 = vsel %vm13366_vm0, %v5559_v36, %v5560_v52  ;;  %v20076_v39 = vld [vmem:[#allocation20_spill] sm:$0xff] }
 0x4a2   : > { %5714 = vrot.lane.b32.xlu1 %v5653_v11, %s11757_s19  ;;  %v5789_v15 = vsel %vm13373_vm10, %v5787_v34, %v5788_v25  ;;  %v5786_v55 = vsel %vm13373_vm10, %v5784_v4, %v5785_v51  ;;  %5611 = vst.msk [vmem:[#allocation4 + $0x80] sm:$0xf] %vm5060_vm1, %v5561_v61  ;;  %v4878_v2 = vadd.s32 %v15813_v59, %v20076_v39  ;;  %v5157_v26 = vrot.slane %v16468_v8, 4 }
 0x4a3   : > { %5488 = vrot.lane.b32.xlu0 %v5428_v53, %s11757_s19  ;;  %5839 = vst.msk [vmem:[#allocation4 + $0x84] sm:$0xf] %vm5060_vm1, %v5789_v15  ;;  %5838 = vst.msk [vmem:[#allocation4 + $0x70] sm:$0xf] %vm5060_vm1, %v5786_v55  ;;  %v4879_v42 = vadd.s32 %v15813_v59, %v20077_v21  ;;  %v5429_v11 = vrot.slane %v16496_v10, 4  ;;  %v5332_v27 = vrot.slane %v5330_v32, 4  ;;  %v20110_v37 = vsel %vm13491_vm13, %v16527_v35, %v16532_v12 }
 0x4a4   : > { %vm4896_vm8 = vcmp.ge.s32.totalorder %v4878_v2, 0  ;;  %vm4914_vm12 = vcmp.lt.s32.totalorder %v4878_v2, 300  ;;  %v5158_v54 = vor.u32 %v5157_v26, %v5153_v38  ;;  %v20111_v17 = vsel %vm13491_vm13, %v16536_v31, %v16539_v43 }
 0x4a5   : > { %vm4932_vm2 = vmand %vm4896_vm8, %vm4914_vm12  ;;  %vm4897_vm6 = vcmp.ge.s32.totalorder %v4879_v42, 0  ;;  %vm4915_vm9 = vcmp.lt.s32.totalorder %v4879_v42, 300 }
 0x4a6   : > { %vm4933_vm11 = vmand %vm4897_vm6, %vm4915_vm9  ;;  %v5159_v41 = vrot.slane %v5158_v54, 4  ;;  %v5659_v54 = vrot.slane %v16509_v47, 4 }
 0x4a7   : > { %v5246_v23 = vpop.permute.xlu0 %5245 }
 0x4a8   : > { %5294 = vst.msk [vmem:[#allocation4] sm:$0xf] %vm5293_vm3, %v5246_v23 }
 0x4ab   : > { %v5477_v29 = vpop.permute.xlu0 %5476 }
 0x4ac   : > { %5524 = vst.msk [vmem:[#allocation4 + $0x4] sm:$0xf] %vm5293_vm3, %v5477_v29 }
 0x4ad   : > { %v4829_v58 = vpop.f32.mrf.mxu1 }
 0x4ae   : > { %v4830_v20 = vadd.f32 %v16572_v6, %v4829_v58 }
 0x4af   : > { %v5705_v5 = vpop.permute.xlu0 %5704  ;;  %v4831_v3 = vpop.f32.mrf.mxu1 }
 0x4b0   : > { %v4986_v45 = vsel %vm4932_vm2, %v4830_v20, 0.0  ;;  %5752 = vst.msk [vmem:[#allocation4 + $0x8] sm:$0xf] %vm5293_vm3, %v5705_v5 }
 0x4b1   : > { %v16578_v49 = vpack.c.bf16 %v4986_v45, %v4986_v45  ;;  %v4832_v62 = vpop.f32.mrf.mxu1 }
 0x4b2   : > { %v4833_v28 = vadd.f32 %v16572_v6, %v4832_v62 }
 0x4b3   : > { %5069 = vst.msk [vmem:[#allocation4 + $0xa0] sm:$0xf] %vm5060_vm1, %v16578_v49  ;;  %6049 = vst.msk [vmem:[#allocation4 + $0x9c] sm:$0xf] %vm5060_vm1, %v16578_v49  ;;  %v5915_v7 = vpop.permute.xlu0 %5914  ;;  %v4834_v24 = vpop.f32.mrf.mxu1  ;;  %v5161_v51 = vshll.u32 %v16578_v49, 16  ;;  %v5165_v18 = vshrl.u32 %v16578_v49, 16 }
 0x4b4   : > { %v5333_v19 = vrot.slane %v16578_v49, 5  ;;  %v4987_v38 = vsel %vm4933_vm11, %v4833_v28, 0.0  ;;  %5962 = vst.msk [vmem:[#allocation4 + $0xc] sm:$0xf] %vm5293_vm3, %v5915_v7  ;;  %v5563_v62 = vrot.slane %v16578_v49, 6 }
 0x4b5   : > { %v16592_v4 = vpack.c.bf16 %v4987_v38, %v4987_v38  ;;  %v5163_v53 = vrot.slane %v5161_v51, 5  ;;  %v5167_v0 = vrot.slane %v5165_v18, 4  ;;  %v5430_v36 = vrot.slane %v5165_v18, 5 }
 0x4b6   : > { %v5431_v34 = vrot.slane %v5161_v51, 6  ;;  %v5334_v61 = vsel %vm13353_vm7, %v5332_v27, %v5333_v19  ;;  %v5335_v15 = vrot.slane %v5333_v19, 4  ;;  %v5660_v55 = vrot.slane %v5165_v18, 6 }
 0x4b7   : > { %5070 = vst.msk [vmem:[#allocation4 + $0xb4] sm:$0xf] %vm5060_vm1, %v16592_v4  ;;  %6050 = vst.msk [vmem:[#allocation4 + $0xb0] sm:$0xf] %vm5060_vm1, %v16592_v4  ;;  %v16602_v32 = vsel %vm13416_vm15, %v5159_v41, %v5163_v53  ;;  %v5168_v10 = vor.u32 %v5167_v0, %v5163_v53  ;;  %v16605_v39 = vshll.u32 %v16592_v4, 16  ;;  %v16608_v2 = vshrl.u32 %v16592_v4, 16 }
 0x4b8   : > { %5382 = vst.msk [vmem:[#allocation4 + $0x90] sm:$0xf] %vm5060_vm1, %v5334_v61  ;;  %5259 = vrot.lane.b32.xlu1 %v16602_v32, %s11757_s19  ;;  %v5432_v23 = vor.u32 %v5431_v34, %v5430_v36  ;;  %v5336_v21 = vrot.slane %v16592_v4, 5  ;;  %v5661_v42 = vrot.slane %v5161_v51, 7  ;;  %v5879_v29 = vrot.slane %v5165_v18, 7 }
 0x4b9   : > { %v5169_v26 = vrot.slane %v5168_v10, 4  ;;  %v5173_v58 = vrot.slane %v16605_v39, 5  ;;  %v5435_v20 = vrot.slane %v16608_v2, 5  ;;  %v5436_v5 = vrot.slane %v16605_v39, 6 }
 0x4ba   : > { %v5433_v3 = vsel %vm13426_vm14, %v5429_v11, %v5432_v23  ;;  %v5337_v45 = vsel %vm13353_vm7, %v5335_v15, %v5336_v21  ;;  %v5662_v24 = vor.u32 %v5661_v42, %v5660_v55  ;;  %v5665_v18 = vrot.slane %v16608_v2, 6 }
 0x4bb   : > { %v16627_v28 = vsel %vm13416_vm15, %v5169_v26, %v5173_v58  ;;  %v16629_v7 = vor.u32 %v5436_v5, %v5435_v20  ;;  %5383 = vst.msk [vmem:[#allocation4 + $0xa4] sm:$0xf] %vm5060_vm1, %v5337_v45  ;;  %v5666_v47 = vrot.slane %v16605_v39, 7  ;;  %v5883_v19 = vrot.slane %v16608_v2, 7  ;;  %v20078_v26 = vld [vmem:[#allocation22_spill] sm:$0xff]  ;;  %v20079_v5 = vld [vmem:[#allocation21_spill] sm:$0xff] }
 0x4bc   : > { %5261 = vrot.lane.b32.xlu0 %v16627_v28, %s11757_s19  ;;  %5490 = vrot.lane.b32.xlu1 %v5433_v3, %s11757_s19  ;;  %v16640_v38 = vrot.slane %v5875_v1, 4  ;;  %v5434_v41 = vrot.slane %v5432_v23, 4  ;;  %v16642_v11 = vrot.slane %v5879_v29, 4  ;;  %v16646_v27 = vsel %vm13475_vm5, %v5659_v54, %v5662_v24 }
 0x4bd   : > { %v5791_v53 = vrot.slane %v16578_v49, 7  ;;  %v5664_v0 = vrot.slane %v5662_v24, 4  ;;  %v16649_v36 = vor.u32 %v5666_v47, %v5665_v18  ;;  %v16654_v34 = vor.u32 %v5883_v19, %v16605_v39 }
 0x4be   : > { %v16656_v8 = vor.u32 %v5879_v29, %v5161_v51  ;;  %v5438_v1 = vsel %vm13426_vm14, %v5434_v41, %v16629_v7  ;;  %v5565_v61 = vrot.slane %v5563_v62, 4  ;;  %v5566_v15 = vrot.slane %v16592_v4, 6 }
 0x4bf   : > { %v5562_v49 = vrot.slane %v5560_v52, 4  ;;  %v16668_v55 = vsel %vm13475_vm5, %v5664_v0, %v16649_v36  ;;  %v5790_v52 = vrot.slane %v5788_v25, 4  ;;  %v5793_v42 = vrot.slane %v5791_v53, 4 }
 0x4c0   : > { %5492 = vrot.lane.b32.xlu0 %v5438_v1, %s11757_s19  ;;  %v5567_v39 = vsel %vm13366_vm0, %v5565_v61, %v5566_v15  ;;  %v5794_v29 = vrot.slane %v16592_v4, 7  ;;  %v4880_v20 = vadd.s32 %v15813_v59, %v20078_v26  ;;  %v4881_v3 = vadd.s32 %v15813_v59, %v20079_v5 }
 0x4c1   : > { %v5564_v23 = vsel %vm13366_vm0, %v5562_v49, %v5563_v62  ;;  %5613 = vst.msk [vmem:[#allocation4 + $0xa8] sm:$0xf] %vm5060_vm1, %v5567_v39  ;;  %v5792_v14 = vsel %vm13373_vm10, %v5790_v52, %v5791_v53  ;;  %v5177_v45 = vrot.slane %v16608_v2, 4  ;;  %v5439_v26 = vrot.slane %v16629_v7, 4 }
 0x4c2   : > { %5612 = vst.msk [vmem:[#allocation4 + $0x94] sm:$0xf] %vm5060_vm1, %v5564_v23  ;;  %v5795_v25 = vsel %vm13373_vm10, %v5793_v42, %v5794_v29  ;;  %5840 = vst.msk [vmem:[#allocation4 + $0x98] sm:$0xf] %vm5060_vm1, %v5792_v14  ;;  %vm4898_vm4 = vcmp.ge.s32.totalorder %v4880_v20, 0  ;;  %vm4916_vm8 = vcmp.lt.s32.totalorder %v4880_v20, 300  ;;  %v20112_v35 = vsel %vm13491_vm13, %v16642_v11, %v16654_v34 }
 0x4c3   : > { %5841 = vst.msk [vmem:[#allocation4 + $0xac] sm:$0xf] %vm5060_vm1, %v5795_v25  ;;  %vm4934_vm12 = vmand %vm4898_vm4, %vm4916_vm8  ;;  %vm4899_vm2 = vcmp.ge.s32.totalorder %v4881_v3, 0  ;;  %vm4917_vm6 = vcmp.lt.s32.totalorder %v4881_v3, 300  ;;  %v5178_v47 = vor.u32 %v5177_v45, %v5173_v58  ;;  %v5338_v20 = vrot.slane %v5336_v21, 4 }
 0x4c4   : > { %vm4935_vm9 = vmand %vm4899_vm2, %vm4917_vm6  ;;  %v5568_v2 = vrot.slane %v5566_v15, 4  ;;  %v20113_v12 = vsel %vm13491_vm13, %v16640_v38, %v16656_v8 }
 0x4c5   : > { %v5179_v42 = vrot.slane %v5178_v47, 4 }
 0x4cb   : > { %v4837_v54 = vpop.f32.mrf.mxu1 }
 0x4cc   : > { %v4838_v62 = vadd.f32 %v16572_v6, %v4837_v54 }
 0x4cd   : > { %v4839_v24 = vpop.f32.mrf.mxu1 }
 0x4ce   : > { %v4988_v18 = vsel %vm4934_vm12, %v4838_v62, 0.0 }
 0x4cf   : > { %v16703_v41 = vpack.c.bf16 %v4988_v18, %v4988_v18  ;;  %v4840_v53 = vpop.f32.mrf.mxu1  ;;  %v5248_v1 = vpop.permute.xlu1 %5247 }
 0x4d0   : > { %v4841_v0 = vadd.f32 %v16572_v6, %v4840_v53  ;;  %v6227_v61 = vpop.permute.xlu0 %6226  ;;  %5295 = vst.msk [vmem:[#allocation4 + $0x14] sm:$0xf] %vm5293_vm3, %v5248_v1 }
 0x4d1   : > { %5071 = vst.msk [vmem:[#allocation4 + $0xc8] sm:$0xf] %vm5060_vm1, %v16703_v41  ;;  %6051 = vst.msk [vmem:[#allocation4 + $0xc4] sm:$0xf] %vm5060_vm1, %v16703_v41  ;;  %v5181_v49 = vshll.u32 %v16703_v41, 16  ;;  %v5185_v52 = vshrl.u32 %v16703_v41, 16  ;;  %v4842_v23 = vpop.f32.mrf.mxu1 }
 0x4d2   : > { %v5339_v58 = vrot.slane %v16703_v41, 5  ;;  %v4989_v39 = vsel %vm4935_vm9, %v4841_v0, 0.0  ;;  %6274 = vst.msk [vmem:[#allocation4 + $0x10] sm:$0xf] %vm5293_vm3, %v6227_v61  ;;  %v16743_v23 = vrot.slane %v5883_v19, 4 }
 0x4d3   : > { %v16718_v14 = vpack.c.bf16 %v4989_v39, %v4989_v39  ;;  %v5183_v25 = vrot.slane %v5181_v49, 5  ;;  %v5187_v5 = vrot.slane %v5185_v52, 4  ;;  %v5440_v3 = vrot.slane %v5185_v52, 5  ;;  %v5479_v7 = vpop.permute.xlu1 %5478 }
 0x4d4   : > { %v5441_v45 = vrot.slane %v5181_v49, 6  ;;  %v5670_v54 = vrot.slane %v5185_v52, 6  ;;  %v5671_v62 = vrot.slane %v5181_v49, 7  ;;  %v5340_v24 = vsel %vm13353_vm7, %v5338_v20, %v5339_v58  ;;  %5525 = vst.msk [vmem:[#allocation4 + $0x18] sm:$0xf] %vm5293_vm3, %v5479_v7  ;;  %v5250_v0 = vpop.permute.xlu0 %5249 }
 0x4d5   : > { %5072 = vst.msk [vmem:[#allocation4 + $0xdc] sm:$0xf] %vm5060_vm1, %v16718_v14  ;;  %6052 = vst.msk [vmem:[#allocation4 + $0xd8] sm:$0xf] %vm5060_vm1, %v16718_v14  ;;  %v16728_v21 = vsel %vm13416_vm15, %v5179_v42, %v5183_v25  ;;  %v5188_v18 = vor.u32 %v5187_v5, %v5183_v25  ;;  %v16731_v47 = vshll.u32 %v16718_v14, 16  ;;  %v16734_v53 = vshrl.u32 %v16718_v14, 16 }
 0x4d6   : > { %5384 = vst.msk [vmem:[#allocation4 + $0xb8] sm:$0xf] %vm5060_vm1, %v5340_v24  ;;  %5263 = vrot.lane.b32.xlu1 %v16728_v21, %s11757_s19  ;;  %v5442_v1 = vor.u32 %v5441_v45, %v5440_v3  ;;  %v5672_v61 = vor.u32 %v5671_v62, %v5670_v54  ;;  %v5669_v39 = vrot.slane %v16649_v36, 4  ;;  %v5887_v3 = vrot.slane %v5185_v52, 7 }
 0x4d7   : > { %5296 = vst.msk [vmem:[#allocation4 + $0x28] sm:$0xf] %vm5293_vm3, %v5250_v0  ;;  %v5189_v42 = vrot.slane %v5188_v18, 4  ;;  %v5193_v20 = vrot.slane %v16731_v47, 5  ;;  %v5445_v25 = vrot.slane %v16734_v53, 5  ;;  %v5446_v5 = vrot.slane %v16731_v47, 6  ;;  %v5707_v19 = vpop.permute.xlu1 %5706 }
 0x4d8   : > { %v5443_v24 = vsel %vm13426_vm14, %v5439_v26, %v5442_v1  ;;  %v5569_v45 = vrot.slane %v16703_v41, 6  ;;  %v5675_v62 = vrot.slane %v16734_v53, 6  ;;  %v5676_v7 = vrot.slane %v16731_v47, 7  ;;  %5753 = vst.msk [vmem:[#allocation4 + $0x1c] sm:$0xf] %vm5293_vm3, %v5707_v19  ;;  %v5481_v52 = vpop.permute.xlu0 %5480 }
 0x4d9   : > { %v16758_v36 = vsel %vm13416_vm15, %v5189_v42, %v5193_v20  ;;  %v16760_v54 = vor.u32 %v5446_v5, %v5445_v25  ;;  %v5891_v15 = vrot.slane %v16734_v53, 7  ;;  %v16771_v26 = vsel %vm13475_vm5, %v5669_v39, %v5672_v61  ;;  %5526 = vst.msk [vmem:[#allocation4 + $0x2c] sm:$0xf] %vm5293_vm3, %v5481_v52 }
 0x4da   : > { %20080 = vst [vmem:[#allocation71_spill] sm:$0xff] %v16758_v36  ;;  %5265 = vrot.lane.b32.xlu0 %v16758_v36, %s11757_s19  ;;  %5494 = vrot.lane.b32.xlu1 %v5443_v24, %s11757_s19  ;;  %v5341_v18 = vrot.slane %v5339_v58, 4  ;;  %v5797_v0 = vrot.slane %v16703_v41, 7  ;;  %v5444_v42 = vrot.slane %v5442_v1, 4  ;;  %v5674_v25 = vrot.slane %v5672_v61, 4 }
 0x4db   : > { %v16775_v5 = vor.u32 %v5676_v7, %v5675_v62  ;;  %v5342_v19 = vrot.slane %v16718_v14, 5  ;;  %v16778_v10 = vrot.slane %v5887_v3, 4  ;;  %v16783_v24 = vor.u32 %v5891_v15, %v16731_v47  ;;  %v5917_v58 = vpop.permute.xlu1 %5916  ;;  %v11360_v61 = vld [vmem:[#allocation4] ss:$20 sps:$4 sm:$0xff]   ;;  %v11362_v62 = vld [vmem:[#allocation4 + $0x4] ss:$20 sps:$4 sm:$0xff]  }
 0x4dc   : > { %v16785_v39 = vor.u32 %v5887_v3, %v5181_v49  ;;  %v5796_v41 = vrot.slane %v5794_v29, 4  ;;  %v5448_v1 = vsel %vm13426_vm14, %v5444_v42, %v16760_v54  ;;  %v5570_v4 = vsel %vm13366_vm0, %v5568_v2, %v5569_v45  ;;  %5963 = vst.msk [vmem:[#allocation4 + $0x20] sm:$0xf] %vm5293_vm3, %v5917_v58  ;;  %v5709_v29 = vpop.permute.xlu0 %5708  ;;  %7070 = vmatprep.mubr.bf16.mxu0 %v11362_v62 }
 0x4dd   : > { %v16795_v7 = vsel %vm13475_vm5, %v5674_v25, %v16775_v5  ;;  %v5343_v49 = vsel %vm13353_vm7, %v5341_v18, %v5342_v19  ;;  %v5571_v18 = vrot.slane %v5569_v45, 4  ;;  %5614 = vst.msk [vmem:[#allocation4 + $0xbc] sm:$0xf] %vm5060_vm1, %v5570_v4  ;;  %v5572_v2 = vrot.slane %v16718_v14, 6  ;;  %7071 = vmatmul.mubr.bf16.vlgmr.msra.gmra.mxu0 %v11360_v61  ;;  %v20082_v61 = vld [vmem:[#allocation24_spill] sm:$0xff] }
 0x4de   : > { %20081 = vst [vmem:[#allocation30_spill] sm:$0xff] %v16785_v39  ;;  %5496 = vrot.lane.b32.xlu0 %v5448_v1, %s11757_s19  ;;  %5385 = vst.msk [vmem:[#allocation4 + $0xcc] sm:$0xf] %vm5060_vm1, %v5343_v49  ;;  %v5799_v42 = vrot.slane %v5797_v0, 4  ;;  %v19296_v25 = vrot.slane %v16718_v14, 7  ;;  %v5798_v58 = vsel %vm13373_vm10, %v5796_v41, %v5797_v0  ;;  %v4882_v4 = vadd.s32 %v15813_v59, %v20082_v61 }
 0x4df   : > { %5754 = vst.msk [vmem:[#allocation4 + $0x30] sm:$0xf] %vm5293_vm3, %v5709_v29  ;;  %v6229_v1 = vpop.permute.xlu1 %6228  ;;  %v5573_v45 = vsel %vm13366_vm0, %v5571_v18, %v5572_v2  ;;  %v11369_v0 = vld [vmem:[#allocation4 + $0x8] ss:$20 sps:$4 sm:$0xff]   ;;  %v5449_v52 = vrot.slane %v16760_v54, 4 }
 0x4e0   : > { %5842 = vst.msk [vmem:[#allocation4 + $0xc0] sm:$0xf] %vm5060_vm1, %v5798_v58  ;;  %v5801_v62 = vsel %vm13373_vm10, %v5799_v42, %v19296_v25  ;;  %v5919_v49 = vpop.permute.xlu0 %5918  ;;  %5615 = vst.msk [vmem:[#allocation4 + $0xd0] sm:$0xf] %vm5060_vm1, %v5573_v45  ;;  %vm4900_vm11 = vcmp.ge.s32.totalorder %v4882_v4, 0  ;;  %vm4918_vm4 = vcmp.lt.s32.totalorder %v4882_v4, 300 }
 0x4e1   : > { %6275 = vst.msk [vmem:[#allocation4 + $0x24] sm:$0xf] %vm5293_vm3, %v6229_v1  ;;  %5964 = vst.msk [vmem:[#allocation4 + $0x34] sm:$0xf] %vm5293_vm3, %v5919_v49  ;;  %v20083_v42 = vld [vmem:[#allocation23_spill] sm:$0xff]  ;;  %v5197_v1 = vrot.slane %v16734_v53, 4 }
 0x4e2   : > { %5843 = vst.msk [vmem:[#allocation4 + $0xd4] sm:$0xf] %vm5060_vm1, %v5801_v62  ;;  %v4883_v58 = vadd.s32 %v15813_v59, %v20083_v42  ;;  %vm4936_vm8 = vmand %vm4900_vm11, %vm4918_vm4 }
 0x4e3   : > { %v11371_v41 = vld [vmem:[#allocation4 + $0xc] ss:$20 sps:$4 sm:$0xff]   ;;  %v5198_v61 = vor.u32 %v5197_v1, %v5193_v20 }
 0x4e4   : > { %7183 = vmatprep.mubr.bf16.mxu1 %v11371_v41  ;;  %vm4901_vm12 = vcmp.ge.s32.totalorder %v4883_v58, 0  ;;  %vm4919_vm2 = vcmp.lt.s32.totalorder %v4883_v58, 300 }
 0x4e5   : > { %7184 = vmatmul.mubr.bf16.vlgmr.msra.gmra.mxu1 %v11369_v0  ;;  %vm4937_vm6 = vmand %vm4901_vm12, %vm4919_vm2  ;;  %v5199_v58 = vrot.slane %v5198_v61, 4  ;;  %v5344_v61 = vrot.slane %v5342_v19, 4 }
 0x4ef   : > { %v5252_v29 = vpop.permute.xlu1 %5251  ;;  %v6231_v18 = vpop.permute.xlu0 %6230 }
 0x4f0   : > { %5297 = vst.msk [vmem:[#allocation4 + $0x3c] sm:$0xf] %vm5293_vm3, %v5252_v29  ;;  %6276 = vst.msk [vmem:[#allocation4 + $0x38] sm:$0xf] %vm5293_vm3, %v6231_v18 }
 0x4f2   : > { %v4845_v45 = vpop.f32.mrf.mxu1 }
 0x4f3   : > { %v4846_v62 = vadd.f32 %v16572_v6, %v4845_v45  ;;  %v5483_v49 = vpop.permute.xlu1 %5482 }
 0x4f4   : > { %5527 = vst.msk [vmem:[#allocation4 + $0x40] sm:$0xf] %vm5293_vm3, %v5483_v49  ;;  %v5254_v0 = vpop.permute.xlu0 %5253  ;;  %v4847_v41 = vpop.f32.mrf.mxu1 }
 0x4f5   : > { %v4990_v4 = vsel %vm4936_vm8, %v4846_v62, 0.0  ;;  %5298 = vst.msk [vmem:[#allocation4 + $0x50] sm:$0xf] %vm5293_vm3, %v5254_v0  ;;  %v5679_v0 = vrot.slane %v16775_v5, 4  ;;  %v16865_v41 = vrot.slane %v5891_v15, 4 }
 0x4f6   : > { %v16845_v29 = vpack.c.bf16 %v4990_v4, %v4990_v4  ;;  %v4848_v18 = vpop.f32.mrf.mxu1 }
 0x4f7   : > { %v4849_v42 = vadd.f32 %v16572_v6, %v4848_v18  ;;  %v5711_v45 = vpop.permute.xlu1 %5710  ;;  %20084 = vst [vmem:[#allocation68_spill] sm:$0xff] %v16865_v41 }
 0x4f8   : > { %5073 = vst.msk [vmem:[#allocation4 + $0xf0] sm:$0xf] %vm5060_vm1, %v16845_v29  ;;  %6053 = vst.msk [vmem:[#allocation4 + $0xec] sm:$0xf] %vm5060_vm1, %v16845_v29  ;;  %v5485_v47 = vpop.permute.xlu0 %5484  ;;  %v4850_v20 = vpop.f32.mrf.mxu1  ;;  %v16855_v1 = vshll.u32 %v16845_v29, 16  ;;  %v16858_v62 = vshrl.u32 %v16845_v29, 16 }
 0x4f9   : > { %5755 = vst.msk [vmem:[#allocation4 + $0x44] sm:$0xf] %vm5293_vm3, %v5711_v45  ;;  %v19297_v49 = vrot.slane %v16845_v29, 5  ;;  %v4991_v54 = vsel %vm4937_vm6, %v4849_v42, 0.0  ;;  %5528 = vst.msk [vmem:[#allocation4 + $0x54] sm:$0xf] %vm5293_vm3, %v5485_v47 }
 0x4fa   : > { %v16869_v4 = vpack.c.bf16 %v4991_v54, %v4991_v54  ;;  %v5203_v18 = vrot.slane %v16855_v1, 5  ;;  %v6296_v45 = vld [vmem:[#allocation4 + $0x28] sm:$0xff]  ;;  %v5207_v20 = vrot.slane %v16858_v62, 4  ;;  %v5450_v42 = vrot.slane %v16858_v62, 5 }
 0x4fb   : > { %v5921_v3 = vpop.permute.xlu1 %5920  ;;  %v6299_v47 = vld [vmem:[#allocation4 + $0x3c] sm:$0xff]  ;;  %v5451_v5 = vrot.slane %v16855_v1, 6  ;;  %v5680_v53 = vrot.slane %v16858_v62, 6  ;;  %v5681_v15 = vrot.slane %v16855_v1, 7  ;;  %v5346_v19 = vsel %vm13353_vm7, %v5344_v61, %v19297_v49 }
 0x4fc   : > { %v11372_v51 = vld [vmem:[#allocation4 + $0x2c] ss:$20 sps:$4 sm:$0xff]   ;;  %5074 = vst.msk [vmem:[#allocation4 + $0x104] sm:$0xf] %vm5060_vm1, %v16869_v4  ;;  %6054 = vst.msk [vmem:[#allocation4 + $0x100] sm:$0xf] %vm5060_vm1, %v16869_v4  ;;  %v5713_v54 = vpop.permute.xlu0 %5712  ;;  %v16888_v16 = vsel %vm13416_vm15, %v5199_v58, %v5203_v18  ;;  %v10691_v56 = vcombine.low %v6296_v45, %v6299_v47  ;;  %v5208_v60 = vor.u32 %v5207_v20, %v5203_v18 }
 0x4fd   : > { %5965 = vst.msk [vmem:[#allocation4 + $0x48] sm:$0xf] %vm5293_vm3, %v5921_v3  ;;  %v16891_v25 = vshll.u32 %v16869_v4, 16  ;;  %5756 = vst.msk [vmem:[#allocation4 + $0x58] sm:$0xf] %vm5293_vm3, %v5713_v54  ;;  %5267 = vrot.lane.b32.xlu1 %v16888_v16, %s11757_s19  ;;  %7080 = vmatprep.mubr.bf16.mxu0 %v11372_v51  ;;  %v5452_v61 = vor.u32 %v5451_v5, %v5450_v42  ;;  %v16898_v3 = vshrl.u32 %v16869_v4, 16 }
 0x4fe   : > { %5386 = vst.msk [vmem:[#allocation4 + $0xe0] sm:$0xf] %vm5060_vm1, %v5346_v19  ;;  %v5682_v49 = vor.u32 %v5681_v15, %v5680_v53  ;;  %v5895_v58 = vrot.slane %v16858_v62, 7  ;;  %v11388_v18 = vld [vmem:[%s19129_s5 + $0x270] ss:$8 sps:$4 sm:$0xff]   ;;  %7081 = vmatmul.mubr.bf16.gmra.mxu0 %v10691_v56  ;;  %v5209_v20 = vrot.slane %v5208_v60, 4 }
 0x4ff   : > { %v11390_v45 = vld [vmem:[%s19129_s5 + $0x274] ss:$8 sps:$4 sm:$0xff]   ;;  %v19298_v47 = vrot.slane %v16891_v25, 5  ;;  %v5456_v51 = vrot.slane %v16891_v25, 6  ;;  %v5686_v42 = vrot.slane %v16891_v25, 7  ;;  %v6233_v5 = vpop.permute.xlu1 %6232  ;;  %v5455_v53 = vrot.slane %v16898_v3, 5 }
 0x500   : > { %7264 = vmatprep.subr.bf16.mxu0 %v11390_v45  ;;  %v11394_v62 = vld [vmem:[%s19129_s5 + $0x264] ss:$8 sps:$4 sm:$0xff]   ;;  %v5575_v15 = vrot.slane %v16845_v29, 6  ;;  %v5574_v56 = vrot.slane %v5572_v2, 4  ;;  %v5803_v60 = vrot.slane %v16845_v29, 7  ;;  %v5453_v54 = vsel %vm13426_vm14, %v5449_v52, %v5452_v61 }
 0x501   : > { %6277 = vst.msk [vmem:[#allocation4 + $0x4c] sm:$0xf] %vm5293_vm3, %v6233_v5  ;;  %v16923_v19 = vsel %vm13416_vm15, %v5209_v20, %v19298_v47  ;;  %v5454_v45 = vrot.slane %v5452_v61, 4  ;;  %v5685_v46 = vrot.slane %v16898_v3, 6  ;;  %7265 = vmatpush1.bf16.msra.mxu0 %v11388_v18  ;;  %v11392_v2 = vld [vmem:[%s19129_s5 + $0x260] ss:$8 sps:$4 sm:$0xff]   ;;  %5498 = vrot.lane.b32.xlu1 %v5453_v54, %s11757_s19  ;;  %v16934_v5 = vor.u32 %v5456_v51, %v5455_v53 }
 0x502   : > { %20085 = vst [vmem:[#allocation72_spill] sm:$0xff] %v16923_v19  ;;  %5269 = vrot.lane.b32.xlu0 %v16923_v19, %s11757_s19  ;;  %v5684_v20 = vrot.slane %v5682_v49, 4  ;;  %v19304_v47 = vrot.slane %v16898_v3, 7  ;;  %v16939_v52 = vsel %vm13475_vm5, %v5679_v0, %v5682_v49  ;;  %v16943_v18 = vrot.slane %v5895_v58, 4  ;;  %7266 = vmatprep.subr.bf16.mxu0 %v11394_v62  ;;  %v11397_v51 = vld [vmem:[%s19129_s5 + $0x254] ss:$8 sps:$4 sm:$0xff]  }
 0x503   : > { %20086 = vst [vmem:[#allocation73_spill] sm:$0xff] %v16939_v52  ;;  %v16941_v61 = vor.u32 %v5686_v42, %v5685_v46  ;;  %v16946_v36 = vor.u32 %v5895_v58, %v16855_v1  ;;  %v19303_v19 = vrot.slane %v16869_v4, 5  ;;  %v11376_v54 = vld [vmem:[#allocation4 + $0x30] ss:$20 sps:$4 sm:$0xff]   ;;  %v20090_v46 = vrot.slane %v16845_v29, 5 }
 0x504   : > { %20087 = vst [vmem:[#allocation31_spill] sm:$0xff] %v16943_v18  ;;  %v11374_v53 = vld [vmem:[#allocation4 + $0x34] ss:$20 sps:$4 sm:$0xff]   ;;  %v16955_v49 = vor.u32 %v19304_v47, %v16891_v25  ;;  %v5576_v1 = vsel %vm13366_vm0, %v5574_v56, %v5575_v15  ;;  %v5458_v58 = vsel %vm13426_vm14, %v5454_v45, %v16934_v5  ;;  %v11395_v29 = vld [vmem:[%s19129_s5 + $0x250] ss:$8 sps:$4 sm:$0xff]  }
 0x505   : > { %20088 = vst [vmem:[#allocation74_spill] sm:$0xff] %v16946_v36  ;;  %v5347_v0 = vrot.slane %v20090_v46, 4  ;;  %v16967_v42 = vsel %vm13475_vm5, %v5684_v20, %v16941_v61  ;;  %7267 = vmatpush1.bf16.msra.mxu0 %v11392_v2  ;;  %5616 = vst.msk [vmem:[#allocation4 + $0xe4] sm:$0xf] %vm5060_vm1, %v5576_v1  ;;  %7193 = vmatprep.mubr.bf16.mxu1 %v11374_v53  ;;  %v20092_v2 = vrot.slane %v16718_v14, 7  ;;  %v5577_v46 = vrot.slane %v5575_v15, 4 }
 0x506   : > { %20089 = vst [vmem:[#allocation32_spill] sm:$0xff] %v16955_v49  ;;  %20091 = vst [vmem:[#allocation34_spill] sm:$0xff] %v16967_v42  ;;  %5500 = vrot.lane.b32.xlu0 %v5458_v58, %s11757_s19  ;;  %7194 = vmatmul.mubr.bf16.gmra.mxu1 %v11376_v54  ;;  %v19302_v53 = vrot.slane %v16869_v4, 6  ;;  %v5805_v1 = vrot.slane %v5803_v60, 4  ;;  %v19301_v58 = vrot.slane %v16869_v4, 7  ;;  %v20093_v54 = vld [vmem:[#allocation26_spill] sm:$0xff] }
 0x507   : > { %v5349_v45 = vsel %vm13353_vm7, %v5347_v0, %v19303_v19  ;;  %v5802_v20 = vrot.slane %v20092_v2, 4  ;;  %7268 = vmatprep.subr.bf16.mxu0 %v11397_v51  ;;  %v20103_v42 = vrot.slane %v16869_v4, 5 }
 0x508   : > { %5387 = vst.msk [vmem:[#allocation4 + $0xf4] sm:$0xf] %vm5060_vm1, %v5349_v45  ;;  %v5579_v14 = vsel %vm13366_vm0, %v5577_v46, %v19302_v53  ;;  %v5807_v51 = vsel %vm13373_vm10, %v5805_v1, %v19301_v58 }
 0x509   : > { %v5804_v62 = vsel %vm13373_vm10, %v5802_v20, %v5803_v60  ;;  %7269 = vmatpush1.bf16.msra.mxu0 %v11395_v29  ;;  %5617 = vst.msk [vmem:[#allocation4 + $0xf8] sm:$0xf] %vm5060_vm1, %v5579_v14  ;;  %5845 = vst.msk [vmem:[#allocation4 + $0xfc] sm:$0xf] %vm5060_vm1, %v5807_v51  ;;  %v4884_v60 = vadd.s32 %v15813_v59, %v20093_v54  ;;  %v20094_v29 = vld [vmem:[#allocation25_spill] sm:$0xff]  ;;  %v5350_v39 = vrot.slane %v20103_v42, 4 }
 0x50a   : > { %5844 = vst.msk [vmem:[#allocation4 + $0xe8] sm:$0xf] %vm5060_vm1, %v5804_v62  ;;  %v4885_v45 = vadd.s32 %v15813_v59, %v20094_v29  ;;  %v5217_v62 = vrot.slane %v16898_v3, 4  ;;  %v11400_v54 = vld [vmem:[%s19129_s5 + $0x244] ss:$8 sps:$4 sm:$0xff]  }
 0x50b   : > { %vm4902_vm9 = vcmp.ge.s32.totalorder %v4884_v60, 0  ;;  %vm4920_vm11 = vcmp.lt.s32.totalorder %v4884_v60, 300  ;;  %7270 = vmatprep.subr.bf16.mxu0 %v11400_v54  ;;  %v5459_v54 = vrot.slane %v16934_v5, 4 }
 0x50c   : > { %v5256_v15 = vpop.permute.xlu1 %5255  ;;  %vm4938_vm4 = vmand %vm4902_vm9, %vm4920_vm11  ;;  %vm4903_vm8 = vcmp.ge.s32.totalorder %v4885_v45, 0  ;;  %vm4921_vm12 = vcmp.lt.s32.totalorder %v4885_v45, 300 }
 0x50d   : > { %5299 = vst.msk [vmem:[#allocation4 + $0x64] sm:$0xf] %vm5293_vm3, %v5256_v15  ;;  %v11398_v15 = vld [vmem:[%s19129_s5 + $0x240] ss:$8 sps:$4 sm:$0xff]   ;;  %vm4939_vm2 = vmand %vm4903_vm8, %vm4921_vm12  ;;  %v20117_v8 = vld [vmem:[#allocation34_spill] sm:$0xff] }
 0x50e   : > { %7271 = vmatpush1.bf16.msra.mxu0 %v11398_v15 }
 0x510   : > { %v5487_v0 = vpop.permute.xlu1 %5486 }
 0x511   : > { %5529 = vst.msk [vmem:[#allocation4 + $0x68] sm:$0xf] %vm5293_vm3, %v5487_v0  ;;  %v5258_v2 = vpop.permute.xlu0 %5257  ;;  %v4853_v20 = vpop.f32.mrf.mxu1  ;;  %v20095_v0 = vrot.slane %v16891_v25, 5 }
 0x512   : > { %5300 = vst.msk [vmem:[#allocation4 + $0x78] sm:$0xf] %vm5293_vm3, %v5258_v2  ;;  %v4854_v46 = vadd.f32 %v16572_v6, %v4853_v20 }
 0x513   : > { %v4855_v51 = vpop.f32.mrf.mxu1  ;;  %v5218_v29 = vor.u32 %v5217_v62, %v20095_v0  ;;  %v20096_v0 = vld [vmem:[#allocation28_spill] sm:$0xff] }
 0x514   : > { %v5715_v1 = vpop.permute.xlu1 %5714  ;;  %v4992_v60 = vsel %vm4938_vm4, %v4854_v46, 0.0  ;;  %v11379_v51 = vld [vmem:[#allocation4 + $0x50] ss:$20 sps:$4 sm:$0xff]  }
 0x515   : > { %5757 = vst.msk [vmem:[#allocation4 + $0x6c] sm:$0xf] %vm5293_vm3, %v5715_v1  ;;  %v5489_v14 = vpop.permute.xlu0 %5488  ;;  %v17023_v2 = vpack.c.bf16 %v4992_v60, %v4992_v60  ;;  %v4856_v45 = vpop.f32.mrf.mxu1  ;;  %v5219_v60 = vrot.slane %v5218_v29, 4 }
 0x516   : > { %5530 = vst.msk [vmem:[#allocation4 + $0x7c] sm:$0xf] %vm5293_vm3, %v5489_v14  ;;  %v4857_v20 = vadd.f32 %v16572_v6, %v4856_v45  ;;  %v17035_v45 = vadd.s32 %v15813_v59, %v20096_v0 }
 0x517   : > { %5075 = vst.msk [vmem:[#allocation4 + $0x118] sm:$0xf] %vm5060_vm1, %v17023_v2  ;;  %6055 = vst.msk [vmem:[#allocation4 + $0x114] sm:$0xf] %vm5060_vm1, %v17023_v2  ;;  %v4858_v46 = vpop.f32.mrf.mxu1  ;;  %v5221_v25 = vshll.u32 %v17023_v2, 16  ;;  %v5225_v62 = vshrl.u32 %v17023_v2, 16 }
 0x518   : > { %v11377_v1 = vld [vmem:[#allocation4 + $0x54] ss:$20 sps:$4 sm:$0xff]   ;;  %v4993_v14 = vsel %vm4939_vm2, %v4857_v20, 0.0  ;;  %v5351_v0 = vrot.slane %v17023_v2, 5  ;;  %vm4904_vm6 = vcmp.ge.s32.totalorder %v17035_v45, 0  ;;  %v5581_v42 = vrot.slane %v17023_v2, 6 }
 0x519   : > { %7090 = vmatprep.mubr.bf16.mxu0 %v11377_v1  ;;  %v17037_v15 = vpack.c.bf16 %v4993_v14, %v4993_v14  ;;  %v5223_v56 = vrot.slane %v5221_v25, 5  ;;  %v5227_v58 = vrot.slane %v5225_v62, 4  ;;  %v5460_v53 = vrot.slane %v5225_v62, 5 }
 0x51a   : > { %7091 = vmatmul.mubr.bf16.gmra.mxu0 %v11379_v51  ;;  %v5461_v46 = vrot.slane %v5221_v25, 6  ;;  %v5690_v19 = vrot.slane %v5225_v62, 6  ;;  %v5691_v47 = vrot.slane %v5221_v25, 7  ;;  %v5903_v36 = vrot.slane %v5225_v62, 7 }
 0x51b   : > { %5076 = vst.msk [vmem:[#allocation4 + $0x12c] sm:$0xf] %vm5060_vm1, %v17037_v15  ;;  %6056 = vst.msk [vmem:[#allocation4 + $0x128] sm:$0xf] %vm5060_vm1, %v17037_v15  ;;  %v17045_v5 = vsel %vm13416_vm15, %v5219_v60, %v5223_v56  ;;  %v5228_v29 = vor.u32 %v5227_v58, %v5223_v56  ;;  %v17048_v20 = vshll.u32 %v17037_v15, 16  ;;  %v17051_v1 = vshrl.u32 %v17037_v15, 16 }
 0x51c   : > { %20097 = vst [vmem:[#allocation33_spill] sm:$0xff] %v17045_v5  ;;  %5271 = vrot.lane.b32.xlu1 %v17045_v5, %s11757_s19  ;;  %v5462_v51 = vor.u32 %v5461_v46, %v5460_v53  ;;  %v17055_v62 = vor.u32 %v5691_v47, %v5690_v19  ;;  %v17057_v14 = vor.u32 %v5903_v36, %v5221_v25  ;;  %v11403_v56 = vld [vmem:[%s19129_s5 + $0x230] ss:$8 sps:$4 sm:$0xff]   ;;  %v11405_v58 = vld [vmem:[%s19129_s5 + $0x234] ss:$8 sps:$4 sm:$0xff]   ;;  %v20099_v19 = vld [vmem:[#allocation27_spill] sm:$0xff] }
 0x51d   : > { %v5229_v60 = vrot.slane %v5228_v29, 4  ;;  %v5233_v41 = vrot.slane %v17048_v20, 5  ;;  %v5465_v5 = vrot.slane %v17051_v1, 5  ;;  %v5466_v47 = vrot.slane %v17048_v20, 6  ;;  %7272 = vmatprep.subr.bf16.mxu0 %v11405_v58 }
 0x51e   : > { %20098 = vst [vmem:[#allocation79_spill] sm:$0xff] %v17057_v14  ;;  %v4887_v53 = vadd.s32 %v15813_v59, %v20099_v19  ;;  %v5689_v25 = vrot.slane %v16941_v61, 4  ;;  %v20100_v46 = vrot.slane %v16898_v3, 7  ;;  %v5463_v49 = vsel %vm13426_vm14, %v5459_v54, %v5462_v51  ;;  %7273 = vmatpush1.bf16.msra.mxu0 %v11403_v56 }
 0x51f   : > { %v17079_v29 = vsel %vm13416_vm15, %v5229_v60, %v5233_v41  ;;  %v17083_v18 = vor.u32 %v5466_v47, %v5465_v5  ;;  %v19311_v59 = vrot.slane %v17051_v1, 7  ;;  %v5464_v54 = vrot.slane %v5462_v51, 4 }
 0x520   : > { %v17075_v52 = vrot.slane %v20100_v46, 4  ;;  %20102 = vst [vmem:[#allocation80_spill] sm:$0xff] %v17079_v29  ;;  %5273 = vrot.lane.b32.xlu0 %v17079_v29, %s11757_s19  ;;  %5502 = vrot.lane.b32.xlu1 %v5463_v49, %s11757_s19  ;;  %v17094_v3 = vsel %vm13475_vm5, %v5689_v25, %v17055_v62  ;;  %vm4922_vm9 = vcmp.lt.s32.totalorder %v17035_v45, 300  ;;  %v5352_v49 = vsel %vm13353_vm7, %v5350_v39, %v5351_v0  ;;  %v11409_v46 = vld [vmem:[%s19129_s5 + $0x224] ss:$8 sps:$4 sm:$0xff]  }
 0x521   : > { %v20104_v5 = vrot.slane %v16869_v4, 6  ;;  %v5237_v58 = vrot.slane %v17051_v1, 4  ;;  %v17107_v60 = vrot.slane %v5903_v36, 4  ;;  %v17112_v47 = vor.u32 %v19311_v59, %v17048_v20  ;;  %5388 = vst.msk [vmem:[#allocation4 + $0x108] sm:$0xf] %vm5060_vm1, %v5352_v49  ;;  %vm17137_vm8 = vmand %vm4904_vm6, %vm4922_vm9  ;;  %7274 = vmatprep.subr.bf16.mxu0 %v11409_v46 }
 0x522   : > { %20101 = vst [vmem:[#allocation29_spill] sm:$0xff] %v17075_v52  ;;  %v5809_v51 = vrot.slane %v17023_v2, 7  ;;  %v5468_v39 = vsel %vm13426_vm14, %v5464_v54, %v17083_v18  ;;  %v5353_v19 = vrot.slane %v5351_v0, 4  ;;  %v5354_v25 = vrot.slane %v17037_v15, 5  ;;  %v11407_v2 = vld [vmem:[%s19129_s5 + $0x220] ss:$8 sps:$4 sm:$0xff]  }
 0x523   : > { %v5580_v56 = vrot.slane %v20104_v5, 4  ;;  %vm4905_vm11 = vcmp.ge.s32.totalorder %v4887_v53, 0  ;;  %vm4923_vm4 = vcmp.lt.s32.totalorder %v4887_v53, 300  ;;  %v5584_v61 = vrot.slane %v17037_v15, 6  ;;  %7275 = vmatpush1.bf16.msra.mxu0 %v11407_v2 }
 0x524   : > { %5504 = vrot.lane.b32.xlu0 %v5468_v39, %s11757_s19  ;;  %v5355_v5 = vsel %vm13353_vm7, %v5353_v19, %v5354_v25  ;;  %v5583_v39 = vrot.slane %v5581_v42, 4  ;;  %v20107_v36 = vrot.slane %v16869_v4, 7  ;;  %v5238_v29 = vor.u32 %v5237_v58, %v5233_v41  ;;  %vm4941_vm12 = vmand %vm4905_vm11, %vm4923_vm4 }
 0x525   : > { %v5582_v0 = vsel %vm13366_vm0, %v5580_v56, %v5581_v42  ;;  %v4861_v54 = vpop.f32.mrf.mxu1  ;;  %5389 = vst.msk [vmem:[#allocation4 + $0x11c] sm:$0xf] %vm5060_vm1, %v5355_v5  ;;  %v5811_v45 = vrot.slane %v5809_v51, 4  ;;  %v5812_v14 = vrot.slane %v17037_v15, 7  ;;  %v20108_v41 = vsel %vm13491_vm13, %v16407_v22, %v16412_v57 }
 0x526   : > { %5618 = vst.msk [vmem:[#allocation4 + $0x10c] sm:$0xf] %vm5060_vm1, %v5582_v0  ;;  %v5808_v56 = vrot.slane %v20107_v36, 4  ;;  %v4862_v59 = vadd.f32 %v16572_v6, %v4861_v54  ;;  %v5585_v42 = vsel %vm13366_vm0, %v5583_v39, %v5584_v61  ;;  %v5239_v22 = vrot.slane %v5238_v29, 4  ;;  %v11412_v29 = vld [vmem:[%s19129_s5 + $0x214] ss:$8 sps:$4 sm:$0xff]  }
 0x527   : > { %v4863_v52 = vpop.f32.mrf.mxu1  ;;  %5619 = vst.msk [vmem:[#allocation4 + $0x120] sm:$0xf] %vm5060_vm1, %v5585_v42  ;;  %v5356_v57 = vrot.slane %v5354_v25, 4  ;;  %7276 = vmatprep.subr.bf16.mxu0 %v11412_v29 }
 0x528   : > { %v5810_v19 = vsel %vm13373_vm10, %v5808_v56, %v5809_v51  ;;  %v4994_v4 = vsel %vm17137_vm8, %v4862_v59, 0.0  ;;  %5922 = vrot.lane.b32.xlu0 %v20108_v41, %s11757_s19  ;;  %v5813_v52 = vsel %vm13373_vm10, %v5811_v45, %v5812_v14  ;;  %v5814_v41 = vrot.slane %v5812_v14, 4 }
 0x529   : > { %5846 = vst.msk [vmem:[#allocation4 + $0x110] sm:$0xf] %vm5060_vm1, %v5810_v19  ;;  %v11034_v15 = vpack.c.bf16 %v4994_v4, %v4994_v4  ;;  %v4864_v58 = vpop.f32.mrf.mxu1  ;;  %5847 = vst.msk [vmem:[#allocation4 + $0x124] sm:$0xf] %vm5060_vm1, %v5813_v52  ;;  %v5586_v4 = vrot.slane %v5584_v61, 4 }
 0x52a   : > { %v5260_v59 = vpop.permute.xlu1 %5259  ;;  %v4865_v51 = vadd.f32 %v16572_v6, %v4864_v58  ;;  %v11410_v6 = vld [vmem:[%s19129_s5 + $0x210] ss:$8 sps:$4 sm:$0xff]  }
 0x52b   : > { %5301 = vst.msk [vmem:[#allocation4 + $0x8c] sm:$0xf] %vm5293_vm3, %v5260_v59  ;;  %v4866_v36 = vpop.f32.mrf.mxu1  ;;  %v17172_v2 = vshll.u32 %v11034_v15, 16  ;;  %v17174_v46 = vshrl.u32 %v11034_v15, 16  ;;  %v5357_v0 = vrot.slane %v11034_v15, 5  ;;  %v5587_v54 = vrot.slane %v11034_v15, 6  ;;  %7277 = vmatpush1.bf16.msra.mxu0 %v11410_v6 }
 0x52c   : > { %6057 = vst.msk [vmem:[#allocation4 + $0x13c] sm:$0xf] %vm5060_vm1, %v11034_v15  ;;  %v4995_v53 = vsel %vm4941_vm12, %v4865_v51, 0.0  ;;  %6234 = vrot.lane.b32.xlu0 %v16462_v48, %s11757_s19  ;;  %v5815_v25 = vrot.slane %v11034_v15, 7  ;;  %v20109_v51 = vrot.slane %v17051_v1, 7  ;;  %7278 = vmatprep.subr.bf16.mxu0 %v11419_v50 }
 0x52d   : > { %v11051_v49 = vpack.c.bf16 %v4995_v53, %v4995_v53  ;;  %v5243_v56 = vrot.slane %v17172_v2, 5  ;;  %v5472_v45 = vrot.slane %v17174_v46, 5  ;;  %v5473_v42 = vrot.slane %v17172_v2, 6 }
 0x52e   : > { %v5491_v5 = vpop.permute.xlu1 %5490  ;;  %v5262_v39 = vpop.permute.xlu0 %5261  ;;  %v5911_v48 = vrot.slane %v17174_v46, 7  ;;  %v6218_v19 = vrot.slane %v17174_v46, 4  ;;  %v5358_v59 = vsel %vm13353_vm7, %v5356_v57, %v5357_v0  ;;  %v17203_v61 = vrot.slane %v20109_v51, 4 }
 0x52f   : > { %5531 = vst.msk [vmem:[#allocation4 + $0x90] sm:$0xf] %vm5293_vm3, %v5491_v5  ;;  %5302 = vst.msk [vmem:[#allocation4 + $0xa0] sm:$0xf] %vm5293_vm3, %v5262_v39  ;;  %v6222_v52 = vshll.u32 %v11051_v49, 16  ;;  %v17193_v15 = vsel %vm13416_vm15, %v5239_v22, %v5243_v56  ;;  %v5474_v58 = vor.u32 %v5473_v42, %v5472_v45  ;;  %v5469_v57 = vrot.slane %v17083_v18, 4 }
 0x530   : > { %5716 = vrot.lane.b32.xlu0 %v16523_v9, %s11757_s19  ;;  %5275 = vrot.lane.b32.xlu1 %v17193_v15, %s11757_s19  ;;  %v17206_v14 = vor.u32 %v5911_v48, %v17172_v2  ;;  %v6219_v22 = vor.u32 %v6218_v19, %v5243_v56  ;;  %5390 = vst.msk [vmem:[#allocation4 + $0x130] sm:$0xf] %vm5060_vm1, %v5358_v59  ;;  %v20123_v49 = vld [vmem:[#allocation33_spill] sm:$0xff]  ;;  %v20125_v5 = vld [vmem:[#allocation74_spill] sm:$0xff]  ;;  %v5694_v39 = vrot.slane %v17055_v62, 4  ;;  %v20127_v45 = vld [vmem:[#allocation72_spill] sm:$0xff] }
 0x531   : > { %v6224_v36 = vrot.slane %v6222_v52, 5  ;;  %v5588_v9 = vsel %vm13366_vm0, %v5586_v4, %v5587_v54  ;;  %v5816_v0 = vsel %vm13373_vm10, %v5814_v41, %v5815_v25  ;;  %v5475_v18 = vsel %vm13426_vm14, %v5469_v57, %v5474_v58  ;;  %v11417_v54 = vld [vmem:[%s19129_s5 + $0x200] ss:$8 sps:$4 sm:$0xff]   ;;  %v20129_v19 = vld [vmem:[#allocation29_spill] sm:$0xff] }
 0x532   : > { %v5493_v30 = vpop.permute.xlu0 %5492  ;;  %v5913_v53 = vsel %vm13491_vm13, %v17203_v61, %v17206_v14  ;;  %v6220_v6 = vrot.slane %v6219_v22, 4  ;;  %5620 = vst.msk [vmem:[#allocation4 + $0x134] sm:$0xf] %vm5060_vm1, %v5588_v9  ;;  %5848 = vst.msk [vmem:[#allocation4 + $0x138] sm:$0xf] %vm5060_vm1, %v5816_v0  ;;  %7279 = vmatpush1.bf16.msra.mxu0 %v11417_v54  ;;  %v20128_v42 = vsel %vm13491_vm13, %v17107_v60, %v17112_v47  ;;  %v5700_v62 = vrot.slane %v17174_v46, 6 }
 0x533   : > { %5532 = vst.msk [vmem:[#allocation4 + $0xa4] sm:$0xf] %vm5293_vm3, %v5493_v30  ;;  %v11382_v25 = vld [vmem:[#allocation4 + $0x78] ss:$20 sps:$4 sm:$0xff]   ;;  %9382 = vmatprep.subr.bf16.mxu0 %v20072_v40  ;;  %v5701_v48 = vrot.slane %v17172_v2, 7  ;;  %v20130_v4 = vld [vmem:[#allocation79_spill] sm:$0xff] }
 0x534   : > { %5926 = vrot.lane.b32.xlu0 %v20110_v37, %s11757_s19  ;;  %5506 = vrot.lane.b32.xlu1 %v5475_v18, %s11757_s19  ;;  %v17232_v63 = vsel %vm13416_vm15, %v6220_v6, %v6224_v36  ;;  %v20131_v41 = vsel %vm13491_vm13, %v20129_v19, %v20130_v4  ;;  %v20132_v60 = vld [vmem:[#allocation80_spill] sm:$0xff] }
 0x535   : > { %v5702_v52 = vor.u32 %v5701_v48, %v5700_v62 }
 0x536   : > { %v11380_v29 = vld [vmem:[#allocation4 + $0x7c] ss:$20 sps:$4 sm:$0xff]  }
 0x537   : > { %7100 = vmatprep.mubr.bf16.mxu0 %v11380_v29 }
 0x538   : > { %6238 = vrot.lane.b32.xlu0 %v16602_v32, %s11757_s19  ;;  %5924 = vrot.lane.b32.xlu1 %v20111_v17, %s11757_s19  ;;  %v20114_v32 = vsel %vm13491_vm13, %v16778_v10, %v16783_v24  ;;  %v5695_v10 = vrot.slane %v17051_v1, 6  ;;  %v20122_v24 = vld [vmem:[#allocation73_spill] sm:$0xff]  ;;  %v20124_v1 = vld [vmem:[#allocation68_spill] sm:$0xff] }
 0x539   : > { %7101 = vmatmul.mubr.bf16.gmra.mxu0 %v11382_v25 }
 0x53c   : > { %5720 = vrot.lane.b32.xlu0 %v16668_v55, %s11757_s19  ;;  %6236 = vrot.lane.b32.xlu1 %v16494_v33, %s11757_s19  ;;  %v20118_v55 = vld [vmem:[#allocation71_spill] sm:$0xff] }
 0x540   : > { %5930 = vrot.lane.b32.xlu0 %v20112_v35, %s11757_s19  ;;  %5718 = vrot.lane.b32.xlu1 %v16646_v27, %s11757_s19 }
 0x544   : > { %6242 = vrot.lane.b32.xlu0 %v16728_v21, %s11757_s19  ;;  %5928 = vrot.lane.b32.xlu1 %v20113_v12, %s11757_s19  ;;  %v20119_v21 = vld [vmem:[#allocation31_spill] sm:$0xff] }
 0x548   : > { %v5264_v33 = vpop.permute.xlu1 %5263  ;;  %5724 = vrot.lane.b32.xlu0 %v16795_v7, %s11757_s19  ;;  %6240 = vrot.lane.b32.xlu1 %v16627_v28, %s11757_s19  ;;  %v20115_v28 = vld [vmem:[#allocation30_spill] sm:$0xff] }
 0x549   : > { %5303 = vst.msk [vmem:[#allocation4 + $0xb4] sm:$0xf] %vm5293_vm3, %v5264_v33  ;;  %v20116_v11 = vsel %vm13491_vm13, %v16743_v23, %v20115_v28  ;;  %v20120_v23 = vld [vmem:[#allocation32_spill] sm:$0xff] }
 0x54c   : > { %v5495_v31 = vpop.permute.xlu1 %5494  ;;  %v5266_v43 = vpop.permute.xlu0 %5265  ;;  %5934 = vrot.lane.b32.xlu0 %v20114_v32, %s11757_s19  ;;  %5722 = vrot.lane.b32.xlu1 %v16771_v26, %s11757_s19  ;;  %v20121_v26 = vsel %vm13491_vm13, %v20119_v21, %v20120_v23 }
 0x54d   : > { %5533 = vst.msk [vmem:[#allocation4 + $0xb8] sm:$0xf] %vm5293_vm3, %v5495_v31  ;;  %5304 = vst.msk [vmem:[#allocation4 + $0xc8] sm:$0xf] %vm5293_vm3, %v5266_v43 }
 0x550   : > { %v5497_v38 = vpop.permute.xlu0 %5496  ;;  %6246 = vrot.lane.b32.xlu0 %v16888_v16, %s11757_s19  ;;  %5932 = vrot.lane.b32.xlu1 %v20116_v11, %s11757_s19  ;;  %v11385_v34 = vld [vmem:[#allocation4 + $0xa0] ss:$20 sps:$4 sm:$0xff]   ;;  %v5696_v16 = vrot.slane %v17048_v20, 7  ;;  %v20126_v20 = vsel %vm13491_vm13, %v20124_v1, %v20125_v5  ;;  %v11420_v11 = vld [vmem:[#allocation4 + $0x10] ss:$20 sps:$4 sm:$0xff]  }
 0x551   : > { %5534 = vst.msk [vmem:[#allocation4 + $0xcc] sm:$0xf] %vm5293_vm3, %v5497_v38 }
 0x552   : > { %v5697_v7 = vor.u32 %v5696_v16, %v5695_v10 }
 0x554   : > { %v11383_v27 = vld [vmem:[#allocation4 + $0xa4] ss:$20 sps:$4 sm:$0xff]   ;;  %5728 = vrot.lane.b32.xlu0 %v20117_v8, %s11757_s19  ;;  %6244 = vrot.lane.b32.xlu1 %v20118_v55, %s11757_s19  ;;  %v5698_v56 = vsel %vm13475_vm5, %v5694_v39, %v5697_v7  ;;  %v5699_v47 = vrot.slane %v5697_v7, 4 }
 0x555   : > { %7110 = vmatprep.mubr.bf16.mxu0 %v11383_v27 }
 0x556   : > { %7111 = vmatmul.mubr.bf16.gmra.mxu0 %v11385_v34  ;;  %v5703_v2 = vsel %vm13475_vm5, %v5699_v47, %v5702_v52 }
 0x558   : > { %5938 = vrot.lane.b32.xlu0 %v20121_v26, %s11757_s19  ;;  %5726 = vrot.lane.b32.xlu1 %v20122_v24, %s11757_s19  ;;  %v11423_v26 = vld [vmem:[#allocation4 + $0x38] ss:$20 sps:$4 sm:$0xff]  }
 0x55c   : > { %6250 = vrot.lane.b32.xlu0 %v20123_v49, %s11757_s19  ;;  %5936 = vrot.lane.b32.xlu1 %v20126_v20, %s11757_s19 }
 0x560   : > { %5732 = vrot.lane.b32.xlu0 %v5698_v56, %s11757_s19  ;;  %6248 = vrot.lane.b32.xlu1 %v20127_v45, %s11757_s19 }
 0x564   : > { %5942 = vrot.lane.b32.xlu0 %v20128_v42, %s11757_s19  ;;  %5730 = vrot.lane.b32.xlu1 %v17094_v3, %s11757_s19 }
 0x568   : > { %6254 = vrot.lane.b32.xlu0 %v17193_v15, %s11757_s19  ;;  %5940 = vrot.lane.b32.xlu1 %v20131_v41, %s11757_s19 }
 0x56c   : > { %6252 = vrot.lane.b32.xlu1 %v20132_v60, %s11757_s19 }
 0x56f   : > { %v5268_v3 = vpop.permute.xlu1 %5267 }
 0x570   : > { %5305 = vst.msk [vmem:[#allocation4 + $0xdc] sm:$0xf] %vm5293_vm3, %v5268_v3  ;;  %5734 = vrot.lane.b32.xlu1 %v5703_v2, %s11757_s19 }
 0x573   : > { %v5499_v46 = vpop.permute.xlu1 %5498 }
 0x574   : > { %v5270_v15 = vpop.permute.xlu0 %5269  ;;  %5535 = vst.msk [vmem:[#allocation4 + $0xe0] sm:$0xf] %vm5293_vm3, %v5499_v46  ;;  %5944 = vrot.lane.b32.xlu1 %v5913_v53, %s11757_s19 }
 0x575   : > { %5306 = vst.msk [vmem:[#allocation4 + $0xf0] sm:$0xf] %vm5293_vm3, %v5270_v15 }
 0x577   : > { %v11391_v59 = vld [vmem:[#allocation4 + $0xc8] ss:$20 sps:$4 sm:$0xff]  }
 0x578   : > { %v5501_v58 = vpop.permute.xlu0 %5500  ;;  %6256 = vrot.lane.b32.xlu1 %v17232_v63, %s11757_s19 }
 0x579   : > { %5536 = vst.msk [vmem:[#allocation4 + $0xf4] sm:$0xf] %vm5293_vm3, %v5501_v58 }
 0x57b   : > { %v11386_v44 = vld [vmem:[#allocation4 + $0xcc] ss:$20 sps:$4 sm:$0xff]  }
 0x57c   : > { %7120 = vmatprep.mubr.bf16.mxu0 %v11386_v44 }
 0x57d   : > { %7121 = vmatmul.mubr.bf16.gmra.mxu0 %v11391_v59 }
 0x58e   : > { %v5272_v51 = vpop.permute.xlu1 %5271 }
 0x58f   : > { %5307 = vst.msk [vmem:[#allocation4 + $0x104] sm:$0xf] %vm5293_vm3, %v5272_v51 }
 0x592   : > { %v5503_v22 = vpop.permute.xlu1 %5502  ;;  %v5274_v36 = vpop.permute.xlu0 %5273 }
 0x593   : > { %5537 = vst.msk [vmem:[#allocation4 + $0x108] sm:$0xf] %vm5293_vm3, %v5503_v22  ;;  %5308 = vst.msk [vmem:[#allocation4 + $0x118] sm:$0xf] %vm5293_vm3, %v5274_v36 }
 0x596   : > { %v5505_v13 = vpop.permute.xlu0 %5504  ;;  %v11406_v30 = vld [vmem:[#allocation4 + $0xf0] ss:$20 sps:$4 sm:$0xff]  }
 0x597   : > { %5538 = vst.msk [vmem:[#allocation4 + $0x11c] sm:$0xf] %vm5293_vm3, %v5505_v13 }
 0x59a   : > { %v5923_v61 = vpop.permute.xlu0 %5922  ;;  %v11401_v14 = vld [vmem:[#allocation4 + $0xf4] ss:$20 sps:$4 sm:$0xff]  }
 0x59b   : > { %5966 = vst.msk [vmem:[#allocation4 + $0x5c] sm:$0xf] %vm5293_vm3, %v5923_v61  ;;  %7130 = vmatprep.mubr.bf16.mxu0 %v11401_v14 }
 0x59c   : > { %7131 = vmatmul.mubr.bf16.gmra.mxu0 %v11406_v30 }
 0x59e   : > { %v6235_v57 = vpop.permute.xlu0 %6234  ;;  %v6332_v50 = vld [vmem:[#allocation4 + $0x118] sm:$0xff] }
 0x59f   : > { %6278 = vst.msk [vmem:[#allocation4 + $0x60] sm:$0xf] %vm5293_vm3, %v6235_v57 }
 0x5a2   : > { %v5276_v9 = vpop.permute.xlu1 %5275  ;;  %v5717_v0 = vpop.permute.xlu0 %5716  ;;  %v6303_v35 = vld [vmem:[#allocation4 + $0x58] sm:$0xff] }
 0x5a3   : > { %5309 = vst.msk [vmem:[#allocation4 + $0x12c] sm:$0xf] %vm5293_vm3, %v5276_v9  ;;  %5758 = vst.msk [vmem:[#allocation4 + $0x80] sm:$0xf] %vm5293_vm3, %v5717_v0 }
 0x5a6   : > { %v5507_v53 = vpop.permute.xlu1 %5506  ;;  %v5927_v6 = vpop.permute.xlu0 %5926 }
 0x5a7   : > { %5539 = vst.msk [vmem:[#allocation4 + $0x130] sm:$0xf] %vm5293_vm3, %v5507_v53  ;;  %5968 = vst.msk [vmem:[#allocation4 + $0x84] sm:$0xf] %vm5293_vm3, %v5927_v6 }
 0x5aa   : > { %v5925_v18 = vpop.permute.xlu1 %5924  ;;  %v6239_v37 = vpop.permute.xlu0 %6238 }
 0x5ab   : > { %5967 = vst.msk [vmem:[#allocation4 + $0x70] sm:$0xf] %vm5293_vm3, %v5925_v18  ;;  %6280 = vst.msk [vmem:[#allocation4 + $0x88] sm:$0xf] %vm5293_vm3, %v6239_v37  ;;  %v7072_v37 = vpop.f32.mrf.mxu0 }
 0x5ae   : > { %v6237_v63 = vpop.permute.xlu1 %6236  ;;  %v5721_v54 = vpop.permute.xlu0 %5720  ;;  %v6335_v29 = vld [vmem:[#allocation4 + $0x12c] sm:$0xff]  ;;  %v6309_v8 = vld [vmem:[#allocation4 + $0x80] sm:$0xff] }
 0x5af   : > { %v11413_v25 = vld [vmem:[#allocation4 + $0x11c] ss:$20 sps:$4 sm:$0xff]   ;;  %6279 = vst.msk [vmem:[#allocation4 + $0x74] sm:$0xf] %vm5293_vm3, %v6237_v63  ;;  %5760 = vst.msk [vmem:[#allocation4 + $0xa8] sm:$0xf] %vm5293_vm3, %v5721_v54  ;;  %v10721_v17 = vcombine.low %v6332_v50, %v6335_v29  ;;  %v7074_v63 = vpop.f32.mrf.mxu0 }
 0x5b0   : > { %7140 = vmatprep.mubr.bf16.mxu0 %v11413_v25 }
 0x5b1   : > { %7141 = vmatmul.mubr.bf16.gmra.mxu0 %v10721_v17  ;;  %v7076_v54 = vpop.f32.mrf.mxu0 }
 0x5b2   : > { %v5719_v12 = vpop.permute.xlu1 %5718  ;;  %v5931_v33 = vpop.permute.xlu0 %5930  ;;  %v6306_v31 = vld [vmem:[#allocation4 + $0x6c] sm:$0xff]  ;;  %7296 = vmatprep.mubr.bf16.mxu0 %v20072_v40 }
 0x5b3   : > { %v11415_v43 = vld [vmem:[#allocation4 + $0x5c] ss:$20 sps:$4 sm:$0xff]   ;;  %5759 = vst.msk [vmem:[#allocation4 + $0x94] sm:$0xf] %vm5293_vm3, %v5719_v12  ;;  %5970 = vst.msk [vmem:[#allocation4 + $0xac] sm:$0xf] %vm5293_vm3, %v5931_v33  ;;  %v10698_v32 = vcombine.low %v6303_v35, %v6306_v31  ;;  %v7078_v50 = vpop.f32.mrf.mxu0 }
 0x5b4   : > { %7203 = vmatprep.mubr.bf16.mxu1 %v11415_v43 }
 0x5b5   : > { %7204 = vmatmul.mubr.bf16.gmra.mxu1 %v10698_v32 }
 0x5b6   : > { %v5929_v38 = vpop.permute.xlu1 %5928  ;;  %v6243_v28 = vpop.permute.xlu0 %6242  ;;  %v11424_v5 = vld [vmem:[#allocation4 + $0x60] ss:$20 sps:$4 sm:$0xff]  }
 0x5b7   : > { %5969 = vst.msk [vmem:[#allocation4 + $0x98] sm:$0xf] %vm5293_vm3, %v5929_v38  ;;  %6282 = vst.msk [vmem:[#allocation4 + $0xb0] sm:$0xf] %vm5293_vm3, %v6243_v28 }
 0x5b9   : > { %7297 = vmatmul.mubr.bf16.vlgmr.msra.gmra.mxu0 %v11420_v11 }
 0x5ba   : > { %v6241_v27 = vpop.permute.xlu1 %6240  ;;  %v5725_v34 = vpop.permute.xlu0 %5724  ;;  %7306 = vmatprep.mubr.bf16.mxu0 %v20072_v40  ;;  %v6315_v20 = vld [vmem:[#allocation4 + $0xa8] sm:$0xff] }
 0x5bb   : > { %6281 = vst.msk [vmem:[#allocation4 + $0x9c] sm:$0xf] %vm5293_vm3, %v6241_v27  ;;  %5762 = vst.msk [vmem:[#allocation4 + $0xd0] sm:$0xf] %vm5293_vm3, %v5725_v34 }
 0x5be   : > { %v5723_v55 = vpop.permute.xlu1 %5722  ;;  %v5935_v10 = vpop.permute.xlu0 %5934  ;;  %v6312_v16 = vld [vmem:[#allocation4 + $0x94] sm:$0xff] }
 0x5bf   : > { %v11421_v21 = vld [vmem:[#allocation4 + $0x84] ss:$20 sps:$4 sm:$0xff]   ;;  %5761 = vst.msk [vmem:[#allocation4 + $0xbc] sm:$0xf] %vm5293_vm3, %v5723_v55  ;;  %5972 = vst.msk [vmem:[#allocation4 + $0xd4] sm:$0xf] %vm5293_vm3, %v5935_v10  ;;  %v10703_v23 = vcombine.low %v6309_v8, %v6312_v16  ;;  %v7082_v29 = vpop.f32.mrf.mxu0  ;;  %v7185_v16 = vpop.f32.mrf.mxu1 }
 0x5c0   : > { %7213 = vmatprep.mubr.bf16.mxu1 %v11421_v21 }
 0x5c1   : > { %7214 = vmatmul.mubr.bf16.gmra.mxu1 %v10703_v23  ;;  %7307 = vmatmul.mubr.bf16.gmra.mxu0 %v11423_v26  ;;  %v7084_v25 = vpop.f32.mrf.mxu0  ;;  %v7187_v23 = vpop.f32.mrf.mxu1 }
 0x5c2   : > { %v5933_v24 = vpop.permute.xlu1 %5932  ;;  %v6247_v7 = vpop.permute.xlu0 %6246  ;;  %7316 = vmatprep.mubr.bf16.mxu0 %v20072_v40  ;;  %v11427_v4 = vld [vmem:[#allocation4 + $0x88] ss:$20 sps:$4 sm:$0xff]  }
 0x5c3   : > { %5971 = vst.msk [vmem:[#allocation4 + $0xc0] sm:$0xf] %vm5293_vm3, %v5933_v24  ;;  %6284 = vst.msk [vmem:[#allocation4 + $0xd8] sm:$0xf] %vm5293_vm3, %v6247_v7  ;;  %v17404_v17 = vpop.f32.mrf.mxu0  ;;  %v7189_v24 = vpop.f32.mrf.mxu1 }
 0x5c5   : > { %v17406_v35 = vpop.f32.mrf.mxu0 }
 0x5c6   : > { %v6245_v49 = vpop.permute.xlu1 %6244  ;;  %v5729_v1 = vpop.permute.xlu0 %5728  ;;  %v6321_v60 = vld [vmem:[#allocation4 + $0xd0] sm:$0xff] }
 0x5c7   : > { %6283 = vst.msk [vmem:[#allocation4 + $0xc4] sm:$0xf] %vm5293_vm3, %v6245_v49  ;;  %5764 = vst.msk [vmem:[#allocation4 + $0xf8] sm:$0xf] %vm5293_vm3, %v5729_v1  ;;  %v7191_v1 = vpop.f32.mrf.mxu1 }
 0x5c9   : > { %7317 = vmatmul.mubr.bf16.gmra.mxu0 %v11424_v5  ;;  %v7195_v5 = vpop.f32.mrf.mxu1 }
 0x5ca   : > { %v5727_v39 = vpop.permute.xlu1 %5726  ;;  %v5939_v56 = vpop.permute.xlu0 %5938  ;;  %v6318_v45 = vld [vmem:[#allocation4 + $0xbc] sm:$0xff]  ;;  %7326 = vmatprep.mubr.bf16.mxu0 %v20072_v40 }
 0x5cb   : > { %v11425_v42 = vld [vmem:[#allocation4 + $0xac] ss:$20 sps:$4 sm:$0xff]   ;;  %5763 = vst.msk [vmem:[#allocation4 + $0xe4] sm:$0xf] %vm5293_vm3, %v5727_v39  ;;  %5974 = vst.msk [vmem:[#allocation4 + $0xfc] sm:$0xf] %vm5293_vm3, %v5939_v56  ;;  %v10708_v62 = vcombine.low %v6315_v20, %v6318_v45  ;;  %v7197_v39 = vpop.f32.mrf.mxu1 }
 0x5cc   : > { %7223 = vmatprep.mubr.bf16.mxu1 %v11425_v42  ;;  %v20133_v45 = vld [vmem:[#allocation11_spill] sm:$0xff] }
 0x5cd   : > { %7224 = vmatmul.mubr.bf16.gmra.mxu1 %v10708_v62  ;;  %v6422_v42 = vsub.s32 0, %v20133_v45  ;;  %v6418_v62 = vld [vmem:[%s19130_s6] sm:$0x3] }
 0x5ce   : > { %v5937_v48 = vpop.permute.xlu1 %5936  ;;  %v6251_v19 = vpop.permute.xlu0 %6250  ;;  %v11430_v58 = vld [vmem:[#allocation4 + $0xb0] ss:$20 sps:$4 sm:$0xff]  }
 0x5cf   : > { %5973 = vst.msk [vmem:[#allocation4 + $0xe8] sm:$0xf] %vm5293_vm3, %v5937_v48  ;;  %6286 = vst.msk [vmem:[#allocation4 + $0x100] sm:$0xf] %vm5293_vm3, %v6251_v19  ;;  %v7199_v48 = vpop.f32.mrf.mxu1 }
 0x5d1   : > { %7327 = vmatmul.mubr.bf16.gmra.mxu0 %v11427_v4  ;;  %v6426_v4 = vsub.s32 1, %v20133_v45 }
 0x5d2   : > { %v6249_v41 = vpop.permute.xlu1 %6248  ;;  %v5733_v52 = vpop.permute.xlu0 %5732  ;;  %7336 = vmatprep.mubr.bf16.mxu0 %v20072_v40  ;;  %v6327_v36 = vld [vmem:[#allocation4 + $0xf8] sm:$0xff] }
 0x5d3   : > { %6285 = vst.msk [vmem:[#allocation4 + $0xec] sm:$0xf] %vm5293_vm3, %v6249_v41  ;;  %5766 = vst.msk [vmem:[#allocation4 + $0x120] sm:$0xf] %vm5293_vm3, %v5733_v52  ;;  %v17455_v52 = vrot.slane %v6418_v62, %v6422_v42 }
 0x5d6   : > { %v5731_v47 = vpop.permute.xlu1 %5730  ;;  %v5943_v3 = vpop.permute.xlu0 %5942  ;;  %v6324_v2 = vld [vmem:[#allocation4 + $0xe4] sm:$0xff] }
 0x5d7   : > { %v11428_v46 = vld [vmem:[#allocation4 + $0xd4] ss:$20 sps:$4 sm:$0xff]   ;;  %5765 = vst.msk [vmem:[#allocation4 + $0x10c] sm:$0xf] %vm5293_vm3, %v5731_v47  ;;  %5976 = vst.msk [vmem:[#allocation4 + $0x124] sm:$0xf] %vm5293_vm3, %v5943_v3  ;;  %v10713_v15 = vcombine.low %v6321_v60, %v6324_v2  ;;  %v7201_v60 = vpop.f32.mrf.mxu1  ;;  %v17459_v3 = vrot.slane %v6418_v62, %v6426_v4 }
 0x5d8   : > { %7233 = vmatprep.mubr.bf16.mxu1 %v11428_v46 }
 0x5d9   : > { %7234 = vmatmul.mubr.bf16.gmra.mxu1 %v10713_v15  ;;  %7337 = vmatmul.mubr.bf16.gmra.mxu0 %v11430_v58  ;;  %v7073_v15 = vadd.f32 %v7072_v37, %v17455_v52  ;;  %v7085_v45 = vadd.f32 %v7084_v25, %v17459_v3 }
 0x5da   : > { %v5941_v44 = vpop.permute.xlu1 %5940  ;;  %v6255_v59 = vpop.permute.xlu0 %6254  ;;  %7346 = vmatprep.mubr.bf16.mxu0 %v20072_v40  ;;  %v11431_v22 = vld [vmem:[#allocation4 + $0xd8] ss:$20 sps:$4 sm:$0xff]  }
 0x5db   : > { %5975 = vst.msk [vmem:[#allocation4 + $0x110] sm:$0xf] %vm5293_vm3, %v5941_v44  ;;  %6288 = vst.msk [vmem:[#allocation4 + $0x128] sm:$0xf] %vm5293_vm3, %v6255_v59  ;;  %v17408_v12 = vpop.f32.mrf.mxu0  ;;  %v7075_v59 = vadd.f32 %v7074_v63, %v17459_v3 }
 0x5dd   : > { %v17410_v33 = vpop.f32.mrf.mxu0 }
 0x5de   : > { %v6253_v51 = vpop.permute.xlu1 %6252 }
 0x5df   : > { %6287 = vst.msk [vmem:[#allocation4 + $0x114] sm:$0xf] %vm5293_vm3, %v6253_v51  ;;  %v17412_v31 = vpop.f32.mrf.mxu0  ;;  %v7186_v51 = vadd.f32 %v7185_v16, %v7073_v15 }
 0x5e1   : > { %7347 = vmatmul.mubr.bf16.gmra.mxu0 %v11431_v22  ;;  %v17414_v43 = vpop.f32.mrf.mxu0 }
 0x5e2   : > { %v5735_v13 = vpop.permute.xlu1 %5734  ;;  %v6330_v61 = vld [vmem:[#allocation4 + $0x10c] sm:$0xff]  ;;  %7356 = vmatprep.mubr.bf16.mxu0 %v20072_v40 }
 0x5e3   : > { %v11432_v14 = vld [vmem:[#allocation4 + $0xfc] ss:$20 sps:$4 sm:$0xff]   ;;  %5767 = vst.msk [vmem:[#allocation4 + $0x134] sm:$0xf] %vm5293_vm3, %v5735_v13  ;;  %v10718_v30 = vcombine.low %v6327_v36, %v6330_v61  ;;  %v7077_v36 = vadd.f32 %v7076_v54, %v17455_v52  ;;  %v7188_v13 = vadd.f32 %v7187_v23, %v7075_v59 }
 0x5e4   : > { %7243 = vmatprep.mubr.bf16.mxu1 %v11432_v14 }
 0x5e5   : > { %7244 = vmatmul.mubr.bf16.gmra.mxu1 %v10718_v30 }
 0x5e6   : > { %v5945_v57 = vpop.permute.xlu1 %5944  ;;  %v11434_v9 = vld [vmem:[#allocation4 + $0x100] ss:$20 sps:$4 sm:$0xff]  }
 0x5e7   : > { %5977 = vst.msk [vmem:[#allocation4 + $0x138] sm:$0xf] %vm5293_vm3, %v5945_v57  ;;  %v7079_v57 = vadd.f32 %v7078_v50, %v17459_v3  ;;  %v7087_v50 = vadd.f32 %v17404_v17, %v17455_v52 }
 0x5e9   : > { %7357 = vmatmul.mubr.bf16.gmra.mxu0 %v11434_v9  ;;  %v7190_v9 = vadd.f32 %v7189_v24, %v7077_v36  ;;  %v7198_v24 = vadd.f32 %v7197_v39, %v7085_v45  ;;  %v7200_v59 = vadd.f32 %v7199_v48, %v7087_v50  ;;  %v7095_v39 = vadd.f32 %v17410_v33, %v17459_v3 }
 0x5ea   : > { %v6257_v0 = vpop.permute.xlu1 %6256  ;;  %7366 = vmatprep.mubr.bf16.mxu0 %v20072_v40  ;;  %v11437_v6 = vld [vmem:[#allocation4 + $0x120] ss:$20 sps:$4 sm:$0xff]  }
 0x5eb   : > { %6289 = vst.msk [vmem:[#allocation4 + $0x13c] sm:$0xf] %vm5293_vm3, %v6257_v0 }
 0x5ee   : > { %v11435_v53 = vld [vmem:[#allocation4 + $0x124] ss:$20 sps:$4 sm:$0xff]  }
 0x5ef   : > { %7253 = vmatprep.mubr.bf16.mxu1 %v11435_v53 }
 0x5f0   : > { %7254 = vmatmul.mubr.bf16.gmra.mxu1 %v11437_v6  ;;  %v7192_v6 = vadd.f32 %v7191_v1, %v7079_v57 }
 0x5f2   : > { %v11438_v18 = vld [vmem:[#allocation4 + $0x128] ss:$20 sps:$4 sm:$0xff]  }
 0x5f3   : > { %7367 = vmatmul.mubr.bf16.gmra.mxu0 %v11438_v18  ;;  %v7083_v18 = vadd.f32 %v7082_v29, %v17455_v52  ;;  %v7089_v29 = vadd.f32 %v17406_v35, %v17459_v3  ;;  %v7097_v35 = vadd.f32 %v17412_v31, %v17455_v52 }
 0x5f5   : > { %v7196_v54 = vadd.f32 %v7195_v5, %v7083_v18  ;;  %v7202_v5 = vadd.f32 %v7201_v60, %v7089_v29 }
 0x5f9   : > { %v17416_v32 = vpop.f32.mrf.mxu0 }
 0x5fb   : > { %v17418_v38 = vpop.f32.mrf.mxu0 }
 0x5fc   : > { %v7105_v45 = vadd.f32 %v17418_v38, %v17459_v3 }
 0x5fd   : > { %v17420_v28 = vpop.f32.mrf.mxu0 }
 0x5ff   : > { %v17422_v11 = vpop.f32.mrf.mxu0 }
 0x616   : > { %v17424_v27 = vpop.f32.mrf.mxu0 }
 0x617   : > { %v7113_v38 = vadd.f32 %v17424_v27, %v17455_v52 }
 0x618   : > { %v17426_v34 = vpop.f32.mrf.mxu0 }
 0x61a   : > { %v17428_v8 = vpop.f32.mrf.mxu0 }
 0x61c   : > { %v17430_v55 = vpop.f32.mrf.mxu0 }
 0x63d   : > { %v17432_v10 = vpop.f32.mrf.mxu0 }
 0x63f   : > { %v17434_v21 = vpop.f32.mrf.mxu0 }
 0x641   : > { %v17436_v26 = vpop.f32.mrf.mxu0 }
 0x643   : > { %v17438_v7 = vpop.f32.mrf.mxu0 }
 0x65c   : > { %v17440_v49 = vpop.f32.mrf.mxu0 }
 0x65e   : > { %v17442_v20 = vpop.f32.mrf.mxu0 }
 0x660   : > { %v17444_v56 = vpop.f32.mrf.mxu0 }
 0x662   : > { %v17450_v19 = vpop.f32.mrf.mxu0 }
 0x671   : > { %v17453_v41 = vpop.f32.mrf.mxu0 }
 0x673   : > { %v17457_v47 = vpop.f32.mrf.mxu0 }
 0x675   : > { %v17461_v2 = vpop.f32.mrf.mxu0  ;;  %v7205_v46 = vpop.f32.mrf.mxu1 }
 0x677   : > { %v17464_v58 = vpop.f32.mrf.mxu0  ;;  %v7207_v44 = vpop.f32.mrf.mxu1 }
 0x678   : > { %v7208_v48 = vadd.f32 %v7207_v44, %v7095_v39 }
 0x679   : > { %v7298_v22 = vpop.f32.mrf.mxu0  ;;  %v7209_v14 = vpop.f32.mrf.mxu1 }
 0x67a   : > { %v7299_v61 = vadd.f32 %v7298_v22, %v7186_v51  ;;  %v7093_v22 = vadd.f32 %v17408_v12, %v17455_v52  ;;  %v7099_v12 = vadd.f32 %v17414_v43, %v17459_v3 }
 0x67b   : > { %v7300_v30 = vpop.f32.mrf.mxu0  ;;  %v7211_v63 = vpop.f32.mrf.mxu1 }
 0x67c   : > { %v7301_v0 = vadd.f32 %v7300_v30, %v7188_v13  ;;  %7377 = vxpose.xlu0.b32.start [1/16] %v7299_v61, 128  ;;  %v7206_v61 = vadd.f32 %v7205_v46, %v7093_v22  ;;  %v7103_v46 = vadd.f32 %v17416_v32, %v17455_v52 }
 0x67d   : > { %v7302_v53 = vpop.f32.mrf.mxu0 }
 0x67e   : > { %v7303_v37 = vadd.f32 %v7302_v53, %v7190_v9  ;;  %7409 = vxpose.xlu1.b32.start [1/16] %v7301_v0, 128  ;;  %v7210_v53 = vadd.f32 %v7209_v14, %v7097_v35  ;;  %v7107_v14 = vadd.f32 %v17420_v28, %v17455_v52  ;;  %v7123_v35 = vadd.f32 %v17432_v10, %v17455_v52 }
 0x67f   : > { %v7304_v16 = vpop.f32.mrf.mxu0 }
 0x680   : > { %v7305_v23 = vadd.f32 %v7304_v16, %v7192_v6  ;;  %7378 = vxpose.xlu0.b32.cont [2/16] %v7303_v37, 128  ;;  %v7212_v37 = vadd.f32 %v7211_v63, %v7099_v12  ;;  %v7109_v63 = vadd.f32 %v17422_v11, %v17459_v3 }
 0x681   : > { %v7215_v42 = vpop.f32.mrf.mxu1  ;;  %v7308_v62 = vpop.f32.mrf.mxu0 }
 0x682   : > { %v7309_v4 = vadd.f32 %v7308_v62, %v7196_v54  ;;  %7410 = vxpose.xlu1.b32.cont [2/16] %v7305_v23, 128  ;;  %v7216_v54 = vadd.f32 %v7215_v42, %v7103_v46 }
 0x683   : > { %v7217_v1 = vpop.f32.mrf.mxu1  ;;  %v7310_v15 = vpop.f32.mrf.mxu0 }
 0x684   : > { %v7311_v51 = vadd.f32 %v7310_v15, %v7198_v24  ;;  %7379 = vxpose.xlu0.b32.cont [3/16] %v7309_v4, 128  ;;  %v7218_v62 = vadd.f32 %v7217_v1, %v7105_v45  ;;  %v7115_v1 = vadd.f32 %v17426_v34, %v17459_v3  ;;  %v7133_v45 = vadd.f32 %v17440_v49, %v17455_v52 }
 0x685   : > { %v7312_v25 = vpop.f32.mrf.mxu0  ;;  %v7219_v13 = vpop.f32.mrf.mxu1 }
 0x686   : > { %v7313_v36 = vadd.f32 %v7312_v25, %v7200_v59  ;;  %7411 = vxpose.xlu1.b32.cont [3/16] %v7311_v51, 128  ;;  %v7220_v4 = vadd.f32 %v7219_v13, %v7107_v14  ;;  %v7135_v14 = vadd.f32 %v17442_v20, %v17459_v3 }
 0x687   : > { %v7314_v17 = vpop.f32.mrf.mxu0  ;;  %v7221_v60 = vpop.f32.mrf.mxu1 }
 0x688   : > { %v7315_v30 = vadd.f32 %v7314_v17, %v7202_v5  ;;  %7380 = vxpose.xlu0.b32.cont [4/16] %v7313_v36, 128  ;;  %v7222_v42 = vadd.f32 %v7221_v60, %v7109_v63  ;;  %v7117_v36 = vadd.f32 %v17428_v8, %v17455_v52 }
 0x689   : > { %v7318_v57 = vpop.f32.mrf.mxu0 }
 0x68a   : > { %v7319_v9 = vadd.f32 %v7318_v57, %v7206_v61  ;;  %7412 = vxpose.xlu1.b32.cont [4/16] %v7315_v30, 128  ;;  %v7119_v61 = vadd.f32 %v17430_v55, %v17459_v3  ;;  %v7127_v55 = vadd.f32 %v17436_v26, %v17455_v52 }
 0x68b   : > { %v7320_v0 = vpop.f32.mrf.mxu0 }
 0x68c   : > { %v7321_v6 = vadd.f32 %v7320_v0, %v7208_v48  ;;  %7381 = vxpose.xlu0.b32.cont [5/16] %v7319_v9, 128  ;;  %v7125_v0 = vadd.f32 %v17434_v21, %v17459_v3 }
 0x68d   : > { %v7225_v18 = vpop.f32.mrf.mxu1  ;;  %v7322_v33 = vpop.f32.mrf.mxu0 }
 0x68e   : > { %v7323_v16 = vadd.f32 %v7322_v33, %v7210_v53  ;;  %7413 = vxpose.xlu1.b32.cont [5/16] %v7321_v6, 128  ;;  %v7226_v25 = vadd.f32 %v7225_v18, %v7113_v38 }
 0x68f   : > { %v7227_v31 = vpop.f32.mrf.mxu1  ;;  %v7324_v44 = vpop.f32.mrf.mxu0 }
 0x690   : > { %v7325_v23 = vadd.f32 %v7324_v44, %v7212_v37  ;;  %7382 = vxpose.xlu0.b32.cont [6/16] %v7323_v16, 128  ;;  %v7228_v13 = vadd.f32 %v7227_v31, %v7115_v1  ;;  %v7129_v37 = vadd.f32 %v17438_v7, %v17459_v3  ;;  %v7143_v1 = vadd.f32 %v17453_v41, %v17455_v52 }
 0x691   : > { %v7328_v43 = vpop.f32.mrf.mxu0  ;;  %v7229_v24 = vpop.f32.mrf.mxu1 }
 0x692   : > { %v7329_v50 = vadd.f32 %v7328_v43, %v7216_v54  ;;  %7414 = vxpose.xlu1.b32.cont [6/16] %v7325_v23, 128  ;;  %v7230_v30 = vadd.f32 %v7229_v24, %v7117_v36 }
 0x693   : > { %v7330_v32 = vpop.f32.mrf.mxu0  ;;  %v7231_v51 = vpop.f32.mrf.mxu1 }
 0x694   : > { %v7331_v15 = vadd.f32 %v7330_v32, %v7218_v62  ;;  %7383 = vxpose.xlu0.b32.cont [7/16] %v7329_v50, 128  ;;  %v7232_v48 = vadd.f32 %v7231_v51, %v7119_v61  ;;  %v7137_v32 = vadd.f32 %v17444_v56, %v17455_v52 }
 0x695   : > { %v7332_v29 = vpop.f32.mrf.mxu0 }
 0x696   : > { %v7333_v59 = vadd.f32 %v7332_v29, %v7220_v4  ;;  %7415 = vxpose.xlu1.b32.cont [7/16] %v7331_v15, 128  ;;  %v7139_v29 = vadd.f32 %v17450_v19, %v17459_v3 }
 0x697   : > { %v7334_v28 = vpop.f32.mrf.mxu0 }
 0x698   : > { %v7335_v5 = vadd.f32 %v7334_v28, %v7222_v42  ;;  %7384 = vxpose.xlu0.b32.cont [8/16] %v7333_v59, 128 }
 0x699   : > { %v7235_v22 = vpop.f32.mrf.mxu1  ;;  %v7338_v11 = vpop.f32.mrf.mxu0 }
 0x69a   : > { %v7339_v17 = vadd.f32 %v7338_v11, %v7226_v25  ;;  %7416 = vxpose.xlu1.b32.cont [8/16] %v7335_v5, 128  ;;  %v7236_v12 = vadd.f32 %v7235_v22, %v7123_v35  ;;  %v7145_v5 = vadd.f32 %v17457_v47, %v17459_v3  ;;  %v7147_v11 = vadd.f32 %v17461_v2, %v17455_v52  ;;  %v7523_v52 = vld [vmem:[%s19132_s8 + $0x8] sm:$0xff] }
 0x69b   : > { %v7237_v27 = vpop.f32.mrf.mxu1  ;;  %v7340_v39 = vpop.f32.mrf.mxu0  ;;  %v7527_v2 = vld [vmem:[%s19132_s8 + $0x28] sm:$0xff] }
 0x69c   : > { %v7341_v57 = vadd.f32 %v7340_v39, %v7228_v13  ;;  %7385 = vxpose.xlu0.b32.cont [9/16] %v7339_v17, 128  ;;  %v7238_v18 = vadd.f32 %v7237_v27, %v7125_v0  ;;  %v7149_v39 = vadd.f32 %v17464_v58, %v17459_v3  ;;  %v7525_v3 = vld [vmem:[%s19132_s8 + $0x18] sm:$0xff]  ;;  %v7522_v58 = vld [vmem:[%s19132_s8] sm:$0xff]  ;;  %v7531_v0 = vld [vmem:[%s19132_s8 + $0x48] sm:$0xff] }
 0x69d   : > { %v7342_v34 = vpop.f32.mrf.mxu0  ;;  %v7239_v60 = vpop.f32.mrf.mxu1 }
 0x69e   : > { %v7343_v9 = vadd.f32 %v7342_v34, %v7230_v30  ;;  %7417 = vxpose.xlu1.b32.cont [9/16] %v7341_v57, 128  ;;  %v7240_v16 = vadd.f32 %v7239_v60, %v7127_v55  ;;  %v7529_v60 = vld [vmem:[%s19132_s8 + $0x38] sm:$0xff]  ;;  %v7535_v55 = vld [vmem:[%s19132_s8 + $0x68] sm:$0xff] }
 0x69f   : > { %v7344_v8 = vpop.f32.mrf.mxu0  ;;  %v7241_v46 = vpop.f32.mrf.mxu1 }
 0x6a0   : > { %v7345_v53 = vadd.f32 %v7344_v8, %v7232_v48  ;;  %7386 = vxpose.xlu0.b32.cont [10/16] %v7343_v9, 128  ;;  %v7242_v54 = vadd.f32 %v7241_v46, %v7129_v37  ;;  %v7524_v8 = vld [vmem:[%s19132_s8 + $0x10] sm:$0xff]  ;;  %v7539_v37 = vld [vmem:[%s19132_s8 + $0x88] sm:$0xff] }
 0x6a1   : > { %v7348_v6 = vpop.f32.mrf.mxu0  ;;  %v7532_v46 = vld [vmem:[%s19132_s8 + $0x50] sm:$0xff] }
 0x6a2   : > { %v7349_v33 = vadd.f32 %v7348_v6, %v7236_v12  ;;  %7418 = vxpose.xlu1.b32.cont [10/16] %v7345_v53, 128  ;;  %v7526_v12 = vld [vmem:[%s19132_s8 + $0x20] sm:$0xff]  ;;  %v7533_v53 = vld [vmem:[%s19132_s8 + $0x58] sm:$0xff]  ;;  %v7528_v6 = vld [vmem:[%s19132_s8 + $0x30] sm:$0xff] }
 0x6a3   : > { %v7350_v10 = vpop.f32.mrf.mxu0 }
 0x6a4   : > { %v7351_v31 = vadd.f32 %v7350_v10, %v7238_v18  ;;  %7387 = vxpose.xlu0.b32.cont [11/16] %v7349_v33, 128  ;;  %v7530_v18 = vld [vmem:[%s19132_s8 + $0x40] sm:$0xff]  ;;  %v7537_v33 = vld [vmem:[%s19132_s8 + $0x78] sm:$0xff] }
 0x6a5   : > { %v7245_v44 = vpop.f32.mrf.mxu1  ;;  %v7352_v21 = vpop.f32.mrf.mxu0  ;;  %v11441_v10 = vld [vmem:[%s19131_s7 + $0x4] ss:$8 sps:$4 sm:$0xff]  }
 0x6a6   : > { %v7353_v23 = vadd.f32 %v7352_v21, %v7240_v16  ;;  %7419 = vxpose.xlu1.b32.cont [11/16] %v7351_v31, 128  ;;  %v7246_v62 = vadd.f32 %v7245_v44, %v7133_v45  ;;  %v11444_v16 = vld [vmem:[%s19133_s9 + $0x4] ss:$8 sps:$4 sm:$0xff]   ;;  %8271 = vmatprep.mubr.bf16.mxu1 %v11441_v10  ;;  %v7541_v21 = vld [vmem:[%s19132_s8 + $0x98] sm:$0xff]  ;;  %v7536_v45 = vld [vmem:[%s19132_s8 + $0x70] sm:$0xff] }
 0x6a7   : > { %v7247_v26 = vpop.f32.mrf.mxu1  ;;  %v7354_v43 = vpop.f32.mrf.mxu0  ;;  %v7534_v31 = vld [vmem:[%s19132_s8 + $0x60] sm:$0xff]  ;;  %9414 = vmatprep.mubr.bf16.mxu0 %v11444_v16  ;;  %v7573_v16 = vld [vmem:[%s19132_s8 + $0x198] sm:$0xff] }
 0x6a8   : > { %v7355_v50 = vadd.f32 %v7354_v43, %v7242_v54  ;;  %7388 = vxpose.xlu0.b32.cont [12/16] %v7353_v23, 128  ;;  %v7248_v63 = vadd.f32 %v7247_v26, %v7135_v14  ;;  %v7543_v26 = vld [vmem:[%s19132_s8 + $0xa8] sm:$0xff]  ;;  %v7538_v43 = vld [vmem:[%s19132_s8 + $0x80] sm:$0xff] }
 0x6a9   : > { %v7249_v7 = vpop.f32.mrf.mxu1  ;;  %v7358_v24 = vpop.f32.mrf.mxu0  ;;  %v7566_v10 = vld [vmem:[%s19132_s8 + $0x160] sm:$0xff] }
 0x6aa   : > { %v7359_v4 = vadd.f32 %v7358_v24, %v7246_v62  ;;  %7420 = vxpose.xlu1.b32.cont [12/16] %v7355_v50, 128  ;;  %v7250_v38 = vadd.f32 %v7249_v7, %v7137_v32  ;;  %v7545_v50 = vld [vmem:[%s19132_s8 + $0xb8] sm:$0xff]  ;;  %v7540_v7 = vld [vmem:[%s19132_s8 + $0x90] sm:$0xff] }
 0x6ab   : > { %v7251_v49 = vpop.f32.mrf.mxu1  ;;  %v7360_v15 = vpop.f32.mrf.mxu0 }
 0x6ac   : > { %v7361_v42 = vadd.f32 %v7360_v15, %v7248_v63  ;;  %7389 = vxpose.xlu0.b32.cont [13/16] %v7359_v4, 128  ;;  %v7252_v59 = vadd.f32 %v7251_v49, %v7139_v29  ;;  %v7547_v63 = vld [vmem:[%s19132_s8 + $0xc8] sm:$0xff]  ;;  %v7542_v4 = vld [vmem:[%s19132_s8 + $0xa0] sm:$0xff]  ;;  %v7549_v15 = vld [vmem:[%s19132_s8 + $0xd8] sm:$0xff] }
 0x6ad   : > { %v7362_v20 = vpop.f32.mrf.mxu0  ;;  %v7544_v29 = vld [vmem:[%s19132_s8 + $0xb0] sm:$0xff] }
 0x6ae   : > { %v7363_v51 = vadd.f32 %v7362_v20, %v7250_v38  ;;  %7421 = vxpose.xlu1.b32.cont [13/16] %v7361_v42, 128  ;;  %v7551_v20 = vld [vmem:[%s19132_s8 + $0xe8] sm:$0xff] }
 0x6af   : > { %v7364_v28 = vpop.f32.mrf.mxu0 }
 0x6b0   : > { %v7365_v56 = vadd.f32 %v7364_v28, %v7252_v59  ;;  %7390 = vxpose.xlu0.b32.cont [14/16] %v7363_v51, 128  ;;  %v7255_v25 = vpop.f32.mrf.mxu1  ;;  %v7546_v59 = vld [vmem:[%s19132_s8 + $0xc0] sm:$0xff] }
 0x6b1   : > { %v7256_v22 = vadd.f32 %v7255_v25, %v7143_v1  ;;  %v7553_v1 = vld [vmem:[%s19132_s8 + $0xf8] sm:$0xff] }
 0x6b2   : > { %7422 = vxpose.xlu1.b32.cont [14/16] %v7365_v56, 128  ;;  %v7257_v19 = vpop.f32.mrf.mxu1  ;;  %v7548_v56 = vld [vmem:[%s19132_s8 + $0xd0] sm:$0xff] }
 0x6b3   : > { %v7258_v36 = vadd.f32 %v7257_v19, %v7145_v5  ;;  %v7368_v13 = vpop.f32.mrf.mxu0  ;;  %v7555_v5 = vld [vmem:[%s19132_s8 + $0x108] sm:$0xff] }
 0x6b4   : > { %v7369_v17 = vadd.f32 %v7368_v13, %v7256_v22  ;;  %v7259_v27 = vpop.f32.mrf.mxu1  ;;  %v7550_v22 = vld [vmem:[%s19132_s8 + $0xe0] sm:$0xff]  ;;  %v7552_v13 = vld [vmem:[%s19132_s8 + $0xf0] sm:$0xff] }
 0x6b5   : > { %v7260_v41 = vadd.f32 %v7259_v27, %v7147_v11  ;;  %v7370_v61 = vpop.f32.mrf.mxu0 }
 0x6b6   : > { %v7371_v30 = vadd.f32 %v7370_v61, %v7258_v36  ;;  %v7261_v57 = vpop.f32.mrf.mxu1  ;;  %7391 = vxpose.xlu0.b32.cont [15/16] %v7369_v17, 128  ;;  %v7557_v36 = vld [vmem:[%s19132_s8 + $0x118] sm:$0xff] }
 0x6b7   : > { %v7262_v34 = vadd.f32 %v7261_v57, %v7149_v39  ;;  %v7372_v47 = vpop.f32.mrf.mxu0  ;;  %v7559_v39 = vld [vmem:[%s19132_s8 + $0x128] sm:$0xff]  ;;  %v7556_v57 = vld [vmem:[%s19132_s8 + $0x110] sm:$0xff] }
 0x6b8   : > { %v7373_v35 = vadd.f32 %v7372_v47, %v7260_v41  ;;  %7423 = vxpose.xlu1.b32.cont [15/16] %v7371_v30, 128  ;;  %v7554_v41 = vld [vmem:[%s19132_s8 + $0x100] sm:$0xff]  ;;  %v7561_v30 = vld [vmem:[%s19132_s8 + $0x138] sm:$0xff] }
 0x6b9   : > { %v7374_v48 = vpop.f32.mrf.mxu0 }
 0x6ba   : > { %v7375_v9 = vadd.f32 %v7374_v48, %v7262_v34  ;;  %7392 = vxpose.xlu0.b32.end [16/16] %v7373_v35, 128  ;;  %v7563_v35 = vld [vmem:[%s19132_s8 + $0x148] sm:$0xff]  ;;  %v7558_v48 = vld [vmem:[%s19132_s8 + $0x120] sm:$0xff] }
 0x6bc   : > { %7424 = vxpose.xlu1.b32.end [16/16] %v7375_v9, 128 }
 0x6da   : > { %7594 = vperm.xlu1 %11154, %v7523_v52  }
 0x6de   : > { %7604 = vperm.xlu1 %11154, %v7525_v3   ;;  %v7565_v3 = vld [vmem:[%s19132_s8 + $0x158] sm:$0xff] }
 0x6e2   : > { %7614 = vperm.xlu1 %11154, %v7527_v2   ;;  %v7560_v2 = vld [vmem:[%s19132_s8 + $0x130] sm:$0xff] }
 0x6e3   : > { %7589 = vperm.xlu0 %11153, %v7522_v58  }
 0x6e6   : > { %7624 = vperm.xlu1 %11154, %v7529_v60   ;;  %v7567_v60 = vld [vmem:[%s19132_s8 + $0x168] sm:$0xff] }
 0x6e7   : > { %7599 = vperm.xlu0 %11153, %v7524_v8   ;;  %v7562_v8 = vld [vmem:[%s19132_s8 + $0x140] sm:$0xff] }
 0x6ea   : > { %7634 = vperm.xlu1 %11154, %v7531_v0  }
 0x6eb   : > { %7609 = vperm.xlu0 %11153, %v7526_v12  }
 0x6ee   : > { %7644 = vperm.xlu1 %11154, %v7533_v53   ;;  %v7569_v53 = vld [vmem:[%s19132_s8 + $0x178] sm:$0xff] }
 0x6ef   : > { %7619 = vperm.xlu0 %11153, %v7528_v6   ;;  %v7564_v6 = vld [vmem:[%s19132_s8 + $0x150] sm:$0xff] }
 0x6f2   : > { %7654 = vperm.xlu1 %11154, %v7535_v55  }
 0x6f3   : > { %7629 = vperm.xlu0 %11153, %v7530_v18  }
 0x6f6   : > { %7664 = vperm.xlu1 %11154, %v7537_v33  }
 0x6f7   : > { %7639 = vperm.xlu0 %11153, %v7532_v46   ;;  %v7571_v46 = vld [vmem:[%s19132_s8 + $0x188] sm:$0xff] }
 0x6fa   : > { %7674 = vperm.xlu1 %11154, %v7539_v37   ;;  %v17577_v44 = vpop.trf.xlu0 }
 0x6fb   : > { %7649 = vperm.xlu0 %11153, %v7534_v31   ;;  %v7568_v31 = vld [vmem:[%s19132_s8 + $0x170] sm:$0xff] }
 0x6fc   : > { %v17585_v54 = vpop.trf.xlu1 }
 0x6fe   : > { %7684 = vperm.xlu1 %11154, %v7541_v21   ;;  %v17587_v23 = vpop.trf.xlu0 }
 0x6ff   : > { %7659 = vperm.xlu0 %11153, %v7536_v45  }
 0x700   : > { %v17595_v14 = vpop.trf.xlu1 }
 0x702   : > { %7694 = vperm.xlu1 %11154, %v7543_v26   ;;  %v17597_v62 = vpop.trf.xlu0  ;;  %v7575_v26 = vld [vmem:[%s19132_s8 + $0x1a8] sm:$0xff] }
 0x703   : > { %7669 = vperm.xlu0 %11153, %v7538_v43   ;;  %v7570_v43 = vld [vmem:[%s19132_s8 + $0x180] sm:$0xff] }
 0x704   : > { %v17607_v32 = vpop.trf.xlu1 }
 0x706   : > { %7704 = vperm.xlu1 %11154, %v7545_v50   ;;  %v17605_v24 = vpop.trf.xlu0 }
 0x707   : > { %7679 = vperm.xlu0 %11153, %v7540_v7  }
 0x708   : > { %v17623_v38 = vpop.trf.xlu1 }
 0x70a   : > { %7714 = vperm.xlu1 %11154, %v7547_v63   ;;  %v17615_v49 = vpop.trf.xlu0  ;;  %v7577_v63 = vld [vmem:[%s19132_s8 + $0x1b8] sm:$0xff] }
 0x70b   : > { %7689 = vperm.xlu0 %11153, %v7542_v4   ;;  %v7572_v4 = vld [vmem:[%s19132_s8 + $0x190] sm:$0xff] }
 0x70c   : > { %v17635_v28 = vpop.trf.xlu1 }
 0x70e   : > { %7724 = vperm.xlu1 %11154, %v7549_v15   ;;  %v17625_v42 = vpop.trf.xlu0 }
 0x70f   : > { %7699 = vperm.xlu0 %11153, %v7544_v29   ;;  %v7579_v29 = vld [vmem:[%s19132_s8 + $0x1c8] sm:$0xff] }
 0x710   : > { %v17651_v19 = vpop.trf.xlu1 }
 0x712   : > { %7734 = vperm.xlu1 %11154, %v7551_v20   ;;  %v17633_v51 = vpop.trf.xlu0 }
 0x713   : > { %7709 = vperm.xlu0 %11153, %v7546_v59   ;;  %v7574_v59 = vld [vmem:[%s19132_s8 + $0x1a0] sm:$0xff] }
 0x714   : > { %v17663_v27 = vpop.trf.xlu1 }
 0x716   : > { %7744 = vperm.xlu1 %11154, %v7553_v1   ;;  %v17643_v25 = vpop.trf.xlu0  ;;  %v7581_v1 = vld [vmem:[%s19132_s8 + $0x1d8] sm:$0xff] }
 0x717   : > { %7719 = vperm.xlu0 %11153, %v7548_v56   ;;  %v17762_v15 = vpack.c.bf16 %v17643_v25, %v17633_v51  ;;  %v17776_v51 = vpack.c.bf16 %v17625_v42, %v17615_v49  ;;  %v7576_v56 = vld [vmem:[%s19132_s8 + $0x1b0] sm:$0xff]  ;;  %v17790_v49 = vpack.c.bf16 %v17605_v24, %v17597_v62  ;;  %v7583_v42 = vld [vmem:[%s19132_s8 + $0x1e8] sm:$0xff]  ;;  %v17804_v62 = vpack.c.bf16 %v17587_v23, %v17577_v44  ;;  %v7585_v24 = vld [vmem:[%s19132_s8 + $0x1f8] sm:$0xff] }
 0x718   : > { %v17677_v34 = vpop.trf.xlu1  ;;  %v8665_v23 = vld [vmem:[%s19134_s10] sm:$0xff] }
 0x71a   : > { %7754 = vperm.xlu1 %11154, %v7555_v5   ;;  %v17653_v11 = vpop.trf.xlu0  ;;  %v7578_v5 = vld [vmem:[%s19132_s8 + $0x1c0] sm:$0xff] }
 0x71b   : > { %7729 = vperm.xlu0 %11153, %v7550_v22  }
 0x71c   : > { %v17685_v52 = vpop.trf.xlu1 }
 0x71e   : > { %7764 = vperm.xlu1 %11154, %v7557_v36   ;;  %v17661_v17 = vpop.trf.xlu0  ;;  %v7582_v36 = vld [vmem:[%s19132_s8 + $0x1e0] sm:$0xff] }
 0x71f   : > { %7739 = vperm.xlu0 %11153, %v7552_v13   ;;  %v17748_v7 = vpack.c.bf16 %v17661_v17, %v17653_v11  ;;  %v7580_v11 = vld [vmem:[%s19132_s8 + $0x1d0] sm:$0xff] }
 0x720   : > { %v17699_v0 = vpop.trf.xlu1  ;;  %v8667_v17 = vld [vmem:[%s19134_s10 + $0x10] sm:$0xff] }
 0x722   : > { %7774 = vperm.xlu1 %11154, %v7559_v39   ;;  %v7403_v61 = vpop.trf.xlu0  ;;  %v7584_v39 = vld [vmem:[%s19132_s8 + $0x1f0] sm:$0xff] }
 0x723   : > { %7749 = vperm.xlu0 %11153, %v7554_v41  }
 0x724   : > { %v17707_v18 = vpop.trf.xlu1 }
 0x726   : > { %7784 = vperm.xlu1 %11154, %v7561_v30   ;;  %v7404_v47 = vpop.trf.xlu0  ;;  %v7586_v30 = vld [vmem:[%s19132_s8 + $0x200] sm:$0x1] }
 0x727   : > { %7759 = vperm.xlu0 %11153, %v7556_v57   ;;  %v17734_v45 = vpack.c.bf16 %v7404_v47, %v7403_v61  ;;  %v8669_v61 = vld [vmem:[%s19134_s10 + $0x20] sm:$0xff]  ;;  %v17856_v57 = vpack.c.bf16 %v17699_v0, %v17685_v52  ;;  %v8671_v47 = vld [vmem:[%s19134_s10 + $0x30] sm:$0xff]  ;;  %v8668_v52 = vld [vmem:[%s19134_s10 + $0x18] sm:$0xff] }
 0x728   : > { %v17729_v21 = vpop.trf.xlu1 }
 0x729   : > { %v17842_v41 = vpack.c.bf16 %v17729_v21, %v17707_v18  ;;  %v8683_v18 = vld [vmem:[%s19134_s10 + $0x90] sm:$0xff]  ;;  %v8685_v21 = vld [vmem:[%s19134_s10 + $0xa0] sm:$0xff] }
 0x72a   : > { %7794 = vperm.xlu1 %11154, %v7563_v35   ;;  %v7405_v9 = vpop.trf.xlu0  ;;  %v8666_v35 = vld [vmem:[%s19134_s10 + $0x8] sm:$0xff] }
 0x72b   : > { %7769 = vperm.xlu0 %11153, %v7558_v48   ;;  %v17870_v48 = vpack.c.bf16 %v17677_v34, %v17663_v27  ;;  %v17884_v27 = vpack.c.bf16 %v17651_v19, %v17635_v28  ;;  %v8675_v34 = vld [vmem:[%s19134_s10 + $0x50] sm:$0xff]  ;;  %v17898_v28 = vpack.c.bf16 %v17623_v38, %v17607_v32  ;;  %v8677_v19 = vld [vmem:[%s19134_s10 + $0x60] sm:$0xff]  ;;  %v17912_v32 = vpack.c.bf16 %v17595_v14, %v17585_v54  ;;  %v8674_v54 = vld [vmem:[%s19134_s10 + $0x48] sm:$0xff] }
 0x72c   : > { %v7437_v50 = vpop.trf.xlu1  ;;  %v8679_v38 = vld [vmem:[%s19134_s10 + $0x70] sm:$0xff] }
 0x72e   : > { %7804 = vperm.xlu1 %11154, %v7565_v3   ;;  %v7406_v58 = vpop.trf.xlu0  ;;  %v8670_v3 = vld [vmem:[%s19134_s10 + $0x28] sm:$0xff] }
 0x72f   : > { %7779 = vperm.xlu0 %11153, %v7560_v2   ;;  %v17720_v37 = vpack.c.bf16 %v7406_v58, %v7405_v9  ;;  %v8673_v9 = vld [vmem:[%s19134_s10 + $0x40] sm:$0xff]  ;;  %v8672_v2 = vld [vmem:[%s19134_s10 + $0x38] sm:$0xff] }
 0x730   : > { %v7438_v20 = vpop.trf.xlu1  ;;  %v11439_v58 = vld [vmem:[%s19131_s7] ss:$8 sps:$4 sm:$0xff]  }
 0x731   : > { %v17828_v13 = vpack.c.bf16 %v7438_v20, %v7437_v50  ;;  %v11459_v20 = vld [vmem:[%s19131_s7 + $0x34] ss:$8 sps:$4 sm:$0xff]  }
 0x732   : > { %7814 = vperm.xlu1 %11154, %v7567_v60   ;;  %v7407_v12 = vpop.trf.xlu0  ;;  %v11442_v60 = vld [vmem:[%s19133_s9] ss:$8 sps:$4 sm:$0xff]  }
 0x733   : > { %7789 = vperm.xlu0 %11153, %v7562_v8   ;;  %v11447_v8 = vld [vmem:[%s19131_s7 + $0x14] ss:$8 sps:$4 sm:$0xff]  }
 0x734   : > { %v7439_v25 = vpop.trf.xlu1 }
 0x736   : > { %7824 = vperm.xlu1 %11154, %v7569_v53   ;;  %v7408_v55 = vpop.trf.xlu0  ;;  %v11448_v53 = vld [vmem:[%s19133_s9 + $0x14] ss:$8 sps:$4 sm:$0xff]  }
 0x737   : > { %v17709_v33 = vpack.c.bf16 %v7408_v55, %v7407_v12  ;;  %7799 = vperm.xlu0 %11153, %v7564_v6   ;;  %v8681_v12 = vld [vmem:[%s19134_s10 + $0x80] sm:$0xff]  ;;  %v8676_v6 = vld [vmem:[%s19134_s10 + $0x58] sm:$0xff] }
 0x738   : > { %v7440_v22 = vpop.trf.xlu1 }
 0x739   : > { %8240 = vmatpush1.bf16.msra.mxu1 %v17709_v33  ;;  %9383 = vmatpush1.bf16.msra.mxu0 %v17709_v33  ;;  %v17816_v44 = vpack.c.bf16 %v7440_v22, %v7439_v25 }
 0x73a   : > { %7834 = vperm.xlu1 %11154, %v7571_v46   ;;  %8241 = vmatprep.subr.bf16.mxu1 %v20072_v40  ;;  %v8678_v46 = vld [vmem:[%s19134_s10 + $0x68] sm:$0xff] }
 0x73b   : > { %7809 = vperm.xlu0 %11153, %v7566_v10   ;;  %9384 = vmatprep.subr.bf16.mxu0 %v20072_v40  ;;  %v11450_v10 = vld [vmem:[%s19133_s9 + $0x10] ss:$8 sps:$4 sm:$0xff]  }
 0x73d   : > { %8242 = vmatpush1.bf16.msra.mxu1 %v17720_v37  ;;  %9385 = vmatpush1.bf16.msra.mxu0 %v17720_v37 }
 0x73e   : > { %7844 = vperm.xlu1 %11154, %v7573_v16   ;;  %8243 = vmatprep.subr.bf16.mxu1 %v20072_v40 }
 0x73f   : > { %7819 = vperm.xlu0 %11153, %v7568_v31   ;;  %9386 = vmatprep.subr.bf16.mxu0 %v20072_v40  ;;  %v11453_v31 = vld [vmem:[%s19131_s7 + $0x24] ss:$8 sps:$4 sm:$0xff]  }
 0x741   : > { %8244 = vmatpush1.bf16.msra.mxu1 %v17734_v45  ;;  %9387 = vmatpush1.bf16.msra.mxu0 %v17734_v45 }
 0x742   : > { %7854 = vperm.xlu1 %11154, %v7575_v26   ;;  %8245 = vmatprep.subr.bf16.mxu1 %v20072_v40  ;;  %v11456_v26 = vld [vmem:[%s19133_s9 + $0x24] ss:$8 sps:$4 sm:$0xff]  }
 0x743   : > { %7829 = vperm.xlu0 %11153, %v7570_v43   ;;  %9388 = vmatprep.subr.bf16.mxu0 %v20072_v40 }
 0x745   : > { %8246 = vmatpush1.bf16.msra.mxu1 %v17748_v7  ;;  %9389 = vmatpush1.bf16.msra.mxu0 %v17748_v7 }
 0x746   : > { %7864 = vperm.xlu1 %11154, %v7577_v63   ;;  %8247 = vmatprep.subr.bf16.mxu1 %v20072_v40  ;;  %v8687_v63 = vld [vmem:[%s19134_s10 + $0xb0] sm:$0xff] }
 0x747   : > { %7839 = vperm.xlu0 %11153, %v7572_v4   ;;  %9390 = vmatprep.subr.bf16.mxu0 %v20072_v40  ;;  %v8682_v4 = vld [vmem:[%s19134_s10 + $0x88] sm:$0xff] }
 0x749   : > { %8248 = vmatpush1.bf16.msra.mxu1 %v17762_v15  ;;  %9391 = vmatpush1.bf16.msra.mxu0 %v17762_v15 }
 0x74a   : > { %7874 = vperm.xlu1 %11154, %v7579_v29   ;;  %8249 = vmatprep.subr.bf16.mxu1 %v20072_v40  ;;  %v11454_v29 = vld [vmem:[%s19133_s9 + $0x20] ss:$8 sps:$4 sm:$0xff]  }
 0x74b   : > { %7849 = vperm.xlu0 %11153, %v7574_v59   ;;  %9392 = vmatprep.subr.bf16.mxu0 %v20072_v40 }
 0x74d   : > { %8250 = vmatpush1.bf16.msra.mxu1 %v17776_v51  ;;  %9393 = vmatpush1.bf16.msra.mxu0 %v17776_v51 }
 0x74e   : > { %7884 = vperm.xlu1 %11154, %v7581_v1   ;;  %8251 = vmatprep.subr.bf16.mxu1 %v20072_v40  ;;  %v8689_v1 = vld [vmem:[%s19134_s10 + $0xc0] sm:$0xff] }
 0x74f   : > { %7859 = vperm.xlu0 %11153, %v7576_v56   ;;  %9394 = vmatprep.subr.bf16.mxu0 %v20072_v40  ;;  %v11462_v56 = vld [vmem:[%s19133_s9 + $0x34] ss:$8 sps:$4 sm:$0xff]  }
 0x751   : > { %8252 = vmatpush1.bf16.msra.mxu1 %v17790_v49  ;;  %9395 = vmatpush1.bf16.msra.mxu0 %v17790_v49 }
 0x752   : > { %7894 = vperm.xlu1 %11154, %v7583_v42   ;;  %8253 = vmatprep.subr.bf16.mxu1 %v20072_v40  ;;  %v8691_v42 = vld [vmem:[%s19134_s10 + $0xd0] sm:$0xff] }
 0x753   : > { %7869 = vperm.xlu0 %11153, %v7578_v5   ;;  %9396 = vmatprep.subr.bf16.mxu0 %v20072_v40  ;;  %v8686_v5 = vld [vmem:[%s19134_s10 + $0xa8] sm:$0xff] }
 0x755   : > { %8254 = vmatpush1.bf16.msra.mxu1 %v17804_v62  ;;  %9397 = vmatpush1.bf16.msra.mxu0 %v17804_v62  ;;  %v17935_v0 = vpop.permute.xlu1 %7594 }
 0x756   : > { %7904 = vperm.xlu1 %11154, %v7585_v24   ;;  %8255 = vmatprep.subr.bf16.mxu1 %v20072_v40  ;;  %v11457_v24 = vld [vmem:[%s19131_s7 + $0x30] ss:$8 sps:$4 sm:$0xff]  }
 0x757   : > { %7879 = vperm.xlu0 %11153, %v7580_v11   ;;  %9398 = vmatprep.subr.bf16.mxu0 %v20072_v40  ;;  %v11465_v11 = vld [vmem:[%s19131_s7 + $0x44] ss:$8 sps:$4 sm:$0xff]  }
 0x759   : > { %8256 = vmatpush2.bf16.msra.mxu1 %v17816_v44  ;;  %9399 = vmatpush2.bf16.msra.mxu0 %v17816_v44  ;;  %v17962_v16 = vpop.permute.xlu1 %7604 }
 0x75a   : > { %8732 = vperm.xlu1 %11154, %v8665_v23   ;;  %8257 = vmatprep.subr.bf16.mxu1 %v20072_v40 }
 0x75b   : > { %7889 = vperm.xlu0 %11153, %v7582_v36   ;;  %9400 = vmatprep.subr.bf16.mxu0 %v20072_v40  ;;  %v8693_v36 = vld [vmem:[%s19134_s10 + $0xe0] sm:$0xff] }
 0x75d   : > { %8258 = vmatpush2.bf16.msra.mxu1 %v17828_v13  ;;  %9401 = vmatpush2.bf16.msra.mxu0 %v17828_v13  ;;  %v17982_v50 = vpop.permute.xlu1 %7614 }
 0x75e   : > { %8742 = vperm.xlu1 %11154, %v8667_v17   ;;  %8259 = vmatprep.subr.bf16.mxu1 %v20072_v40  ;;  %v17927_v14 = vpop.permute.xlu0 %7589  ;;  %v11468_v17 = vld [vmem:[%s19133_s9 + $0x44] ss:$8 sps:$4 sm:$0xff]  }
 0x75f   : > { %7899 = vperm.xlu0 %11153, %v7584_v39   ;;  %9402 = vmatprep.subr.bf16.mxu0 %v20072_v40 }
 0x761   : > { %8260 = vmatpush2.bf16.msra.mxu1 %v17842_v41  ;;  %9403 = vmatpush2.bf16.msra.mxu0 %v17842_v41  ;;  %v18012_v25 = vpop.permute.xlu1 %7624 }
 0x762   : > { %8752 = vperm.xlu1 %11154, %v8669_v61   ;;  %8261 = vmatprep.subr.bf16.mxu1 %v20072_v40  ;;  %v17948_v55 = vpop.permute.xlu0 %7599  ;;  %v8695_v61 = vld [vmem:[%s19134_s10 + $0xf0] sm:$0xff] }
 0x763   : > { %7909 = vperm.xlu0 %11153, %v7586_v30   ;;  %9404 = vmatprep.subr.bf16.mxu0 %v20072_v40  ;;  %v8690_v30 = vld [vmem:[%s19134_s10 + $0xc8] sm:$0xff] }
 0x765   : > { %8262 = vmatpush2.bf16.msra.mxu1 %v17856_v57  ;;  %9405 = vmatpush2.bf16.msra.mxu0 %v17856_v57  ;;  %v18035_v23 = vpop.permute.xlu1 %7634 }
 0x766   : > { %8762 = vperm.xlu1 %11154, %v8671_v47   ;;  %8263 = vmatprep.subr.bf16.mxu1 %v20072_v40  ;;  %v17978_v43 = vpop.permute.xlu0 %7609  ;;  %v11466_v47 = vld [vmem:[%s19133_s9 + $0x40] ss:$8 sps:$4 sm:$0xff]  }
 0x767   : > { %8737 = vperm.xlu0 %11153, %v8666_v35   ;;  %9406 = vmatprep.subr.bf16.mxu0 %v20072_v40 }
 0x769   : > { %8264 = vmatpush2.bf16.msra.mxu1 %v17870_v48  ;;  %9407 = vmatpush2.bf16.msra.mxu0 %v17870_v48  ;;  %v18062_v35 = vpop.permute.xlu1 %7644 }
 0x76a   : > { %8772 = vperm.xlu1 %11154, %v8673_v9   ;;  %8265 = vmatprep.subr.bf16.mxu1 %v20072_v40  ;;  %v18001_v59 = vpop.permute.xlu0 %7619  ;;  %v11471_v9 = vld [vmem:[%s19131_s7 + $0x54] ss:$8 sps:$4 sm:$0xff]  }
 0x76b   : > { %8747 = vperm.xlu0 %11153, %v8668_v52   ;;  %9408 = vmatprep.subr.bf16.mxu0 %v20072_v40  ;;  %v8697_v52 = vld [vmem:[%s19134_s10 + $0x100] sm:$0xff] }
 0x76d   : > { %8266 = vmatpush2.bf16.msra.mxu1 %v17884_v27  ;;  %9409 = vmatpush2.bf16.msra.mxu0 %v17884_v27 }
 0x76e   : > { %8782 = vperm.xlu1 %11154, %v8675_v34   ;;  %8267 = vmatprep.subr.bf16.mxu1 %v20072_v40  ;;  %v18028_v22 = vpop.permute.xlu0 %7629  ;;  %v11474_v34 = vld [vmem:[%s19133_s9 + $0x54] ss:$8 sps:$4 sm:$0xff]  }
 0x76f   : > { %8757 = vperm.xlu0 %11153, %v8670_v3   ;;  %9410 = vmatprep.subr.bf16.mxu0 %v20072_v40 }
 0x771   : > { %8268 = vmatpush2.bf16.msra.mxu1 %v17898_v28  ;;  %9411 = vmatpush2.bf16.msra.mxu0 %v17898_v28 }
 0x772   : > { %8792 = vperm.xlu1 %11154, %v8677_v19   ;;  %8269 = vmatprep.subr.bf16.mxu1 %v20072_v40  ;;  %v18048_v39 = vpop.permute.xlu0 %7639  ;;  %v18082_v19 = vpop.permute.xlu1 %7654 }
 0x773   : > { %8767 = vperm.xlu0 %11153, %v8672_v2   ;;  %9412 = vmatprep.subr.bf16.mxu0 %v20072_v40  ;;  %v8699_v2 = vld [vmem:[%s19134_s10 + $0x110] sm:$0xff] }
 0x775   : > { %8270 = vmatpush2.bf16.msra.mxu1 %v17912_v32  ;;  %9413 = vmatpush2.bf16.msra.mxu0 %v17912_v32 }
 0x776   : > { %8802 = vperm.xlu1 %11154, %v8679_v38   ;;  %11052 = vmatprep.subr.bf16.mxu1 %v20072_v40  ;;  %v18078_v3 = vpop.permute.xlu0 %7649  ;;  %v8694_v38 = vld [vmem:[%s19134_s10 + $0xe8] sm:$0xff] }
 0x777   : > { %8777 = vperm.xlu0 %11153, %v8674_v54  }
 0x778   : > { %8272 = vmatmul.mubr.bf16.vlgmr.msra.gmra.mxu1 %v11439_v58  ;;  %9415 = vmatmul.mubr.bf16.vlgmr.msra.gmra.mxu0 %v11442_v60  ;;  %v11472_v58 = vld [vmem:[%s19133_s9 + $0x50] ss:$8 sps:$4 sm:$0xff]   ;;  %v11477_v60 = vld [vmem:[%s19131_s7 + $0x64] ss:$8 sps:$4 sm:$0xff]  }
 0x779   : > { %11068 = vmatpush1.bf16.msra.mxu1 %v17709_v33  ;;  %8279 = vmatprep.mubr.bf16.mxu1 %v11447_v8  ;;  %v11445_v33 = vld [vmem:[%s19131_s7 + $0x10] ss:$8 sps:$4 sm:$0xff]   ;;  %v8701_v8 = vld [vmem:[%s19134_s10 + $0x120] sm:$0xff] }
 0x77a   : > { %8812 = vperm.xlu1 %11154, %v8681_v12   ;;  %11053 = vmatprep.subr.bf16.mxu1 %v20072_v40  ;;  %v18101_v54 = vpop.permute.xlu0 %7659  ;;  %v11480_v12 = vld [vmem:[%s19133_s9 + $0x64] ss:$8 sps:$4 sm:$0xff]  }
 0x77b   : > { %8787 = vperm.xlu0 %11153, %v8676_v6   ;;  %9422 = vmatprep.mubr.bf16.mxu0 %v11448_v53  ;;  %v18112_v53 = vpop.permute.xlu1 %7664  ;;  %v8703_v6 = vld [vmem:[%s19134_s10 + $0x130] sm:$0xff] }
 0x77d   : > { %11069 = vmatpush1.bf16.msra.mxu1 %v17720_v37  ;;  %v8680_v37 = vld [vmem:[%s19134_s10 + $0x78] sm:$0xff] }
 0x77e   : > { %8822 = vperm.xlu1 %11154, %v8683_v18   ;;  %11054 = vmatprep.subr.bf16.mxu1 %v20072_v40  ;;  %v11475_v18 = vld [vmem:[%s19131_s7 + $0x60] ss:$8 sps:$4 sm:$0xff]  }
 0x77f   : > { %8797 = vperm.xlu0 %11153, %v8678_v46   ;;  %v11478_v46 = vld [vmem:[%s19133_s9 + $0x60] ss:$8 sps:$4 sm:$0xff]  }
 0x780   : > { %8280 = vmatmul.mubr.bf16.gmra.mxu1 %v11445_v33  ;;  %9423 = vmatmul.mubr.bf16.gmra.mxu0 %v11450_v10  ;;  %v18128_v33 = vpop.permute.xlu0 %7669  ;;  %v11483_v10 = vld [vmem:[%s19131_s7 + $0x74] ss:$8 sps:$4 sm:$0xff]  }
 0x781   : > { %11070 = vmatpush1.bf16.msra.mxu1 %v17734_v45  ;;  %8287 = vmatprep.mubr.bf16.mxu1 %v11453_v31  ;;  %v11451_v45 = vld [vmem:[%s19131_s7 + $0x20] ss:$8 sps:$4 sm:$0xff]   ;;  %v18135_v31 = vpop.permute.xlu1 %7674 }
 0x782   : > { %8832 = vperm.xlu1 %11154, %v8685_v21   ;;  %11055 = vmatprep.subr.bf16.mxu1 %v20072_v40  ;;  %v8705_v21 = vld [vmem:[%s19134_s10 + $0x140] sm:$0xff] }
 0x783   : > { %8807 = vperm.xlu0 %11153, %v8680_v37   ;;  %9430 = vmatprep.mubr.bf16.mxu0 %v11456_v26  ;;  %v11486_v26 = vld [vmem:[%s19133_s9 + $0x74] ss:$8 sps:$4 sm:$0xff]  }
 0x784   : > { %v18148_v37 = vpop.permute.xlu0 %7679 }
 0x785   : > { %11071 = vmatpush1.bf16.msra.mxu1 %v17748_v7  ;;  %v8684_v7 = vld [vmem:[%s19134_s10 + $0x98] sm:$0xff] }
 0x786   : > { %8842 = vperm.xlu1 %11154, %v8687_v63   ;;  %11056 = vmatprep.subr.bf16.mxu1 %v20072_v40  ;;  %v8707_v63 = vld [vmem:[%s19134_s10 + $0x150] sm:$0xff] }
 0x787   : > { %8817 = vperm.xlu0 %11153, %v8682_v4   ;;  %v11481_v4 = vld [vmem:[%s19131_s7 + $0x70] ss:$8 sps:$4 sm:$0xff]  }
 0x788   : > { %8288 = vmatmul.mubr.bf16.gmra.mxu1 %v11451_v45  ;;  %9431 = vmatmul.mubr.bf16.gmra.mxu0 %v11454_v29  ;;  %v8702_v45 = vld [vmem:[%s19134_s10 + $0x128] sm:$0xff]  ;;  %v18162_v29 = vpop.permute.xlu1 %7684 }
 0x789   : > { %11072 = vmatpush1.bf16.msra.mxu1 %v17762_v15  ;;  %8295 = vmatprep.mubr.bf16.mxu1 %v11459_v20  ;;  %v11460_v15 = vld [vmem:[%s19133_s9 + $0x30] ss:$8 sps:$4 sm:$0xff]   ;;  %v11489_v20 = vld [vmem:[%s19131_s7 + $0x84] ss:$8 sps:$4 sm:$0xff]  }
 0x78a   : > { %8852 = vperm.xlu1 %11154, %v8689_v1   ;;  %11057 = vmatprep.subr.bf16.mxu1 %v20072_v40  ;;  %v8709_v1 = vld [vmem:[%s19134_s10 + $0x160] sm:$0xff] }
 0x78b   : > { %8827 = vperm.xlu0 %11153, %v8684_v7   ;;  %9438 = vmatprep.mubr.bf16.mxu0 %v11462_v56  ;;  %v11492_v56 = vld [vmem:[%s19133_s9 + $0x84] ss:$8 sps:$4 sm:$0xff]   ;;  %v18178_v7 = vpop.permute.xlu0 %7689 }
 0x78d   : > { %11073 = vmatpush1.bf16.msra.mxu1 %v17776_v51  ;;  %v8688_v51 = vld [vmem:[%s19134_s10 + $0xb8] sm:$0xff] }
 0x78e   : > { %8862 = vperm.xlu1 %11154, %v8691_v42   ;;  %11058 = vmatprep.subr.bf16.mxu1 %v20072_v40  ;;  %v18182_v42 = vpop.permute.xlu1 %7694 }
 0x78f   : > { %8837 = vperm.xlu0 %11153, %v8686_v5   ;;  %v8711_v5 = vld [vmem:[%s19134_s10 + $0x170] sm:$0xff] }
 0x790   : > { %8296 = vmatmul.mubr.bf16.gmra.mxu1 %v11457_v24  ;;  %9439 = vmatmul.mubr.bf16.gmra.mxu0 %v11460_v15  ;;  %v11487_v24 = vld [vmem:[%s19131_s7 + $0x80] ss:$8 sps:$4 sm:$0xff]   ;;  %v11495_v15 = vld [vmem:[%s19131_s7 + $0x94] ss:$8 sps:$4 sm:$0xff]  }
 0x791   : > { %11074 = vmatpush1.bf16.msra.mxu1 %v17790_v49  ;;  %8303 = vmatprep.mubr.bf16.mxu1 %v11465_v11  ;;  %v11463_v49 = vld [vmem:[%s19131_s7 + $0x40] ss:$8 sps:$4 sm:$0xff]   ;;  %v11498_v11 = vld [vmem:[%s19133_s9 + $0x94] ss:$8 sps:$4 sm:$0xff]  }
 0x792   : > { %8872 = vperm.xlu1 %11154, %v8693_v36   ;;  %11059 = vmatprep.subr.bf16.mxu1 %v20072_v40  ;;  %v18203_v36 = vpop.permute.xlu0 %7699 }
 0x793   : > { %8847 = vperm.xlu0 %11153, %v8688_v51   ;;  %9446 = vmatprep.mubr.bf16.mxu0 %v11468_v17  ;;  %v8713_v17 = vld [vmem:[%s19134_s10 + $0x180] sm:$0xff]  ;;  %v18211_v51 = vpop.permute.xlu1 %7704 }
 0x795   : > { %11075 = vmatpush1.bf16.msra.mxu1 %v17804_v62  ;;  %v8692_v62 = vld [vmem:[%s19134_s10 + $0xd8] sm:$0xff] }
 0x796   : > { %8882 = vperm.xlu1 %11154, %v8695_v61   ;;  %11060 = vmatprep.subr.bf16.mxu1 %v20072_v40  ;;  %v8715_v61 = vld [vmem:[%s19134_s10 + $0x190] sm:$0xff] }
 0x797   : > { %8857 = vperm.xlu0 %11153, %v8690_v30   ;;  %v11493_v30 = vld [vmem:[%s19131_s7 + $0x90] ss:$8 sps:$4 sm:$0xff]  }
 0x798   : > { %8304 = vmatmul.mubr.bf16.gmra.mxu1 %v11463_v49  ;;  %9447 = vmatmul.mubr.bf16.gmra.mxu0 %v11466_v47  ;;  %v11496_v49 = vld [vmem:[%s19133_s9 + $0x90] ss:$8 sps:$4 sm:$0xff]   ;;  %v8710_v47 = vld [vmem:[%s19134_s10 + $0x168] sm:$0xff] }
 0x799   : > { %11076 = vmatpush2.bf16.msra.mxu1 %v17816_v44  ;;  %8311 = vmatprep.mubr.bf16.mxu1 %v11471_v9  ;;  %v11469_v44 = vld [vmem:[%s19131_s7 + $0x50] ss:$8 sps:$4 sm:$0xff]   ;;  %v18225_v9 = vpop.permute.xlu0 %7709 }
 0x79a   : > { %8892 = vperm.xlu1 %11154, %v8697_v52   ;;  %11061 = vmatprep.subr.bf16.mxu1 %v20072_v40  ;;  %v11501_v52 = vld [vmem:[%s19131_s7 + $0xa4] ss:$8 sps:$4 sm:$0xff]  }
 0x79b   : > { %8867 = vperm.xlu0 %11153, %v8692_v62   ;;  %9454 = vmatprep.mubr.bf16.mxu0 %v11474_v34  ;;  %v11504_v34 = vld [vmem:[%s19133_s9 + $0xa4] ss:$8 sps:$4 sm:$0xff]   ;;  %v18233_v62 = vpop.permute.xlu1 %7714 }
 0x79d   : > { %11077 = vmatpush2.bf16.msra.mxu1 %v17828_v13  ;;  %v8696_v13 = vld [vmem:[%s19134_s10 + $0xf8] sm:$0xff] }
 0x79e   : > { %8902 = vperm.xlu1 %11154, %v8699_v2   ;;  %11062 = vmatprep.subr.bf16.mxu1 %v20072_v40  ;;  %v8717_v2 = vld [vmem:[%s19134_s10 + $0x1a0] sm:$0xff] }
 0x79f   : > { %8877 = vperm.xlu0 %11153, %v8694_v38   ;;  %v8712_v38 = vld [vmem:[%s19134_s10 + $0x178] sm:$0xff] }
 0x7a0   : > { %8312 = vmatmul.mubr.bf16.gmra.mxu1 %v11469_v44  ;;  %9455 = vmatmul.mubr.bf16.gmra.mxu0 %v11472_v58  ;;  %v18241_v44 = vpop.permute.xlu0 %7719  ;;  %v8719_v58 = vld [vmem:[%s19134_s10 + $0x1b0] sm:$0xff] }
 0x7a1   : > { %11078 = vmatpush2.bf16.msra.mxu1 %v17842_v41  ;;  %8319 = vmatprep.mubr.bf16.mxu1 %v11477_v60  ;;  %v8698_v41 = vld [vmem:[%s19134_s10 + $0x108] sm:$0xff] }
 0x7a2   : > { %8912 = vperm.xlu1 %11154, %v8701_v8   ;;  %11063 = vmatprep.subr.bf16.mxu1 %v20072_v40  ;;  %v11499_v60 = vld [vmem:[%s19131_s7 + $0xa0] ss:$8 sps:$4 sm:$0xff]  }
 0x7a3   : > { %8887 = vperm.xlu0 %11153, %v8696_v13   ;;  %9462 = vmatprep.mubr.bf16.mxu0 %v11480_v12  ;;  %v11502_v8 = vld [vmem:[%s19133_s9 + $0xa0] ss:$8 sps:$4 sm:$0xff]   ;;  %v18255_v13 = vpop.permute.xlu1 %7724 }
 0x7a4   : > { %v8714_v12 = vld [vmem:[%s19134_s10 + $0x188] sm:$0xff] }
 0x7a5   : > { %11079 = vmatpush2.bf16.msra.mxu1 %v17856_v57  ;;  %v8700_v57 = vld [vmem:[%s19134_s10 + $0x118] sm:$0xff] }
 0x7a6   : > { %8922 = vperm.xlu1 %11154, %v8703_v6   ;;  %11064 = vmatprep.subr.bf16.mxu1 %v20072_v40  ;;  %v11507_v6 = vld [vmem:[%s19131_s7 + $0xb4] ss:$8 sps:$4 sm:$0xff]  }
 0x7a7   : > { %8897 = vperm.xlu0 %11153, %v8698_v41   ;;  %v8716_v41 = vld [vmem:[%s19134_s10 + $0x198] sm:$0xff] }
 0x7a8   : > { %8320 = vmatmul.mubr.bf16.gmra.mxu1 %v11475_v18  ;;  %9463 = vmatmul.mubr.bf16.gmra.mxu0 %v11478_v46  ;;  %v11510_v18 = vld [vmem:[%s19133_s9 + $0xb4] ss:$8 sps:$4 sm:$0xff]   ;;  %v8721_v46 = vld [vmem:[%s19134_s10 + $0x1c0] sm:$0xff] }
 0x7a9   : > { %11080 = vmatpush2.bf16.msra.mxu1 %v17870_v48  ;;  %8327 = vmatprep.mubr.bf16.mxu1 %v11483_v10  ;;  %v11484_v48 = vld [vmem:[%s19133_s9 + $0x70] ss:$8 sps:$4 sm:$0xff]   ;;  %v18269_v10 = vpop.permute.xlu0 %7729 }
 0x7aa   : > { %8932 = vperm.xlu1 %11154, %v8705_v21   ;;  %11065 = vmatprep.subr.bf16.mxu1 %v20072_v40  ;;  %v18271_v21 = vpop.permute.xlu1 %7734 }
 0x7ab   : > { %8907 = vperm.xlu0 %11153, %v8700_v57   ;;  %9470 = vmatprep.mubr.bf16.mxu0 %v11486_v26  ;;  %v8723_v26 = vld [vmem:[%s19134_s10 + $0x1d0] sm:$0xff] }
 0x7ac   : > { %v11505_v57 = vld [vmem:[%s19131_s7 + $0xb0] ss:$8 sps:$4 sm:$0xff]  }
 0x7ad   : > { %11081 = vmatpush2.bf16.msra.mxu1 %v17884_v27  ;;  %v8704_v27 = vld [vmem:[%s19134_s10 + $0x138] sm:$0xff] }
 0x7ae   : > { %8942 = vperm.xlu1 %11154, %v8707_v63   ;;  %11066 = vmatprep.subr.bf16.mxu1 %v20072_v40  ;;  %v11508_v63 = vld [vmem:[%s19133_s9 + $0xb0] ss:$8 sps:$4 sm:$0xff]  }
 0x7af   : > { %8917 = vperm.xlu0 %11153, %v8702_v45   ;;  %v11516_v45 = vld [vmem:[%s19133_s9 + $0xc4] ss:$8 sps:$4 sm:$0xff]  }
 0x7b0   : > { %8328 = vmatmul.mubr.bf16.gmra.mxu1 %v11481_v4  ;;  %9471 = vmatmul.mubr.bf16.gmra.mxu0 %v11484_v48  ;;  %v8718_v4 = vld [vmem:[%s19134_s10 + $0x1a8] sm:$0xff] }
 0x7b1   : > { %11082 = vmatpush2.bf16.msra.mxu1 %v17898_v28  ;;  %8335 = vmatprep.mubr.bf16.mxu1 %v11489_v20  ;;  %v11490_v28 = vld [vmem:[%s19133_s9 + $0x80] ss:$8 sps:$4 sm:$0xff]   ;;  %v11513_v48 = vld [vmem:[%s19131_s7 + $0xc4] ss:$8 sps:$4 sm:$0xff]   ;;  %v18291_v20 = vpop.permute.xlu0 %7739 }
 0x7b2   : > { %8952 = vperm.xlu1 %11154, %v8709_v1   ;;  %11067 = vmatprep.subr.bf16.mxu1 %v20072_v40  ;;  %v8706_v40 = vld [vmem:[%s19134_s10 + $0x148] sm:$0xff]  ;;  %v8725_v1 = vld [vmem:[%s19134_s10 + $0x1e0] sm:$0xff] }
 0x7b3   : > { %8927 = vperm.xlu0 %11153, %v8704_v27   ;;  %9478 = vmatprep.mubr.bf16.mxu0 %v11492_v56  ;;  %v8720_v56 = vld [vmem:[%s19134_s10 + $0x1b8] sm:$0xff]  ;;  %v18299_v27 = vpop.permute.xlu1 %7744 }
 0x7b5   : > { %11083 = vmatpush2.bf16.msra.mxu1 %v17912_v32  ;;  %v8708_v32 = vld [vmem:[%s19134_s10 + $0x158] sm:$0xff] }
 0x7b6   : > { %8962 = vperm.xlu1 %11154, %v8711_v5   ;;  %v8727_v5 = vld [vmem:[%s19134_s10 + $0x1f0] sm:$0xff] }
 0x7b7   : > { %8937 = vperm.xlu0 %11153, %v8706_v40   ;;  %v8722_v40 = vld [vmem:[%s19134_s10 + $0x1c8] sm:$0xff] }
 0x7b8   : > { %8336 = vmatmul.mubr.bf16.gmra.mxu1 %v11487_v24  ;;  %9479 = vmatmul.mubr.bf16.gmra.mxu0 %v11490_v28  ;;  %v11511_v24 = vld [vmem:[%s19131_s7 + $0xc0] ss:$8 sps:$4 sm:$0xff]  }
 0x7b9   : > { %8343 = vmatprep.mubr.bf16.mxu1 %v11495_v15  ;;  %9486 = vmatprep.mubr.bf16.mxu0 %v11498_v11  ;;  %v11514_v28 = vld [vmem:[%s19133_s9 + $0xc0] ss:$8 sps:$4 sm:$0xff]   ;;  %v18313_v15 = vpop.permute.xlu0 %7749  ;;  %v11519_v11 = vld [vmem:[%s19131_s7 + $0xd4] ss:$8 sps:$4 sm:$0xff]  }
 0x7ba   : > { %8972 = vperm.xlu1 %11154, %v8713_v17   ;;  %v11522_v17 = vld [vmem:[%s19133_s9 + $0xd4] ss:$8 sps:$4 sm:$0xff]  }
 0x7bb   : > { %8947 = vperm.xlu0 %11153, %v8708_v32   ;;  %v18321_v32 = vpop.permute.xlu1 %7754 }
 0x7be   : > { %8982 = vperm.xlu1 %11154, %v8715_v61   ;;  %v8729_v61 = vld [vmem:[%s19134_s10 + $0x200] sm:$0x1] }
 0x7bf   : > { %8957 = vperm.xlu0 %11153, %v8710_v47   ;;  %v11517_v47 = vld [vmem:[%s19131_s7 + $0xd0] ss:$8 sps:$4 sm:$0xff]  }
 0x7c0   : > { %8344 = vmatmul.mubr.bf16.gmra.mxu1 %v11493_v30  ;;  %9487 = vmatmul.mubr.bf16.gmra.mxu0 %v11496_v49  ;;  %v8724_v30 = vld [vmem:[%s19134_s10 + $0x1d8] sm:$0xff]  ;;  %v18329_v49 = vpop.permute.xlu0 %7759 }
 0x7c1   : > { %8351 = vmatprep.mubr.bf16.mxu1 %v11501_v52  ;;  %9494 = vmatprep.mubr.bf16.mxu0 %v11504_v34  ;;  %v11520_v52 = vld [vmem:[%s19133_s9 + $0xd0] ss:$8 sps:$4 sm:$0xff]   ;;  %v8726_v34 = vld [vmem:[%s19134_s10 + $0x1e8] sm:$0xff] }
 0x7c2   : > { %8992 = vperm.xlu1 %11154, %v8717_v2   ;;  %v18340_v2 = vpop.permute.xlu1 %7764 }
 0x7c3   : > { %8967 = vperm.xlu0 %11153, %v8712_v38   ;;  %v11525_v38 = vld [vmem:[%s19131_s7 + $0xe4] ss:$8 sps:$4 sm:$0xff]  }
 0x7c6   : > { %9002 = vperm.xlu1 %11154, %v8719_v58   ;;  %v11528_v58 = vld [vmem:[%s19133_s9 + $0xe4] ss:$8 sps:$4 sm:$0xff]  }
 0x7c7   : > { %8977 = vperm.xlu0 %11153, %v8714_v12   ;;  %v18353_v12 = vpop.permute.xlu1 %7774 }
 0x7c8   : > { %8352 = vmatmul.mubr.bf16.gmra.mxu1 %v11499_v60  ;;  %9495 = vmatmul.mubr.bf16.gmra.mxu0 %v11502_v8  ;;  %v8728_v60 = vld [vmem:[%s19134_s10 + $0x1f8] sm:$0xff]  ;;  %v18351_v8 = vpop.permute.xlu0 %7769 }
 0x7c9   : > { %8359 = vmatprep.mubr.bf16.mxu1 %v11507_v6  ;;  %9502 = vmatprep.mubr.bf16.mxu0 %v11510_v18  ;;  %v11523_v6 = vld [vmem:[%s19131_s7 + $0xe0] ss:$8 sps:$4 sm:$0xff]  }
 0x7ca   : > { %9012 = vperm.xlu1 %11154, %v8721_v46   ;;  %v11526_v18 = vld [vmem:[%s19133_s9 + $0xe0] ss:$8 sps:$4 sm:$0xff]   ;;  %v11531_v46 = vld [vmem:[%s19131_s7 + $0xf4] ss:$8 sps:$4 sm:$0xff]  }
 0x7cb   : > { %8987 = vperm.xlu0 %11153, %v8716_v41   ;;  %v11534_v41 = vld [vmem:[%s19133_s9 + $0xf4] ss:$8 sps:$4 sm:$0xff]  }
 0x7ce   : > { %9022 = vperm.xlu1 %11154, %v8723_v26   ;;  %v18367_v26 = vpop.permute.xlu0 %7779 }
 0x7cf   : > { %8997 = vperm.xlu0 %11153, %v8718_v4   ;;  %v11532_v4 = vld [vmem:[%s19133_s9 + $0xf0] ss:$8 sps:$4 sm:$0xff]  }
 0x7d0   : > { %8360 = vmatmul.mubr.bf16.gmra.mxu1 %v11505_v57  ;;  %9503 = vmatmul.mubr.bf16.gmra.mxu0 %v11508_v63  ;;  %v18369_v57 = vpop.permute.xlu1 %7784  ;;  %v11529_v63 = vld [vmem:[%s19131_s7 + $0xf0] ss:$8 sps:$4 sm:$0xff]  }
 0x7d1   : > { %8367 = vmatprep.mubr.bf16.mxu1 %v11513_v48  ;;  %9510 = vmatprep.mubr.bf16.mxu0 %v11516_v45  ;;  %v11537_v45 = vld [vmem:[%s19131_s7 + $0x104] ss:$8 sps:$4 sm:$0xff]  }
 0x7d2   : > { %9032 = vperm.xlu1 %11154, %v8725_v1   ;;  %v18377_v48 = vpop.permute.xlu0 %7789  ;;  %v11540_v1 = vld [vmem:[%s19133_s9 + $0x104] ss:$8 sps:$4 sm:$0xff]  }
 0x7d3   : > { %9007 = vperm.xlu0 %11153, %v8720_v56  }
 0x7d4   : > { %v18385_v56 = vpop.permute.xlu1 %7794 }
 0x7d6   : > { %9042 = vperm.xlu1 %11154, %v8727_v5   ;;  %v18387_v5 = vpop.permute.xlu0 %7799 }
 0x7d7   : > { %9017 = vperm.xlu0 %11153, %v8722_v40  }
 0x7d8   : > { %8368 = vmatmul.mubr.bf16.gmra.mxu1 %v11511_v24  ;;  %9511 = vmatmul.mubr.bf16.gmra.mxu0 %v11514_v28  ;;  %v11535_v24 = vld [vmem:[%s19131_s7 + $0x100] ss:$8 sps:$4 sm:$0xff]   ;;  %v18395_v40 = vpop.permute.xlu1 %7804 }
 0x7d9   : > { %8375 = vmatprep.mubr.bf16.mxu1 %v11519_v11  ;;  %9518 = vmatprep.mubr.bf16.mxu0 %v11522_v17  ;;  %v11538_v28 = vld [vmem:[%s19133_s9 + $0x100] ss:$8 sps:$4 sm:$0xff]   ;;  %v11543_v11 = vld [vmem:[%s19131_s7 + $0x114] ss:$8 sps:$4 sm:$0xff]  }
 0x7da   : > { %9052 = vperm.xlu1 %11154, %v8729_v61   ;;  %v11546_v17 = vld [vmem:[%s19133_s9 + $0x114] ss:$8 sps:$4 sm:$0xff]   ;;  %v18403_v61 = vpop.permute.xlu0 %7809 }
 0x7db   : > { %9027 = vperm.xlu0 %11153, %v8724_v30  }
 0x7dc   : > { %v18405_v30 = vpop.permute.xlu1 %7814 }
 0x7df   : > { %9037 = vperm.xlu0 %11153, %v8726_v34   ;;  %v11549_v34 = vld [vmem:[%s19131_s7 + $0x124] ss:$8 sps:$4 sm:$0xff]  }
 0x7e0   : > { %8376 = vmatmul.mubr.bf16.gmra.mxu1 %v11517_v47  ;;  %9519 = vmatmul.mubr.bf16.gmra.mxu0 %v11520_v52  ;;  %v11541_v47 = vld [vmem:[%s19131_s7 + $0x110] ss:$8 sps:$4 sm:$0xff]  }
 0x7e1   : > { %8383 = vmatprep.mubr.bf16.mxu1 %v11525_v38  ;;  %9526 = vmatprep.mubr.bf16.mxu0 %v11528_v58  ;;  %v11544_v52 = vld [vmem:[%s19133_s9 + $0x110] ss:$8 sps:$4 sm:$0xff]   ;;  %v11552_v38 = vld [vmem:[%s19133_s9 + $0x124] ss:$8 sps:$4 sm:$0xff]   ;;  %v18419_v58 = vpop.permute.xlu0 %7819 }
 0x7e3   : > { %9047 = vperm.xlu0 %11153, %v8728_v60   ;;  %v18421_v60 = vpop.permute.xlu1 %7824 }
 0x7e8   : > { %8384 = vmatmul.mubr.bf16.gmra.mxu1 %v11523_v6  ;;  %9527 = vmatmul.mubr.bf16.gmra.mxu0 %v11526_v18  ;;  %v11547_v6 = vld [vmem:[%s19131_s7 + $0x120] ss:$8 sps:$4 sm:$0xff]  }
 0x7e9   : > { %8391 = vmatprep.mubr.bf16.mxu1 %v11531_v46  ;;  %9534 = vmatprep.mubr.bf16.mxu0 %v11534_v41  ;;  %v11550_v18 = vld [vmem:[%s19133_s9 + $0x120] ss:$8 sps:$4 sm:$0xff]   ;;  %v18429_v46 = vpop.permute.xlu0 %7829  ;;  %v11555_v41 = vld [vmem:[%s19131_s7 + $0x134] ss:$8 sps:$4 sm:$0xff]  }
 0x7f0   : > { %8392 = vmatmul.mubr.bf16.gmra.mxu1 %v11529_v63  ;;  %9535 = vmatmul.mubr.bf16.gmra.mxu0 %v11532_v4  ;;  %v11558_v63 = vld [vmem:[%s19133_s9 + $0x134] ss:$8 sps:$4 sm:$0xff]   ;;  %v18437_v4 = vpop.permute.xlu1 %7834 }
 0x7f1   : > { %8399 = vmatprep.mubr.bf16.mxu1 %v11537_v45  ;;  %9542 = vmatprep.mubr.bf16.mxu0 %v11540_v1  ;;  %v18439_v45 = vpop.permute.xlu0 %7839  ;;  %v11553_v1 = vld [vmem:[%s19131_s7 + $0x130] ss:$8 sps:$4 sm:$0xff]  }
 0x7f2   : > { %20134 = vst [vmem:[#allocation76_spill] sm:$0xff] %v18439_v45 }
 0x7f8   : > { %8400 = vmatmul.mubr.bf16.gmra.mxu1 %v11535_v24  ;;  %9543 = vmatmul.mubr.bf16.gmra.mxu0 %v11538_v28  ;;  %v11556_v24 = vld [vmem:[%s19133_s9 + $0x130] ss:$8 sps:$4 sm:$0xff]   ;;  %v18447_v28 = vpop.permute.xlu1 %7844 }
 0x7f9   : > { %8407 = vmatprep.mubr.bf16.mxu1 %v11543_v11  ;;  %9550 = vmatprep.mubr.bf16.mxu0 %v11546_v17  ;;  %20135 = vst [vmem:[#allocation35_spill] sm:$0xff] %v18447_v28  ;;  %v11561_v11 = vld [vmem:[%s19131_s7 + $0x144] ss:$8 sps:$4 sm:$0xff]  }
 0x7fa   : > { %v11564_v17 = vld [vmem:[%s19133_s9 + $0x144] ss:$8 sps:$4 sm:$0xff]  }
 0x800   : > { %8408 = vmatmul.mubr.bf16.gmra.mxu1 %v11541_v47  ;;  %9551 = vmatmul.mubr.bf16.gmra.mxu0 %v11544_v52  ;;  %v18455_v47 = vpop.permute.xlu0 %7849  ;;  %v18457_v52 = vpop.permute.xlu1 %7854 }
 0x801   : > { %8415 = vmatprep.mubr.bf16.mxu1 %v11549_v34  ;;  %9558 = vmatprep.mubr.bf16.mxu0 %v11552_v38  ;;  %20136 = vst [vmem:[#allocation78_spill] sm:$0xff] %v18455_v47  ;;  %20137 = vst [vmem:[#allocation84_spill] sm:$0xff] %v18457_v52  ;;  %v11559_v34 = vld [vmem:[%s19131_s7 + $0x140] ss:$8 sps:$4 sm:$0xff]  }
 0x802   : > { %v11562_v38 = vld [vmem:[%s19133_s9 + $0x140] ss:$8 sps:$4 sm:$0xff]  }
 0x808   : > { %8416 = vmatmul.mubr.bf16.gmra.mxu1 %v11547_v6  ;;  %9559 = vmatmul.mubr.bf16.gmra.mxu0 %v11550_v18  ;;  %v11567_v6 = vld [vmem:[%s19131_s7 + $0x154] ss:$8 sps:$4 sm:$0xff]  }
 0x809   : > { %8423 = vmatprep.mubr.bf16.mxu1 %v11555_v41  ;;  %9566 = vmatprep.mubr.bf16.mxu0 %v11558_v63  ;;  %v11570_v18 = vld [vmem:[%s19133_s9 + $0x154] ss:$8 sps:$4 sm:$0xff]   ;;  %v18471_v41 = vpop.permute.xlu0 %7859  ;;  %v18473_v63 = vpop.permute.xlu1 %7864 }
 0x80a   : > { %20138 = vst [vmem:[#allocation77_spill] sm:$0xff] %v18471_v41  ;;  %20139 = vst [vmem:[#allocation75_spill] sm:$0xff] %v18473_v63 }
 0x810   : > { %8424 = vmatmul.mubr.bf16.gmra.mxu1 %v11553_v1  ;;  %9567 = vmatmul.mubr.bf16.gmra.mxu0 %v11556_v24  ;;  %v11565_v1 = vld [vmem:[%s19131_s7 + $0x150] ss:$8 sps:$4 sm:$0xff]  }
 0x811   : > { %8431 = vmatprep.mubr.bf16.mxu1 %v11561_v11  ;;  %9574 = vmatprep.mubr.bf16.mxu0 %v11564_v17  ;;  %v11568_v24 = vld [vmem:[%s19133_s9 + $0x150] ss:$8 sps:$4 sm:$0xff]   ;;  %v18481_v11 = vpop.permute.xlu0 %7869  ;;  %v11573_v17 = vld [vmem:[%s19131_s7 + $0x164] ss:$8 sps:$4 sm:$0xff]  }
 0x812   : > { %20140 = vst [vmem:[#allocation81_spill] sm:$0xff] %v18481_v11  ;;  %v11574_v11 = vld [vmem:[%s19133_s9 + $0x160] ss:$8 sps:$4 sm:$0xff]  }
 0x818   : > { %8432 = vmatmul.mubr.bf16.gmra.mxu1 %v11559_v34  ;;  %9575 = vmatmul.mubr.bf16.gmra.mxu0 %v11562_v38  ;;  %v11576_v34 = vld [vmem:[%s19133_s9 + $0x164] ss:$8 sps:$4 sm:$0xff]   ;;  %v18489_v38 = vpop.permute.xlu1 %7874 }
 0x819   : > { %8439 = vmatprep.mubr.bf16.mxu1 %v11567_v6  ;;  %9582 = vmatprep.mubr.bf16.mxu0 %v11570_v18  ;;  %20141 = vst [vmem:[#allocation82_spill] sm:$0xff] %v18489_v38  ;;  %v18491_v6 = vpop.permute.xlu0 %7879  ;;  %v11571_v18 = vld [vmem:[%s19131_s7 + $0x160] ss:$8 sps:$4 sm:$0xff]   ;;  %v11579_v38 = vld [vmem:[%s19131_s7 + $0x174] ss:$8 sps:$4 sm:$0xff]  }
 0x81a   : > { %20142 = vst [vmem:[#allocation83_spill] sm:$0xff] %v18491_v6 }
 0x81c   : > { %v18499_v63 = vpop.permute.xlu1 %7884 }
 0x81d   : > { %20143 = vst [vmem:[#allocation85_spill] sm:$0xff] %v18499_v63  ;;  %v11580_v63 = vld [vmem:[%s19133_s9 + $0x170] ss:$8 sps:$4 sm:$0xff]  }
 0x820   : > { %8440 = vmatmul.mubr.bf16.gmra.mxu1 %v11565_v1  ;;  %9583 = vmatmul.mubr.bf16.gmra.mxu0 %v11568_v24  ;;  %v11582_v1 = vld [vmem:[%s19133_s9 + $0x174] ss:$8 sps:$4 sm:$0xff]   ;;  %v18507_v24 = vpop.permute.xlu0 %7889 }
 0x821   : > { %8447 = vmatprep.mubr.bf16.mxu1 %v11573_v17  ;;  %9590 = vmatprep.mubr.bf16.mxu0 %v11576_v34  ;;  %20144 = vst [vmem:[#allocation86_spill] sm:$0xff] %v18507_v24  ;;  %v18509_v17 = vpop.permute.xlu1 %7894  ;;  %v11577_v34 = vld [vmem:[%s19131_s7 + $0x170] ss:$8 sps:$4 sm:$0xff]   ;;  %v11586_v24 = vld [vmem:[%s19133_s9 + $0x180] ss:$8 sps:$4 sm:$0xff]  }
 0x822   : > { %20145 = vst [vmem:[#allocation87_spill] sm:$0xff] %v18509_v17  ;;  %v11583_v17 = vld [vmem:[%s19131_s7 + $0x180] ss:$8 sps:$4 sm:$0xff]  }
 0x828   : > { %8448 = vmatmul.mubr.bf16.gmra.mxu1 %v11571_v18  ;;  %9591 = vmatmul.mubr.bf16.gmra.mxu0 %v11574_v11  ;;  %v11585_v18 = vld [vmem:[%s19131_s7 + $0x184] ss:$8 sps:$4 sm:$0xff]  }
 0x829   : > { %8455 = vmatprep.mubr.bf16.mxu1 %v11579_v38  ;;  %9598 = vmatprep.mubr.bf16.mxu0 %v11582_v1  ;;  %v11588_v11 = vld [vmem:[%s19133_s9 + $0x184] ss:$8 sps:$4 sm:$0xff]   ;;  %v18523_v38 = vpop.permute.xlu0 %7899  ;;  %v18525_v1 = vpop.permute.xlu1 %7904 }
 0x82a   : > { %20146 = vst [vmem:[#allocation88_spill] sm:$0xff] %v18523_v38  ;;  %20147 = vst [vmem:[#allocation45_spill] sm:$0xff] %v18525_v1 }
 0x82d   : > { %v18534_v6 = vpop.permute.xlu0 %7909 }
 0x82e   : > { %20148 = vst [vmem:[#allocation90_spill] sm:$0xff] %v18534_v6 }
 0x830   : > { %8456 = vmatmul.mubr.bf16.gmra.mxu1 %v11577_v34  ;;  %9599 = vmatmul.mubr.bf16.gmra.mxu0 %v11580_v63  ;;  %v11591_v63 = vld [vmem:[%s19131_s7 + $0x194] ss:$8 sps:$4 sm:$0xff]  }
 0x831   : > { %8463 = vmatprep.mubr.bf16.mxu1 %v11585_v18  ;;  %9606 = vmatprep.mubr.bf16.mxu0 %v11588_v11  ;;  %v11594_v34 = vld [vmem:[%s19133_s9 + $0x194] ss:$8 sps:$4 sm:$0xff]   ;;  %v8733_v18 = vpop.permute.xlu1 %8732  ;;  %v8738_v47 = vpop.permute.xlu0 %8737 }
 0x838   : > { %v8273_v11 = vpop.f32.mrf.mxu1  ;;  %8464 = vmatmul.mubr.bf16.gmra.mxu1 %v11583_v17  ;;  %v9416_v1 = vpop.f32.mrf.mxu0  ;;  %9607 = vmatmul.mubr.bf16.gmra.mxu0 %v11586_v24 }
 0x839   : > { %v8274_v38 = vadd.f32 %v8273_v11, %v17927_v14  ;;  %v9417_v41 = vadd.f32 %v9416_v1, %v8733_v18  ;;  %8471 = vmatprep.mubr.bf16.mxu1 %v11591_v63  ;;  %9614 = vmatprep.mubr.bf16.mxu0 %v11594_v34  ;;  %v11589_v14 = vld [vmem:[%s19131_s7 + $0x190] ss:$8 sps:$4 sm:$0xff]   ;;  %v8743_v18 = vpop.permute.xlu1 %8742 }
 0x83a   : > { %v8275_v52 = vpop.f32.mrf.mxu1  ;;  %v9418_v6 = vpop.f32.mrf.mxu0 }
 0x83b   : > { %8535 = vst [vmem:[%s18543_s21] sm:$0xff] %v8274_v38  ;;  %9678 = vst [vmem:[%s18546_s17] sm:$0xff] %v9417_v41  ;;  %v11592_v52 = vld [vmem:[%s19133_s9 + $0x190] ss:$8 sps:$4 sm:$0xff]   ;;  %v11597_v38 = vld [vmem:[%s19131_s7 + $0x1a4] ss:$8 sps:$4 sm:$0xff]  }
 0x83c   : > { %v8276_v17 = vpop.f32.mrf.mxu1  ;;  %v9419_v24 = vpop.f32.mrf.mxu0  ;;  %v11600_v41 = vld [vmem:[%s19133_s9 + $0x1a4] ss:$8 sps:$4 sm:$0xff]  }
 0x83d   : > { %v8277_v6 = vadd.f32 %v8276_v17, %v17935_v0  ;;  %v9420_v1 = vadd.f32 %v9419_v24, %v8738_v47 }
 0x83e   : > { %v8278_v63 = vpop.f32.mrf.mxu1  ;;  %v9421_v34 = vpop.f32.mrf.mxu0 }
 0x83f   : > { %8536 = vst [vmem:[%s18543_s21 + $0x8] sm:$0xff] %v8277_v6  ;;  %9679 = vst [vmem:[%s18546_s17 + $0x8] sm:$0xff] %v9420_v1  ;;  %v8748_v63 = vpop.permute.xlu0 %8747  ;;  %v11603_v6 = vld [vmem:[%s19131_s7 + $0x1b4] ss:$8 sps:$4 sm:$0xff]  }
 0x840   : > { %v8281_v11 = vpop.f32.mrf.mxu1  ;;  %8472 = vmatmul.mubr.bf16.gmra.mxu1 %v11589_v14  ;;  %v9424_v28 = vpop.f32.mrf.mxu0  ;;  %9615 = vmatmul.mubr.bf16.gmra.mxu0 %v11592_v52  ;;  %v11595_v14 = vld [vmem:[%s19131_s7 + $0x1a0] ss:$8 sps:$4 sm:$0xff]   ;;  %v11606_v1 = vld [vmem:[%s19133_s9 + $0x1b4] ss:$8 sps:$4 sm:$0xff]  }
 0x841   : > { %v8282_v0 = vadd.f32 %v8281_v11, %v17948_v55  ;;  %v9425_v47 = vadd.f32 %v9424_v28, %v8743_v18  ;;  %8479 = vmatprep.mubr.bf16.mxu1 %v11597_v38  ;;  %9622 = vmatprep.mubr.bf16.mxu0 %v11600_v41  ;;  %v11598_v55 = vld [vmem:[%s19133_s9 + $0x1a0] ss:$8 sps:$4 sm:$0xff]   ;;  %v8753_v18 = vpop.permute.xlu1 %8752 }
 0x842   : > { %v8283_v17 = vpop.f32.mrf.mxu1  ;;  %v9426_v24 = vpop.f32.mrf.mxu0 }
 0x843   : > { %8537 = vst [vmem:[%s18543_s21 + $0x10] sm:$0xff] %v8282_v0  ;;  %9680 = vst [vmem:[%s18546_s17 + $0x10] sm:$0xff] %v9425_v47  ;;  %v8758_v24 = vpop.permute.xlu0 %8757 }
 0x844   : > { %v8284_v34 = vpop.f32.mrf.mxu1  ;;  %v9427_v45 = vpop.f32.mrf.mxu0 }
 0x845   : > { %v8285_v28 = vadd.f32 %v8284_v34, %v17962_v16  ;;  %v9428_v52 = vadd.f32 %v9427_v45, %v8748_v63 }
 0x846   : > { %v8286_v38 = vpop.f32.mrf.mxu1  ;;  %v9429_v41 = vpop.f32.mrf.mxu0 }
 0x847   : > { %8538 = vst [vmem:[%s18543_s21 + $0x18] sm:$0xff] %v8285_v28  ;;  %9681 = vst [vmem:[%s18546_s17 + $0x18] sm:$0xff] %v9428_v52  ;;  %v11609_v52 = vld [vmem:[%s19131_s7 + $0x1c4] ss:$8 sps:$4 sm:$0xff]   ;;  %v8763_v41 = vpop.permute.xlu1 %8762 }
 0x848   : > { %v8289_v11 = vpop.f32.mrf.mxu1  ;;  %8480 = vmatmul.mubr.bf16.gmra.mxu1 %v11595_v14  ;;  %v9432_v0 = vpop.f32.mrf.mxu0  ;;  %9623 = vmatmul.mubr.bf16.gmra.mxu0 %v11598_v55  ;;  %v11601_v14 = vld [vmem:[%s19131_s7 + $0x1b0] ss:$8 sps:$4 sm:$0xff]  }
 0x849   : > { %v8290_v16 = vadd.f32 %v8289_v11, %v17978_v43  ;;  %v9433_v45 = vadd.f32 %v9432_v0, %v8753_v18  ;;  %8487 = vmatprep.mubr.bf16.mxu1 %v11603_v6  ;;  %9630 = vmatprep.mubr.bf16.mxu0 %v11606_v1  ;;  %v11604_v43 = vld [vmem:[%s19133_s9 + $0x1b0] ss:$8 sps:$4 sm:$0xff]   ;;  %v11612_v6 = vld [vmem:[%s19133_s9 + $0x1c4] ss:$8 sps:$4 sm:$0xff]  }
 0x84a   : > { %v8291_v47 = vpop.f32.mrf.mxu1  ;;  %v9434_v17 = vpop.f32.mrf.mxu0 }
 0x84b   : > { %8539 = vst [vmem:[%s18543_s21 + $0x20] sm:$0xff] %v8290_v16  ;;  %9682 = vst [vmem:[%s18546_s17 + $0x20] sm:$0xff] %v9433_v45  ;;  %v8768_v47 = vpop.permute.xlu0 %8767 }
 0x84c   : > { %v8292_v63 = vpop.f32.mrf.mxu1  ;;  %v9435_v34 = vpop.f32.mrf.mxu0 }
 0x84d   : > { %v8293_v55 = vadd.f32 %v8292_v63, %v17982_v50  ;;  %v9436_v28 = vadd.f32 %v9435_v34, %v8758_v24  ;;  %v11607_v63 = vld [vmem:[%s19131_s7 + $0x1c0] ss:$8 sps:$4 sm:$0xff]  }
 0x84e   : > { %v8294_v1 = vpop.f32.mrf.mxu1  ;;  %v9437_v38 = vpop.f32.mrf.mxu0 }
 0x84f   : > { %8540 = vst [vmem:[%s18543_s21 + $0x28] sm:$0xff] %v8293_v55  ;;  %9683 = vst [vmem:[%s18546_s17 + $0x28] sm:$0xff] %v9436_v28  ;;  %v11618_v55 = vld [vmem:[%s19133_s9 + $0x1d4] ss:$8 sps:$4 sm:$0xff]  }
 0x850   : > { %v8297_v18 = vpop.f32.mrf.mxu1  ;;  %8488 = vmatmul.mubr.bf16.gmra.mxu1 %v11601_v14  ;;  %v9440_v11 = vpop.f32.mrf.mxu0  ;;  %9631 = vmatmul.mubr.bf16.gmra.mxu0 %v11604_v43  ;;  %v11615_v43 = vld [vmem:[%s19131_s7 + $0x1d4] ss:$8 sps:$4 sm:$0xff]  }
 0x851   : > { %v8298_v50 = vadd.f32 %v8297_v18, %v18001_v59  ;;  %v9441_v0 = vadd.f32 %v9440_v11, %v8763_v41  ;;  %8495 = vmatprep.mubr.bf16.mxu1 %v11609_v52  ;;  %9638 = vmatprep.mubr.bf16.mxu0 %v11612_v6  ;;  %v11610_v59 = vld [vmem:[%s19133_s9 + $0x1c0] ss:$8 sps:$4 sm:$0xff]   ;;  %v8773_v6 = vpop.permute.xlu1 %8772 }
 0x852   : > { %v8299_v16 = vpop.f32.mrf.mxu1  ;;  %v9442_v45 = vpop.f32.mrf.mxu0 }
 0x853   : > { %8541 = vst [vmem:[%s18543_s21 + $0x30] sm:$0xff] %v8298_v50  ;;  %9684 = vst [vmem:[%s18546_s17 + $0x30] sm:$0xff] %v9441_v0  ;;  %v8778_v50 = vpop.permute.xlu0 %8777  ;;  %v11613_v45 = vld [vmem:[%s19131_s7 + $0x1d0] ss:$8 sps:$4 sm:$0xff]  }
 0x854   : > { %v8300_v17 = vpop.f32.mrf.mxu1  ;;  %v9443_v24 = vpop.f32.mrf.mxu0 }
 0x855   : > { %v8301_v34 = vadd.f32 %v8300_v17, %v18012_v25  ;;  %v9444_v14 = vadd.f32 %v9443_v24, %v8768_v47  ;;  %v11621_v24 = vld [vmem:[%s19131_s7 + $0x1e4] ss:$8 sps:$4 sm:$0xff]  }
 0x856   : > { %v8302_v28 = vpop.f32.mrf.mxu1  ;;  %v9445_v52 = vpop.f32.mrf.mxu0 }
 0x857   : > { %8542 = vst [vmem:[%s18543_s21 + $0x38] sm:$0xff] %v8301_v34  ;;  %9685 = vst [vmem:[%s18546_s17 + $0x38] sm:$0xff] %v9444_v14  ;;  %v8783_v14 = vpop.permute.xlu1 %8782 }
 0x858   : > { %v8305_v1 = vpop.f32.mrf.mxu1  ;;  %8496 = vmatmul.mubr.bf16.gmra.mxu1 %v11607_v63  ;;  %v9448_v38 = vpop.f32.mrf.mxu0  ;;  %9639 = vmatmul.mubr.bf16.gmra.mxu0 %v11610_v59  ;;  %v11624_v63 = vld [vmem:[%s19133_s9 + $0x1e4] ss:$8 sps:$4 sm:$0xff]  }
 0x859   : > { %v8306_v25 = vadd.f32 %v8305_v1, %v18028_v22  ;;  %v9449_v41 = vadd.f32 %v9448_v38, %v8773_v6  ;;  %8503 = vmatprep.mubr.bf16.mxu1 %v11615_v43  ;;  %9646 = vmatprep.mubr.bf16.mxu0 %v11618_v55  ;;  %v11616_v22 = vld [vmem:[%s19133_s9 + $0x1d0] ss:$8 sps:$4 sm:$0xff]   ;;  %v8788_v1 = vpop.permute.xlu0 %8787 }
 0x85a   : > { %v8307_v18 = vpop.f32.mrf.mxu1  ;;  %v9450_v11 = vpop.f32.mrf.mxu0 }
 0x85b   : > { %8543 = vst [vmem:[%s18543_s21 + $0x40] sm:$0xff] %v8306_v25  ;;  %9686 = vst [vmem:[%s18546_s17 + $0x40] sm:$0xff] %v9449_v41  ;;  %v11619_v41 = vld [vmem:[%s19131_s7 + $0x1e0] ss:$8 sps:$4 sm:$0xff]  }
 0x85c   : > { %v8308_v0 = vpop.f32.mrf.mxu1  ;;  %v9451_v16 = vpop.f32.mrf.mxu0 }
 0x85d   : > { %v8309_v47 = vadd.f32 %v8308_v0, %v18035_v23  ;;  %v9452_v17 = vadd.f32 %v9451_v16, %v8778_v50  ;;  %v11627_v50 = vld [vmem:[%s19131_s7 + $0x1f4] ss:$8 sps:$4 sm:$0xff]  }
 0x85e   : > { %v8310_v59 = vpop.f32.mrf.mxu1  ;;  %v9453_v34 = vpop.f32.mrf.mxu0  ;;  %v11630_v0 = vld [vmem:[%s19133_s9 + $0x1f4] ss:$8 sps:$4 sm:$0xff]  }
 0x85f   : > { %8544 = vst [vmem:[%s18543_s21 + $0x48] sm:$0xff] %v8309_v47  ;;  %9687 = vst [vmem:[%s18546_s17 + $0x48] sm:$0xff] %v9452_v17  ;;  %v7521_v34 = vld [vmem:[%s19131_s7 + $0x200] sm:$0x11] }
 0x860   : > { %v8313_v43 = vpop.f32.mrf.mxu1  ;;  %8504 = vmatmul.mubr.bf16.gmra.mxu1 %v11613_v45  ;;  %v9456_v55 = vpop.f32.mrf.mxu0  ;;  %9647 = vmatmul.mubr.bf16.gmra.mxu0 %v11616_v22 }
 0x861   : > { %v8314_v23 = vadd.f32 %v8313_v43, %v18048_v39  ;;  %v9457_v28 = vadd.f32 %v9456_v55, %v8783_v14  ;;  %8511 = vmatprep.mubr.bf16.mxu1 %v11621_v24  ;;  %9654 = vmatprep.mubr.bf16.mxu0 %v11624_v63  ;;  %v11622_v39 = vld [vmem:[%s19133_s9 + $0x1e0] ss:$8 sps:$4 sm:$0xff]   ;;  %v8793_v22 = vpop.permute.xlu1 %8792  ;;  %v8798_v14 = vpop.permute.xlu0 %8797 }
 0x862   : > { %v8315_v52 = vpop.f32.mrf.mxu1  ;;  %v9458_v6 = vpop.f32.mrf.mxu0 }
 0x863   : > { %8545 = vst [vmem:[%s18543_s21 + $0x50] sm:$0xff] %v8314_v23  ;;  %9688 = vst [vmem:[%s18546_s17 + $0x50] sm:$0xff] %v9457_v28  ;;  %v11628_v23 = vld [vmem:[%s19133_s9 + $0x1f0] ss:$8 sps:$4 sm:$0xff]   ;;  %v10871_v6 = vcombine.high %v7521_v34, %v7521_v34 }
 0x864   : > { %v8316_v38 = vpop.f32.mrf.mxu1  ;;  %v9459_v25 = vpop.f32.mrf.mxu0 }
 0x865   : > { %v8317_v18 = vadd.f32 %v8316_v38, %v18062_v35  ;;  %v9460_v11 = vadd.f32 %v9459_v25, %v8788_v1  ;;  %v8803_v25 = vpop.permute.xlu1 %8802 }
 0x866   : > { %v8318_v16 = vpop.f32.mrf.mxu1  ;;  %v9461_v45 = vpop.f32.mrf.mxu0 }
 0x867   : > { %8546 = vst [vmem:[%s18543_s21 + $0x58] sm:$0xff] %v8317_v18  ;;  %9689 = vst [vmem:[%s18546_s17 + $0x58] sm:$0xff] %v9460_v11  ;;  %v8808_v16 = vpop.permute.xlu0 %8807 }
 0x868   : > { %v8321_v47 = vpop.f32.mrf.mxu1  ;;  %8512 = vmatmul.mubr.bf16.gmra.mxu1 %v11619_v41  ;;  %v9464_v17 = vpop.f32.mrf.mxu0  ;;  %9655 = vmatmul.mubr.bf16.gmra.mxu0 %v11622_v39 }
 0x869   : > { %v8322_v35 = vadd.f32 %v8321_v47, %v18078_v3  ;;  %v9465_v24 = vadd.f32 %v9464_v17, %v8793_v22  ;;  %8519 = vmatprep.mubr.bf16.mxu1 %v11627_v50  ;;  %9662 = vmatprep.mubr.bf16.mxu0 %v11630_v0  ;;  %v11625_v3 = vld [vmem:[%s19131_s7 + $0x1f0] ss:$8 sps:$4 sm:$0xff]   ;;  %v8664_v0 = vld [vmem:[%s19133_s9 + $0x200] sm:$0x11]  ;;  %v10870_v47 = vcombine.low %v7521_v34, %v7521_v34 }
 0x86a   : > { %v8323_v63 = vpop.f32.mrf.mxu1  ;;  %v9466_v59 = vpop.f32.mrf.mxu0 }
 0x86b   : > { %8547 = vst [vmem:[%s18543_s21 + $0x60] sm:$0xff] %v8322_v35  ;;  %9690 = vst [vmem:[%s18546_s17 + $0x60] sm:$0xff] %v9465_v24  ;;  %v8813_v59 = vpop.permute.xlu1 %8812 }
 0x86c   : > { %v8324_v43 = vpop.f32.mrf.mxu1  ;;  %v9467_v55 = vpop.f32.mrf.mxu0 }
 0x86d   : > { %v8325_v28 = vadd.f32 %v8324_v43, %v18082_v19  ;;  %v9468_v52 = vadd.f32 %v9467_v55, %v8798_v14 }
 0x86e   : > { %v8326_v1 = vpop.f32.mrf.mxu1  ;;  %v9469_v38 = vpop.f32.mrf.mxu0 }
 0x86f   : > { %8548 = vst [vmem:[%s18543_s21 + $0x68] sm:$0xff] %v8325_v28  ;;  %9691 = vst [vmem:[%s18546_s17 + $0x68] sm:$0xff] %v9468_v52 }
 0x870   : > { %v8329_v41 = vpop.f32.mrf.mxu1  ;;  %8520 = vmatmul.mubr.bf16.gmra.mxu1 %v11625_v3  ;;  %v9472_v39 = vpop.f32.mrf.mxu0  ;;  %9663 = vmatmul.mubr.bf16.gmra.mxu0 %v11628_v23 }
 0x871   : > { %v8330_v18 = vadd.f32 %v8329_v41, %v18101_v54  ;;  %v9473_v11 = vadd.f32 %v9472_v39, %v8803_v25  ;;  %8527 = vmatprep.mubr.bf16.mxu1 %v10871_v6  ;;  %v10937_v54 = vcombine.high %v8664_v0, %v8664_v0  ;;  %v8818_v23 = vpop.permute.xlu0 %8817  ;;  %v10936_v6 = vcombine.low %v8664_v0, %v8664_v0 }
 0x872   : > { %v8331_v50 = vpop.f32.mrf.mxu1  ;;  %v9474_v19 = vpop.f32.mrf.mxu0 }
 0x873   : > { %8549 = vst [vmem:[%s18543_s21 + $0x70] sm:$0xff] %v8330_v18  ;;  %9692 = vst [vmem:[%s18546_s17 + $0x70] sm:$0xff] %v9473_v11 }
 0x874   : > { %v8332_v45 = vpop.f32.mrf.mxu1  ;;  %v9475_v22 = vpop.f32.mrf.mxu0 }
 0x875   : > { %v8333_v17 = vadd.f32 %v8332_v45, %v18112_v53  ;;  %v9476_v35 = vadd.f32 %v9475_v22, %v8808_v16  ;;  %v8828_v16 = vpop.permute.xlu0 %8827 }
 0x876   : > { %v8334_v24 = vpop.f32.mrf.mxu1  ;;  %v9477_v63 = vpop.f32.mrf.mxu0 }
 0x877   : > { %8550 = vst [vmem:[%s18543_s21 + $0x78] sm:$0xff] %v8333_v17  ;;  %9693 = vst [vmem:[%s18546_s17 + $0x78] sm:$0xff] %v9476_v35 }
 0x878   : > { %v8337_v14 = vpop.f32.mrf.mxu1  ;;  %8528 = vmatmul.mubr.bf16.gmra.mxu1 %v10870_v47  ;;  %v9480_v43 = vpop.f32.mrf.mxu0 }
 0x879   : > { %v8338_v55 = vadd.f32 %v8337_v14, %v18128_v33  ;;  %v9481_v3 = vadd.f32 %v9480_v43, %v8813_v59  ;;  %9670 = vmatprep.mubr.bf16.mxu1 %v10937_v54  ;;  %v8823_v33 = vpop.permute.xlu1 %8822 }
 0x87a   : > { %v8339_v34 = vpop.f32.mrf.mxu1  ;;  %v9482_v53 = vpop.f32.mrf.mxu0 }
 0x87b   : > { %8551 = vst [vmem:[%s18543_s21 + $0x80] sm:$0xff] %v8338_v55  ;;  %9694 = vst [vmem:[%s18546_s17 + $0x80] sm:$0xff] %v9481_v3  ;;  %v8838_v55 = vpop.permute.xlu0 %8837 }
 0x87c   : > { %v8340_v28 = vpop.f32.mrf.mxu1  ;;  %v9483_v52 = vpop.f32.mrf.mxu0 }
 0x87d   : > { %v8341_v1 = vadd.f32 %v8340_v28, %v18135_v31  ;;  %v9484_v38 = vadd.f32 %v9483_v52, %v8818_v23  ;;  %v8833_v54 = vpop.permute.xlu1 %8832 }
 0x87e   : > { %v8342_v25 = vpop.f32.mrf.mxu1  ;;  %v9485_v41 = vpop.f32.mrf.mxu0 }
 0x87f   : > { %8552 = vst [vmem:[%s18543_s21 + $0x88] sm:$0xff] %v8341_v1  ;;  %9695 = vst [vmem:[%s18546_s17 + $0x88] sm:$0xff] %v9484_v38 }
 0x880   : > { %v8345_v39 = vpop.f32.mrf.mxu1  ;;  %v9488_v18 = vpop.f32.mrf.mxu0  ;;  %9671 = vmatmul.mubr.bf16.vlgmr.msra.gmra.mxu1 %v10936_v6 }
 0x881   : > { %v8346_v11 = vadd.f32 %v8345_v39, %v18148_v37  ;;  %v9489_v50 = vadd.f32 %v9488_v18, %v8823_v33  ;;  %v8843_v52 = vpop.permute.xlu1 %8842  ;;  %v8848_v33 = vpop.permute.xlu0 %8847 }
 0x882   : > { %v8347_v19 = vpop.f32.mrf.mxu1  ;;  %v9490_v0 = vpop.f32.mrf.mxu0 }
 0x883   : > { %8553 = vst [vmem:[%s18543_s21 + $0x90] sm:$0xff] %v8346_v11  ;;  %9696 = vst [vmem:[%s18546_s17 + $0x90] sm:$0xff] %v9489_v50 }
 0x884   : > { %v8348_v31 = vpop.f32.mrf.mxu1  ;;  %v9491_v45 = vpop.f32.mrf.mxu0 }
 0x885   : > { %v8349_v22 = vadd.f32 %v8348_v31, %v18162_v29  ;;  %v9492_v47 = vadd.f32 %v9491_v45, %v8828_v16  ;;  %v8853_v0 = vpop.permute.xlu1 %8852 }
 0x886   : > { %v8350_v17 = vpop.f32.mrf.mxu1  ;;  %v9493_v35 = vpop.f32.mrf.mxu0 }
 0x887   : > { %8554 = vst [vmem:[%s18543_s21 + $0x98] sm:$0xff] %v8349_v22  ;;  %9697 = vst [vmem:[%s18546_s17 + $0x98] sm:$0xff] %v9492_v47  ;;  %v8858_v17 = vpop.permute.xlu0 %8857 }
 0x888   : > { %v8353_v24 = vpop.f32.mrf.mxu1  ;;  %v9496_v37 = vpop.f32.mrf.mxu0 }
 0x889   : > { %v8354_v63 = vadd.f32 %v8353_v24, %v18178_v7  ;;  %v9497_v59 = vadd.f32 %v9496_v37, %v8833_v54 }
 0x88a   : > { %v8355_v14 = vpop.f32.mrf.mxu1  ;;  %v9498_v43 = vpop.f32.mrf.mxu0 }
 0x88b   : > { %8555 = vst [vmem:[%s18543_s21 + $0xa0] sm:$0xff] %v8354_v63  ;;  %9698 = vst [vmem:[%s18546_s17 + $0xa0] sm:$0xff] %v9497_v59  ;;  %v8863_v59 = vpop.permute.xlu1 %8862 }
 0x88c   : > { %v8356_v3 = vpop.f32.mrf.mxu1  ;;  %v9499_v29 = vpop.f32.mrf.mxu0 }
 0x88d   : > { %v8357_v34 = vadd.f32 %v8356_v3, %v18182_v42  ;;  %v9500_v53 = vadd.f32 %v9499_v29, %v8838_v55 }
 0x88e   : > { %v8358_v23 = vpop.f32.mrf.mxu1  ;;  %v9501_v28 = vpop.f32.mrf.mxu0 }
 0x88f   : > { %8556 = vst [vmem:[%s18543_s21 + $0xa8] sm:$0xff] %v8357_v34  ;;  %9699 = vst [vmem:[%s18546_s17 + $0xa8] sm:$0xff] %v9500_v53  ;;  %v8868_v34 = vpop.permute.xlu0 %8867 }
 0x890   : > { %v8361_v6 = vpop.f32.mrf.mxu1  ;;  %v9504_v7 = vpop.f32.mrf.mxu0 }
 0x891   : > { %v8362_v1 = vadd.f32 %v8361_v6, %v18203_v36  ;;  %v9505_v38 = vadd.f32 %v9504_v7, %v8843_v52  ;;  %v8873_v7 = vpop.permute.xlu1 %8872 }
 0x892   : > { %v8363_v25 = vpop.f32.mrf.mxu1  ;;  %v9506_v41 = vpop.f32.mrf.mxu0 }
 0x893   : > { %8557 = vst [vmem:[%s18543_s21 + $0xb0] sm:$0xff] %v8362_v1  ;;  %9700 = vst [vmem:[%s18546_s17 + $0xb0] sm:$0xff] %v9505_v38 }
 0x894   : > { %v8364_v39 = vpop.f32.mrf.mxu1  ;;  %v9507_v42 = vpop.f32.mrf.mxu0 }
 0x895   : > { %v8365_v18 = vadd.f32 %v8364_v39, %v18211_v51  ;;  %v9508_v11 = vadd.f32 %v9507_v42, %v8848_v33  ;;  %v8878_v39 = vpop.permute.xlu0 %8877 }
 0x896   : > { %v8366_v50 = vpop.f32.mrf.mxu1  ;;  %v9509_v19 = vpop.f32.mrf.mxu0 }
 0x897   : > { %8558 = vst [vmem:[%s18543_s21 + $0xb8] sm:$0xff] %v8365_v18  ;;  %9701 = vst [vmem:[%s18546_s17 + $0xb8] sm:$0xff] %v9508_v11 }
 0x898   : > { %v8369_v16 = vpop.f32.mrf.mxu1  ;;  %v9512_v36 = vpop.f32.mrf.mxu0 }
 0x899   : > { %v8370_v31 = vadd.f32 %v8369_v16, %v18225_v9  ;;  %v9513_v45 = vadd.f32 %v9512_v36, %v8853_v0  ;;  %v8883_v0 = vpop.permute.xlu1 %8882 }
 0x89a   : > { %v8371_v22 = vpop.f32.mrf.mxu1  ;;  %v9514_v47 = vpop.f32.mrf.mxu0 }
 0x89b   : > { %8559 = vst [vmem:[%s18543_s21 + $0xc0] sm:$0xff] %v8370_v31  ;;  %9702 = vst [vmem:[%s18546_s17 + $0xc0] sm:$0xff] %v9513_v45  ;;  %v8888_v47 = vpop.permute.xlu0 %8887 }
 0x89c   : > { %v8372_v35 = vpop.f32.mrf.mxu1  ;;  %v9515_v51 = vpop.f32.mrf.mxu0 }
 0x89d   : > { %v8373_v54 = vadd.f32 %v8372_v35, %v18233_v62  ;;  %v9516_v24 = vadd.f32 %v9515_v51, %v8858_v17 }
 0x89e   : > { %v8374_v37 = vpop.f32.mrf.mxu1  ;;  %v9517_v63 = vpop.f32.mrf.mxu0 }
 0x89f   : > { %8560 = vst [vmem:[%s18543_s21 + $0xc8] sm:$0xff] %v8373_v54  ;;  %9703 = vst [vmem:[%s18546_s17 + $0xc8] sm:$0xff] %v9516_v24  ;;  %v8893_v37 = vpop.permute.xlu1 %8892 }
 0x8a0   : > { %v8377_v14 = vpop.f32.mrf.mxu1  ;;  %v9520_v9 = vpop.f32.mrf.mxu0 }
 0x8a1   : > { %v8378_v43 = vadd.f32 %v8377_v14, %v18241_v44  ;;  %v9521_v55 = vadd.f32 %v9520_v9, %v8863_v59 }
 0x8a2   : > { %v8379_v3 = vpop.f32.mrf.mxu1  ;;  %v9522_v29 = vpop.f32.mrf.mxu0 }
 0x8a3   : > { %8561 = vst [vmem:[%s18543_s21 + $0xd0] sm:$0xff] %v8378_v43  ;;  %9704 = vst [vmem:[%s18546_s17 + $0xd0] sm:$0xff] %v9521_v55  ;;  %v8898_v55 = vpop.permute.xlu0 %8897 }
 0x8a4   : > { %v8380_v53 = vpop.f32.mrf.mxu1  ;;  %v9523_v62 = vpop.f32.mrf.mxu0 }
 0x8a5   : > { %v8381_v23 = vadd.f32 %v8380_v53, %v18255_v13  ;;  %v9524_v28 = vadd.f32 %v9523_v62, %v8868_v34 }
 0x8a6   : > { %v8382_v52 = vpop.f32.mrf.mxu1  ;;  %v9525_v6 = vpop.f32.mrf.mxu0 }
 0x8a7   : > { %8562 = vst [vmem:[%s18543_s21 + $0xd8] sm:$0xff] %v8381_v23  ;;  %9705 = vst [vmem:[%s18546_s17 + $0xd8] sm:$0xff] %v9524_v28  ;;  %v8903_v23 = vpop.permute.xlu1 %8902 }
 0x8a8   : > { %v8385_v1 = vpop.f32.mrf.mxu1  ;;  %v9528_v44 = vpop.f32.mrf.mxu0 }
 0x8a9   : > { %v8386_v38 = vadd.f32 %v8385_v1, %v18269_v10  ;;  %v9529_v25 = vadd.f32 %v9528_v44, %v8873_v7  ;;  %v8908_v44 = vpop.permute.xlu0 %8907 }
 0x8aa   : > { %v8387_v41 = vpop.f32.mrf.mxu1  ;;  %v9530_v33 = vpop.f32.mrf.mxu0 }
 0x8ab   : > { %8563 = vst [vmem:[%s18543_s21 + $0xe0] sm:$0xff] %v8386_v38  ;;  %9706 = vst [vmem:[%s18546_s17 + $0xe0] sm:$0xff] %v9529_v25 }
 0x8ac   : > { %v8388_v42 = vpop.f32.mrf.mxu1  ;;  %v9531_v13 = vpop.f32.mrf.mxu0 }
 0x8ad   : > { %v8389_v18 = vadd.f32 %v8388_v42, %v18271_v21  ;;  %v9532_v11 = vadd.f32 %v9531_v13, %v8878_v39  ;;  %v8913_v42 = vpop.permute.xlu1 %8912 }
 0x8ae   : > { %v8390_v50 = vpop.f32.mrf.mxu1  ;;  %v9533_v19 = vpop.f32.mrf.mxu0 }
 0x8af   : > { %8564 = vst [vmem:[%s18543_s21 + $0xe8] sm:$0xff] %v8389_v18  ;;  %9707 = vst [vmem:[%s18546_s17 + $0xe8] sm:$0xff] %v9532_v11 }
 0x8b0   : > { %v8393_v16 = vpop.f32.mrf.mxu1  ;;  %v9536_v10 = vpop.f32.mrf.mxu0 }
 0x8b1   : > { %v8394_v36 = vadd.f32 %v8393_v16, %v18291_v20  ;;  %v9537_v31 = vadd.f32 %v9536_v10, %v8883_v0  ;;  %v8918_v0 = vpop.permute.xlu0 %8917 }
 0x8b2   : > { %v8395_v45 = vpop.f32.mrf.mxu1  ;;  %v9538_v22 = vpop.f32.mrf.mxu0 }
 0x8b3   : > { %8565 = vst [vmem:[%s18543_s21 + $0xf0] sm:$0xff] %v8394_v36  ;;  %9708 = vst [vmem:[%s18546_s17 + $0xf0] sm:$0xff] %v9537_v31  ;;  %v8923_v22 = vpop.permute.xlu1 %8922 }
 0x8b4   : > { %v8396_v17 = vpop.f32.mrf.mxu1  ;;  %v9539_v21 = vpop.f32.mrf.mxu0 }
 0x8b5   : > { %v8397_v35 = vadd.f32 %v8396_v17, %v18299_v27  ;;  %v9540_v51 = vadd.f32 %v9539_v21, %v8888_v47 }
 0x8b6   : > { %v8398_v54 = vpop.f32.mrf.mxu1  ;;  %v9541_v24 = vpop.f32.mrf.mxu0 }
 0x8b7   : > { %8566 = vst [vmem:[%s18543_s21 + $0xf8] sm:$0xff] %v8397_v35  ;;  %9709 = vst [vmem:[%s18546_s17 + $0xf8] sm:$0xff] %v9540_v51  ;;  %v8928_v54 = vpop.permute.xlu0 %8927 }
 0x8b8   : > { %v8401_v63 = vpop.f32.mrf.mxu1  ;;  %v9544_v20 = vpop.f32.mrf.mxu0 }
 0x8b9   : > { %v8402_v59 = vadd.f32 %v8401_v63, %v18313_v15  ;;  %v9545_v14 = vadd.f32 %v9544_v20, %v8893_v37 }
 0x8ba   : > { %v8403_v9 = vpop.f32.mrf.mxu1  ;;  %v9546_v43 = vpop.f32.mrf.mxu0 }
 0x8bb   : > { %8567 = vst [vmem:[%s18543_s21 + $0x100] sm:$0xff] %v8402_v59  ;;  %9710 = vst [vmem:[%s18546_s17 + $0x100] sm:$0xff] %v9545_v14  ;;  %v8933_v14 = vpop.permute.xlu1 %8932 }
 0x8bc   : > { %v8404_v3 = vpop.f32.mrf.mxu1  ;;  %v9547_v27 = vpop.f32.mrf.mxu0 }
 0x8bd   : > { %v8405_v29 = vadd.f32 %v8404_v3, %v18321_v32  ;;  %v9548_v34 = vadd.f32 %v9547_v27, %v8898_v55 }
 0x8be   : > { %v8406_v53 = vpop.f32.mrf.mxu1  ;;  %v9549_v62 = vpop.f32.mrf.mxu0 }
 0x8bf   : > { %8568 = vst [vmem:[%s18543_s21 + $0x108] sm:$0xff] %v8405_v29  ;;  %9711 = vst [vmem:[%s18546_s17 + $0x108] sm:$0xff] %v9548_v34  ;;  %v8938_v29 = vpop.permute.xlu0 %8937 }
 0x8c0   : > { %v8409_v28 = vpop.f32.mrf.mxu1  ;;  %v9552_v15 = vpop.f32.mrf.mxu0 }
 0x8c1   : > { %v8410_v52 = vadd.f32 %v8409_v28, %v18329_v49  ;;  %v9553_v6 = vadd.f32 %v9552_v15, %v8903_v23  ;;  %v8943_v15 = vpop.permute.xlu1 %8942 }
 0x8c2   : > { %v8411_v7 = vpop.f32.mrf.mxu1  ;;  %v9554_v1 = vpop.f32.mrf.mxu0 }
 0x8c3   : > { %8569 = vst [vmem:[%s18543_s21 + $0x110] sm:$0xff] %v8410_v52  ;;  %9712 = vst [vmem:[%s18546_s17 + $0x110] sm:$0xff] %v9553_v6 }
 0x8c4   : > { %v8412_v38 = vpop.f32.mrf.mxu1  ;;  %v9555_v32 = vpop.f32.mrf.mxu0 }
 0x8c5   : > { %v8413_v25 = vadd.f32 %v8412_v38, %v18340_v2  ;;  %v9556_v41 = vadd.f32 %v9555_v32, %v8908_v44  ;;  %v8948_v38 = vpop.permute.xlu0 %8947 }
 0x8c6   : > { %v8414_v33 = vpop.f32.mrf.mxu1  ;;  %v9557_v39 = vpop.f32.mrf.mxu0 }
 0x8c7   : > { %8570 = vst [vmem:[%s18543_s21 + $0x118] sm:$0xff] %v8413_v25  ;;  %9713 = vst [vmem:[%s18546_s17 + $0x118] sm:$0xff] %v9556_v41 }
 0x8c8   : > { %v8417_v13 = vpop.f32.mrf.mxu1  ;;  %v9560_v49 = vpop.f32.mrf.mxu0 }
 0x8c9   : > { %v8418_v18 = vadd.f32 %v8417_v13, %v18351_v8  ;;  %v9561_v11 = vadd.f32 %v9560_v49, %v8913_v42  ;;  %v8953_v42 = vpop.permute.xlu1 %8952 }
 0x8ca   : > { %v8419_v50 = vpop.f32.mrf.mxu1  ;;  %v9562_v19 = vpop.f32.mrf.mxu0 }
 0x8cb   : > { %8571 = vst [vmem:[%s18543_s21 + $0x120] sm:$0xff] %v8418_v18  ;;  %9714 = vst [vmem:[%s18546_s17 + $0x120] sm:$0xff] %v9561_v11  ;;  %v8958_v19 = vpop.permute.xlu0 %8957 }
 0x8cc   : > { %v8420_v16 = vpop.f32.mrf.mxu1  ;;  %v9563_v2 = vpop.f32.mrf.mxu0 }
 0x8cd   : > { %v8421_v10 = vadd.f32 %v8420_v16, %v18353_v12  ;;  %v9564_v36 = vadd.f32 %v9563_v2, %v8918_v0 }
 0x8ce   : > { %v8422_v31 = vpop.f32.mrf.mxu1  ;;  %v9565_v45 = vpop.f32.mrf.mxu0 }
 0x8cf   : > { %8572 = vst [vmem:[%s18543_s21 + $0x128] sm:$0xff] %v8421_v10  ;;  %9715 = vst [vmem:[%s18546_s17 + $0x128] sm:$0xff] %v9564_v36  ;;  %v8963_v31 = vpop.permute.xlu1 %8962 }
 0x8d0   : > { %v8425_v47 = vpop.f32.mrf.mxu1  ;;  %v9568_v8 = vpop.f32.mrf.mxu0 }
 0x8d1   : > { %v8426_v17 = vadd.f32 %v8425_v47, %v18367_v26  ;;  %v9569_v21 = vadd.f32 %v9568_v8, %v8923_v22 }
 0x8d2   : > { %v8427_v35 = vpop.f32.mrf.mxu1  ;;  %v9570_v51 = vpop.f32.mrf.mxu0 }
 0x8d3   : > { %8573 = vst [vmem:[%s18543_s21 + $0x130] sm:$0xff] %v8426_v17  ;;  %9716 = vst [vmem:[%s18546_s17 + $0x130] sm:$0xff] %v9569_v21  ;;  %v8968_v21 = vpop.permute.xlu0 %8967 }
 0x8d4   : > { %v8428_v24 = vpop.f32.mrf.mxu1  ;;  %v9571_v12 = vpop.f32.mrf.mxu0 }
 0x8d5   : > { %v8429_v37 = vadd.f32 %v8428_v24, %v18369_v57  ;;  %v9572_v63 = vadd.f32 %v9571_v12, %v8928_v54 }
 0x8d6   : > { %v8430_v20 = vpop.f32.mrf.mxu1  ;;  %v9573_v59 = vpop.f32.mrf.mxu0 }
 0x8d7   : > { %8574 = vst [vmem:[%s18543_s21 + $0x138] sm:$0xff] %v8429_v37  ;;  %9717 = vst [vmem:[%s18546_s17 + $0x138] sm:$0xff] %v9572_v63  ;;  %v8973_v37 = vpop.permute.xlu1 %8972 }
 0x8d8   : > { %v8433_v9 = vpop.f32.mrf.mxu1  ;;  %v9576_v26 = vpop.f32.mrf.mxu0 }
 0x8d9   : > { %v8434_v43 = vadd.f32 %v8433_v9, %v18377_v48  ;;  %v9577_v55 = vadd.f32 %v9576_v26, %v8933_v14  ;;  %v8978_v26 = vpop.permute.xlu0 %8977 }
 0x8da   : > { %v8435_v3 = vpop.f32.mrf.mxu1  ;;  %v9578_v27 = vpop.f32.mrf.mxu0 }
 0x8db   : > { %8575 = vst [vmem:[%s18543_s21 + $0x140] sm:$0xff] %v8434_v43  ;;  %9718 = vst [vmem:[%s18546_s17 + $0x140] sm:$0xff] %v9577_v55 }
 0x8dc   : > { %v8436_v34 = vpop.f32.mrf.mxu1  ;;  %v9579_v57 = vpop.f32.mrf.mxu0 }
 0x8dd   : > { %v8437_v53 = vadd.f32 %v8436_v34, %v18385_v56  ;;  %v9580_v62 = vadd.f32 %v9579_v57, %v8938_v29  ;;  %v8983_v34 = vpop.permute.xlu1 %8982 }
 0x8de   : > { %v8438_v23 = vpop.f32.mrf.mxu1  ;;  %v9581_v28 = vpop.f32.mrf.mxu0 }
 0x8df   : > { %8576 = vst [vmem:[%s18543_s21 + $0x148] sm:$0xff] %v8437_v53  ;;  %9719 = vst [vmem:[%s18546_s17 + $0x148] sm:$0xff] %v9580_v62  ;;  %v20149_v53 = vld [vmem:[#allocation76_spill] sm:$0xff] }
 0x8e0   : > { %v8441_v52 = vpop.f32.mrf.mxu1  ;;  %v9584_v48 = vpop.f32.mrf.mxu0 }
 0x8e1   : > { %v8442_v6 = vadd.f32 %v8441_v52, %v18387_v5  ;;  %v9585_v7 = vadd.f32 %v9584_v48, %v8943_v15  ;;  %v8988_v52 = vpop.permute.xlu0 %8987 }
 0x8e2   : > { %v8443_v1 = vpop.f32.mrf.mxu1  ;;  %v9586_v44 = vpop.f32.mrf.mxu0 }
 0x8e3   : > { %8577 = vst [vmem:[%s18543_s21 + $0x150] sm:$0xff] %v8442_v6  ;;  %9720 = vst [vmem:[%s18546_s17 + $0x150] sm:$0xff] %v9585_v7  ;;  %v20150_v6 = vld [vmem:[#allocation35_spill] sm:$0xff] }
 0x8e4   : > { %v8444_v32 = vpop.f32.mrf.mxu1  ;;  %v9587_v56 = vpop.f32.mrf.mxu0 }
 0x8e5   : > { %v8445_v25 = vadd.f32 %v8444_v32, %v18395_v40  ;;  %v9588_v41 = vadd.f32 %v9587_v56, %v8948_v38  ;;  %v8993_v32 = vpop.permute.xlu1 %8992 }
 0x8e6   : > { %v8446_v33 = vpop.f32.mrf.mxu1  ;;  %v9589_v39 = vpop.f32.mrf.mxu0 }
 0x8e7   : > { %8578 = vst [vmem:[%s18543_s21 + $0x158] sm:$0xff] %v8445_v25  ;;  %9721 = vst [vmem:[%s18546_s17 + $0x158] sm:$0xff] %v9588_v41  ;;  %v20151_v41 = vld [vmem:[#allocation78_spill] sm:$0xff] }
 0x8e8   : > { %v8449_v13 = vpop.f32.mrf.mxu1  ;;  %v9592_v5 = vpop.f32.mrf.mxu0 }
 0x8e9   : > { %v8450_v49 = vadd.f32 %v8449_v13, %v18403_v61  ;;  %v9593_v18 = vadd.f32 %v9592_v5, %v8953_v42  ;;  %v8998_v5 = vpop.permute.xlu0 %8997 }
 0x8ea   : > { %v8451_v11 = vpop.f32.mrf.mxu1  ;;  %v9594_v50 = vpop.f32.mrf.mxu0 }
 0x8eb   : > { %8579 = vst [vmem:[%s18543_s21 + $0x160] sm:$0xff] %v8450_v49  ;;  %9722 = vst [vmem:[%s18546_s17 + $0x160] sm:$0xff] %v9593_v18  ;;  %v20152_v11 = vld [vmem:[#allocation84_spill] sm:$0xff] }
 0x8ec   : > { %v8452_v0 = vpop.f32.mrf.mxu1  ;;  %v9595_v40 = vpop.f32.mrf.mxu0 }
 0x8ed   : > { %v8453_v16 = vadd.f32 %v8452_v0, %v18405_v30  ;;  %v9596_v2 = vadd.f32 %v9595_v40, %v8958_v19 }
 0x8ee   : > { %v8454_v10 = vpop.f32.mrf.mxu1  ;;  %v9597_v36 = vpop.f32.mrf.mxu0 }
 0x8ef   : > { %8580 = vst [vmem:[%s18543_s21 + $0x168] sm:$0xff] %v8453_v16  ;;  %9723 = vst [vmem:[%s18546_s17 + $0x168] sm:$0xff] %v9596_v2  ;;  %v9003_v16 = vpop.permute.xlu1 %9002  ;;  %v20153_v36 = vld [vmem:[#allocation77_spill] sm:$0xff] }
 0x8f0   : > { %v8457_v45 = vpop.f32.mrf.mxu1  ;;  %v9600_v61 = vpop.f32.mrf.mxu0 }
 0x8f1   : > { %v8458_v22 = vadd.f32 %v8457_v45, %v18419_v58  ;;  %v9601_v47 = vadd.f32 %v9600_v61, %v8963_v31 }
 0x8f2   : > { %v8459_v8 = vpop.f32.mrf.mxu1  ;;  %v9602_v17 = vpop.f32.mrf.mxu0 }
 0x8f3   : > { %8581 = vst [vmem:[%s18543_s21 + $0x170] sm:$0xff] %v8458_v22  ;;  %9724 = vst [vmem:[%s18546_s17 + $0x170] sm:$0xff] %v9601_v47  ;;  %v9008_v47 = vpop.permute.xlu0 %9007 }
 0x8f4   : > { %v8460_v35 = vpop.f32.mrf.mxu1  ;;  %v9603_v30 = vpop.f32.mrf.mxu0 }
 0x8f5   : > { %v8461_v51 = vadd.f32 %v8460_v35, %v18421_v60  ;;  %v9604_v54 = vadd.f32 %v9603_v30, %v8968_v21  ;;  %v20154_v21 = vld [vmem:[#allocation75_spill] sm:$0xff] }
 0x8f6   : > { %v8462_v24 = vpop.f32.mrf.mxu1  ;;  %v9605_v12 = vpop.f32.mrf.mxu0 }
 0x8f7   : > { %8582 = vst [vmem:[%s18543_s21 + $0x178] sm:$0xff] %v8461_v51  ;;  %9725 = vst [vmem:[%s18546_s17 + $0x178] sm:$0xff] %v9604_v54  ;;  %v9013_v24 = vpop.permute.xlu1 %9012 }
 0x8f8   : > { %v8465_v63 = vpop.f32.mrf.mxu1  ;;  %v9608_v58 = vpop.f32.mrf.mxu0 }
 0x8f9   : > { %v8466_v20 = vadd.f32 %v8465_v63, %v18429_v46  ;;  %v9609_v59 = vadd.f32 %v9608_v58, %v8973_v37  ;;  %v20155_v63 = vld [vmem:[#allocation81_spill] sm:$0xff] }
 0x8fa   : > { %v8467_v14 = vpop.f32.mrf.mxu1  ;;  %v9610_v9 = vpop.f32.mrf.mxu0 }
 0x8fb   : > { %8583 = vst [vmem:[%s18543_s21 + $0x180] sm:$0xff] %v8466_v20  ;;  %9726 = vst [vmem:[%s18546_s17 + $0x180] sm:$0xff] %v9609_v59  ;;  %v9018_v9 = vpop.permute.xlu0 %9017 }
 0x8fc   : > { %v8468_v43 = vpop.f32.mrf.mxu1  ;;  %v9611_v60 = vpop.f32.mrf.mxu0 }
 0x8fd   : > { %v8469_v55 = vadd.f32 %v8468_v43, %v18437_v4  ;;  %v9612_v3 = vadd.f32 %v9611_v60, %v8978_v26  ;;  %v20156_v60 = vld [vmem:[#allocation82_spill] sm:$0xff] }
 0x8fe   : > { %v8470_v27 = vpop.f32.mrf.mxu1  ;;  %v9613_v29 = vpop.f32.mrf.mxu0 }
 0x8ff   : > { %8584 = vst [vmem:[%s18543_s21 + $0x188] sm:$0xff] %v8469_v55  ;;  %9727 = vst [vmem:[%s18546_s17 + $0x188] sm:$0xff] %v9612_v3 }
 0x900   : > { %v8473_v57 = vpop.f32.mrf.mxu1  ;;  %v9616_v46 = vpop.f32.mrf.mxu0 }
 0x901   : > { %v8474_v62 = vadd.f32 %v8473_v57, %v20149_v53  ;;  %v9617_v23 = vadd.f32 %v9616_v46, %v8983_v34  ;;  %v9023_v34 = vpop.permute.xlu1 %9022  ;;  %v20157_v53 = vld [vmem:[#allocation83_spill] sm:$0xff] }
 0x902   : > { %v8475_v28 = vpop.f32.mrf.mxu1  ;;  %v9618_v15 = vpop.f32.mrf.mxu0 }
 0x903   : > { %8585 = vst [vmem:[%s18543_s21 + $0x190] sm:$0xff] %v8474_v62  ;;  %9728 = vst [vmem:[%s18546_s17 + $0x190] sm:$0xff] %v9617_v23 }
 0x904   : > { %v8476_v48 = vpop.f32.mrf.mxu1  ;;  %v9619_v4 = vpop.f32.mrf.mxu0 }
 0x905   : > { %v8477_v7 = vadd.f32 %v8476_v48, %v20150_v6  ;;  %v9620_v1 = vadd.f32 %v9619_v4, %v8988_v52  ;;  %v9028_v52 = vpop.permute.xlu0 %9027  ;;  %v20158_v6 = vld [vmem:[#allocation85_spill] sm:$0xff] }
 0x906   : > { %v8478_v44 = vpop.f32.mrf.mxu1  ;;  %v9621_v38 = vpop.f32.mrf.mxu0 }
 0x907   : > { %8586 = vst [vmem:[%s18543_s21 + $0x198] sm:$0xff] %v8477_v7  ;;  %9729 = vst [vmem:[%s18546_s17 + $0x198] sm:$0xff] %v9620_v1 }
 0x908   : > { %v8481_v56 = vpop.f32.mrf.mxu1  ;;  %v9624_v25 = vpop.f32.mrf.mxu0 }
 0x909   : > { %v8482_v33 = vadd.f32 %v8481_v56, %v20151_v41  ;;  %v9625_v39 = vadd.f32 %v9624_v25, %v8993_v32  ;;  %v9033_v32 = vpop.permute.xlu1 %9032  ;;  %v20159_v41 = vld [vmem:[#allocation86_spill] sm:$0xff] }
 0x90a   : > { %v8483_v42 = vpop.f32.mrf.mxu1  ;;  %v9626_v13 = vpop.f32.mrf.mxu0 }
 0x90b   : > { %8587 = vst [vmem:[%s18543_s21 + $0x1a0] sm:$0xff] %v8482_v33  ;;  %9730 = vst [vmem:[%s18546_s17 + $0x1a0] sm:$0xff] %v9625_v39 }
 0x90c   : > { %v8484_v49 = vpop.f32.mrf.mxu1  ;;  %v9627_v18 = vpop.f32.mrf.mxu0 }
 0x90d   : > { %v8485_v50 = vadd.f32 %v8484_v49, %v20152_v11  ;;  %v9628_v19 = vadd.f32 %v9627_v18, %v8998_v5  ;;  %v9038_v5 = vpop.permute.xlu0 %9037  ;;  %v20160_v11 = vld [vmem:[#allocation87_spill] sm:$0xff] }
 0x90e   : > { %v8486_v0 = vpop.f32.mrf.mxu1  ;;  %v9629_v40 = vpop.f32.mrf.mxu0 }
 0x90f   : > { %8588 = vst [vmem:[%s18543_s21 + $0x1a8] sm:$0xff] %v8485_v50  ;;  %9731 = vst [vmem:[%s18546_s17 + $0x1a8] sm:$0xff] %v9628_v19 }
 0x910   : > { %v8489_v2 = vpop.f32.mrf.mxu1  ;;  %v9632_v10 = vpop.f32.mrf.mxu0 }
 0x911   : > { %v8490_v31 = vadd.f32 %v8489_v2, %v20153_v36  ;;  %v9633_v45 = vadd.f32 %v9632_v10, %v9003_v16  ;;  %v9043_v16 = vpop.permute.xlu1 %9042  ;;  %v20161_v36 = vld [vmem:[#allocation88_spill] sm:$0xff] }
 0x912   : > { %v8491_v61 = vpop.f32.mrf.mxu1  ;;  %v9634_v22 = vpop.f32.mrf.mxu0 }
 0x913   : > { %8589 = vst [vmem:[%s18543_s21 + $0x1b0] sm:$0xff] %v8490_v31  ;;  %9732 = vst [vmem:[%s18546_s17 + $0x1b0] sm:$0xff] %v9633_v45 }
 0x914   : > { %v8492_v8 = vpop.f32.mrf.mxu1  ;;  %v9635_v17 = vpop.f32.mrf.mxu0 }
 0x915   : > { %v8493_v35 = vadd.f32 %v8492_v8, %v20154_v21  ;;  %v9636_v30 = vadd.f32 %v9635_v17, %v9008_v47  ;;  %v9048_v47 = vpop.permute.xlu0 %9047  ;;  %v20162_v21 = vld [vmem:[#allocation45_spill] sm:$0xff] }
 0x916   : > { %v8494_v51 = vpop.f32.mrf.mxu1  ;;  %v9637_v54 = vpop.f32.mrf.mxu0 }
 0x917   : > { %8590 = vst [vmem:[%s18543_s21 + $0x1b8] sm:$0xff] %v8493_v35  ;;  %9733 = vst [vmem:[%s18546_s17 + $0x1b8] sm:$0xff] %v9636_v30 }
 0x918   : > { %v8497_v12 = vpop.f32.mrf.mxu1  ;;  %v9640_v37 = vpop.f32.mrf.mxu0 }
 0x919   : > { %v8498_v58 = vadd.f32 %v8497_v12, %v20155_v63  ;;  %v9641_v20 = vadd.f32 %v9640_v37, %v9013_v24  ;;  %v20163_v12 = vld [vmem:[#allocation90_spill] sm:$0xff] }
 0x91a   : > { %v8499_v59 = vpop.f32.mrf.mxu1  ;;  %v9642_v14 = vpop.f32.mrf.mxu0 }
 0x91b   : > { %8591 = vst [vmem:[%s18543_s21 + $0x1c0] sm:$0xff] %v8498_v58  ;;  %9734 = vst [vmem:[%s18546_s17 + $0x1c0] sm:$0xff] %v9641_v20  ;;  %v9053_v59 = vpop.permute.xlu1 %9052 }
 0x91c   : > { %v8500_v26 = vpop.f32.mrf.mxu1  ;;  %v9643_v43 = vpop.f32.mrf.mxu0 }
 0x91d   : > { %v8501_v55 = vadd.f32 %v8500_v26, %v20156_v60  ;;  %v9644_v3 = vadd.f32 %v9643_v43, %v9018_v9 }
 0x91e   : > { %v8502_v27 = vpop.f32.mrf.mxu1  ;;  %v9645_v29 = vpop.f32.mrf.mxu0 }
 0x91f   : > { %8592 = vst [vmem:[%s18543_s21 + $0x1c8] sm:$0xff] %v8501_v55  ;;  %9735 = vst [vmem:[%s18546_s17 + $0x1c8] sm:$0xff] %v9644_v3  ;;  %v9914_v55 = vld [vmem:[%s18543_s21] sm:$0xff] (%p11875_p5)  ;;  %v9916_v3 = vld [vmem:[%s18543_s21 + $0x8] sm:$0xff] (%p11875_p5) }
 0x920   : > { %v8505_v57 = vpop.f32.mrf.mxu1  ;;  %v9648_v46 = vpop.f32.mrf.mxu0  ;;  %v9918_v27 = vld [vmem:[%s18543_s21 + $0x10] sm:$0xff] (%p11875_p5)  ;;  %v9920_v29 = vld [vmem:[%s18543_s21 + $0x18] sm:$0xff] (%p11875_p5)  ;;  %9915 = vst [vmem:[%s18844_s16] sm:$0xff] (%p11875_p5), %v9914_v55  ;;  %9917 = vst [vmem:[%s18844_s16 + $0x18] sm:$0xff] (%p11875_p5), %v9916_v3 }
 0x921   : > { %v8506_v62 = vadd.f32 %v8505_v57, %v20157_v53  ;;  %v9649_v23 = vadd.f32 %v9648_v46, %v9023_v34  ;;  %v9922_v34 = vld [vmem:[%s18543_s21 + $0x20] sm:$0xff] (%p11875_p5)  ;;  %v9924_v57 = vld [vmem:[%s18543_s21 + $0x28] sm:$0xff] (%p11875_p5)  ;;  %v9926_v46 = vld [vmem:[%s18543_s21 + $0x30] sm:$0xff] (%p11875_p5)  ;;  %9919 = vst [vmem:[%s18844_s16 + $0x30] sm:$0xff] (%p11875_p5), %v9918_v27 }
 0x922   : > { %v8507_v28 = vpop.f32.mrf.mxu1  ;;  %v9650_v15 = vpop.f32.mrf.mxu0  ;;  %v9928_v53 = vld [vmem:[%s18543_s21 + $0x38] sm:$0xff] (%p11875_p5)  ;;  %9921 = vst [vmem:[%s18844_s16 + $0x48] sm:$0xff] (%p11875_p5), %v9920_v29  ;;  %9923 = vst [vmem:[%s18844_s16 + $0x60] sm:$0xff] (%p11875_p5), %v9922_v34 }
 0x923   : > { %8593 = vst [vmem:[%s18543_s21 + $0x1d0] sm:$0xff] %v8506_v62  ;;  %9736 = vst [vmem:[%s18546_s17 + $0x1d0] sm:$0xff] %v9649_v23  ;;  %v9930_v62 = vld [vmem:[%s18543_s21 + $0x40] sm:$0xff] (%p11875_p5)  ;;  %v9932_v23 = vld [vmem:[%s18543_s21 + $0x48] sm:$0xff] (%p11875_p5) }
 0x924   : > { %v8508_v48 = vpop.f32.mrf.mxu1  ;;  %v9651_v4 = vpop.f32.mrf.mxu0  ;;  %v9934_v28 = vld [vmem:[%s18543_s21 + $0x50] sm:$0xff] (%p11875_p5)  ;;  %v9936_v15 = vld [vmem:[%s18543_s21 + $0x58] sm:$0xff] (%p11875_p5)  ;;  %9925 = vst [vmem:[%s18844_s16 + $0x78] sm:$0xff] (%p11875_p5), %v9924_v57  ;;  %9927 = vst [vmem:[%s18844_s16 + $0x90] sm:$0xff] (%p11875_p5), %v9926_v46 }
 0x925   : > { %v8509_v7 = vadd.f32 %v8508_v48, %v20158_v6  ;;  %v9652_v1 = vadd.f32 %v9651_v4, %v9028_v52  ;;  %v9938_v52 = vld [vmem:[%s18543_s21 + $0x60] sm:$0xff] (%p11875_p5)  ;;  %v9940_v48 = vld [vmem:[%s18543_s21 + $0x68] sm:$0xff] (%p11875_p5)  ;;  %v9942_v4 = vld [vmem:[%s18543_s21 + $0x70] sm:$0xff] (%p11875_p5)  ;;  %9929 = vst [vmem:[%s18844_s16 + $0xa8] sm:$0xff] (%p11875_p5), %v9928_v53 }
 0x926   : > { %v8510_v44 = vpop.f32.mrf.mxu1  ;;  %v9653_v38 = vpop.f32.mrf.mxu0  ;;  %9931 = vst [vmem:[%s18844_s16 + $0xc0] sm:$0xff] (%p11875_p5), %v9930_v62  ;;  %9933 = vst [vmem:[%s18844_s16 + $0xd8] sm:$0xff] (%p11875_p5), %v9932_v23  ;;  %v9944_v6 = vld [vmem:[%s18543_s21 + $0x78] sm:$0xff] (%p11875_p5) }
 0x927   : > { %8594 = vst [vmem:[%s18543_s21 + $0x1d8] sm:$0xff] %v8509_v7  ;;  %9737 = vst [vmem:[%s18546_s17 + $0x1d8] sm:$0xff] %v9652_v1  ;;  %v9946_v7 = vld [vmem:[%s18543_s21 + $0x80] sm:$0xff] (%p11875_p5)  ;;  %v9948_v1 = vld [vmem:[%s18543_s21 + $0x88] sm:$0xff] (%p11875_p5) }
 0x928   : > { %v8513_v56 = vpop.f32.mrf.mxu1  ;;  %v9656_v25 = vpop.f32.mrf.mxu0  ;;  %9935 = vst [vmem:[%s18844_s16 + $0xf0] sm:$0xff] (%p11875_p5), %v9934_v28  ;;  %9937 = vst [vmem:[%s18844_s16 + $0x108] sm:$0xff] (%p11875_p5), %v9936_v15  ;;  %v9950_v44 = vld [vmem:[%s18543_s21 + $0x90] sm:$0xff] (%p11875_p5)  ;;  %v9952_v38 = vld [vmem:[%s18543_s21 + $0x98] sm:$0xff] (%p11875_p5) }
 0x929   : > { %v8514_v33 = vadd.f32 %v8513_v56, %v20159_v41  ;;  %v9657_v39 = vadd.f32 %v9656_v25, %v9033_v32  ;;  %9939 = vst [vmem:[%s18844_s16 + $0x120] sm:$0xff] (%p11875_p5), %v9938_v52  ;;  %9941 = vst [vmem:[%s18844_s16 + $0x138] sm:$0xff] (%p11875_p5), %v9940_v48  ;;  %v9954_v32 = vld [vmem:[%s18543_s21 + $0xa0] sm:$0xff] (%p11875_p5)  ;;  %v9956_v56 = vld [vmem:[%s18543_s21 + $0xa8] sm:$0xff] (%p11875_p5) }
 0x92a   : > { %v8515_v42 = vpop.f32.mrf.mxu1  ;;  %v9658_v13 = vpop.f32.mrf.mxu0  ;;  %9943 = vst [vmem:[%s18844_s16 + $0x150] sm:$0xff] (%p11875_p5), %v9942_v4  ;;  %9945 = vst [vmem:[%s18844_s16 + $0x168] sm:$0xff] (%p11875_p5), %v9944_v6  ;;  %v9958_v25 = vld [vmem:[%s18543_s21 + $0xb0] sm:$0xff] (%p11875_p5)  ;;  %v9960_v41 = vld [vmem:[%s18543_s21 + $0xb8] sm:$0xff] (%p11875_p5) }
 0x92b   : > { %8595 = vst [vmem:[%s18543_s21 + $0x1e0] sm:$0xff] %v8514_v33  ;;  %9738 = vst [vmem:[%s18546_s17 + $0x1e0] sm:$0xff] %v9657_v39  ;;  %v9962_v33 = vld [vmem:[%s18543_s21 + $0xc0] sm:$0xff] (%p11875_p5)  ;;  %v9964_v39 = vld [vmem:[%s18543_s21 + $0xc8] sm:$0xff] (%p11875_p5) }
 0x92c   : > { %v8516_v49 = vpop.f32.mrf.mxu1  ;;  %v9659_v18 = vpop.f32.mrf.mxu0  ;;  %9947 = vst [vmem:[%s18844_s16 + $0x180] sm:$0xff] (%p11875_p5), %v9946_v7  ;;  %9949 = vst [vmem:[%s18844_s16 + $0x198] sm:$0xff] (%p11875_p5), %v9948_v1  ;;  %v9966_v42 = vld [vmem:[%s18543_s21 + $0xd0] sm:$0xff] (%p11875_p5)  ;;  %v9968_v13 = vld [vmem:[%s18543_s21 + $0xd8] sm:$0xff] (%p11875_p5) }
 0x92d   : > { %v8517_v50 = vadd.f32 %v8516_v49, %v20160_v11  ;;  %v9660_v19 = vadd.f32 %v9659_v18, %v9038_v5  ;;  %9951 = vst [vmem:[%s18844_s16 + $0x1b0] sm:$0xff] (%p11875_p5), %v9950_v44  ;;  %9953 = vst [vmem:[%s18844_s16 + $0x1c8] sm:$0xff] (%p11875_p5), %v9952_v38  ;;  %v9970_v5 = vld [vmem:[%s18543_s21 + $0xe0] sm:$0xff] (%p11875_p5)  ;;  %v9972_v49 = vld [vmem:[%s18543_s21 + $0xe8] sm:$0xff] (%p11875_p5) }
 0x92e   : > { %v8518_v0 = vpop.f32.mrf.mxu1  ;;  %v9661_v40 = vpop.f32.mrf.mxu0  ;;  %9955 = vst [vmem:[%s18844_s16 + $0x1e0] sm:$0xff] (%p11875_p5), %v9954_v32  ;;  %9957 = vst [vmem:[%s18844_s16 + $0x1f8] sm:$0xff] (%p11875_p5), %v9956_v56  ;;  %v9974_v18 = vld [vmem:[%s18543_s21 + $0xf0] sm:$0xff] (%p11875_p5)  ;;  %v9976_v11 = vld [vmem:[%s18543_s21 + $0xf8] sm:$0xff] (%p11875_p5) }
 0x92f   : > { %8596 = vst [vmem:[%s18543_s21 + $0x1e8] sm:$0xff] %v8517_v50  ;;  %9739 = vst [vmem:[%s18546_s17 + $0x1e8] sm:$0xff] %v9660_v19  ;;  %v9978_v50 = vld [vmem:[%s18543_s21 + $0x100] sm:$0xff] (%p11875_p5)  ;;  %v9980_v19 = vld [vmem:[%s18543_s21 + $0x108] sm:$0xff] (%p11875_p5) }
 0x930   : > { %v8521_v2 = vpop.f32.mrf.mxu1  ;;  %v9664_v10 = vpop.f32.mrf.mxu0  ;;  %9959 = vst [vmem:[%s18844_s16 + $0x210] sm:$0xff] (%p11875_p5), %v9958_v25  ;;  %9961 = vst [vmem:[%s18844_s16 + $0x228] sm:$0xff] (%p11875_p5), %v9960_v41  ;;  %v9982_v0 = vld [vmem:[%s18543_s21 + $0x110] sm:$0xff] (%p11875_p5)  ;;  %v9984_v40 = vld [vmem:[%s18543_s21 + $0x118] sm:$0xff] (%p11875_p5) }
 0x931   : > { %v8522_v31 = vadd.f32 %v8521_v2, %v20161_v36  ;;  %v9665_v45 = vadd.f32 %v9664_v10, %v9043_v16  ;;  %9963 = vst [vmem:[%s18844_s16 + $0x240] sm:$0xff] (%p11875_p5), %v9962_v33  ;;  %9965 = vst [vmem:[%s18844_s16 + $0x258] sm:$0xff] (%p11875_p5), %v9964_v39  ;;  %v9986_v16 = vld [vmem:[%s18543_s21 + $0x120] sm:$0xff] (%p11875_p5)  ;;  %v9988_v2 = vld [vmem:[%s18543_s21 + $0x128] sm:$0xff] (%p11875_p5) }
 0x932   : > { %v8523_v61 = vpop.f32.mrf.mxu1  ;;  %v9666_v22 = vpop.f32.mrf.mxu0  ;;  %9967 = vst [vmem:[%s18844_s16 + $0x270] sm:$0xff] (%p11875_p5), %v9966_v42  ;;  %9969 = vst [vmem:[%s18844_s16 + $0x288] sm:$0xff] (%p11875_p5), %v9968_v13  ;;  %v9990_v10 = vld [vmem:[%s18543_s21 + $0x130] sm:$0xff] (%p11875_p5)  ;;  %v9992_v36 = vld [vmem:[%s18543_s21 + $0x138] sm:$0xff] (%p11875_p5) }
 0x933   : > { %8597 = vst [vmem:[%s18543_s21 + $0x1f0] sm:$0xff] %v8522_v31  ;;  %9740 = vst [vmem:[%s18546_s17 + $0x1f0] sm:$0xff] %v9665_v45  ;;  %v9994_v31 = vld [vmem:[%s18543_s21 + $0x140] sm:$0xff] (%p11875_p5)  ;;  %v9996_v45 = vld [vmem:[%s18543_s21 + $0x148] sm:$0xff] (%p11875_p5) }
 0x934   : > { %v8524_v8 = vpop.f32.mrf.mxu1  ;;  %v9667_v17 = vpop.f32.mrf.mxu0  ;;  %9971 = vst [vmem:[%s18844_s16 + $0x2a0] sm:$0xff] (%p11875_p5), %v9970_v5  ;;  %9973 = vst [vmem:[%s18844_s16 + $0x2b8] sm:$0xff] (%p11875_p5), %v9972_v49  ;;  %v9998_v61 = vld [vmem:[%s18543_s21 + $0x150] sm:$0xff] (%p11875_p5)  ;;  %v10000_v22 = vld [vmem:[%s18543_s21 + $0x158] sm:$0xff] (%p11875_p5) }
 0x935   : > { %v8525_v35 = vadd.f32 %v8524_v8, %v20162_v21  ;;  %v9668_v30 = vadd.f32 %v9667_v17, %v9048_v47  ;;  %9975 = vst [vmem:[%s18844_s16 + $0x2d0] sm:$0xff] (%p11875_p5), %v9974_v18  ;;  %9977 = vst [vmem:[%s18844_s16 + $0x2e8] sm:$0xff] (%p11875_p5), %v9976_v11  ;;  %v10002_v47 = vld [vmem:[%s18543_s21 + $0x160] sm:$0xff] (%p11875_p5)  ;;  %v10004_v8 = vld [vmem:[%s18543_s21 + $0x168] sm:$0xff] (%p11875_p5) }
 0x936   : > { %v8526_v51 = vpop.f32.mrf.mxu1  ;;  %v9669_v54 = vpop.f32.mrf.mxu0  ;;  %9979 = vst [vmem:[%s18844_s16 + $0x300] sm:$0xff] (%p11875_p5), %v9978_v50  ;;  %9981 = vst [vmem:[%s18844_s16 + $0x318] sm:$0xff] (%p11875_p5), %v9980_v19  ;;  %v10006_v17 = vld [vmem:[%s18543_s21 + $0x170] sm:$0xff] (%p11875_p5)  ;;  %v10008_v21 = vld [vmem:[%s18543_s21 + $0x178] sm:$0xff] (%p11875_p5) }
 0x937   : > { %8598 = vst [vmem:[%s18543_s21 + $0x1f8] sm:$0xff] %v8525_v35  ;;  %9741 = vst [vmem:[%s18546_s17 + $0x1f8] sm:$0xff] %v9668_v30  ;;  %v10010_v35 = vld [vmem:[%s18543_s21 + $0x180] sm:$0xff] (%p11875_p5)  ;;  %v10012_v30 = vld [vmem:[%s18543_s21 + $0x188] sm:$0xff] (%p11875_p5) }
 0x938   : > { %v8529_v24 = vpop.f32.mrf.mxu1  ;;  %9983 = vst [vmem:[%s18844_s16 + $0x330] sm:$0xff] (%p11875_p5), %v9982_v0  ;;  %9985 = vst [vmem:[%s18844_s16 + $0x348] sm:$0xff] (%p11875_p5), %v9984_v40  ;;  %v10014_v51 = vld [vmem:[%s18543_s21 + $0x190] sm:$0xff] (%p11875_p5)  ;;  %v10016_v54 = vld [vmem:[%s18543_s21 + $0x198] sm:$0xff] (%p11875_p5) }
 0x939   : > { %v8530_v37 = vadd.f32 %v8529_v24, %v20163_v12  ;;  %9987 = vst [vmem:[%s18844_s16 + $0x360] sm:$0xff] (%p11875_p5), %v9986_v16  ;;  %9989 = vst [vmem:[%s18844_s16 + $0x378] sm:$0xff] (%p11875_p5), %v9988_v2  ;;  %v10018_v24 = vld [vmem:[%s18543_s21 + $0x1a0] sm:$0xff] (%p11875_p5)  ;;  %v10020_v12 = vld [vmem:[%s18543_s21 + $0x1a8] sm:$0xff] (%p11875_p5) }
 0x93a   : > { %v8531_v63 = vpop.f32.mrf.mxu1  ;;  %9991 = vst [vmem:[%s18844_s16 + $0x390] sm:$0xff] (%p11875_p5), %v9990_v10  ;;  %9993 = vst [vmem:[%s18844_s16 + $0x3a8] sm:$0xff] (%p11875_p5), %v9992_v36 }
 0x93b   : > { %8599 = vst [vmem:[%s18543_s21 + $0x200] sm:$0x1] %v8530_v37  ;;  %9995 = vst [vmem:[%s18844_s16 + $0x3c0] sm:$0xff] (%p11875_p5), %v9994_v31  ;;  %v10022_v37 = vld [vmem:[%s18543_s21 + $0x1b0] sm:$0xff] (%p11875_p5)  ;;  %v10024_v63 = vld [vmem:[%s18543_s21 + $0x1b8] sm:$0xff] (%p11875_p5) }
 0x93c   : > { %v8532_v58 = vpop.f32.mrf.mxu1  ;;  %9997 = vst [vmem:[%s18844_s16 + $0x3d8] sm:$0xff] (%p11875_p5), %v9996_v45  ;;  %9999 = vst [vmem:[%s18844_s16 + $0x3f0] sm:$0xff] (%p11875_p5), %v9998_v61 }
 0x93d   : > { %10001 = vst [vmem:[%s18844_s16 + $0x408] sm:$0xff] (%p11875_p5), %v10000_v22  ;;  %10003 = vst [vmem:[%s18844_s16 + $0x420] sm:$0xff] (%p11875_p5), %v10002_v47  ;;  %v10026_v58 = vld [vmem:[%s18543_s21 + $0x1c0] sm:$0xff] (%p11875_p5) }
 0x93e   : > { %v8533_v20 = vpop.f32.mrf.mxu1  ;;  %10005 = vst [vmem:[%s18844_s16 + $0x438] sm:$0xff] (%p11875_p5), %v10004_v8  ;;  %10007 = vst [vmem:[%s18844_s16 + $0x450] sm:$0xff] (%p11875_p5), %v10006_v17 }
 0x93f   : > { %10009 = vst [vmem:[%s18844_s16 + $0x468] sm:$0xff] (%p11875_p5), %v10008_v21  ;;  %10011 = vst [vmem:[%s18844_s16 + $0x480] sm:$0xff] (%p11875_p5), %v10010_v35  ;;  %v10028_v20 = vld [vmem:[%s18543_s21 + $0x1c8] sm:$0xff] (%p11875_p5) }
 0x940   : > { %v9672_v14 = vpop.f32.mrf.mxu1  ;;  %10013 = vst [vmem:[%s18844_s16 + $0x498] sm:$0xff] (%p11875_p5), %v10012_v30  ;;  %10015 = vst [vmem:[%s18844_s16 + $0x4b0] sm:$0xff] (%p11875_p5), %v10014_v51 }
 0x941   : > { %v9673_v9 = vadd.f32 %v9672_v14, %v9053_v59  ;;  %10017 = vst [vmem:[%s18844_s16 + $0x4c8] sm:$0xff] (%p11875_p5), %v10016_v54  ;;  %10019 = vst [vmem:[%s18844_s16 + $0x4e0] sm:$0xff] (%p11875_p5), %v10018_v24  ;;  %v10030_v59 = vld [vmem:[%s18543_s21 + $0x1d0] sm:$0xff] (%p11875_p5)  ;;  %v10032_v14 = vld [vmem:[%s18543_s21 + $0x1d8] sm:$0xff] (%p11875_p5) }
 0x942   : > { %v9674_v26 = vpop.f32.mrf.mxu1  ;;  %9753 = sbr.rel (!%p11875_p5) target bundleno = 2377 (0x949), region = 68  ;;  %10021 = vst [vmem:[%s18844_s16 + $0x4f8] sm:$0xff] (%p11875_p5), %v10020_v12  ;;  %10023 = vst [vmem:[%s18844_s16 + $0x510] sm:$0xff] (%p11875_p5), %v10022_v37  ;;  %v10042_v55 = vld [vmem:[%s18543_s21 + $0x200] sm:$0xff] (%p11875_p5) }
 0x943   : > { %9742 = vst [vmem:[%s18546_s17 + $0x200] sm:$0x1] %v9673_v9  ;;  %10025 = vst [vmem:[%s18844_s16 + $0x528] sm:$0xff] (%p11875_p5), %v10024_v63  ;;  %v10034_v9 = vld [vmem:[%s18543_s21 + $0x1e0] sm:$0xff] (%p11875_p5)  ;;  %v10036_v26 = vld [vmem:[%s18543_s21 + $0x1e8] sm:$0xff] (%p11875_p5) }
 0x944   : > { %v9675_v43 = vpop.f32.mrf.mxu1  ;;  %10027 = vst [vmem:[%s18844_s16 + $0x540] sm:$0xff] (%p11875_p5), %v10026_v58  ;;  %10029 = vst [vmem:[%s18844_s16 + $0x558] sm:$0xff] (%p11875_p5), %v10028_v20 }
 0x945   : > { %10031 = vst [vmem:[%s18844_s16 + $0x570] sm:$0xff] (%p11875_p5), %v10030_v59  ;;  %10033 = vst [vmem:[%s18844_s16 + $0x588] sm:$0xff] (%p11875_p5), %v10032_v14  ;;  %v10038_v43 = vld [vmem:[%s18543_s21 + $0x1f0] sm:$0xff] (%p11875_p5) }
 0x946   : > { %v9676_v60 = vpop.f32.mrf.mxu1  ;;  %10035 = vst [vmem:[%s18844_s16 + $0x5a0] sm:$0xff] (%p11875_p5), %v10034_v9  ;;  %10037 = vst [vmem:[%s18844_s16 + $0x5b8] sm:$0xff] (%p11875_p5), %v10036_v26 }
 0x947   : > { %10039 = vst [vmem:[%s18844_s16 + $0x5d0] sm:$0xff] %v10038_v43  ;;  %v10040_v60 = vld [vmem:[%s18543_s21 + $0x1f8] sm:$0xff]  ;;  %10043 = vst [vmem:[%s18844_s16 + $0x600] sm:$0xff] %v10042_v55 }
 0x948   : > { %10041 = vst [vmem:[%s18844_s16 + $0x5e8] sm:$0xff] %v10040_v60 }
 0x949 PF: > { %10049 = sbr.rel (!%p11875_p5) target bundleno = 2416 (0x970), region = 106  ;;  %v10210_v3 = vld [vmem:[%s18546_s17] sm:$0xff] (%p11875_p5)  ;;  %v10212_v27 = vld [vmem:[%s18546_s17 + $0x8] sm:$0xff] (%p11875_p5)  ;;  %v10214_v29 = vld [vmem:[%s18546_s17 + $0x10] sm:$0xff] (%p11875_p5) }
 0x94a   : > { %s11087_s21 = smul.u32 (%p11875_p5), 195, %s11740_s24  ;;  %v10216_v34 = vld [vmem:[%s18546_s17 + $0x18] sm:$0xff] (%p11875_p5)  ;;  %v10218_v57 = vld [vmem:[%s18546_s17 + $0x20] sm:$0xff] (%p11875_p5)  ;;  %v10220_v46 = vld [vmem:[%s18546_s17 + $0x28] sm:$0xff] (%p11875_p5) }
 0x94b   : > { %v10222_v53 = vld [vmem:[%s18546_s17 + $0x30] sm:$0xff] (%p11875_p5)  ;;  %v10224_v62 = vld [vmem:[%s18546_s17 + $0x38] sm:$0xff] (%p11875_p5)  ;;  %v10226_v23 = vld [vmem:[%s18546_s17 + $0x40] sm:$0xff] (%p11875_p5) }
 0x94c   : > { %s10051_s14 = sadd.s32 (%p11875_p5), %s11736_s23, %s11087_s21  ;;  %v10228_v28 = vld [vmem:[%s18546_s17 + $0x48] sm:$0xff] (%p11875_p5)  ;;  %v10230_v15 = vld [vmem:[%s18546_s17 + $0x50] sm:$0xff] (%p11875_p5)  ;;  %v10232_v52 = vld [vmem:[%s18546_s17 + $0x58] sm:$0xff] (%p11875_p5) }
 0x94d   : > { %s10939_s26 = sshll.u32 (%p11875_p5), %s10051_s14, 3  ;;  %v10234_v48 = vld [vmem:[%s18546_s17 + $0x60] sm:$0xff] (%p11875_p5)  ;;  %v10236_v4 = vld [vmem:[%s18546_s17 + $0x68] sm:$0xff] (%p11875_p5)  ;;  %v10238_v6 = vld [vmem:[%s18546_s17 + $0x70] sm:$0xff] (%p11875_p5) }
 0x94e   : > { %s18983_s24 = scalar_lea.vmem %s19136_s12, %s10939_s26  ;;  %v10240_v7 = vld [vmem:[%s18546_s17 + $0x78] sm:$0xff]  ;;  %v10242_v1 = vld [vmem:[%s18546_s17 + $0x80] sm:$0xff]  ;;  %v10244_v44 = vld [vmem:[%s18546_s17 + $0x88] sm:$0xff] }
 0x94f   : > { %10211 = vst [vmem:[%s18983_s24] sm:$0xff] %v10210_v3  ;;  %10213 = vst [vmem:[%s18983_s24 + $0x18] sm:$0xff] %v10212_v27  ;;  %v10246_v38 = vld [vmem:[%s18546_s17 + $0x90] sm:$0xff]  ;;  %v10248_v32 = vld [vmem:[%s18546_s17 + $0x98] sm:$0xff] }
 0x950   : > { %10215 = vst [vmem:[%s18983_s24 + $0x30] sm:$0xff] %v10214_v29  ;;  %10217 = vst [vmem:[%s18983_s24 + $0x48] sm:$0xff] %v10216_v34  ;;  %v10250_v56 = vld [vmem:[%s18546_s17 + $0xa0] sm:$0xff]  ;;  %v10252_v25 = vld [vmem:[%s18546_s17 + $0xa8] sm:$0xff] }
 0x951   : > { %10219 = vst [vmem:[%s18983_s24 + $0x60] sm:$0xff] %v10218_v57  ;;  %10221 = vst [vmem:[%s18983_s24 + $0x78] sm:$0xff] %v10220_v46  ;;  %v10254_v41 = vld [vmem:[%s18546_s17 + $0xb0] sm:$0xff]  ;;  %v10256_v33 = vld [vmem:[%s18546_s17 + $0xb8] sm:$0xff] }
 0x952   : > { %10223 = vst [vmem:[%s18983_s24 + $0x90] sm:$0xff] %v10222_v53  ;;  %10225 = vst [vmem:[%s18983_s24 + $0xa8] sm:$0xff] %v10224_v62  ;;  %v10258_v39 = vld [vmem:[%s18546_s17 + $0xc0] sm:$0xff]  ;;  %v10260_v42 = vld [vmem:[%s18546_s17 + $0xc8] sm:$0xff] }
 0x953   : > { %10227 = vst [vmem:[%s18983_s24 + $0xc0] sm:$0xff] %v10226_v23  ;;  %10229 = vst [vmem:[%s18983_s24 + $0xd8] sm:$0xff] %v10228_v28  ;;  %v10262_v13 = vld [vmem:[%s18546_s17 + $0xd0] sm:$0xff]  ;;  %v10264_v5 = vld [vmem:[%s18546_s17 + $0xd8] sm:$0xff] }
 0x954   : > { %10231 = vst [vmem:[%s18983_s24 + $0xf0] sm:$0xff] %v10230_v15  ;;  %10233 = vst [vmem:[%s18983_s24 + $0x108] sm:$0xff] %v10232_v52  ;;  %v10266_v49 = vld [vmem:[%s18546_s17 + $0xe0] sm:$0xff]  ;;  %v10268_v18 = vld [vmem:[%s18546_s17 + $0xe8] sm:$0xff] }
 0x955   : > { %10235 = vst [vmem:[%s18983_s24 + $0x120] sm:$0xff] %v10234_v48  ;;  %10237 = vst [vmem:[%s18983_s24 + $0x138] sm:$0xff] %v10236_v4  ;;  %v10270_v11 = vld [vmem:[%s18546_s17 + $0xf0] sm:$0xff]  ;;  %v10272_v50 = vld [vmem:[%s18546_s17 + $0xf8] sm:$0xff] }
 0x956   : > { %10239 = vst [vmem:[%s18983_s24 + $0x150] sm:$0xff] %v10238_v6  ;;  %10241 = vst [vmem:[%s18983_s24 + $0x168] sm:$0xff] %v10240_v7  ;;  %v10274_v19 = vld [vmem:[%s18546_s17 + $0x100] sm:$0xff]  ;;  %v10276_v0 = vld [vmem:[%s18546_s17 + $0x108] sm:$0xff] }
 0x957   : > { %10243 = vst [vmem:[%s18983_s24 + $0x180] sm:$0xff] %v10242_v1  ;;  %10245 = vst [vmem:[%s18983_s24 + $0x198] sm:$0xff] %v10244_v44  ;;  %v10278_v40 = vld [vmem:[%s18546_s17 + $0x110] sm:$0xff]  ;;  %v10280_v16 = vld [vmem:[%s18546_s17 + $0x118] sm:$0xff] }
 0x958   : > { %10247 = vst [vmem:[%s18983_s24 + $0x1b0] sm:$0xff] %v10246_v38  ;;  %10249 = vst [vmem:[%s18983_s24 + $0x1c8] sm:$0xff] %v10248_v32  ;;  %v10282_v2 = vld [vmem:[%s18546_s17 + $0x120] sm:$0xff]  ;;  %v10284_v10 = vld [vmem:[%s18546_s17 + $0x128] sm:$0xff] }
 0x959   : > { %10251 = vst [vmem:[%s18983_s24 + $0x1e0] sm:$0xff] %v10250_v56  ;;  %10253 = vst [vmem:[%s18983_s24 + $0x1f8] sm:$0xff] %v10252_v25  ;;  %v10286_v36 = vld [vmem:[%s18546_s17 + $0x130] sm:$0xff]  ;;  %v10288_v31 = vld [vmem:[%s18546_s17 + $0x138] sm:$0xff] }
 0x95a   : > { %10255 = vst [vmem:[%s18983_s24 + $0x210] sm:$0xff] %v10254_v41  ;;  %10257 = vst [vmem:[%s18983_s24 + $0x228] sm:$0xff] %v10256_v33  ;;  %v10290_v45 = vld [vmem:[%s18546_s17 + $0x140] sm:$0xff]  ;;  %v10292_v61 = vld [vmem:[%s18546_s17 + $0x148] sm:$0xff] }
 0x95b   : > { %10259 = vst [vmem:[%s18983_s24 + $0x240] sm:$0xff] %v10258_v39  ;;  %10261 = vst [vmem:[%s18983_s24 + $0x258] sm:$0xff] %v10260_v42  ;;  %v10294_v22 = vld [vmem:[%s18546_s17 + $0x150] sm:$0xff]  ;;  %v10296_v47 = vld [vmem:[%s18546_s17 + $0x158] sm:$0xff] }
 0x95c   : > { %10263 = vst [vmem:[%s18983_s24 + $0x270] sm:$0xff] %v10262_v13  ;;  %10265 = vst [vmem:[%s18983_s24 + $0x288] sm:$0xff] %v10264_v5  ;;  %v10298_v8 = vld [vmem:[%s18546_s17 + $0x160] sm:$0xff]  ;;  %v10300_v17 = vld [vmem:[%s18546_s17 + $0x168] sm:$0xff] }
 0x95d   : > { %10267 = vst [vmem:[%s18983_s24 + $0x2a0] sm:$0xff] %v10266_v49  ;;  %10269 = vst [vmem:[%s18983_s24 + $0x2b8] sm:$0xff] %v10268_v18  ;;  %v10302_v21 = vld [vmem:[%s18546_s17 + $0x170] sm:$0xff]  ;;  %v10304_v35 = vld [vmem:[%s18546_s17 + $0x178] sm:$0xff] }
 0x95e   : > { %10271 = vst [vmem:[%s18983_s24 + $0x2d0] sm:$0xff] %v10270_v11  ;;  %10273 = vst [vmem:[%s18983_s24 + $0x2e8] sm:$0xff] %v10272_v50  ;;  %v10306_v30 = vld [vmem:[%s18546_s17 + $0x180] sm:$0xff]  ;;  %v10308_v51 = vld [vmem:[%s18546_s17 + $0x188] sm:$0xff] }
 0x95f   : > { %10275 = vst [vmem:[%s18983_s24 + $0x300] sm:$0xff] %v10274_v19  ;;  %10277 = vst [vmem:[%s18983_s24 + $0x318] sm:$0xff] %v10276_v0  ;;  %v10310_v54 = vld [vmem:[%s18546_s17 + $0x190] sm:$0xff]  ;;  %v10312_v24 = vld [vmem:[%s18546_s17 + $0x198] sm:$0xff] }
 0x960   : > { %10279 = vst [vmem:[%s18983_s24 + $0x330] sm:$0xff] %v10278_v40  ;;  %10281 = vst [vmem:[%s18983_s24 + $0x348] sm:$0xff] %v10280_v16  ;;  %v10314_v12 = vld [vmem:[%s18546_s17 + $0x1a0] sm:$0xff]  ;;  %v10316_v37 = vld [vmem:[%s18546_s17 + $0x1a8] sm:$0xff] }
 0x961   : > { %10283 = vst [vmem:[%s18983_s24 + $0x360] sm:$0xff] %v10282_v2  ;;  %10285 = vst [vmem:[%s18983_s24 + $0x378] sm:$0xff] %v10284_v10  ;;  %v10318_v63 = vld [vmem:[%s18546_s17 + $0x1b0] sm:$0xff]  ;;  %v10320_v58 = vld [vmem:[%s18546_s17 + $0x1b8] sm:$0xff] }
 0x962   : > { %10287 = vst [vmem:[%s18983_s24 + $0x390] sm:$0xff] %v10286_v36  ;;  %10289 = vst [vmem:[%s18983_s24 + $0x3a8] sm:$0xff] %v10288_v31  ;;  %v10322_v20 = vld [vmem:[%s18546_s17 + $0x1c0] sm:$0xff]  ;;  %v10324_v59 = vld [vmem:[%s18546_s17 + $0x1c8] sm:$0xff] }
 0x963   : > { %10291 = vst [vmem:[%s18983_s24 + $0x3c0] sm:$0xff] %v10290_v45  ;;  %10293 = vst [vmem:[%s18983_s24 + $0x3d8] sm:$0xff] %v10292_v61  ;;  %v10326_v14 = vld [vmem:[%s18546_s17 + $0x1d0] sm:$0xff]  ;;  %v10328_v9 = vld [vmem:[%s18546_s17 + $0x1d8] sm:$0xff] }
 0x964   : > { %10295 = vst [vmem:[%s18983_s24 + $0x3f0] sm:$0xff] %v10294_v22  ;;  %10297 = vst [vmem:[%s18983_s24 + $0x408] sm:$0xff] %v10296_v47  ;;  %v10330_v26 = vld [vmem:[%s18546_s17 + $0x1e0] sm:$0xff]  ;;  %v10332_v43 = vld [vmem:[%s18546_s17 + $0x1e8] sm:$0xff] }
 0x965   : > { %10299 = vst [vmem:[%s18983_s24 + $0x420] sm:$0xff] %v10298_v8  ;;  %10301 = vst [vmem:[%s18983_s24 + $0x438] sm:$0xff] %v10300_v17  ;;  %v10334_v60 = vld [vmem:[%s18546_s17 + $0x1f0] sm:$0xff]  ;;  %v10336_v55 = vld [vmem:[%s18546_s17 + $0x1f8] sm:$0xff] }
 0x966   : > { %10303 = vst [vmem:[%s18983_s24 + $0x450] sm:$0xff] %v10302_v21  ;;  %10305 = vst [vmem:[%s18983_s24 + $0x468] sm:$0xff] %v10304_v35  ;;  %v10338_v3 = vld [vmem:[%s18546_s17 + $0x200] sm:$0xff] }
 0x967   : > { %10307 = vst [vmem:[%s18983_s24 + $0x480] sm:$0xff] %v10306_v30  ;;  %10309 = vst [vmem:[%s18983_s24 + $0x498] sm:$0xff] %v10308_v51 }
 0x968   : > { %10311 = vst [vmem:[%s18983_s24 + $0x4b0] sm:$0xff] %v10310_v54  ;;  %10313 = vst [vmem:[%s18983_s24 + $0x4c8] sm:$0xff] %v10312_v24 }
 0x969   : > { %10315 = vst [vmem:[%s18983_s24 + $0x4e0] sm:$0xff] %v10314_v12  ;;  %10317 = vst [vmem:[%s18983_s24 + $0x4f8] sm:$0xff] %v10316_v37 }
 0x96a   : > { %10319 = vst [vmem:[%s18983_s24 + $0x510] sm:$0xff] %v10318_v63  ;;  %10321 = vst [vmem:[%s18983_s24 + $0x528] sm:$0xff] %v10320_v58 }
 0x96b   : > { %10323 = vst [vmem:[%s18983_s24 + $0x540] sm:$0xff] %v10322_v20  ;;  %10325 = vst [vmem:[%s18983_s24 + $0x558] sm:$0xff] %v10324_v59 }
 0x96c   : > { %10327 = vst [vmem:[%s18983_s24 + $0x570] sm:$0xff] %v10326_v14  ;;  %10329 = vst [vmem:[%s18983_s24 + $0x588] sm:$0xff] %v10328_v9 }
 0x96d   : > { %10331 = vst [vmem:[%s18983_s24 + $0x5a0] sm:$0xff] %v10330_v26  ;;  %10333 = vst [vmem:[%s18983_s24 + $0x5b8] sm:$0xff] %v10332_v43 }
 0x96e   : > { %10335 = vst [vmem:[%s18983_s24 + $0x5d0] sm:$0xff] %v10334_v60  ;;  %10337 = vst [vmem:[%s18983_s24 + $0x5e8] sm:$0xff] %v10336_v55 }
 0x96f   : > { %10339 = vst [vmem:[%s18983_s24 + $0x600] sm:$0xff] %v10338_v3 }
 0x970 PF: > { %s23_s27 = sadd.s32 1, %s11752_s27   ;;  %s20164_s23 = sld [smem:[#allocation7_spill]] }
 0x971   : > { %p20_p10 = scmp.ge.s32.totalorder %s23_s27, 8   ;;  %s20165_s24 = sld [smem:[#allocation8_spill]] }
 0x972   : > { %s20166_s25 = sld [smem:[#allocation9_spill]]  ;;  %s20168_s21 = smov %s11732_s22 }
 0x973   : > { %s20167_s26 = sld [smem:[#allocation10_spill]]  ;;  %s20169_s22 = smov %s11886_s18 }
 0x974   :  { %22 = sbr.rel (!%p20_p10) target bundleno = 6 (0x6), region = 183 }

</bundles_post_ra>
